<compile_context>
chip_gen: v7x
topology: tpu7x:2x2x1
jax: 0.10.0
libtpu: 0.0.40
codegen_flags: <defaults>
</compile_context>

<pallas_src>
import numpy as np
import jax
import jax.numpy as jnp
from jax import lax
from jax.experimental import pallas as pl
from jax.experimental.pallas import tpu as pltpu

RNN_HIDDEN = 128   # torch.nn.LSTM(hps.hidden_size, 128, 1)
CHUNK = 8          # sublane-aligned step granularity for xgates loads / rnn_buf stores


def rnn_hsg_kernel(x_ref, hsgp_ref, posp_ref, keep_ref,
                   wih_ref, whh_ref, b_ref, wc_ref, bc_ref,
                   out_ref,
                   xg_buf, rnn_buf):
    """LSTM recurrence with per-document state reset + classifier + softmax combine."""
    n_pad = x_ref.shape[0]

    # ---- 1) Hoisted input-side gate matmul: one batched MXU matmul for all steps. ----
    xg_buf[...] = (jnp.dot(x_ref[...], wih_ref[...],
                           preferred_element_type=jnp.float32,
                           precision=lax.Precision.HIGHEST)
                   + b_ref[...])                                    # (n_pad, 4*128)

    # ---- 2) Serial recurrence. h/c live in vregs via the fori carry. -----------------
    def chunk_body(ci, carry):
        h, c = carry
        base = pl.multiple_of(ci * CHUNK, CHUNK)
        xg_tile = xg_buf[pl.ds(base, CHUNK), :]                     # (8, 4*128) aligned load
        rows = []
        for r in range(CHUNK):                                      # unrolled
            keep = keep_ref[base + r]                               # scalar from SMEM
            h = h * keep                                            # doc-boundary reset
            c = c * keep
            gates = xg_tile[r:r + 1, :] + jnp.dot(
                h, whh_ref[...],
                preferred_element_type=jnp.float32,
                precision=lax.Precision.HIGHEST)                    # (1, 4*128)
            i_g = jax.nn.sigmoid(gates[:, 0:RNN_HIDDEN])
            f_g = jax.nn.sigmoid(gates[:, RNN_HIDDEN:2 * RNN_HIDDEN])
            g_g = jnp.tanh(gates[:, 2 * RNN_HIDDEN:3 * RNN_HIDDEN])
            o_g = jax.nn.sigmoid(gates[:, 3 * RNN_HIDDEN:4 * RNN_HIDDEN])
            c = f_g * c + i_g * g_g
            h = o_g * jnp.tanh(c)
            rows.append(h)
        rnn_buf[pl.ds(base, CHUNK), :] = jnp.concatenate(rows, axis=0)   # one (8,128) store
        return h, c

    h0 = jnp.zeros((1, RNN_HIDDEN), jnp.float32)
    c0 = jnp.zeros((1, RNN_HIDDEN), jnp.float32)
    lax.fori_loop(0, n_pad // CHUNK, chunk_body, (h0, c0))

    # ---- 3) Classifier: Linear(128, 2) + Sigmoid (one batched matmul). ---------------
    logits = (jnp.dot(rnn_buf[...], wc_ref[...],
                      preferred_element_type=jnp.float32,
                      precision=lax.Precision.HIGHEST)
              + bc_ref[...])                                        # (n_pad, 2)
    rnn_results = jax.nn.sigmoid(logits)

    # ---- 4) Two-class softmax as sigmoid of the difference (no cross-lane reduce). ---
    def softmax2(v):
        p0 = jax.nn.sigmoid(v[:, 0:1] - v[:, 1:2])
        return jnp.concatenate([p0, 1.0 - p0], axis=-1)

    out_ref[...] = (softmax2(hsgp_ref[...])
                    + posp_ref[...]
                    + softmax2(rnn_results) / 3.0)


def rnn_hsg_forward(sent_features, hsg_p, batch_pos_probs, keep,
                    w_ih_t, w_hh_t, bias, w_c_t, b_c):
    n = sent_features.shape[0]
    n_pad = ((n + CHUNK - 1) // CHUNK) * CHUNK
    pad = n_pad - n

    # Pad the per-sentence arrays to a multiple of 8 rows (sublane-aligned chunks).
    # Padded rows use keep=0 (fresh zero state) and are sliced off after the call.
    x_p = jnp.pad(sent_features, ((0, pad), (0, 0)))
    hsg_p_p = jnp.pad(hsg_p, ((0, pad), (0, 0)))
    pos_p = jnp.pad(batch_pos_probs, ((0, pad), (0, 0)))
    keep_p = jnp.pad(keep, (0, pad))

    vmem = pl.BlockSpec(memory_space=pltpu.MemorySpace.VMEM)
    smem = pl.BlockSpec(memory_space=pltpu.MemorySpace.SMEM)

    # Explicit scoped-VMEM budget (v5e default is 16 MiB; v7x physical is only 64 MiB).
    resident_bytes = 4 * (
        x_p.size + hsg_p_p.size + pos_p.size
        + w_ih_t.size + w_hh_t.size + bias.size + w_c_t.size + b_c.size
        + n_pad * 4 * RNN_HIDDEN      # xgates scratch
        + n_pad * RNN_HIDDEN          # rnn_buf scratch
        + n_pad * 2)                  # output
    vmem_limit = int(min(max(2 * resident_bytes + (4 << 20), 16 << 20), 48 << 20))

    out = pl.pallas_call(
        rnn_hsg_kernel,
        out_shape=jax.ShapeDtypeStruct((n_pad, 2), jnp.float32),
        in_specs=[vmem, vmem, vmem, smem, vmem, vmem, vmem, vmem, vmem],
        out_specs=vmem,
        scratch_shapes=[
            pltpu.VMEM((n_pad, 4 * RNN_HIDDEN), jnp.float32),   # hoisted input gates
            pltpu.VMEM((n_pad, RNN_HIDDEN), jnp.float32),       # per-sentence LSTM outputs
        ],
        compiler_params=pltpu.CompilerParams(vmem_limit_bytes=vmem_limit),
    )(x_p, hsg_p_p, pos_p, keep_p, w_ih_t, w_hh_t, bias, w_c_t, b_c)
    return out[:n]


def reference_forward(sent_features, hsg_p, pos_probs, indices,
                      w_ih, w_hh, b_ih, b_hh, w_c, b_c):
    """Pure-numpy re-implementation of the PyTorch forward (post-HSG part)."""
    def sigmoid(z):
        return 1.0 / (1.0 + np.exp(-z))

    def softmax(z):
        e = np.exp(z - z.max(-1, keepdims=True))
        return e / e.sum(-1, keepdims=True)

    rnn_results, bpp = [], []
    start = 0
    for length in indices:
        xs = sent_features[start:start + length]
        h = np.zeros(RNN_HIDDEN, np.float32)
        c = np.zeros(RNN_HIDDEN, np.float32)
        hs = []
        for t in range(length):
            g = w_ih @ xs[t] + b_ih + w_hh @ h + b_hh
            i = sigmoid(g[:RNN_HIDDEN])
            f = sigmoid(g[RNN_HIDDEN:2 * RNN_HIDDEN])
            gg = np.tanh(g[2 * RNN_HIDDEN:3 * RNN_HIDDEN])
            o = sigmoid(g[3 * RNN_HIDDEN:])
            c = f * c + i * gg
            h = o * np.tanh(c)
            hs.append(h)
        hs = np.stack(hs)
        rnn_results.append(sigmoid(hs @ w_c.T + b_c))
        bpp.append(pos_probs[:length])
        start += length
    rnn_results = np.concatenate(rnn_results)
    bpp = np.concatenate(bpp)
    return softmax(hsg_p) + bpp + softmax(rnn_results) / 3.0


if __name__ == "__main__":
    hidden_size = 32            # hps.hidden_size
    indices = [3, 5, 4]         # sentences per document (dgl.unbatch equivalent)
    n_sent = sum(indices)       # 12 -> exercises the pad-to-8 path (n_pad = 16)
    max_pos = 16

    key = jax.random.PRNGKey(0)
    ks = jax.random.split(key, 8)

    # Stand-ins for the HSumGraph outputs.
    sent_features = jax.random.normal(ks[0], (n_sent, hidden_size), jnp.float32)
    hsg_p = jax.random.normal(ks[1], (n_sent, 2), jnp.float32)

    # position_probabilities = [[1 - x, x] for x in ...]
    xs = jnp.arange(max_pos, dtype=jnp.float32) / (2.0 * max_pos)
    pos_probs = jnp.stack([1.0 - xs, xs], axis=-1)                       # (max_pos, 2)
    batch_pos_probs = jnp.concatenate([pos_probs[:l] for l in indices])  # (n_sent, 2)

    # keep flag: 0.0 at the first sentence of each document, 1.0 elsewhere
    keep_np = np.ones((n_sent,), np.float32)
    start = 0
    for l in indices:
        keep_np[start] = 0.0
        start += l
    keep = jnp.asarray(keep_np)

    # LSTM parameters (torch layout: W_ih (4*128, H), W_hh (4*128, 128), gate order i,f,g,o)
    s = 1.0 / np.sqrt(RNN_HIDDEN)
    w_ih = jax.random.uniform(ks[2], (4 * RNN_HIDDEN, hidden_size), jnp.float32, -s, s)
    w_hh = jax.random.uniform(ks[3], (4 * RNN_HIDDEN, RNN_HIDDEN), jnp.float32, -s, s)
    b_ih = jax.random.uniform(ks[4], (4 * RNN_HIDDEN,), jnp.float32, -s, s)
    b_hh = jax.random.uniform(ks[5], (4 * RNN_HIDDEN,), jnp.float32, -s, s)

    # Classifier: Linear(128, 2)
    w_c = jax.random.uniform(ks[6], (2, RNN_HIDDEN), jnp.float32, -s, s)
    b_c = jax.random.uniform(ks[7], (2,), jnp.float32, -s, s)

    # Pre-transposed / fused parameters for the kernel.
    w_ih_t = w_ih.T                                   # (H, 512)
    w_hh_t = w_hh.T                                   # (128, 512)
    bias = (b_ih + b_hh).reshape(1, 4 * RNN_HIDDEN)   # (1, 512)
    w_c_t = w_c.T                                     # (128, 2)
    b_c2 = b_c.reshape(1, 2)                          # (1, 2)

    out = rnn_hsg_forward(sent_features, hsg_p, batch_pos_probs, keep,
                          w_ih_t, w_hh_t, bias, w_c_t, b_c2)
    out = jax.block_until_ready(out)

    ref = reference_forward(np.asarray(sent_features), np.asarray(hsg_p),
                            np.asarray(pos_probs), indices,
                            np.asarray(w_ih), np.asarray(w_hh),
                            np.asarray(b_ih), np.asarray(b_hh),
                            np.asarray(w_c), np.asarray(b_c))

    np.testing.assert_allclose(np.asarray(out), ref, atol=1e-4, rtol=1e-4)
    print("KERNEL_OK")
</pallas_src>

<mosaic_0001>
module attributes {stable_mosaic.version = 11 : i64} {
  func.func @rnn_hsg_kernel(%arg0: memref<16x32xf32, #tpu.memory_space<vmem>>, %arg1: memref<16x2xf32, #tpu.memory_space<vmem>>, %arg2: memref<16x2xf32, #tpu.memory_space<vmem>>, %arg3: memref<16xf32, #tpu.memory_space<smem>>, %arg4: memref<32x512xf32, #tpu.memory_space<vmem>>, %arg5: memref<128x512xf32, #tpu.memory_space<vmem>>, %arg6: memref<1x512xf32, #tpu.memory_space<vmem>>, %arg7: memref<128x2xf32, #tpu.memory_space<vmem>>, %arg8: memref<1x2xf32, #tpu.memory_space<vmem>>, %arg9: memref<16x2xf32, #tpu.memory_space<vmem>>, %arg10: memref<16x512xf32, #tpu.memory_space<vmem>>, %arg11: memref<16x128xf32, #tpu.memory_space<vmem>>) attributes {dimension_semantics = [], scalar_prefetch = 0 : i64, scratch_operands = 2 : i64, tpu.core_type = #tpu.core_type<tc>} {
    %c0 = arith.constant 0 : index
    %c0_0 = arith.constant 0 : index
    %0 = vector.load %arg0[%c0, %c0_0] : memref<16x32xf32, #tpu.memory_space<vmem>>, vector<16x32xf32>
    %c0_1 = arith.constant 0 : index
    %c0_2 = arith.constant 0 : index
    %1 = vector.load %arg4[%c0_1, %c0_2] : memref<32x512xf32, #tpu.memory_space<vmem>>, vector<32x512xf32>
    %cst = arith.constant dense<0.000000e+00> : vector<16x512xf32>
    %2 = tpu.matmul %0, %1, %cst {dimension_numbers = #tpu.dot_dimension_numbers<[1], [0], [0], [1], [0, 0, 1, 1], [], []>, precision = #tpu.contract_precision<fp32>} : vector<16x32xf32>, vector<32x512xf32>, vector<16x512xf32> -> vector<16x512xf32>
    %c0_3 = arith.constant 0 : index
    %c0_4 = arith.constant 0 : index
    %3 = vector.load %arg6[%c0_3, %c0_4] : memref<1x512xf32, #tpu.memory_space<vmem>>, vector<1x512xf32>
    %4 = vector.broadcast %3 : vector<1x512xf32> to vector<16x512xf32>
    %5 = arith.addf %2, %4 : vector<16x512xf32>
    %c0_5 = arith.constant 0 : index
    %c0_6 = arith.constant 0 : index
    %6 = vector.load %arg10[%c0_5, %c0_6] : memref<16x512xf32, #tpu.memory_space<vmem>>, vector<16x512xf32>
    tpu.vector_store %arg10[%c0_5, %c0_6], %5 {strides = array<i32>} : memref<16x512xf32, #tpu.memory_space<vmem>>, vector<16x512xf32>,
    %cst_7 = arith.constant 0.000000e+00 : f32
    %7 = vector.broadcast %cst_7 : f32 to vector<1x128xf32>
    %cst_8 = arith.constant 0.000000e+00 : f32
    %8 = vector.broadcast %cst_8 : f32 to vector<1x128xf32>
    %c0_i32 = arith.constant 0 : i32
    %c2_i32 = arith.constant 2 : i32
    %9 = arith.addi %c0_i32, %c2_i32 : i32
    %c1_i32 = arith.constant 1 : i32
    %10:2 = scf.for %arg12 = %c0_i32 to %9 step %c1_i32 iter_args(%arg13 = %7, %arg14 = %8) -> (vector<1x128xf32>, vector<1x128xf32>)  : i32 {
      %c8_i32 = arith.constant 8 : i32
      %51 = arith.muli %arg12, %c8_i32 : i32
      %52 = tpu.assume_multiple %51, 8 : i32
      %53 = arith.index_cast %52 : i32 to index
      %c0_29 = arith.constant 0 : index
      %54 = vector.load %arg10[%53, %c0_29] : memref<16x512xf32, #tpu.memory_space<vmem>>, vector<8x512xf32>
      %c0_i32_30 = arith.constant 0 : i32
      %55 = arith.addi %52, %c0_i32_30 : i32
      %56 = arith.index_cast %55 : i32 to index
      %57 = memref.load %arg3[%56] : memref<16xf32, #tpu.memory_space<smem>>
      %58 = vector.broadcast %57 : f32 to vector<1x128xf32>
      %59 = arith.mulf %arg13, %58 : vector<1x128xf32>
      %60 = vector.broadcast %57 : f32 to vector<1x128xf32>
      %61 = arith.mulf %arg14, %60 : vector<1x128xf32>
      %62 = vector.extract_strided_slice %54 {offsets = [0, 0], sizes = [1, 512], strides = [1, 1]} : vector<8x512xf32> to vector<1x512xf32>
      %c0_31 = arith.constant 0 : index
      %c0_32 = arith.constant 0 : index
      %63 = vector.load %arg5[%c0_31, %c0_32] : memref<128x512xf32, #tpu.memory_space<vmem>>, vector<128x512xf32>
      %cst_33 = arith.constant dense<0.000000e+00> : vector<1x512xf32>
      %64 = tpu.matmul %59, %63, %cst_33 {dimension_numbers = #tpu.dot_dimension_numbers<[1], [0], [0], [1], [0, 0, 1, 1], [], []>, precision = #tpu.contract_precision<fp32>} : vector<1x128xf32>, vector<128x512xf32>, vector<1x512xf32> -> vector<1x512xf32>
      %65 = arith.addf %62, %64 : vector<1x512xf32>
      %66 = vector.extract_strided_slice %65 {offsets = [0, 0], sizes = [1, 128], strides = [1, 1]} : vector<1x512xf32> to vector<1x128xf32>
      %67 = arith.negf %66 : vector<1x128xf32>
      %68 = math.exp %67 : vector<1x128xf32>
      %cst_34 = arith.constant 1.000000e+00 : f32
      %69 = vector.broadcast %cst_34 : f32 to vector<1x128xf32>
      %70 = arith.addf %69, %68 : vector<1x128xf32>
      %71 = arith.divf %69, %70 : vector<1x128xf32>
      %72 = vector.extract_strided_slice %65 {offsets = [0, 128], sizes = [1, 128], strides = [1, 1]} : vector<1x512xf32> to vector<1x128xf32>
      %73 = arith.negf %72 : vector<1x128xf32>
      %74 = math.exp %73 : vector<1x128xf32>
      %cst_35 = arith.constant 1.000000e+00 : f32
      %75 = vector.broadcast %cst_35 : f32 to vector<1x128xf32>
      %76 = arith.addf %75, %74 : vector<1x128xf32>
      %77 = arith.divf %75, %76 : vector<1x128xf32>
      %78 = vector.extract_strided_slice %65 {offsets = [0, 256], sizes = [1, 128], strides = [1, 1]} : vector<1x512xf32> to vector<1x128xf32>
      %79 = math.tanh %78 : vector<1x128xf32>
      %80 = vector.extract_strided_slice %65 {offsets = [0, 384], sizes = [1, 128], strides = [1, 1]} : vector<1x512xf32> to vector<1x128xf32>
      %81 = arith.negf %80 : vector<1x128xf32>
      %82 = math.exp %81 : vector<1x128xf32>
      %cst_36 = arith.constant 1.000000e+00 : f32
      %83 = vector.broadcast %cst_36 : f32 to vector<1x128xf32>
      %84 = arith.addf %83, %82 : vector<1x128xf32>
      %85 = arith.divf %83, %84 : vector<1x128xf32>
      %86 = arith.mulf %77, %61 : vector<1x128xf32>
      %87 = arith.mulf %71, %79 : vector<1x128xf32>
      %88 = arith.addf %86, %87 : vector<1x128xf32>
      %89 = math.tanh %88 : vector<1x128xf32>
      %90 = arith.mulf %85, %89 : vector<1x128xf32>
      %c1_i32_37 = arith.constant 1 : i32
      %91 = arith.addi %52, %c1_i32_37 : i32
      %92 = arith.index_cast %91 : i32 to index
      %93 = memref.load %arg3[%92] : memref<16xf32, #tpu.memory_space<smem>>
      %94 = vector.broadcast %93 : f32 to vector<1x128xf32>
      %95 = arith.mulf %90, %94 : vector<1x128xf32>
      %96 = vector.broadcast %93 : f32 to vector<1x128xf32>
      %97 = arith.mulf %88, %96 : vector<1x128xf32>
      %98 = vector.extract_strided_slice %54 {offsets = [1, 0], sizes = [1, 512], strides = [1, 1]} : vector<8x512xf32> to vector<1x512xf32>
      %c0_38 = arith.constant 0 : index
      %c0_39 = arith.constant 0 : index
      %99 = vector.load %arg5[%c0_38, %c0_39] : memref<128x512xf32, #tpu.memory_space<vmem>>, vector<128x512xf32>
      %cst_40 = arith.constant dense<0.000000e+00> : vector<1x512xf32>
      %100 = tpu.matmul %95, %99, %cst_40 {dimension_numbers = #tpu.dot_dimension_numbers<[1], [0], [0], [1], [0, 0, 1, 1], [], []>, precision = #tpu.contract_precision<fp32>} : vector<1x128xf32>, vector<128x512xf32>, vector<1x512xf32> -> vector<1x512xf32>
      %101 = arith.addf %98, %100 : vector<1x512xf32>
      %102 = vector.extract_strided_slice %101 {offsets = [0, 0], sizes = [1, 128], strides = [1, 1]} : vector<1x512xf32> to vector<1x128xf32>
      %103 = arith.negf %102 : vector<1x128xf32>
      %104 = math.exp %103 : vector<1x128xf32>
      %cst_41 = arith.constant 1.000000e+00 : f32
      %105 = vector.broadcast %cst_41 : f32 to vector<1x128xf32>
      %106 = arith.addf %105, %104 : vector<1x128xf32>
      %107 = arith.divf %105, %106 : vector<1x128xf32>
      %108 = vector.extract_strided_slice %101 {offsets = [0, 128], sizes = [1, 128], strides = [1, 1]} : vector<1x512xf32> to vector<1x128xf32>
      %109 = arith.negf %108 : vector<1x128xf32>
      %110 = math.exp %109 : vector<1x128xf32>
      %cst_42 = arith.constant 1.000000e+00 : f32
      %111 = vector.broadcast %cst_42 : f32 to vector<1x128xf32>
      %112 = arith.addf %111, %110 : vector<1x128xf32>
      %113 = arith.divf %111, %112 : vector<1x128xf32>
      %114 = vector.extract_strided_slice %101 {offsets = [0, 256], sizes = [1, 128], strides = [1, 1]} : vector<1x512xf32> to vector<1x128xf32>
      %115 = math.tanh %114 : vector<1x128xf32>
      %116 = vector.extract_strided_slice %101 {offsets = [0, 384], sizes = [1, 128], strides = [1, 1]} : vector<1x512xf32> to vector<1x128xf32>
      %117 = arith.negf %116 : vector<1x128xf32>
      %118 = math.exp %117 : vector<1x128xf32>
      %cst_43 = arith.constant 1.000000e+00 : f32
      %119 = vector.broadcast %cst_43 : f32 to vector<1x128xf32>
      %120 = arith.addf %119, %118 : vector<1x128xf32>
      %121 = arith.divf %119, %120 : vector<1x128xf32>
      %122 = arith.mulf %113, %97 : vector<1x128xf32>
      %123 = arith.mulf %107, %115 : vector<1x128xf32>
      %124 = arith.addf %122, %123 : vector<1x128xf32>
      %125 = math.tanh %124 : vector<1x128xf32>
      %126 = arith.mulf %121, %125 : vector<1x128xf32>
      %c2_i32_44 = arith.constant 2 : i32
      %127 = arith.addi %52, %c2_i32_44 : i32
      %128 = arith.index_cast %127 : i32 to index
      %129 = memref.load %arg3[%128] : memref<16xf32, #tpu.memory_space<smem>>
      %130 = vector.broadcast %129 : f32 to vector<1x128xf32>
      %131 = arith.mulf %126, %130 : vector<1x128xf32>
      %132 = vector.broadcast %129 : f32 to vector<1x128xf32>
      %133 = arith.mulf %124, %132 : vector<1x128xf32>
      %134 = vector.extract_strided_slice %54 {offsets = [2, 0], sizes = [1, 512], strides = [1, 1]} : vector<8x512xf32> to vector<1x512xf32>
      %c0_45 = arith.constant 0 : index
      %c0_46 = arith.constant 0 : index
      %135 = vector.load %arg5[%c0_45, %c0_46] : memref<128x512xf32, #tpu.memory_space<vmem>>, vector<128x512xf32>
      %cst_47 = arith.constant dense<0.000000e+00> : vector<1x512xf32>
      %136 = tpu.matmul %131, %135, %cst_47 {dimension_numbers = #tpu.dot_dimension_numbers<[1], [0], [0], [1], [0, 0, 1, 1], [], []>, precision = #tpu.contract_precision<fp32>} : vector<1x128xf32>, vector<128x512xf32>, vector<1x512xf32> -> vector<1x512xf32>
      %137 = arith.addf %134, %136 : vector<1x512xf32>
      %138 = vector.extract_strided_slice %137 {offsets = [0, 0], sizes = [1, 128], strides = [1, 1]} : vector<1x512xf32> to vector<1x128xf32>
      %139 = arith.negf %138 : vector<1x128xf32>
      %140 = math.exp %139 : vector<1x128xf32>
      %cst_48 = arith.constant 1.000000e+00 : f32
      %141 = vector.broadcast %cst_48 : f32 to vector<1x128xf32>
      %142 = arith.addf %141, %140 : vector<1x128xf32>
      %143 = arith.divf %141, %142 : vector<1x128xf32>
      %144 = vector.extract_strided_slice %137 {offsets = [0, 128], sizes = [1, 128], strides = [1, 1]} : vector<1x512xf32> to vector<1x128xf32>
      %145 = arith.negf %144 : vector<1x128xf32>
      %146 = math.exp %145 : vector<1x128xf32>
      %cst_49 = arith.constant 1.000000e+00 : f32
      %147 = vector.broadcast %cst_49 : f32 to vector<1x128xf32>
      %148 = arith.addf %147, %146 : vector<1x128xf32>
      %149 = arith.divf %147, %148 : vector<1x128xf32>
      %150 = vector.extract_strided_slice %137 {offsets = [0, 256], sizes = [1, 128], strides = [1, 1]} : vector<1x512xf32> to vector<1x128xf32>
      %151 = math.tanh %150 : vector<1x128xf32>
      %152 = vector.extract_strided_slice %137 {offsets = [0, 384], sizes = [1, 128], strides = [1, 1]} : vector<1x512xf32> to vector<1x128xf32>
      %153 = arith.negf %152 : vector<1x128xf32>
      %154 = math.exp %153 : vector<1x128xf32>
      %cst_50 = arith.constant 1.000000e+00 : f32
      %155 = vector.broadcast %cst_50 : f32 to vector<1x128xf32>
      %156 = arith.addf %155, %154 : vector<1x128xf32>
      %157 = arith.divf %155, %156 : vector<1x128xf32>
      %158 = arith.mulf %149, %133 : vector<1x128xf32>
      %159 = arith.mulf %143, %151 : vector<1x128xf32>
      %160 = arith.addf %158, %159 : vector<1x128xf32>
      %161 = math.tanh %160 : vector<1x128xf32>
      %162 = arith.mulf %157, %161 : vector<1x128xf32>
      %c3_i32 = arith.constant 3 : i32
      %163 = arith.addi %52, %c3_i32 : i32
      %164 = arith.index_cast %163 : i32 to index
      %165 = memref.load %arg3[%164] : memref<16xf32, #tpu.memory_space<smem>>
      %166 = vector.broadcast %165 : f32 to vector<1x128xf32>
      %167 = arith.mulf %162, %166 : vector<1x128xf32>
      %168 = vector.broadcast %165 : f32 to vector<1x128xf32>
      %169 = arith.mulf %160, %168 : vector<1x128xf32>
      %170 = vector.extract_strided_slice %54 {offsets = [3, 0], sizes = [1, 512], strides = [1, 1]} : vector<8x512xf32> to vector<1x512xf32>
      %c0_51 = arith.constant 0 : index
      %c0_52 = arith.constant 0 : index
      %171 = vector.load %arg5[%c0_51, %c0_52] : memref<128x512xf32, #tpu.memory_space<vmem>>, vector<128x512xf32>
      %cst_53 = arith.constant dense<0.000000e+00> : vector<1x512xf32>
      %172 = tpu.matmul %167, %171, %cst_53 {dimension_numbers = #tpu.dot_dimension_numbers<[1], [0], [0], [1], [0, 0, 1, 1], [], []>, precision = #tpu.contract_precision<fp32>} : vector<1x128xf32>, vector<128x512xf32>, vector<1x512xf32> -> vector<1x512xf32>
      %173 = arith.addf %170, %172 : vector<1x512xf32>
      %174 = vector.extract_strided_slice %173 {offsets = [0, 0], sizes = [1, 128], strides = [1, 1]} : vector<1x512xf32> to vector<1x128xf32>
      %175 = arith.negf %174 : vector<1x128xf32>
      %176 = math.exp %175 : vector<1x128xf32>
      %cst_54 = arith.constant 1.000000e+00 : f32
      %177 = vector.broadcast %cst_54 : f32 to vector<1x128xf32>
      %178 = arith.addf %177, %176 : vector<1x128xf32>
      %179 = arith.divf %177, %178 : vector<1x128xf32>
      %180 = vector.extract_strided_slice %173 {offsets = [0, 128], sizes = [1, 128], strides = [1, 1]} : vector<1x512xf32> to vector<1x128xf32>
      %181 = arith.negf %180 : vector<1x128xf32>
      %182 = math.exp %181 : vector<1x128xf32>
      %cst_55 = arith.constant 1.000000e+00 : f32
      %183 = vector.broadcast %cst_55 : f32 to vector<1x128xf32>
      %184 = arith.addf %183, %182 : vector<1x128xf32>
      %185 = arith.divf %183, %184 : vector<1x128xf32>
      %186 = vector.extract_strided_slice %173 {offsets = [0, 256], sizes = [1, 128], strides = [1, 1]} : vector<1x512xf32> to vector<1x128xf32>
      %187 = math.tanh %186 : vector<1x128xf32>
      %188 = vector.extract_strided_slice %173 {offsets = [0, 384], sizes = [1, 128], strides = [1, 1]} : vector<1x512xf32> to vector<1x128xf32>
      %189 = arith.negf %188 : vector<1x128xf32>
      %190 = math.exp %189 : vector<1x128xf32>
      %cst_56 = arith.constant 1.000000e+00 : f32
      %191 = vector.broadcast %cst_56 : f32 to vector<1x128xf32>
      %192 = arith.addf %191, %190 : vector<1x128xf32>
      %193 = arith.divf %191, %192 : vector<1x128xf32>
      %194 = arith.mulf %185, %169 : vector<1x128xf32>
      %195 = arith.mulf %179, %187 : vector<1x128xf32>
      %196 = arith.addf %194, %195 : vector<1x128xf32>
      %197 = math.tanh %196 : vector<1x128xf32>
      %198 = arith.mulf %193, %197 : vector<1x128xf32>
      %c4_i32 = arith.constant 4 : i32
      %199 = arith.addi %52, %c4_i32 : i32
      %200 = arith.index_cast %199 : i32 to index
      %201 = memref.load %arg3[%200] : memref<16xf32, #tpu.memory_space<smem>>
      %202 = vector.broadcast %201 : f32 to vector<1x128xf32>
      %203 = arith.mulf %198, %202 : vector<1x128xf32>
      %204 = vector.broadcast %201 : f32 to vector<1x128xf32>
      %205 = arith.mulf %196, %204 : vector<1x128xf32>
      %206 = vector.extract_strided_slice %54 {offsets = [4, 0], sizes = [1, 512], strides = [1, 1]} : vector<8x512xf32> to vector<1x512xf32>
      %c0_57 = arith.constant 0 : index
      %c0_58 = arith.constant 0 : index
      %207 = vector.load %arg5[%c0_57, %c0_58] : memref<128x512xf32, #tpu.memory_space<vmem>>, vector<128x512xf32>
      %cst_59 = arith.constant dense<0.000000e+00> : vector<1x512xf32>
      %208 = tpu.matmul %203, %207, %cst_59 {dimension_numbers = #tpu.dot_dimension_numbers<[1], [0], [0], [1], [0, 0, 1, 1], [], []>, precision = #tpu.contract_precision<fp32>} : vector<1x128xf32>, vector<128x512xf32>, vector<1x512xf32> -> vector<1x512xf32>
      %209 = arith.addf %206, %208 : vector<1x512xf32>
      %210 = vector.extract_strided_slice %209 {offsets = [0, 0], sizes = [1, 128], strides = [1, 1]} : vector<1x512xf32> to vector<1x128xf32>
      %211 = arith.negf %210 : vector<1x128xf32>
      %212 = math.exp %211 : vector<1x128xf32>
      %cst_60 = arith.constant 1.000000e+00 : f32
      %213 = vector.broadcast %cst_60 : f32 to vector<1x128xf32>
      %214 = arith.addf %213, %212 : vector<1x128xf32>
      %215 = arith.divf %213, %214 : vector<1x128xf32>
      %216 = vector.extract_strided_slice %209 {offsets = [0, 128], sizes = [1, 128], strides = [1, 1]} : vector<1x512xf32> to vector<1x128xf32>
      %217 = arith.negf %216 : vector<1x128xf32>
      %218 = math.exp %217 : vector<1x128xf32>
      %cst_61 = arith.constant 1.000000e+00 : f32
      %219 = vector.broadcast %cst_61 : f32 to vector<1x128xf32>
      %220 = arith.addf %219, %218 : vector<1x128xf32>
      %221 = arith.divf %219, %220 : vector<1x128xf32>
      %222 = vector.extract_strided_slice %209 {offsets = [0, 256], sizes = [1, 128], strides = [1, 1]} : vector<1x512xf32> to vector<1x128xf32>
      %223 = math.tanh %222 : vector<1x128xf32>
      %224 = vector.extract_strided_slice %209 {offsets = [0, 384], sizes = [1, 128], strides = [1, 1]} : vector<1x512xf32> to vector<1x128xf32>
      %225 = arith.negf %224 : vector<1x128xf32>
      %226 = math.exp %225 : vector<1x128xf32>
      %cst_62 = arith.constant 1.000000e+00 : f32
      %227 = vector.broadcast %cst_62 : f32 to vector<1x128xf32>
      %228 = arith.addf %227, %226 : vector<1x128xf32>
      %229 = arith.divf %227, %228 : vector<1x128xf32>
      %230 = arith.mulf %221, %205 : vector<1x128xf32>
      %231 = arith.mulf %215, %223 : vector<1x128xf32>
      %232 = arith.addf %230, %231 : vector<1x128xf32>
      %233 = math.tanh %232 : vector<1x128xf32>
      %234 = arith.mulf %229, %233 : vector<1x128xf32>
      %c5_i32 = arith.constant 5 : i32
      %235 = arith.addi %52, %c5_i32 : i32
      %236 = arith.index_cast %235 : i32 to index
      %237 = memref.load %arg3[%236] : memref<16xf32, #tpu.memory_space<smem>>
      %238 = vector.broadcast %237 : f32 to vector<1x128xf32>
      %239 = arith.mulf %234, %238 : vector<1x128xf32>
      %240 = vector.broadcast %237 : f32 to vector<1x128xf32>
      %241 = arith.mulf %232, %240 : vector<1x128xf32>
      %242 = vector.extract_strided_slice %54 {offsets = [5, 0], sizes = [1, 512], strides = [1, 1]} : vector<8x512xf32> to vector<1x512xf32>
      %c0_63 = arith.constant 0 : index
      %c0_64 = arith.constant 0 : index
      %243 = vector.load %arg5[%c0_63, %c0_64] : memref<128x512xf32, #tpu.memory_space<vmem>>, vector<128x512xf32>
      %cst_65 = arith.constant dense<0.000000e+00> : vector<1x512xf32>
      %244 = tpu.matmul %239, %243, %cst_65 {dimension_numbers = #tpu.dot_dimension_numbers<[1], [0], [0], [1], [0, 0, 1, 1], [], []>, precision = #tpu.contract_precision<fp32>} : vector<1x128xf32>, vector<128x512xf32>, vector<1x512xf32> -> vector<1x512xf32>
      %245 = arith.addf %242, %244 : vector<1x512xf32>
      %246 = vector.extract_strided_slice %245 {offsets = [0, 0], sizes = [1, 128], strides = [1, 1]} : vector<1x512xf32> to vector<1x128xf32>
      %247 = arith.negf %246 : vector<1x128xf32>
      %248 = math.exp %247 : vector<1x128xf32>
      %cst_66 = arith.constant 1.000000e+00 : f32
      %249 = vector.broadcast %cst_66 : f32 to vector<1x128xf32>
      %250 = arith.addf %249, %248 : vector<1x128xf32>
      %251 = arith.divf %249, %250 : vector<1x128xf32>
      %252 = vector.extract_strided_slice %245 {offsets = [0, 128], sizes = [1, 128], strides = [1, 1]} : vector<1x512xf32> to vector<1x128xf32>
      %253 = arith.negf %252 : vector<1x128xf32>
      %254 = math.exp %253 : vector<1x128xf32>
      %cst_67 = arith.constant 1.000000e+00 : f32
      %255 = vector.broadcast %cst_67 : f32 to vector<1x128xf32>
      %256 = arith.addf %255, %254 : vector<1x128xf32>
      %257 = arith.divf %255, %256 : vector<1x128xf32>
      %258 = vector.extract_strided_slice %245 {offsets = [0, 256], sizes = [1, 128], strides = [1, 1]} : vector<1x512xf32> to vector<1x128xf32>
      %259 = math.tanh %258 : vector<1x128xf32>
      %260 = vector.extract_strided_slice %245 {offsets = [0, 384], sizes = [1, 128], strides = [1, 1]} : vector<1x512xf32> to vector<1x128xf32>
      %261 = arith.negf %260 : vector<1x128xf32>
      %262 = math.exp %261 : vector<1x128xf32>
      %cst_68 = arith.constant 1.000000e+00 : f32
      %263 = vector.broadcast %cst_68 : f32 to vector<1x128xf32>
      %264 = arith.addf %263, %262 : vector<1x128xf32>
      %265 = arith.divf %263, %264 : vector<1x128xf32>
      %266 = arith.mulf %257, %241 : vector<1x128xf32>
      %267 = arith.mulf %251, %259 : vector<1x128xf32>
      %268 = arith.addf %266, %267 : vector<1x128xf32>
      %269 = math.tanh %268 : vector<1x128xf32>
      %270 = arith.mulf %265, %269 : vector<1x128xf32>
      %c6_i32 = arith.constant 6 : i32
      %271 = arith.addi %52, %c6_i32 : i32
      %272 = arith.index_cast %271 : i32 to index
      %273 = memref.load %arg3[%272] : memref<16xf32, #tpu.memory_space<smem>>
      %274 = vector.broadcast %273 : f32 to vector<1x128xf32>
      %275 = arith.mulf %270, %274 : vector<1x128xf32>
      %276 = vector.broadcast %273 : f32 to vector<1x128xf32>
      %277 = arith.mulf %268, %276 : vector<1x128xf32>
      %278 = vector.extract_strided_slice %54 {offsets = [6, 0], sizes = [1, 512], strides = [1, 1]} : vector<8x512xf32> to vector<1x512xf32>
      %c0_69 = arith.constant 0 : index
      %c0_70 = arith.constant 0 : index
      %279 = vector.load %arg5[%c0_69, %c0_70] : memref<128x512xf32, #tpu.memory_space<vmem>>, vector<128x512xf32>
      %cst_71 = arith.constant dense<0.000000e+00> : vector<1x512xf32>
      %280 = tpu.matmul %275, %279, %cst_71 {dimension_numbers = #tpu.dot_dimension_numbers<[1], [0], [0], [1], [0, 0, 1, 1], [], []>, precision = #tpu.contract_precision<fp32>} : vector<1x128xf32>, vector<128x512xf32>, vector<1x512xf32> -> vector<1x512xf32>
      %281 = arith.addf %278, %280 : vector<1x512xf32>
      %282 = vector.extract_strided_slice %281 {offsets = [0, 0], sizes = [1, 128], strides = [1, 1]} : vector<1x512xf32> to vector<1x128xf32>
      %283 = arith.negf %282 : vector<1x128xf32>
      %284 = math.exp %283 : vector<1x128xf32>
      %cst_72 = arith.constant 1.000000e+00 : f32
      %285 = vector.broadcast %cst_72 : f32 to vector<1x128xf32>
      %286 = arith.addf %285, %284 : vector<1x128xf32>
      %287 = arith.divf %285, %286 : vector<1x128xf32>
      %288 = vector.extract_strided_slice %281 {offsets = [0, 128], sizes = [1, 128], strides = [1, 1]} : vector<1x512xf32> to vector<1x128xf32>
      %289 = arith.negf %288 : vector<1x128xf32>
      %290 = math.exp %289 : vector<1x128xf32>
      %cst_73 = arith.constant 1.000000e+00 : f32
      %291 = vector.broadcast %cst_73 : f32 to vector<1x128xf32>
      %292 = arith.addf %291, %290 : vector<1x128xf32>
      %293 = arith.divf %291, %292 : vector<1x128xf32>
      %294 = vector.extract_strided_slice %281 {offsets = [0, 256], sizes = [1, 128], strides = [1, 1]} : vector<1x512xf32> to vector<1x128xf32>
      %295 = math.tanh %294 : vector<1x128xf32>
      %296 = vector.extract_strided_slice %281 {offsets = [0, 384], sizes = [1, 128], strides = [1, 1]} : vector<1x512xf32> to vector<1x128xf32>
      %297 = arith.negf %296 : vector<1x128xf32>
      %298 = math.exp %297 : vector<1x128xf32>
      %cst_74 = arith.constant 1.000000e+00 : f32
      %299 = vector.broadcast %cst_74 : f32 to vector<1x128xf32>
      %300 = arith.addf %299, %298 : vector<1x128xf32>
      %301 = arith.divf %299, %300 : vector<1x128xf32>
      %302 = arith.mulf %293, %277 : vector<1x128xf32>
      %303 = arith.mulf %287, %295 : vector<1x128xf32>
      %304 = arith.addf %302, %303 : vector<1x128xf32>
      %305 = math.tanh %304 : vector<1x128xf32>
      %306 = arith.mulf %301, %305 : vector<1x128xf32>
      %c7_i32 = arith.constant 7 : i32
      %307 = arith.addi %52, %c7_i32 : i32
      %308 = arith.index_cast %307 : i32 to index
      %309 = memref.load %arg3[%308] : memref<16xf32, #tpu.memory_space<smem>>
      %310 = vector.broadcast %309 : f32 to vector<1x128xf32>
      %311 = arith.mulf %306, %310 : vector<1x128xf32>
      %312 = vector.broadcast %309 : f32 to vector<1x128xf32>
      %313 = arith.mulf %304, %312 : vector<1x128xf32>
      %314 = vector.extract_strided_slice %54 {offsets = [7, 0], sizes = [1, 512], strides = [1, 1]} : vector<8x512xf32> to vector<1x512xf32>
      %c0_75 = arith.constant 0 : index
      %c0_76 = arith.constant 0 : index
      %315 = vector.load %arg5[%c0_75, %c0_76] : memref<128x512xf32, #tpu.memory_space<vmem>>, vector<128x512xf32>
      %cst_77 = arith.constant dense<0.000000e+00> : vector<1x512xf32>
      %316 = tpu.matmul %311, %315, %cst_77 {dimension_numbers = #tpu.dot_dimension_numbers<[1], [0], [0], [1], [0, 0, 1, 1], [], []>, precision = #tpu.contract_precision<fp32>} : vector<1x128xf32>, vector<128x512xf32>, vector<1x512xf32> -> vector<1x512xf32>
      %317 = arith.addf %314, %316 : vector<1x512xf32>
      %318 = vector.extract_strided_slice %317 {offsets = [0, 0], sizes = [1, 128], strides = [1, 1]} : vector<1x512xf32> to vector<1x128xf32>
      %319 = arith.negf %318 : vector<1x128xf32>
      %320 = math.exp %319 : vector<1x128xf32>
      %cst_78 = arith.constant 1.000000e+00 : f32
      %321 = vector.broadcast %cst_78 : f32 to vector<1x128xf32>
      %322 = arith.addf %321, %320 : vector<1x128xf32>
      %323 = arith.divf %321, %322 : vector<1x128xf32>
      %324 = vector.extract_strided_slice %317 {offsets = [0, 128], sizes = [1, 128], strides = [1, 1]} : vector<1x512xf32> to vector<1x128xf32>
      %325 = arith.negf %324 : vector<1x128xf32>
      %326 = math.exp %325 : vector<1x128xf32>
      %cst_79 = arith.constant 1.000000e+00 : f32
      %327 = vector.broadcast %cst_79 : f32 to vector<1x128xf32>
      %328 = arith.addf %327, %326 : vector<1x128xf32>
      %329 = arith.divf %327, %328 : vector<1x128xf32>
      %330 = vector.extract_strided_slice %317 {offsets = [0, 256], sizes = [1, 128], strides = [1, 1]} : vector<1x512xf32> to vector<1x128xf32>
      %331 = math.tanh %330 : vector<1x128xf32>
      %332 = vector.extract_strided_slice %317 {offsets = [0, 384], sizes = [1, 128], strides = [1, 1]} : vector<1x512xf32> to vector<1x128xf32>
      %333 = arith.negf %332 : vector<1x128xf32>
      %334 = math.exp %333 : vector<1x128xf32>
      %cst_80 = arith.constant 1.000000e+00 : f32
      %335 = vector.broadcast %cst_80 : f32 to vector<1x128xf32>
      %336 = arith.addf %335, %334 : vector<1x128xf32>
      %337 = arith.divf %335, %336 : vector<1x128xf32>
      %338 = arith.mulf %329, %313 : vector<1x128xf32>
      %339 = arith.mulf %323, %331 : vector<1x128xf32>
      %340 = arith.addf %338, %339 : vector<1x128xf32>
      %341 = math.tanh %340 : vector<1x128xf32>
      %342 = arith.mulf %337, %341 : vector<1x128xf32>
      %343 = tpu.concatenate %90, %126, %162, %198, %234, %270, %306, %342 in 0 : vector<1x128xf32>, vector<1x128xf32>, vector<1x128xf32>, vector<1x128xf32>, vector<1x128xf32>, vector<1x128xf32>, vector<1x128xf32>, vector<1x128xf32> -> vector<8x128xf32>
      %344 = arith.index_cast %52 : i32 to index
      %c0_81 = arith.constant 0 : index
      %345 = vector.load %arg11[%344, %c0_81] : memref<16x128xf32, #tpu.memory_space<vmem>>, vector<8x128xf32>
      tpu.vector_store %arg11[%344, %c0_81], %343 {strides = array<i32>} : memref<16x128xf32, #tpu.memory_space<vmem>>, vector<8x128xf32>,
      scf.yield %342, %340 : vector<1x128xf32>, vector<1x128xf32>
    }
    %c2_i32_9 = arith.constant 2 : i32
    %c0_10 = arith.constant 0 : index
    %c0_11 = arith.constant 0 : index
    %11 = vector.load %arg11[%c0_10, %c0_11] : memref<16x128xf32, #tpu.memory_space<vmem>>, vector<16x128xf32>
    %c0_12 = arith.constant 0 : index
    %c0_13 = arith.constant 0 : index
    %12 = vector.load %arg7[%c0_12, %c0_13] : memref<128x2xf32, #tpu.memory_space<vmem>>, vector<128x2xf32>
    %cst_14 = arith.constant dense<0.000000e+00> : vector<16x2xf32>
    %13 = tpu.matmul %11, %12, %cst_14 {dimension_numbers = #tpu.dot_dimension_numbers<[1], [0], [0], [1], [0, 0, 1, 1], [], []>, precision = #tpu.contract_precision<fp32>} : vector<16x128xf32>, vector<128x2xf32>, vector<16x2xf32> -> vector<16x2xf32>
    %c0_15 = arith.constant 0 : index
    %c0_16 = arith.constant 0 : index
    %14 = vector.load %arg8[%c0_15, %c0_16] : memref<1x2xf32, #tpu.memory_space<vmem>>, vector<1x2xf32>
    %15 = vector.broadcast %14 : vector<1x2xf32> to vector<16x2xf32>
    %16 = arith.addf %13, %15 : vector<16x2xf32>
    %17 = arith.negf %16 : vector<16x2xf32>
    %18 = math.exp %17 : vector<16x2xf32>
    %cst_17 = arith.constant 1.000000e+00 : f32
    %19 = vector.broadcast %cst_17 : f32 to vector<16x2xf32>
    %20 = arith.addf %19, %18 : vector<16x2xf32>
    %21 = arith.divf %19, %20 : vector<16x2xf32>
    %c0_18 = arith.constant 0 : index
    %c0_19 = arith.constant 0 : index
    %22 = vector.load %arg1[%c0_18, %c0_19] : memref<16x2xf32, #tpu.memory_space<vmem>>, vector<16x2xf32>
    %23 = vector.extract_strided_slice %22 {offsets = [0, 0], sizes = [16, 1], strides = [1, 1]} : vector<16x2xf32> to vector<16x1xf32>
    %24 = vector.extract_strided_slice %22 {offsets = [0, 1], sizes = [16, 1], strides = [1, 1]} : vector<16x2xf32> to vector<16x1xf32>
    %25 = arith.subf %23, %24 : vector<16x1xf32>
    %26 = arith.negf %25 : vector<16x1xf32>
    %27 = math.exp %26 : vector<16x1xf32>
    %cst_20 = arith.constant 1.000000e+00 : f32
    %28 = vector.broadcast %cst_20 : f32 to vector<16x1xf32>
    %29 = arith.addf %28, %27 : vector<16x1xf32>
    %30 = arith.divf %28, %29 : vector<16x1xf32>
    %cst_21 = arith.constant 1.000000e+00 : f32
    %31 = vector.broadcast %cst_21 : f32 to vector<16x1xf32>
    %32 = arith.subf %31, %30 : vector<16x1xf32>
    %33 = tpu.concatenate %30, %32 in 1 : vector<16x1xf32>, vector<16x1xf32> -> vector<16x2xf32>
    %c0_22 = arith.constant 0 : index
    %c0_23 = arith.constant 0 : index
    %34 = vector.load %arg2[%c0_22, %c0_23] : memref<16x2xf32, #tpu.memory_space<vmem>>, vector<16x2xf32>
    %35 = arith.addf %33, %34 : vector<16x2xf32>
    %36 = vector.extract_strided_slice %21 {offsets = [0, 0], sizes = [16, 1], strides = [1, 1]} : vector<16x2xf32> to vector<16x1xf32>
    %37 = vector.extract_strided_slice %21 {offsets = [0, 1], sizes = [16, 1], strides = [1, 1]} : vector<16x2xf32> to vector<16x1xf32>
    %38 = arith.subf %36, %37 : vector<16x1xf32>
    %39 = arith.negf %38 : vector<16x1xf32>
    %40 = math.exp %39 : vector<16x1xf32>
    %cst_24 = arith.constant 1.000000e+00 : f32
    %41 = vector.broadcast %cst_24 : f32 to vector<16x1xf32>
    %42 = arith.addf %41, %40 : vector<16x1xf32>
    %43 = arith.divf %41, %42 : vector<16x1xf32>
    %cst_25 = arith.constant 1.000000e+00 : f32
    %44 = vector.broadcast %cst_25 : f32 to vector<16x1xf32>
    %45 = arith.subf %44, %43 : vector<16x1xf32>
    %46 = tpu.concatenate %43, %45 in 1 : vector<16x1xf32>, vector<16x1xf32> -> vector<16x2xf32>
    %cst_26 = arith.constant 3.000000e+00 : f32
    %47 = vector.broadcast %cst_26 : f32 to vector<16x2xf32>
    %48 = arith.divf %46, %47 : vector<16x2xf32>
    %49 = arith.addf %35, %48 : vector<16x2xf32>
    %c0_27 = arith.constant 0 : index
    %c0_28 = arith.constant 0 : index
    %50 = vector.load %arg9[%c0_27, %c0_28] : memref<16x2xf32, #tpu.memory_space<vmem>>, vector<16x2xf32>
    tpu.vector_store %arg9[%c0_27, %c0_28], %49 {strides = array<i32>} : memref<16x2xf32, #tpu.memory_space<vmem>>, vector<16x2xf32>,
    return
  }
}

</mosaic_0001>

<bundles_post_ra>
// kernel: tpu_custom_call.1
= control target key start
LH: loop header
LB: loop body
LE: loop exit
PB: predicated region body
PF: predicated region fallthrough
CT: control target
= control target key end

     0   :  { %14 = vsyncpa [#allocation6], 0  ;;  %s24529_s0 = inlined_call_operand.vmem [shape: f32[16,32], index: 0, kind: input, shape index: {}]   ;;  %s24530_s1 = inlined_call_operand.vmem [shape: f32[16,2], index: 1, kind: input, shape index: {}]   ;;  %s24531_s2 = inlined_call_operand.vmem [shape: f32[16,2], index: 2, kind: input, shape index: {}]   ;;  %s24532_s3 = inlined_call_operand.vmem [shape: f32[16], index: 3, kind: input, shape index: {}]   ;;  %s24533_s4 = inlined_call_operand.vmem [shape: f32[32,512], index: 4, kind: input, shape index: {}]   ;;  %s24534_s5 = inlined_call_operand.hbm [shape: f32[128,512], index: 5, kind: input, shape index: {}]   ;;  %s24535_s6 = inlined_call_operand.vmem [shape: f32[1,512], index: 6, kind: input, shape index: {}]   ;;  %s24536_s7 = inlined_call_operand.vmem [shape: f32[128,2], index: 7, kind: input, shape index: {}]   ;;  %s24537_s8 = inlined_call_operand.vmem [shape: f32[1,2], index: 8, kind: input, shape index: {}]   ;;  %s24538_s9 = inlined_call_operand.vmem [shape: f32[16,2], index: 9, kind: output, shape index: {}]  }
   0x1   :  { %s28_s11 = sshll.u32 %s24532_s3, 4  ;;  %s29_s11 = int_to_ptr.vmem [resolvable:$true] %s28_s11 }
   0x2   :  { %15 = vsyncpa [#allocation5], 0  ;;  %s20422_s12 = scalar_lea.vmem %s29_s11, 16  ;;  %p20427_p1 = scmp.lt.s32.totalorder %s29_s11, %s29_s11 }
   0x3   :  { %p20423_p0 = scmp.ne.s32.totalorder %s29_s11, %s20422_s12  ;;  %p20428_p2 = scmp.lt.s32.totalorder %s20422_s12, %s20422_s12 }
   0x5   :  { %p20429_p3 = por %p20428_p2, %p20427_p1 }
   0x7   :  { %p20430_p4 = pnand %p20429_p3, %p20423_p0 }
   0x9   :  { %20433 = shalt.err (!%p20430_p4)
}
   0xa   :  { %s20484_s13 = smov [#allocation4]   ;;  %s20485_s14 = smov [#allocation7]  }
   0xb   :  { %31 = dma.vmem_to_smem %s29_s11, 16, %s20484_s13, [#allocation6]  }
   0xc   :  { %s39_s15 = sshll.u32 %s20485_s14, 4  ;;  %s20434_s18 = scalar_lea.hbm %s24534_s5, 8192  ;;  %s40_s15 = int_to_ptr.vmem [resolvable:$true] %s39_s15 }
   0xd   :  { %p20435_p5 = scmp.ne.s32.totalorder %s24534_s5, %s20434_s18  ;;  %p20438_p6 = scmp.lt.u32.totalorder %s20434_s18, %s24534_s5 }
   0xf   :  { %p20440_p7 = pnand %p20438_p6, %p20435_p5 }
  0x11   :  { %20443 = shalt.err (!%p20440_p7)
}
  0x12   :  { %s20444_s22 = scalar_lea.vmem %s40_s15, 8192  ;;  %p20449_p9 = scmp.lt.s32.totalorder %s40_s15, %s40_s15 }
  0x13   :  { %p20445_p8 = scmp.ne.s32.totalorder %s40_s15, %s20444_s22  ;;  %p20450_p10 = scmp.lt.s32.totalorder %s20444_s22, %s20444_s22 }
  0x15   :  { %p20451_p11 = por %p20450_p10, %p20449_p9 }
  0x17   :  { %p20452_p12 = pnand %p20451_p11, %p20445_p8 }
  0x19   :  { %20455 = shalt.err (!%p20452_p12)
}
  0x1a   :  { %s20486_s23 = smov 512   ;;  %s20487_s24 = smov 32  }
  0x1b   :  { %45 = dma.hbm_to_vmem [thread:$0]  %s24534_s5, 8192, %s40_s15, [#allocation5], %s20486_s23, %s20486_s23, %s20487_s24  }
  0x1c   :  { %20468 = dma.done.wait [#allocation6], 16  }
  0x1d   :  { %20469 = vsyncadd [#allocation6], 4294967280 }
  0x1e   :  { %20470 = dma.done.wait [#allocation5], 8192  }
  0x1f   :  { %20471 = vsyncadd [#allocation5], 4294959104 }
  0x20   :  { %58 = sfence }
  0x21   :  { %v62_v0 = vld [vmem:[%s24533_s4 + $0x8] sm:$0xff]  ;;  %v64_v2 = vld [vmem:[%s24533_s4 + $0x18] sm:$0xff]  ;;  %vm99_vm0 = vcmask 261120   ;;  %v61_v7 = vld [vmem:[%s24533_s4] sm:$0xff]  ;;  %v20488_v9 = vmov 0.0  }
  0x22   :  { %v66_v1 = vld [vmem:[%s24533_s4 + $0x28] sm:$0xff]  ;;  %v106_v3 = vand.u32 4294901760, %v62_v0  ;;  %v68_v5 = vld [vmem:[%s24533_s4 + $0x38] sm:$0xff]  ;;  %v698_v6 = vand.u32 4294901760, %v64_v2  ;;  %v65_v8 = vld [vmem:[%s24533_s4 + $0x20] sm:$0xff]  ;;  %178 = vmatprep.mubr.f32.mxu0 %v20488_v9  ;;  %770 = vmatprep.mubr.f32.mxu1 %v20488_v9  ;;  %v108_v11 = vand.u32 4294901760, %v61_v7 }
  0x23   :  { %v110_v4 = vand.u32 4294901760, %v66_v1  ;;  %v702_v10 = vand.u32 4294901760, %v68_v5  ;;  %v112_v12 = vand.u32 4294901760, %v65_v8  ;;  %v63_v13 = vld [vmem:[%s24533_s4 + $0x10] sm:$0xff]  ;;  %v70_v15 = vld [vmem:[%s24533_s4 + $0x48] sm:$0xff]  ;;  %v72_v21 = vld [vmem:[%s24533_s4 + $0x58] sm:$0xff] }
  0x24   :  { %v67_v14 = vld [vmem:[%s24533_s4 + $0x30] sm:$0xff]  ;;  %v20588_v17 = vsub.f32 %v62_v0, %v106_v3  ;;  %v20592_v19 = vsub.f32 %v64_v2, %v698_v6  ;;  %v74_v20 = vld [vmem:[%s24533_s4 + $0x68] sm:$0xff]  ;;  %v76_v22 = vld [vmem:[%s24533_s4 + $0x78] sm:$0xff]  ;;  %v20609_v26 = vsub.f32 %v61_v7, %v108_v11  ;;  %v700_v29 = vand.u32 4294901760, %v63_v13 }
  0x25   :  { %v20586_v16 = vpack.c.bf16 %v110_v4, %v106_v3  ;;  %v20590_v18 = vsub.f32 %v66_v1, %v110_v4  ;;  %v20603_v23 = vpack.c.bf16 %v702_v10, %v698_v6  ;;  %v20605_v24 = vsub.f32 %v68_v5, %v702_v10  ;;  %v69_v27 = vld [vmem:[%s24533_s4 + $0x40] sm:$0xff]  ;;  %v71_v37 = vld [vmem:[%s24533_s4 + $0x50] sm:$0xff] }
  0x26   :  { %v20607_v25 = vpack.c.bf16 %v112_v12, %v108_v11  ;;  %v20615_v28 = vsub.f32 %v65_v8, %v112_v12  ;;  %v704_v30 = vand.u32 4294901760, %v67_v14  ;;  %v114_v31 = vand.u32 4294901760, %v70_v15  ;;  %v73_v35 = vld [vmem:[%s24533_s4 + $0x60] sm:$0xff]  ;;  %v75_v42 = vld [vmem:[%s24533_s4 + $0x70] sm:$0xff] }
  0x27   :  { %16647 = vmatprep.subr.bf16.mxu0 %v20586_v16  ;;  %16695 = vmatprep.subr.bf16.mxu1 %v20603_v23  ;;  %v118_v32 = vand.u32 4294901760, %v74_v20  ;;  %v706_v33 = vand.u32 4294901760, %v72_v21  ;;  %v710_v34 = vand.u32 4294901760, %v76_v22  ;;  %v116_v36 = vand.u32 4294901760, %v69_v27  ;;  %v59_v43 = vld [vmem:[%s24529_s0] sm:$0xff] }
  0x28   :  { %16649 = vmatpush1.bf16.msra.mxu0 %v20607_v25  ;;  %v20625_v38 = vpack.c.bf16 %v704_v30, %v700_v29  ;;  %v20627_v39 = vsub.f32 %v63_v13, %v700_v29  ;;  %v20629_v40 = vsub.f32 %v67_v14, %v704_v30  ;;  %v20631_v41 = vsub.f32 %v70_v15, %v114_v31  ;;  %v60_v13 = vld [vmem:[%s24529_s0 + $0x8] sm:$0xff] }
  0x29   :  { %v20639_v44 = vpack.c.bf16 %v118_v32, %v114_v31  ;;  %v20641_v45 = vsub.f32 %v74_v20, %v118_v32  ;;  %v20643_v46 = vpack.c.bf16 %v710_v34, %v706_v33  ;;  %v20645_v47 = vsub.f32 %v72_v21, %v706_v33 }
  0x2a   :  { %16697 = vmatpush1.bf16.msra.mxu1 %v20625_v38  ;;  %v20648_v48 = vsub.f32 %v76_v22, %v710_v34  ;;  %v120_v49 = vand.u32 4294901760, %v73_v35  ;;  %v20650_v50 = vsub.f32 %v69_v27, %v116_v36  ;;  %v708_v51 = vand.u32 4294901760, %v71_v37 }
  0x2b   :  { %16651 = vmatprep.subr.bf16.mxu0 %v20639_v44  ;;  %16699 = vmatprep.subr.bf16.mxu1 %v20643_v46  ;;  %v712_v52 = vand.u32 4294901760, %v75_v42  ;;  %v101_v53 = vsel %vm99_vm0, %v59_v43, 0  ;;  %v203_v54 = vand.u32 4294901760, %v20588_v17  ;;  %v215_v55 = vand.u32 4294901760, %v20590_v18 }
  0x2c   :  { %v20657_v56 = vpack.c.bf16 %v120_v49, %v116_v36  ;;  %v20659_v57 = vsub.f32 %v73_v35, %v120_v49  ;;  %v20661_v58 = vsub.f32 %v71_v37, %v708_v51  ;;  %v20663_v59 = vand.u32 4294901760, %v101_v53 }
  0x2d   :  { %v20665_v60 = vpack.c.bf16 %v712_v52, %v708_v51  ;;  %v20667_v61 = vsub.f32 %v75_v42, %v712_v52  ;;  %v204_v62 = vsub.f32 %v20588_v17, %v203_v54  ;;  %v216_v63 = vsub.f32 %v20590_v18, %v215_v55 }
  0x2e   :  { %16653 = vmatpush1.bf16.msra.mxu0 %v20657_v56  ;;  %v20677_v0 = vsub.f32 %v101_v53, %v20663_v59  ;;  %v795_v1 = vand.u32 4294901760, %v20592_v19  ;;  %v807_v2 = vand.u32 4294901760, %v20605_v24  ;;  %v209_v3 = vand.u32 4294901760, %v20609_v26 }
  0x2f   :  { %16701 = vmatpush1.bf16.msra.mxu1 %v20665_v60  ;;  %v205_v4 = vand.u32 4294901760, %v204_v62  ;;  %v217_v5 = vand.u32 4294901760, %v216_v63  ;;  %v221_v6 = vand.u32 4294901760, %v20615_v28  ;;  %v801_v7 = vand.u32 4294901760, %v20627_v39 }
  0x30   :  { %v20686_v8 = vand.u32 4294901760, %v20677_v0  ;;  %v796_v10 = vsub.f32 %v20592_v19, %v795_v1  ;;  %v808_v11 = vsub.f32 %v20605_v24, %v807_v2  ;;  %v210_v12 = vsub.f32 %v20609_v26, %v209_v3 }
  0x31   :  { %v16654_v14 = vpack.c.bf16 %v217_v5, %v205_v4  ;;  %v222_v15 = vsub.f32 %v20615_v28, %v221_v6  ;;  %v802_v20 = vsub.f32 %v20627_v39, %v801_v7  ;;  %v813_v21 = vand.u32 4294901760, %v20629_v40 }
  0x32   :  { %v182_v22 = vsub.f32 %v20677_v0, %v20686_v8  ;;  %v797_v27 = vand.u32 4294901760, %v796_v10  ;;  %v809_v29 = vand.u32 4294901760, %v808_v11  ;;  %v211_v30 = vand.u32 4294901760, %v210_v12 }
  0x33   :  { %16655 = vmatprep.subr.bf16.mxu0 %v16654_v14  ;;  %v223_v31 = vand.u32 4294901760, %v222_v15  ;;  %v803_v32 = vand.u32 4294901760, %v802_v20  ;;  %v814_v33 = vsub.f32 %v20629_v40, %v813_v21  ;;  %v104_v34 = vsel %vm99_vm0, %v60_v13, 0 }
  0x34   :  { %v183_v35 = vand.u32 4294901760, %v182_v22  ;;  %v16702_v36 = vpack.c.bf16 %v809_v29, %v797_v27  ;;  %v20713_v37 = vand.u32 4294901760, %v104_v34  ;;  %v227_v42 = vand.u32 4294901760, %v20631_v41 }
  0x35   :  { %v16656_v43 = vpack.c.bf16 %v223_v31, %v211_v30  ;;  %v815_v49 = vand.u32 4294901760, %v814_v33  ;;  %v239_v51 = vand.u32 4294901760, %v20641_v45  ;;  %v819_v52 = vand.u32 4294901760, %v20645_v47 }
  0x36   :  { %184 = vmatmul.mubr.f32.vlgmr.msra.gmra.mrb[0].mxu0 %v183_v35  ;;  %776 = vmatmul.mubr.f32.vlgmr.msra.gmra.mrb[0].mxu1 %v183_v35  ;;  %v20719_v53 = vsub.f32 %v104_v34, %v20713_v37  ;;  %v228_v62 = vsub.f32 %v20631_v41, %v227_v42  ;;  %v831_v63 = vand.u32 4294901760, %v20648_v48  ;;  %v233_v4 = vand.u32 4294901760, %v20650_v50 }
  0x37   :  { %16703 = vmatprep.subr.bf16.mxu1 %v16702_v36  ;;  %16657 = vmatpush1.bf16.msra.mxu0 %v16656_v43  ;;  %v16704_v5 = vpack.c.bf16 %v815_v49, %v803_v32  ;;  %v240_v10 = vsub.f32 %v20641_v45, %v239_v51  ;;  %v820_v11 = vsub.f32 %v20645_v47, %v819_v52  ;;  %v245_v12 = vand.u32 4294901760, %v20659_v57 }
  0x38   :  { %189 = vmatprep.mubr.f32.mxu0 %v20488_v9  ;;  %781 = vmatprep.mubr.f32.mxu1 %v20488_v9  ;;  %v20736_v13 = vand.u32 4294901760, %v20719_v53  ;;  %v229_v14 = vand.u32 4294901760, %v228_v62  ;;  %v832_v15 = vsub.f32 %v20648_v48, %v831_v63  ;;  %v234_v20 = vsub.f32 %v20650_v50, %v233_v4 }
  0x39   :  { %16705 = vmatpush1.bf16.msra.mxu1 %v16704_v5  ;;  %v241_v22 = vand.u32 4294901760, %v240_v10  ;;  %v821_v27 = vand.u32 4294901760, %v820_v11  ;;  %v246_v29 = vsub.f32 %v20659_v57, %v245_v12  ;;  %v825_v30 = vand.u32 4294901760, %v20661_v58 }
  0x3a   :  { %v193_v31 = vsub.f32 %v20719_v53, %v20736_v13  ;;  %v833_v32 = vand.u32 4294901760, %v832_v15  ;;  %v235_v33 = vand.u32 4294901760, %v234_v20  ;;  %v837_v34 = vand.u32 4294901760, %v20667_v61 }
  0x3b   :  { %v16658_v35 = vpack.c.bf16 %v241_v22, %v229_v14  ;;  %v247_v36 = vand.u32 4294901760, %v246_v29  ;;  %v826_v43 = vsub.f32 %v20661_v58, %v825_v30  ;;  %v16662_v15 = vpack.c.bf16 %v20590_v18, %v20588_v17 }
  0x3c   :  { %v194_v49 = vand.u32 4294901760, %v193_v31  ;;  %v16706_v62 = vpack.c.bf16 %v833_v32, %v821_v27  ;;  %v838_v5 = vsub.f32 %v20667_v61, %v837_v34  ;;  %v16710_v20 = vpack.c.bf16 %v20605_v24, %v20592_v19 }
  0x3d   :  { %16659 = vmatprep.subr.bf16.mxu0 %v16658_v35  ;;  %v16660_v10 = vpack.c.bf16 %v247_v36, %v235_v33  ;;  %v827_v11 = vand.u32 4294901760, %v826_v43  ;;  %v16664_v22 = vpack.c.bf16 %v20615_v28, %v20609_v26  ;;  %v16666_v29 = vpack.c.bf16 %v20641_v45, %v20631_v41 }
  0x3e   :  { %195 = vmatmul.mubr.f32.gmra.mrb[2].mxu0 %v194_v49  ;;  %787 = vmatmul.mubr.f32.gmra.mrb[2].mxu1 %v194_v49  ;;  %v839_v14 = vand.u32 4294901760, %v838_v5  ;;  %v16712_v31 = vpack.c.bf16 %v20629_v40, %v20627_v39  ;;  %v16714_v32 = vpack.c.bf16 %v20648_v48, %v20645_v47  ;;  %v16668_v33 = vpack.c.bf16 %v20659_v57, %v20650_v50 }
  0x3f   :  { %16707 = vmatprep.subr.bf16.mxu1 %v16706_v62  ;;  %16661 = vmatpush1.bf16.msra.mxu0 %v16660_v10  ;;  %v16716_v35 = vpack.c.bf16 %v20667_v61, %v20661_v58  ;;  %v16678_v36 = vpack.c.bf16 %v215_v55, %v203_v54  ;;  %v16680_v17 = vpack.c.bf16 %v221_v6, %v209_v3 }
  0x40   :  { %v16708_v27 = vpack.c.bf16 %v839_v14, %v827_v11  ;;  %305 = vmatprep.mubr.f32.mxu0 %v20488_v9  ;;  %897 = vmatprep.mubr.f32.mxu1 %v20488_v9  ;;  %v16682_v18 = vpack.c.bf16 %v239_v51, %v227_v42  ;;  %v16728_v19 = vpack.c.bf16 %v813_v21, %v801_v7  ;;  %v20866_v21 = vmov 0.0  }
  0x41   :  { %16663 = vmatprep.subr.bf16.mxu0 %v16662_v15  ;;  %v16730_v24 = vpack.c.bf16 %v831_v63, %v819_v52  ;;  %v16684_v26 = vpack.c.bf16 %v245_v12, %v233_v4  ;;  %v16732_v28 = vpack.c.bf16 %v837_v34, %v825_v30 }
  0x42   :  { %16709 = vmatpush1.bf16.msra.mxu1 %v16708_v27  ;;  %307 = vmatmul.mubr.f32.vlgmr.msra.gmra.mrb[0].mxu0 %v20663_v59 }
  0x43   :  { %16711 = vmatprep.subr.bf16.mxu1 %v16710_v20  ;;  %16665 = vmatpush1.bf16.msra.mxu0 %v16664_v22 }
  0x44   :  { %312 = vmatprep.mubr.f32.mxu0 %v20488_v9  ;;  %16667 = vmatprep.subr.bf16.mxu0 %v16666_v29 }
  0x45   :  { %899 = vmatmul.mubr.f32.vlgmr.msra.gmra.mrb[0].mxu1 %v20663_v59 }
  0x46   :  { %16713 = vmatpush1.bf16.msra.mxu1 %v16712_v31  ;;  %904 = vmatprep.mubr.f32.mxu1 %v20488_v9 }
  0x47   :  { %314 = vmatmul.mubr.f32.gmra.mrb[2].mxu0 %v20713_v37  ;;  %16715 = vmatprep.subr.bf16.mxu1 %v16714_v32 }
  0x48   :  { %16669 = vmatpush1.bf16.msra.mxu0 %v16668_v33  ;;  %400 = vmatprep.mubr.f32.mxu0 %v20488_v9 }
  0x49   :  { %906 = vmatmul.mubr.f32.gmra.mrb[2].mxu1 %v20713_v37  ;;  %16671 = vmatprep.subr.bf16.mxu0 %v20586_v16 }
  0x4a   :  { %16717 = vmatpush1.bf16.msra.mxu1 %v16716_v35  ;;  %992 = vmatprep.mubr.f32.mxu1 %v20488_v9 }
  0x4b   :  { %403 = vmatmul.mubr.f32.vlgmr.msra.gmra.mrb[0].mxu0 %v20677_v0  ;;  %16719 = vmatprep.subr.bf16.mxu1 %v20603_v23 }
  0x4c   :  { %16673 = vmatpush1.bf16.msra.mxu0 %v20607_v25  ;;  %408 = vmatprep.mubr.f32.mxu0 %v20488_v9 }
  0x4d   :  { %995 = vmatmul.mubr.f32.vlgmr.msra.gmra.mrb[0].mxu1 %v20677_v0  ;;  %16675 = vmatprep.subr.bf16.mxu0 %v20639_v44  ;;  %v16726_v0 = vpack.c.bf16 %v807_v2, %v795_v1 }
  0x4e   :  { %16721 = vmatpush1.bf16.msra.mxu1 %v20625_v38  ;;  %1000 = vmatprep.mubr.f32.mxu1 %v20488_v9 }
  0x4f   :  { %411 = vmatmul.mubr.f32.gmra.mrb[2].mxu0 %v20719_v53  ;;  %16723 = vmatprep.subr.bf16.mxu1 %v20643_v46 }
  0x50   :  { %16677 = vmatpush1.bf16.msra.mxu0 %v20657_v56  ;;  %489 = vmatprep.mubr.f32.mxu0 %v20488_v9 }
  0x51   :  { %1003 = vmatmul.mubr.f32.gmra.mrb[2].mxu1 %v20719_v53  ;;  %16679 = vmatprep.subr.bf16.mxu0 %v16678_v36 }
  0x52   :  { %16725 = vmatpush1.bf16.msra.mxu1 %v20665_v60  ;;  %1081 = vmatprep.mubr.f32.mxu1 %v20488_v9 }
  0x53   :  { %493 = vmatmul.mubr.f32.vlgmr.msra.gmra.mrb[0].mxu0 %v20686_v8  ;;  %16727 = vmatprep.subr.bf16.mxu1 %v16726_v0 }
  0x54   :  { %16681 = vmatpush1.bf16.msra.mxu0 %v16680_v17  ;;  %498 = vmatprep.mubr.f32.mxu0 %v20488_v9 }
  0x55   :  { %1085 = vmatmul.mubr.f32.vlgmr.msra.gmra.mrb[0].mxu1 %v20686_v8  ;;  %16683 = vmatprep.subr.bf16.mxu0 %v16682_v18  ;;  %v20864_v8 = vmov 0.0  }
  0x56   :  { %16729 = vmatpush1.bf16.msra.mxu1 %v16728_v19  ;;  %1090 = vmatprep.mubr.f32.mxu1 %v20488_v9 }
  0x57   :  { %502 = vmatmul.mubr.f32.gmra.mrb[2].mxu0 %v20736_v13  ;;  %16731 = vmatprep.subr.bf16.mxu1 %v16730_v24 }
  0x58   :  { %16685 = vmatpush1.bf16.msra.mxu0 %v16684_v26  ;;  %596 = vmatprep.mubr.f32.mxu0 %v20488_v9 }
  0x59   :  { %1094 = vmatmul.mubr.f32.gmra.mrb[2].mxu1 %v20736_v13  ;;  %16687 = vmatprep.subr.bf16.mxu0 %v20586_v16  ;;  %v79_v16 = vlaneseq }
  0x5a   :  { %16733 = vmatpush1.bf16.msra.mxu1 %v16732_v28  ;;  %1188 = vmatprep.mubr.f32.mxu1 %v20488_v9 }
  0x5b   :  { %598 = vmatmul.mubr.f32.vlgmr.msra.gmra.mrb[0].mxu0 %v20663_v59  ;;  %16735 = vmatprep.subr.bf16.mxu1 %v20603_v23  ;;  %v80_v23 = vshrl.u32 %v79_v16, 7 }
  0x5c   :  { %16689 = vmatpush1.bf16.msra.mxu0 %v20607_v25  ;;  %603 = vmatprep.mubr.f32.mxu0 %v20488_v9 }
  0x5d   :  { %1190 = vmatmul.mubr.f32.vlgmr.msra.gmra.mrb[0].mxu1 %v20663_v59  ;;  %16691 = vmatprep.subr.bf16.mxu0 %v20639_v44  ;;  %v81_v25 = vsub.s32 0, %v80_v23  ;;  %v85_v39 = vsub.s32 1, %v80_v23  ;;  %v89_v40 = vsub.s32 2, %v80_v23  ;;  %v93_v41 = vsub.s32 3, %v80_v23 }
  0x5e   :  { %16737 = vmatpush1.bf16.msra.mxu1 %v20625_v38  ;;  %1195 = vmatprep.mubr.f32.mxu1 %v20488_v9  ;;  %v77_v38 = vld [vmem:[%s24535_s6] sm:$0xf]  ;;  %s20868_s6 = smov 0  }
  0x5f   :  { %605 = vmatmul.mubr.f32.gmra.mrb[2].mxu0 %v20713_v37  ;;  %16739 = vmatprep.subr.bf16.mxu1 %v20643_v46  ;;  %v82_v44 = vrot.slane %v77_v38, %v81_v25  ;;  %v86_v45 = vrot.slane %v77_v38, %v85_v39  ;;  %v90_v46 = vrot.slane %v77_v38, %v89_v40 }
  0x60   :  { %16693 = vmatpush1.bf16.msra.mxu0 %v20657_v56  ;;  %683 = vmatprep.mubr.f32.mxu0 %v20488_v9  ;;  %v94_v48 = vrot.slane %v77_v38, %v93_v41 }
  0x61   :  { %1197 = vmatmul.mubr.f32.gmra.mrb[2].mxu1 %v20713_v37 }
  0x62   :  { %16741 = vmatpush1.bf16.msra.mxu1 %v20665_v60  ;;  %1275 = vmatprep.mubr.f32.mxu1 %v20488_v9 }
  0x63   :  { %685 = vmatmul.mubr.f32.vlgmr.msra.gmra.mrb[0].mxu0 %v20663_v59 }
  0x64   :  { %690 = vmatprep.mubr.f32.mxu0 %v20488_v9 }
  0x65   :  { %1277 = vmatmul.mubr.f32.vlgmr.msra.gmra.mrb[0].mxu1 %v20663_v59 }
  0x66   :  { %1282 = vmatprep.mubr.f32.mxu1 %v20488_v9 }
  0x67   :  { %692 = vmatmul.mubr.f32.gmra.mrb[2].mxu0 %v20713_v37 }
  0x69   :  { %1284 = vmatmul.mubr.f32.gmra.mrb[2].mxu1 %v20713_v37 }
 0x136   :  { %v686_v47 = vpop.f32.mrb[0].mxu0 }
 0x137   :  { %v20006_v9 = vadd.f32 %v686_v47, %v82_v44  ;;  %v688_v50 = vpop.f32.mrb[1].mxu0 }
 0x138   :  { %v1278_v54 = vpop.f32.mrb[0].mxu1  ;;  %v20007_v55 = vadd.f32 %v688_v50, %v86_v45 }
 0x139   :  { %1290 = vst [vmem:[#allocation2] sm:$0xff] %v20006_v9  ;;  %v20010_v56 = vadd.f32 %v1278_v54, %v90_v46  ;;  %v1280_v57 = vpop.f32.mrb[1].mxu1 }
 0x13a   :  { %1291 = vst [vmem:[#allocation2 + $0x8] sm:$0xff] %v20007_v55  ;;  %v20011_v58 = vadd.f32 %v1280_v57, %v94_v48  ;;  %v693_v59 = vpop.f32.mrb[2].mxu0 }
 0x13b   :  { %1292 = vst [vmem:[#allocation2 + $0x10] sm:$0xff] %v20010_v56  ;;  %v20008_v60 = vadd.f32 %v693_v59, %v82_v44  ;;  %v695_v61 = vpop.f32.mrb[3].mxu0 }
 0x13c   :  { %1293 = vst [vmem:[#allocation2 + $0x18] sm:$0xff] %v20011_v58  ;;  %v1285_v1 = vpop.f32.mrb[2].mxu1  ;;  %v20009_v2 = vadd.f32 %v695_v61, %v86_v45 }
 0x13d   :  { %1294 = vst [vmem:[#allocation2 + $0x20] sm:$0xff] %v20008_v60  ;;  %v20012_v3 = vadd.f32 %v1285_v1, %v90_v46  ;;  %v1287_v6 = vpop.f32.mrb[3].mxu1 }
 0x13e   :  { %1295 = vst [vmem:[#allocation2 + $0x28] sm:$0xff] %v20009_v2  ;;  %v20013_v7 = vadd.f32 %v1287_v6, %v94_v48 }
 0x13f   :  { %1296 = vst [vmem:[#allocation2 + $0x30] sm:$0xff] %v20012_v3 }
 0x140   :  { %1297 = vst [vmem:[#allocation2 + $0x38] sm:$0xff] %v20013_v7 }
 0x141 LB: > { %25028 = vst [vmem:[#allocation10_spill] sm:$0xff] %v20474_v8  ;;  %v20879_v37 = vld [vmem:[#allocation7 + $0x8] sm:$0xff]  ;;  %v20883_v51 = vld [vmem:[#allocation7 + $0x18] sm:$0xff]  ;;  %v20890_v12 = vld [vmem:[#allocation7] sm:$0xff]  ;;  %v24539_v30 = vmov 0.0   ;;  %s21101_s18 = sshll.u32 %s20482_s6, 3  ;;  %s20482_s6 = sphi %s20868_s6, %s1303_s6   ;;  %v20478_v21 = vphi %v20866_v21, %v15451_v21   ;;  %v20474_v8 = vphi %v20864_v8, %v15449_v8  }
 0x142   : > { %v20881_v42 = vld [vmem:[#allocation7 + $0x28] sm:$0xff]  ;;  %v24564_v52 = vand.u32 4294901760, %v20879_v37  ;;  %v20887_v63 = vld [vmem:[#allocation7 + $0x38] sm:$0xff]  ;;  %v24562_v4 = vand.u32 4294901760, %v20883_v51  ;;  %v20892_v13 = vld [vmem:[#allocation7 + $0x20] sm:$0xff]  ;;  %1483 = vmatprep.mubr.f32.mxu0 %v24539_v30  ;;  %2338 = vmatprep.mubr.f32.mxu1 %v24539_v30  ;;  %v24560_v43 = vand.u32 4294901760, %v20890_v12 }
 0x143   : > { %v24563_v53 = vand.u32 4294901760, %v20881_v42  ;;  %v24561_v34 = vand.u32 4294901760, %v20887_v63  ;;  %v24559_v49 = vand.u32 4294901760, %v20892_v13  ;;  %v20899_v62 = vld [vmem:[#allocation7 + $0x10] sm:$0xff]  ;;  %v20903_v10 = vld [vmem:[#allocation7 + $0x48] sm:$0xff]  ;;  %v20916_v27 = vld [vmem:[#allocation7 + $0x58] sm:$0xff] }
 0x144   : > { %v20901_v5 = vld [vmem:[#allocation7 + $0x30] sm:$0xff]  ;;  %v24556_v15 = vand.u32 4294901760, %v20899_v62  ;;  %v20913_v20 = vld [vmem:[#allocation7 + $0x68] sm:$0xff]  ;;  %v24554_v22 = vand.u32 4294901760, %v20903_v10  ;;  %v20918_v29 = vld [vmem:[#allocation7 + $0x78] sm:$0xff]  ;;  %v24548_v35 = vand.u32 4294901760, %v20916_v27 }
 0x145   : > { %v20909_v11 = vpack.c.bf16 %v24563_v53, %v24564_v52  ;;  %v24555_v14 = vand.u32 4294901760, %v20901_v5  ;;  %v20924_v31 = vpack.c.bf16 %v24561_v34, %v24562_v4  ;;  %v20930_v32 = vpack.c.bf16 %v24559_v49, %v24560_v43  ;;  %v20934_v36 = vld [vmem:[#allocation7 + $0x40] sm:$0xff]  ;;  %v20938_v17 = vld [vmem:[#allocation7 + $0x50] sm:$0xff]  ;;  %v20952_v16 = vld [vmem:[#allocation7 + $0x88] sm:$0xff]  ;;  %s21152_s19 = sld [smem:[#allocation4 + %s21101_s18]]  ;;  %s1307_s3 = sshra.s32 %s21101_s18, 3 }
 0x146   : > { %v24549_v33 = vand.u32 4294901760, %v20913_v20  ;;  %v20936_v0 = vld [vmem:[#allocation7 + $0x60] sm:$0xff]  ;;  %v24547_v19 = vand.u32 4294901760, %v20918_v29  ;;  %v24546_v24 = vand.u32 4294901760, %v20934_v36  ;;  %v20950_v28 = vld [vmem:[#allocation7 + $0x70] sm:$0xff]  ;;  %v20954_v23 = vld [vmem:[#allocation7 + $0xa8] sm:$0xff] }
 0x147   : > { %25029 = vst [vmem:[#allocation11_spill] sm:$0xff] %v20909_v11  ;;  %25030 = vst [vmem:[#allocation12_spill] sm:$0xff] %v20924_v31  ;;  %16743 = vmatprep.subr.bf16.mxu0 %v20909_v11  ;;  %v20945_v18 = vpack.c.bf16 %v24555_v14, %v24556_v15  ;;  %v24545_v26 = vand.u32 4294901760, %v20936_v0  ;;  %16935 = vmatprep.subr.bf16.mxu1 %v20924_v31  ;;  %v24542_v38 = vand.u32 4294901760, %v20938_v17  ;;  %v24541_v39 = vand.u32 4294901760, %v20950_v28  ;;  %v20967_v41 = vld [vmem:[#allocation7 + $0x98] sm:$0xff] }
 0x148   : > { %25031 = vst [vmem:[#allocation13_spill] sm:$0xff] %v20930_v32  ;;  %16745 = vmatpush1.bf16.msra.mxu0 %v20930_v32  ;;  %v20962_v25 = vpack.c.bf16 %v24549_v33, %v24554_v22  ;;  %v24544_v40 = vand.u32 4294901760, %v20952_v16  ;;  %v20969_v44 = vld [vmem:[#allocation7 + $0xb8] sm:$0xff]  ;;  %v20971_v45 = vld [vmem:[#allocation7 + $0x80] sm:$0xff]  ;;  %v20978_v46 = vpack.c.bf16 %v24547_v19, %v24548_v35  ;;  %v24543_v48 = vand.u32 4294901760, %v20954_v23  ;;  %v20990_v54 = vld [vmem:[#allocation7 + $0x90] sm:$0xff] }
 0x149   : > { %25032 = vst [vmem:[#allocation14_spill] sm:$0xff] %v20945_v18  ;;  %16937 = vmatpush1.bf16.msra.mxu1 %v20945_v18  ;;  %v20984_v47 = vpack.c.bf16 %v24545_v26, %v24546_v24  ;;  %v24553_v9 = vand.u32 4294901760, %v20967_v41  ;;  %v20988_v50 = vld [vmem:[#allocation7 + $0xa0] sm:$0xff]  ;;  %v20992_v55 = vld [vmem:[#allocation7 + $0xb0] sm:$0xff]  ;;  %v20999_v56 = vpack.c.bf16 %v24541_v39, %v24542_v38  ;;  %v24552_v57 = vand.u32 4294901760, %v20969_v44  ;;  %v21004_v60 = vld [vmem:[#allocation7 + $0xc8] sm:$0xff] }
 0x14a   : > { %25033 = vst [vmem:[#allocation15_spill] sm:$0xff] %v20962_v25  ;;  %25034 = vst [vmem:[#allocation16_spill] sm:$0xff] %v20978_v46  ;;  %16747 = vmatprep.subr.bf16.mxu0 %v20962_v25  ;;  %v24551_v58 = vand.u32 4294901760, %v20971_v45  ;;  %v24550_v59 = vand.u32 4294901760, %v20988_v50  ;;  %v21006_v61 = vld [vmem:[#allocation7 + $0xe8] sm:$0xff]  ;;  %v21008_v1 = vld [vmem:[#allocation7 + $0xd8] sm:$0xff]  ;;  %16939 = vmatprep.subr.bf16.mxu1 %v20978_v46  ;;  %v21015_v2 = vpack.c.bf16 %v24543_v48, %v24544_v40 }
 0x14b   : > { %25035 = vst [vmem:[#allocation17_spill] sm:$0xff] %v20984_v47  ;;  %25036 = vst [vmem:[#allocation18_spill] sm:$0xff] %v20999_v56  ;;  %v24558_v3 = vand.u32 4294901760, %v20990_v54  ;;  %v24557_v6 = vand.u32 4294901760, %v20992_v55  ;;  %v24566_v7 = vand.u32 4294901760, %v21004_v60  ;;  %v21020_v30 = vld [vmem:[#allocation7 + $0xf8] sm:$0xff]  ;;  %v21031_v48 = vpack.c.bf16 %v24552_v57, %v24553_v9 }
 0x14c   : > { %25037 = vst [vmem:[#allocation19_spill] sm:$0xff] %v21015_v2  ;;  %v21022_v39 = vld [vmem:[#allocation7 + $0xc0] sm:$0xff]  ;;  %16749 = vmatpush1.bf16.msra.mxu0 %v20984_v47  ;;  %v21037_v40 = vpack.c.bf16 %v24550_v59, %v24551_v58  ;;  %v24565_v26 = vand.u32 4294901760, %v21006_v61  ;;  %v24568_v24 = vand.u32 4294901760, %v21008_v1  ;;  %v21041_v19 = vld [vmem:[#allocation7 + $0xd0] sm:$0xff]  ;;  %v21045_v33 = vld [vmem:[#allocation7 + $0x108] sm:$0xff] }
 0x14d   : > { %v21024_v38 = vld [vmem:[#allocation7 + $0xe0] sm:$0xff]  ;;  %25038 = vst [vmem:[#allocation20_spill] sm:$0xff] %v21031_v48  ;;  %v21043_v35 = vld [vmem:[#allocation7 + $0xf0] sm:$0xff]  ;;  %25041 = vst [vmem:[#allocation23_spill] sm:$0xff] %v21045_v33  ;;  %16941 = vmatpush1.bf16.msra.mxu1 %v20999_v56  ;;  %16751 = vmatprep.subr.bf16.mxu0 %v21015_v2  ;;  %v21053_v59 = vpack.c.bf16 %v24557_v6, %v24558_v3  ;;  %v24567_v58 = vand.u32 4294901760, %v21020_v30  ;;  %v24570_v57 = vand.u32 4294901760, %v21022_v39 }
 0x14e   : > { %25039 = vst [vmem:[#allocation21_spill] sm:$0xff] %v21037_v40  ;;  %25040 = vst [vmem:[#allocation22_spill] sm:$0xff] %v21043_v35  ;;  %v24569_v9 = vand.u32 4294901760, %v21024_v38  ;;  %v21058_v22 = vld [vmem:[#allocation7 + $0x128] sm:$0xff]  ;;  %v21060_v14 = vld [vmem:[#allocation7 + $0x118] sm:$0xff]  ;;  %16943 = vmatprep.subr.bf16.mxu1 %v21031_v48  ;;  %v21069_v6 = vpack.c.bf16 %v24565_v26, %v24566_v7  ;;  %s16327_s20 = sshll.u32 %s1307_s3, 5 }
 0x14f   : > { %25042 = vst [vmem:[#allocation24_spill] sm:$0xff] %v21053_v59  ;;  %25043 = vst [vmem:[#allocation25_spill] sm:$0xff] %v21058_v22  ;;  %v21062_v15 = vld [vmem:[#allocation7 + $0x138] sm:$0xff]  ;;  %v21074_v34 = vld [vmem:[#allocation7 + $0x100] sm:$0xff]  ;;  %v21084_v52 = vpack.c.bf16 %v24567_v58, %v24568_v24  ;;  %v25054_v58 = vand.u32 4294901760, %v21041_v19  ;;  %v25055_v24 = vand.u32 4294901760, %v21043_v35 }
 0x150   : > { %25044 = vst [vmem:[#allocation26_spill] sm:$0xff] %v21060_v14  ;;  %25045 = vst [vmem:[#allocation27_spill] sm:$0xff] %v21062_v15  ;;  %v21076_v4 = vld [vmem:[#allocation7 + $0x120] sm:$0xff]  ;;  %v21078_v53 = vld [vmem:[#allocation7 + $0x110] sm:$0xff]  ;;  %v21090_v26 = vpack.c.bf16 %v24569_v9, %v24570_v57  ;;  %16753 = vmatpush1.bf16.msra.mxu0 %v21037_v40  ;;  %v25065_v18 = vand.u32 4294901760, %v21062_v15  ;;  %v25069_v7 = vand.u32 4294901760, %v21074_v34 }
 0x151   : > { %25046 = vst [vmem:[#allocation28_spill] sm:$0xff] %v21069_v6  ;;  %25047 = vst [vmem:[#allocation29_spill] sm:$0xff] %v21074_v34  ;;  %v21094_v49 = vld [vmem:[#allocation7 + $0x130] sm:$0xff]  ;;  %v21096_v3 = vld [vmem:[#allocation7 + $0x148] sm:$0xff]  ;;  %v21108_v9 = vpack.c.bf16 %v25055_v24, %v25054_v58  ;;  %16945 = vmatpush1.bf16.msra.mxu1 %v21053_v59  ;;  %16755 = vmatprep.subr.bf16.mxu0 %v21069_v6  ;;  %v25060_v24 = vand.u32 4294901760, %v21045_v33  ;;  %v25061_v58 = vand.u32 4294901760, %v21058_v22 }
 0x152   : > { %25048 = vst [vmem:[#allocation30_spill] sm:$0xff] %v21076_v4  ;;  %25049 = vst [vmem:[#allocation31_spill] sm:$0xff] %v21084_v52  ;;  %v21098_v8 = vld [vmem:[#allocation7 + $0x168] sm:$0xff]  ;;  %v21113_v48 = vld [vmem:[#allocation7 + $0x158] sm:$0xff]  ;;  %16947 = vmatprep.subr.bf16.mxu1 %v21084_v52  ;;  %v25064_v6 = vand.u32 4294901760, %v21060_v14  ;;  %v25070_v11 = vand.u32 4294901760, %v21076_v4 }
 0x153   : > { %25050 = vst [vmem:[#allocation32_spill] sm:$0xff] %v21090_v26  ;;  %25051 = vst [vmem:[#allocation33_spill] sm:$0xff] %v21094_v49  ;;  %v21115_v56 = vld [vmem:[#allocation7 + $0x178] sm:$0xff]  ;;  %v21117_v2 = vld [vmem:[#allocation7 + $0x140] sm:$0xff]  ;;  %v21125_v57 = vpack.c.bf16 %v25061_v58, %v25060_v24  ;;  %v25076_v32 = vand.u32 4294901760, %v21096_v3  ;;  %v25077_v31 = vand.u32 4294901760, %v21098_v8 }
 0x154   : > { %25052 = vst [vmem:[#allocation34_spill] sm:$0xff] %v21096_v3  ;;  %25053 = vst [vmem:[#allocation35_spill] sm:$0xff] %v21098_v8  ;;  %v21130_v47 = vld [vmem:[#allocation7 + $0x160] sm:$0xff]  ;;  %v21132_v46 = vld [vmem:[#allocation7 + $0x150] sm:$0xff]  ;;  %v21141_v24 = vpack.c.bf16 %v25065_v18, %v25064_v6  ;;  %16757 = vmatpush1.bf16.msra.mxu0 %v21090_v26  ;;  %v21168_v15 = vpack.c.bf16 %v25070_v11, %v25069_v7  ;;  %v25073_v26 = vand.u32 4294901760, %v21078_v53  ;;  %v25074_v11 = vand.u32 4294901760, %v21094_v49 }
 0x155   : > { %25056 = vst [vmem:[#allocation36_spill] sm:$0xff] %v21108_v9  ;;  %25057 = vst [vmem:[#allocation37_spill] sm:$0xff] %v21113_v48  ;;  %v21134_v59 = vld [vmem:[#allocation7 + $0x170] sm:$0xff]  ;;  %v21145_v43 = vld [vmem:[#allocation7 + $0x188] sm:$0xff]  ;;  %16949 = vmatpush1.bf16.msra.mxu1 %v21108_v9  ;;  %16759 = vmatprep.subr.bf16.mxu0 %v21125_v57  ;;  %v21191_v52 = vpack.c.bf16 %v25077_v31, %v25076_v32  ;;  %v25085_v32 = vand.u32 4294901760, %v21132_v46  ;;  %s22494_s21 = scalar_lea.vmem [#allocation2], %s16327_s20 }
 0x156   : > { %25058 = vst [vmem:[#allocation38_spill] sm:$0xff] %v21115_v56  ;;  %25059 = vst [vmem:[#allocation39_spill] sm:$0xff] %v21117_v2  ;;  %v21147_v40 = vld [vmem:[#allocation7 + $0x1a8] sm:$0xff]  ;;  %v21149_v25 = vld [vmem:[#allocation7 + $0x198] sm:$0xff]  ;;  %v21185_v7 = vpack.c.bf16 %v25074_v11, %v25073_v26  ;;  %16951 = vmatprep.subr.bf16.mxu1 %v21141_v24  ;;  %v25080_v26 = vand.u32 4294901760, %v21115_v56  ;;  %v25086_v8 = vand.u32 4294901760, %v21134_v59 }
 0x157   : > { %25062 = vst [vmem:[#allocation40_spill] sm:$0xff] %v21125_v57  ;;  %25063 = vst [vmem:[#allocation41_spill] sm:$0xff] %v21130_v47  ;;  %v21157_v18 = vld [vmem:[#allocation7 + $0x1b8] sm:$0xff]  ;;  %v21159_v6 = vld [vmem:[#allocation7 + $0x180] sm:$0xff]  ;;  %v25079_v57 = vand.u32 4294901760, %v21113_v48  ;;  %v25083_v48 = vand.u32 4294901760, %v21130_v47 }
 0x158   : > { %25066 = vst [vmem:[#allocation42_spill] sm:$0xff] %v21141_v24  ;;  %25067 = vst [vmem:[#allocation43_spill] sm:$0xff] %v21149_v25  ;;  %v21161_v58 = vld [vmem:[#allocation7 + $0x1a0] sm:$0xff]  ;;  %v21173_v14 = vld [vmem:[#allocation7 + $0x190] sm:$0xff]  ;;  %v25082_v24 = vand.u32 4294901760, %v21117_v2  ;;  %16761 = vmatpush1.bf16.msra.mxu0 %v21168_v15  ;;  %v21229_v56 = vpack.c.bf16 %v25086_v8, %v25085_v32  ;;  %v25088_v2 = vand.u32 4294901760, %v21145_v43 }
 0x159   : > { %25068 = vst [vmem:[#allocation44_spill] sm:$0xff] %v21157_v18  ;;  %25071 = vst [vmem:[#allocation45_spill] sm:$0xff] %v21168_v15  ;;  %v21175_v22 = vld [vmem:[#allocation7 + $0x1b0] sm:$0xff]  ;;  %v21177_v33 = vld [vmem:[#allocation7 + $0x1c8] sm:$0xff]  ;;  %v21204_v11 = vpack.c.bf16 %v25080_v26, %v25079_v57  ;;  %v25089_v47 = vand.u32 4294901760, %v21147_v40  ;;  %16953 = vmatpush1.bf16.msra.mxu1 %v21185_v7  ;;  %16763 = vmatprep.subr.bf16.mxu0 %v21191_v52  ;;  %v25092_v8 = vand.u32 4294901760, %v21149_v25 }
 0x15a   : > { %25072 = vst [vmem:[#allocation46_spill] sm:$0xff] %v21175_v22  ;;  %25075 = vst [vmem:[#allocation47_spill] sm:$0xff] %v21185_v7  ;;  %v21195_v35 = vld [vmem:[#allocation7 + $0x1e8] sm:$0xff]  ;;  %v21197_v9 = vld [vmem:[#allocation7 + $0x1d8] sm:$0xff]  ;;  %v21219_v49 = vpack.c.bf16 %v25083_v48, %v25082_v24  ;;  %v25093_v32 = vand.u32 4294901760, %v21157_v18  ;;  %v25095_v24 = vand.u32 4294901760, %v21159_v6 }
 0x15b   : > { %25078 = vst [vmem:[#allocation48_spill] sm:$0xff] %v21191_v52  ;;  %25081 = vst [vmem:[#allocation49_spill] sm:$0xff] %v21204_v11  ;;  %v21209_v4 = vld [vmem:[#allocation7 + $0x1f8] sm:$0xff]  ;;  %v21211_v34 = vld [vmem:[#allocation7 + $0x1c0] sm:$0xff]  ;;  %v21235_v48 = vpack.c.bf16 %v25089_v47, %v25088_v2  ;;  %16955 = vmatprep.subr.bf16.mxu1 %v21204_v11  ;;  %v25096_v7 = vand.u32 4294901760, %v21161_v58  ;;  %v25098_v25 = vand.u32 4294901760, %v21173_v14 }
 0x15c   : > { %v21213_v3 = vld [vmem:[#allocation7 + $0x1e0] sm:$0xff]  ;;  %25084 = vst [vmem:[#allocation50_spill] sm:$0xff] %v21219_v49  ;;  %25087 = vst [vmem:[#allocation51_spill] sm:$0xff] %v21229_v56  ;;  %v21239_v57 = vld [vmem:[#allocation7 + $0x1d0] sm:$0xff]  ;;  %v21249_v15 = vpack.c.bf16 %v25093_v32, %v25092_v8  ;;  %v25099_v8 = vand.u32 4294901760, %v21175_v22  ;;  %v25101_v47 = vand.u32 4294901760, %v21177_v33  ;;  %16765 = vmatpush1.bf16.msra.mxu0 %v21219_v49 }
 0x15d   : > { %25090 = vst [vmem:[#allocation52_spill] sm:$0xff] %v21235_v48  ;;  %v21241_v31 = vld [vmem:[#allocation7 + $0x1f0] sm:$0xff]  ;;  %v21259_v52 = vpack.c.bf16 %v25096_v7, %v25095_v24  ;;  %v25102_v2 = vand.u32 4294901760, %v21195_v35  ;;  %v25104_v26 = vand.u32 4294901760, %v20879_v37  ;;  %v25106_v22 = vand.u32 4294901760, %v20881_v42  ;;  %16957 = vmatpush1.bf16.msra.mxu1 %v21229_v56  ;;  %16767 = vmatprep.subr.bf16.mxu0 %v21235_v48  ;;  %s3128_s22 = sadd.s32 1, %s21101_s18 }
 0x15e   : > { %25091 = vst [vmem:[#allocation53_spill] sm:$0xff] %v21241_v31  ;;  %25094 = vst [vmem:[#allocation54_spill] sm:$0xff] %v21249_v15  ;;  %v21265_v32 = vpack.c.bf16 %v25099_v8, %v25098_v25  ;;  %v25108_v8 = vand.u32 4294901760, %v20883_v51  ;;  %v25112_v7 = vand.u32 4294901760, %v20887_v63  ;;  %16959 = vmatprep.subr.bf16.mxu1 %v21249_v15  ;;  %v25117_v48 = vand.u32 4294901760, %v20890_v12  ;;  %s3129_s23 = sld [smem:[#allocation4 + %s3128_s22]] }
 0x15f   : > { %25097 = vst [vmem:[#allocation55_spill] sm:$0xff] %v21259_v52  ;;  %v21271_v18 = vpack.c.bf16 %v25102_v2, %v25101_v47  ;;  %v21276_v11 = vsub.f32 %v20879_v37, %v25104_v26  ;;  %v21283_v25 = vsub.f32 %v20881_v42, %v25106_v22  ;;  %v25109_v2 = vand.u32 4294901760, %v21197_v9  ;;  %s4886_s24 = sadd.s32 2, %s21101_s18  ;;  %s6647_s26 = sadd.s32 3, %s21101_s18 }
 0x160   : > { %25100 = vst [vmem:[#allocation56_spill] sm:$0xff] %v21265_v32  ;;  %v21288_v47 = vsub.f32 %v20883_v51, %v25108_v8  ;;  %v25110_v37 = vand.u32 4294901760, %v21209_v4  ;;  %v21301_v42 = vsub.f32 %v20887_v63, %v25112_v7  ;;  %v24655_v22 = vstv %s21152_s19  ;;  %16769 = vmatpush1.bf16.msra.mxu0 %v21259_v52  ;;  %s4887_s25 = sld [smem:[#allocation4 + %s4886_s24]]  ;;  %s8408_s28 = sadd.s32 4, %s21101_s18 }
 0x161   : > { %25103 = vst [vmem:[#allocation57_spill] sm:$0xff] %v21271_v18  ;;  %25105 = vst [vmem:[#allocation58_spill] sm:$0xff] %v21276_v11  ;;  %v25113_v51 = vand.u32 4294901760, %v21211_v34  ;;  %v25114_v8 = vand.u32 4294901760, %v21213_v3  ;;  %v1318_v24 = vmul.f32 %v20478_v21, %v24655_v22  ;;  %v25116_v63 = vand.u32 4294901760, %v21276_v11  ;;  %16961 = vmatpush1.bf16.msra.mxu1 %v21265_v32  ;;  %16771 = vmatprep.subr.bf16.mxu0 %v21271_v18  ;;  %s6648_s27 = sld [smem:[#allocation4 + %s6647_s26]] }
 0x162   : > { %25107 = vst [vmem:[#allocation59_spill] sm:$0xff] %v21283_v25  ;;  %v21295_v26 = vpack.c.bf16 %v25110_v37, %v25109_v2  ;;  %v25119_v21 = vand.u32 4294901760, %v21239_v57  ;;  %v25120_v22 = vand.u32 4294901760, %v21241_v31  ;;  %v25123_v15 = vand.u32 4294901760, %v21288_v47  ;;  %s8409_s29 = sld [smem:[#allocation4 + %s8408_s28]]  ;;  %s10169_s30 = sadd.s32 5, %s21101_s18 }
 0x163   : > { %v21310_v49 = vpack.c.bf16 %v25114_v8, %v25113_v51  ;;  %v1498_v7 = vsub.f32 %v21276_v11, %v25116_v63  ;;  %v21325_v51 = vsub.f32 %v20890_v12, %v25117_v48  ;;  %v25118_v8 = vand.u32 4294901760, %v20892_v13  ;;  %s10170_s10 = sld [smem:[#allocation4 + %s10169_s30]]  ;;  %s11930_s11 = sadd.s32 6, %s21101_s18 }
 0x164   : > { %25111 = vst [vmem:[#allocation60_spill] sm:$0xff] %v21295_v26  ;;  %v21336_v2 = vpack.c.bf16 %v25120_v22, %v25119_v21  ;;  %v25122_v63 = vand.u32 4294901760, %v21283_v25  ;;  %v2353_v12 = vsub.f32 %v21288_v47, %v25123_v15  ;;  %v1385_v48 = vrot.slane %v1318_v24, 7  ;;  %16963 = vmatprep.subr.bf16.mxu1 %v21295_v26  ;;  %s11931_s5 = sld [smem:[#allocation4 + %s11930_s11]]  ;;  %s13691_s12 = sadd.s32 7, %s21101_s18 }
 0x165   : > { %25115 = vst [vmem:[#allocation61_spill] sm:$0xff] %v21310_v49  ;;  %v21330_v37 = vsub.f32 %v20892_v13, %v25118_v8  ;;  %v1499_v11 = vand.u32 4294901760, %v1498_v7  ;;  %v25124_v13 = vand.u32 4294901760, %v21301_v42  ;;  %v24668_v31 = vand.u32 4294901760, %v21325_v51  ;;  %16773 = vmatpush1.bf16.msra.mxu0 %v21310_v49  ;;  %s13692_s13 = sld [smem:[#allocation4 + %s13691_s12]]  ;;  %s15466_s14 = scalar_lea.vmem [#allocation3], %s21101_s18 }
 0x166   : > { %25121 = vst [vmem:[#allocation62_spill] sm:$0xff] %v21336_v2  ;;  %v1510_v56 = vsub.f32 %v21283_v25, %v25122_v63  ;;  %v2354_v63 = vand.u32 4294901760, %v2353_v12  ;;  %v21352_v25 = vand.u32 4294901760, %v1385_v48  ;;  %v25126_v15 = vand.u32 4294901760, %v20899_v62  ;;  %16965 = vmatpush1.bf16.msra.mxu1 %v21336_v2  ;;  %s1303_s6 = sadd.s32 1, %s20482_s6  }
 0x167   : > { %v2365_v8 = vsub.f32 %v21301_v42, %v25124_v13  ;;  %v24669_v22 = vand.u32 4294901760, %v21330_v37  ;;  %v1504_v13 = vsub.f32 %v21325_v51, %v24668_v31  ;;  %vm15452_vm1 = vcmask 1040384   ;;  %p1300_p13 = scmp.ge.s32.totalorder %s1303_s6, 2  }
 0x168   : > { %v1511_v21 = vand.u32 4294901760, %v1510_v56  ;;  %25125 = vst [vmem:[#allocation63_spill] sm:$0xff] %v21352_v25  ;;  %v21357_v24 = vsub.f32 %v20899_v62, %v25126_v15  ;;  %v25127_v56 = vand.u32 4294901760, %v20901_v5  ;;  %v21374_v62 = vsub.f32 %v1385_v48, %v21352_v25 }
 0x169   : > { %v2366_v7 = vand.u32 4294901760, %v2365_v8  ;;  %v1516_v32 = vsub.f32 %v21330_v37, %v24669_v22  ;;  %v25130_v15 = vand.u32 4294901760, %v20903_v10  ;;  %v1505_v26 = vand.u32 4294901760, %v1504_v13 }
 0x16a   : > { %v21369_v12 = vsub.f32 %v20901_v5, %v25127_v56  ;;  %v21371_v18 = vpack.c.bf16 %v1511_v21, %v1499_v11  ;;  %25129 = vst [vmem:[#allocation65_spill] sm:$0xff] %v21374_v62  ;;  %v24674_v8 = vand.u32 4294901760, %v21357_v24  ;;  %v21389_v11 = vand.u32 4294901760, %v21374_v62 }
 0x16b   : > { %v21380_v31 = vsub.f32 %v20903_v10, %v25130_v15  ;;  %v21383_v22 = vpack.c.bf16 %v2366_v7, %v2354_v63  ;;  %v1517_v52 = vand.u32 4294901760, %v1516_v32  ;;  %v25133_v21 = vand.u32 4294901760, %v20913_v20 }
 0x16c   : > { %25128 = vst [vmem:[#allocation64_spill] sm:$0xff] %v21371_v18  ;;  %v24675_v5 = vand.u32 4294901760, %v21369_v12  ;;  %16775 = vmatprep.subr.bf16.mxu0 %v21371_v18  ;;  %25132 = vst [vmem:[#allocation67_spill] sm:$0xff] %v21389_v11  ;;  %v2359_v10 = vsub.f32 %v21357_v24, %v24674_v8  ;;  %v25135_v13 = vand.u32 4294901760, %v20916_v27  ;;  %v25137_v15 = vand.u32 4294901760, %v20918_v29 }
 0x16d   : > { %25131 = vst [vmem:[#allocation66_spill] sm:$0xff] %v21383_v22  ;;  %v24680_v48 = vand.u32 4294901760, %v21380_v31  ;;  %v21398_v63 = vsub.f32 %v20913_v20, %v25133_v21  ;;  %16967 = vmatprep.subr.bf16.mxu1 %v21383_v22  ;;  %v21401_v32 = vpack.c.bf16 %v1517_v52, %v1505_v26  ;;  %v1487_v20 = vsub.f32 %v21374_v62, %v21389_v11  ;;  %v25189_v62 = vld [vmem:[#allocation25_spill] sm:$0xff] }
 0x16e   : > { %v2371_v7 = vsub.f32 %v21369_v12, %v24675_v5  ;;  %v21409_v56 = vsub.f32 %v20916_v27, %v25135_v13  ;;  %v21414_v8 = vsub.f32 %v20918_v29, %v25137_v15  ;;  %v2360_v21 = vand.u32 4294901760, %v2359_v10 }
 0x16f   : > { %25134 = vst [vmem:[#allocation68_spill] sm:$0xff] %v21401_v32  ;;  %v1522_v52 = vsub.f32 %v21380_v31, %v24680_v48  ;;  %v24683_v26 = vand.u32 4294901760, %v21398_v63  ;;  %v25139_v13 = vand.u32 4294901760, %v20934_v36  ;;  %v1488_v15 = vand.u32 4294901760, %v1487_v20 }
 0x170   : > { %25136 = vst [vmem:[#allocation69_spill] sm:$0xff] %v21409_v56  ;;  %25138 = vst [vmem:[#allocation70_spill] sm:$0xff] %v21414_v8  ;;  %v2372_v5 = vand.u32 4294901760, %v2371_v7  ;;  %v24684_v22 = vand.u32 4294901760, %v21409_v56  ;;  %v25141_v48 = vand.u32 4294901760, %v20936_v0  ;;  %vm15454_vm2 = vcmask 1041408  }
 0x171   : > { %v21427_v29 = vsub.f32 %v20934_v36, %v25139_v13  ;;  %v1523_v18 = vand.u32 4294901760, %v1522_v52  ;;  %v1534_v10 = vsub.f32 %v21398_v63, %v24683_v26  ;;  %v25144_v36 = vand.u32 4294901760, %v21414_v8  ;;  %1489 = vmatmul.mubr.f32.vlgmr.msra.gmra.mrb[0].mxu0 %v1488_v15  ;;  %2344 = vmatmul.mubr.f32.vlgmr.msra.gmra.mrb[0].mxu1 %v1488_v15 }
 0x172   : > { %v21435_v11 = vsub.f32 %v20936_v0, %v25141_v48  ;;  %v21437_v7 = vpack.c.bf16 %v2372_v5, %v2360_v21  ;;  %v2377_v27 = vsub.f32 %v21409_v56, %v24684_v22  ;;  %v25145_v0 = vand.u32 4294901760, %v20938_v17  ;;  %16777 = vmatpush1.bf16.msra.mxu0 %v21401_v32 }
 0x173   : > { %25140 = vst [vmem:[#allocation71_spill] sm:$0xff] %v21427_v29  ;;  %v2389_v20 = vsub.f32 %v21414_v8, %v25144_v36  ;;  %v24685_v52 = vand.u32 4294901760, %v21427_v29  ;;  %v1535_v13 = vand.u32 4294901760, %v1534_v10  ;;  %v25147_v48 = vand.u32 4294901760, %v20950_v28 }
 0x174   : > { %25142 = vst [vmem:[#allocation72_spill] sm:$0xff] %v21435_v11  ;;  %25143 = vst [vmem:[#allocation73_spill] sm:$0xff] %v21437_v7  ;;  %v24688_v26 = vand.u32 4294901760, %v21435_v11  ;;  %v21450_v5 = vsub.f32 %v20938_v17, %v25145_v0  ;;  %16969 = vmatpush1.bf16.msra.mxu1 %v21437_v7  ;;  %v2378_v36 = vand.u32 4294901760, %v2377_v27  ;;  %v25149_v10 = vand.u32 4294901760, %v20952_v16 }
 0x175   : > { %v21455_v21 = vsub.f32 %v20950_v28, %v25147_v48  ;;  %v2390_v22 = vand.u32 4294901760, %v2389_v20  ;;  %v1528_v15 = vsub.f32 %v21427_v29, %v24685_v52  ;;  %v21467_v0 = vpack.c.bf16 %v1535_v13, %v1523_v18 }
 0x176   : > { %25146 = vst [vmem:[#allocation74_spill] sm:$0xff] %v21450_v5  ;;  %v21465_v17 = vsub.f32 %v20952_v16, %v25149_v10  ;;  %v1540_v28 = vsub.f32 %v21435_v11, %v24688_v26  ;;  %v24689_v48 = vand.u32 4294901760, %v21450_v5  ;;  %v25152_v20 = vmov 0.0  }
 0x177   : > { %25148 = vst [vmem:[#allocation75_spill] sm:$0xff] %v21455_v21  ;;  %25151 = vst [vmem:[#allocation77_spill] sm:$0xff] %v21467_v0  ;;  %v24690_v27 = vand.u32 4294901760, %v21455_v21  ;;  %1719 = vmatprep.mubr.f32.mxu0 %v25152_v20  ;;  %2574 = vmatprep.mubr.f32.mxu1 %v25152_v20  ;;  %v21476_v52 = vpack.c.bf16 %v2390_v22, %v2378_v36  ;;  %v1529_v7 = vand.u32 4294901760, %v1528_v15  ;;  %v25154_v18 = vand.u32 4294901760, %v20954_v23 }
 0x178   : > { %25150 = vst [vmem:[#allocation76_spill] sm:$0xff] %v21465_v17  ;;  %v24699_v16 = vand.u32 4294901760, %v21465_v17  ;;  %16779 = vmatprep.subr.bf16.mxu0 %v21467_v0  ;;  %v1541_v10 = vand.u32 4294901760, %v1540_v28  ;;  %v2383_v26 = vsub.f32 %v21450_v5, %v24689_v48  ;;  %v25156_v36 = vand.u32 4294901760, %v20967_v41 }
 0x179   : > { %25153 = vst [vmem:[#allocation78_spill] sm:$0xff] %v21476_v52  ;;  %v21482_v13 = vsub.f32 %v20954_v23, %v25154_v18  ;;  %v2395_v22 = vsub.f32 %v21455_v21, %v24690_v27  ;;  %16971 = vmatprep.subr.bf16.mxu1 %v21476_v52  ;;  %v25157_v18 = vand.u32 4294901760, %v20969_v44  ;;  %v25158_v27 = vand.u32 4294901760, %v20971_v45 }
 0x17a   : > { %v21494_v15 = vsub.f32 %v20967_v41, %v25156_v36  ;;  %v1546_v23 = vsub.f32 %v21465_v17, %v24699_v16  ;;  %v21511_v41 = vpack.c.bf16 %v1541_v10, %v1529_v7  ;;  %v2384_v36 = vand.u32 4294901760, %v2383_v26 }
 0x17b   : > { %25155 = vst [vmem:[#allocation79_spill] sm:$0xff] %v21482_v13  ;;  %v24702_v28 = vand.u32 4294901760, %v21482_v13  ;;  %v21504_v48 = vsub.f32 %v20969_v44, %v25157_v18  ;;  %v21509_v0 = vsub.f32 %v20971_v45, %v25158_v27  ;;  %v2396_v52 = vand.u32 4294901760, %v2395_v22 }
 0x17c   : > { %25159 = vst [vmem:[#allocation80_spill] sm:$0xff] %v21511_v41  ;;  %v24705_v32 = vand.u32 4294901760, %v21494_v15  ;;  %v1547_v2 = vand.u32 4294901760, %v1546_v23  ;;  %16781 = vmatpush1.bf16.msra.mxu0 %v21511_v41  ;;  %v25161_v26 = vand.u32 4294901760, %v20988_v50  ;;  %v25162_v27 = vand.u32 4294901760, %v20990_v54 }
 0x17d   : > { %v1558_v16 = vsub.f32 %v21482_v13, %v24702_v28  ;;  %v24703_v49 = vand.u32 4294901760, %v21504_v48  ;;  %v24704_v44 = vand.u32 4294901760, %v21509_v0  ;;  %v21520_v18 = vpack.c.bf16 %v2396_v52, %v2384_v36 }
 0x17e   : > { %v2401_v45 = vsub.f32 %v21494_v15, %v24705_v32  ;;  %v21528_v7 = vsub.f32 %v20988_v50, %v25161_v26  ;;  %v21533_v10 = vsub.f32 %v20990_v54, %v25162_v27  ;;  %v25163_v36 = vand.u32 4294901760, %v20992_v55 }
 0x17f   : > { %25160 = vst [vmem:[#allocation81_spill] sm:$0xff] %v21520_v18  ;;  %v1559_v22 = vand.u32 4294901760, %v1558_v16  ;;  %v2413_v52 = vsub.f32 %v21504_v48, %v24703_v49  ;;  %v1552_v23 = vsub.f32 %v21509_v0, %v24704_v44  ;;  %16973 = vmatpush1.bf16.msra.mxu1 %v21520_v18  ;;  %v25164_v26 = vand.u32 4294901760, %v21004_v60 }
 0x180   : > { %v21544_v28 = vsub.f32 %v20992_v55, %v25163_v36  ;;  %v2402_v50 = vand.u32 4294901760, %v2401_v45  ;;  %v24712_v54 = vand.u32 4294901760, %v21528_v7  ;;  %v24710_v16 = vand.u32 4294901760, %v21533_v10 }
 0x181   : > { %v21552_v27 = vsub.f32 %v21004_v60, %v25164_v26  ;;  %v21554_v49 = vpack.c.bf16 %v1559_v22, %v1547_v2  ;;  %v2414_v44 = vand.u32 4294901760, %v2413_v52  ;;  %v1553_v32 = vand.u32 4294901760, %v1552_v23 }
 0x182   : > { %v24711_v41 = vand.u32 4294901760, %v21544_v28  ;;  %v1564_v55 = vsub.f32 %v21528_v7, %v24712_v54  ;;  %v2407_v45 = vsub.f32 %v21533_v10, %v24710_v16  ;;  %v25166_v18 = vand.u32 4294901760, %v21006_v61 }
 0x183   : > { %25165 = vst [vmem:[#allocation82_spill] sm:$0xff] %v21554_v49  ;;  %v24713_v36 = vand.u32 4294901760, %v21552_v27  ;;  %16783 = vmatprep.subr.bf16.mxu0 %v21554_v49  ;;  %v21570_v2 = vpack.c.bf16 %v2414_v44, %v2402_v50  ;;  %v25168_v52 = vand.u32 4294901760, %v21008_v1  ;;  %v25169_v26 = vand.u32 4294901760, %v21020_v30 }
 0x184   : > { %v21567_v60 = vsub.f32 %v21006_v61, %v25166_v18  ;;  %v2419_v22 = vsub.f32 %v21544_v28, %v24711_v41  ;;  %v1565_v61 = vand.u32 4294901760, %v1564_v55  ;;  %v2408_v18 = vand.u32 4294901760, %v2407_v45 }
 0x185   : > { %25167 = vst [vmem:[#allocation83_spill] sm:$0xff] %v21570_v2  ;;  %v21578_v23 = vsub.f32 %v21008_v1, %v25168_v52  ;;  %v21583_v16 = vsub.f32 %v21020_v30, %v25169_v26  ;;  %v1570_v44 = vsub.f32 %v21552_v27, %v24713_v36  ;;  %16975 = vmatprep.subr.bf16.mxu1 %v21570_v2  ;;  %v25170_v52 = vand.u32 4294901760, %v21022_v39 }
 0x186   : > { %v24716_v50 = vand.u32 4294901760, %v21567_v60  ;;  %v2420_v41 = vand.u32 4294901760, %v2419_v22  ;;  %v21597_v55 = vpack.c.bf16 %v1565_v61, %v1553_v32  ;;  %v25173_v36 = vand.u32 4294901760, %v21024_v38 }
 0x187   : > { %v21595_v30 = vsub.f32 %v21022_v39, %v25170_v52  ;;  %v1571_v45 = vand.u32 4294901760, %v1570_v44  ;;  %v25176_v1 = vand.u32 4294901760, %v21578_v23  ;;  %v25177_v39 = vand.u32 4294901760, %v21583_v16 }
 0x188   : > { %25172 = vst [vmem:[#allocation85_spill] sm:$0xff] %v21597_v55  ;;  %v1582_v26 = vsub.f32 %v21567_v60, %v24716_v50  ;;  %v21605_v22 = vsub.f32 %v21024_v38, %v25173_v36  ;;  %v21607_v54 = vpack.c.bf16 %v2420_v41, %v2408_v18  ;;  %16785 = vmatpush1.bf16.msra.mxu0 %v21597_v55  ;;  %v25178_v38 = vand.u32 4294901760, %v21041_v19  ;;  %v25180_v36 = vld [vmem:[#allocation22_spill] sm:$0xff]  ;;  %v25183_v55 = vld [vmem:[#allocation23_spill] sm:$0xff] }
 0x189   : > { %25171 = vst [vmem:[#allocation84_spill] sm:$0xff] %v21595_v30  ;;  %v2425_v2 = vsub.f32 %v21578_v23, %v25176_v1  ;;  %v2437_v32 = vsub.f32 %v21583_v16, %v25177_v39  ;;  %v24723_v61 = vand.u32 4294901760, %v21595_v30  ;;  %v25181_v18 = vand.u32 4294901760, %v25180_v36 }
 0x18a   : > { %25174 = vst [vmem:[#allocation86_spill] sm:$0xff] %v21605_v22  ;;  %25175 = vst [vmem:[#allocation87_spill] sm:$0xff] %v21607_v54  ;;  %v1583_v44 = vand.u32 4294901760, %v1582_v26  ;;  %v21621_v41 = vsub.f32 %v21041_v19, %v25178_v38  ;;  %16977 = vmatpush1.bf16.msra.mxu1 %v21607_v54  ;;  %v25184_v52 = vand.u32 4294901760, %v25183_v55  ;;  %v25187_v38 = vand.u32 4294901760, %v21605_v22 }
 0x18b   : > { %v21626_v1 = vsub.f32 %v25180_v36, %v25181_v18  ;;  %v2426_v39 = vand.u32 4294901760, %v2425_v2  ;;  %v2438_v50 = vand.u32 4294901760, %v2437_v32  ;;  %v1576_v26 = vsub.f32 %v21595_v30, %v24723_v61 }
 0x18c   : > { %25179 = vst [vmem:[#allocation88_spill] sm:$0xff] %v21621_v41  ;;  %v21635_v49 = vsub.f32 %v25183_v55, %v25184_v52  ;;  %v21637_v19 = vpack.c.bf16 %v1583_v44, %v1571_v45  ;;  %v1588_v36 = vsub.f32 %v21605_v22, %v25187_v38  ;;  %v24728_v18 = vand.u32 4294901760, %v21621_v41  ;;  %v25192_v52 = vld [vmem:[#allocation26_spill] sm:$0xff]  ;;  %v25195_v38 = vld [vmem:[#allocation27_spill] sm:$0xff] }
 0x18d   : > { %25182 = vst [vmem:[#allocation22_spill] sm:$0xff] %v21626_v1  ;;  %v24731_v2 = vand.u32 4294901760, %v21626_v1  ;;  %v21644_v32 = vpack.c.bf16 %v2438_v50, %v2426_v39  ;;  %v1577_v54 = vand.u32 4294901760, %v1576_v26  ;;  %v25190_v30 = vand.u32 4294901760, %v25189_v62 }
 0x18e   : > { %25185 = vst [vmem:[#allocation23_spill] sm:$0xff] %v21635_v49  ;;  %25186 = vst [vmem:[#allocation89_spill] sm:$0xff] %v21637_v19  ;;  %v24740_v61 = vand.u32 4294901760, %v21635_v49  ;;  %16787 = vmatprep.subr.bf16.mxu0 %v21637_v19  ;;  %v1589_v45 = vand.u32 4294901760, %v1588_v36  ;;  %v2431_v44 = vsub.f32 %v21621_v41, %v24728_v18  ;;  %v25193_v39 = vand.u32 4294901760, %v25192_v52  ;;  %v25198_v19 = vld [vmem:[#allocation29_spill] sm:$0xff] }
 0x18f   : > { %25188 = vst [vmem:[#allocation90_spill] sm:$0xff] %v21644_v32  ;;  %v21650_v55 = vsub.f32 %v25189_v62, %v25190_v30  ;;  %v2443_v50 = vsub.f32 %v21626_v1, %v24731_v2  ;;  %16979 = vmatprep.subr.bf16.mxu1 %v21644_v32  ;;  %v25196_v36 = vand.u32 4294901760, %v25195_v38  ;;  %v25199_v2 = vand.u32 4294901760, %v25198_v19 }
 0x190   : > { %v21662_v26 = vsub.f32 %v25192_v52, %v25193_v39  ;;  %v1594_v62 = vsub.f32 %v21635_v49, %v24740_v61  ;;  %v21679_v52 = vpack.c.bf16 %v1589_v45, %v1577_v54  ;;  %v2432_v39 = vand.u32 4294901760, %v2431_v44 }
 0x191   : > { %25191 = vst [vmem:[#allocation25_spill] sm:$0xff] %v21650_v55  ;;  %v24744_v30 = vand.u32 4294901760, %v21650_v55  ;;  %v21672_v18 = vsub.f32 %v25195_v38, %v25196_v36  ;;  %v21677_v1 = vsub.f32 %v25198_v19, %v25199_v2  ;;  %v2444_v32 = vand.u32 4294901760, %v2443_v50  ;;  %v25203_v19 = vld [vmem:[#allocation30_spill] sm:$0xff] }
 0x192   : > { %25194 = vst [vmem:[#allocation26_spill] sm:$0xff] %v21662_v26  ;;  %25201 = vst [vmem:[#allocation91_spill] sm:$0xff] %v21679_v52  ;;  %v24743_v41 = vand.u32 4294901760, %v21662_v26  ;;  %v1595_v22 = vand.u32 4294901760, %v1594_v62  ;;  %16789 = vmatpush1.bf16.msra.mxu0 %v21679_v52  ;;  %v25204_v2 = vand.u32 4294901760, %v25203_v19  ;;  %v25205_v44 = vand.u32 4294901760, %v21078_v53 }
 0x193   : > { %25197 = vst [vmem:[#allocation27_spill] sm:$0xff] %v21672_v18  ;;  %25200 = vst [vmem:[#allocation29_spill] sm:$0xff] %v21677_v1  ;;  %v1606_v61 = vsub.f32 %v21650_v55, %v24744_v30  ;;  %v24747_v49 = vand.u32 4294901760, %v21672_v18  ;;  %v24750_v38 = vand.u32 4294901760, %v21677_v1  ;;  %v21688_v36 = vpack.c.bf16 %v2444_v32, %v2432_v39 }
 0x194   : > { %v2449_v54 = vsub.f32 %v21662_v26, %v24743_v41  ;;  %v21696_v45 = vsub.f32 %v25203_v19, %v25204_v2  ;;  %v21701_v50 = vsub.f32 %v21078_v53, %v25205_v44  ;;  %v25207_v41 = vld [vmem:[#allocation33_spill] sm:$0xff]  ;;  %v25210_v2 = vld [vmem:[#allocation34_spill] sm:$0xff]  ;;  %vm15456_vm3 = vcmask 1042432  }
 0x195   : > { %25202 = vst [vmem:[#allocation92_spill] sm:$0xff] %v21688_v36  ;;  %v1607_v62 = vand.u32 4294901760, %v1606_v61  ;;  %v2461_v32 = vsub.f32 %v21672_v18, %v24747_v49  ;;  %v1600_v39 = vsub.f32 %v21677_v1, %v24750_v38  ;;  %v25208_v30 = vand.u32 4294901760, %v25207_v41  ;;  %16981 = vmatpush1.bf16.msra.mxu1 %v21688_v36  ;;  %v25214_v36 = vld [vmem:[#allocation35_spill] sm:$0xff] }
 0x196   : > { %25206 = vst [vmem:[#allocation30_spill] sm:$0xff] %v21701_v50  ;;  %v2450_v19 = vand.u32 4294901760, %v2449_v54  ;;  %v24760_v53 = vand.u32 4294901760, %v21696_v45  ;;  %v24759_v61 = vand.u32 4294901760, %v21701_v50  ;;  %v25211_v44 = vand.u32 4294901760, %v25210_v2 }
 0x197   : > { %v21712_v52 = vsub.f32 %v25207_v41, %v25208_v30  ;;  %v21722_v18 = vpack.c.bf16 %v1607_v62, %v1595_v22  ;;  %v2462_v38 = vand.u32 4294901760, %v2461_v32  ;;  %v1601_v1 = vand.u32 4294901760, %v1600_v39  ;;  %v25217_v32 = vld [vmem:[#allocation37_spill] sm:$0xff] }
 0x198   : > { %v21720_v49 = vsub.f32 %v25210_v2, %v25211_v44  ;;  %v1612_v41 = vsub.f32 %v21696_v45, %v24760_v53  ;;  %v2455_v30 = vsub.f32 %v21701_v50, %v24759_v61  ;;  %v25215_v55 = vand.u32 4294901760, %v25214_v36  ;;  %v25219_v61 = vld [vmem:[#allocation38_spill] sm:$0xff] }
 0x199   : > { %25209 = vst [vmem:[#allocation33_spill] sm:$0xff] %v21712_v52  ;;  %25213 = vst [vmem:[#allocation93_spill] sm:$0xff] %v21722_v18  ;;  %v24763_v26 = vand.u32 4294901760, %v21712_v52  ;;  %16791 = vmatprep.subr.bf16.mxu0 %v21722_v18  ;;  %v21738_v22 = vpack.c.bf16 %v2462_v38, %v2450_v19  ;;  %v25218_v39 = vand.u32 4294901760, %v25217_v32  ;;  %v25220_v53 = vand.u32 4294901760, %v25219_v61 }
 0x19a   : > { %25212 = vst [vmem:[#allocation34_spill] sm:$0xff] %v21720_v49  ;;  %v21735_v2 = vsub.f32 %v25214_v36, %v25215_v55  ;;  %v1613_v55 = vand.u32 4294901760, %v1612_v41  ;;  %v2456_v36 = vand.u32 4294901760, %v2455_v30  ;;  %v25221_v18 = vand.u32 4294901760, %v21720_v49  ;;  %v25225_v30 = vld [vmem:[#allocation41_spill] sm:$0xff] }
 0x19b   : > { %25216 = vst [vmem:[#allocation35_spill] sm:$0xff] %v21738_v22  ;;  %v2467_v62 = vsub.f32 %v21712_v52, %v24763_v26  ;;  %v21746_v44 = vsub.f32 %v25217_v32, %v25218_v39  ;;  %v21751_v54 = vsub.f32 %v25219_v61, %v25220_v53  ;;  %16983 = vmatprep.subr.bf16.mxu1 %v21738_v22  ;;  %v25222_v39 = vld [vmem:[#allocation39_spill] sm:$0xff]  ;;  %vm15458_vm4 = vcmask 1043456  }
 0x19c   : > { %v1618_v38 = vsub.f32 %v21720_v49, %v25221_v18  ;;  %v24772_v19 = vand.u32 4294901760, %v21735_v2  ;;  %v25223_v50 = vand.u32 4294901760, %v25222_v39  ;;  %v21765_v61 = vpack.c.bf16 %v1613_v55, %v1601_v1 }
 0x19d   : > { %v2468_v26 = vand.u32 4294901760, %v2467_v62  ;;  %v25226_v49 = vand.u32 4294901760, %v25225_v30  ;;  %v25228_v32 = vand.u32 4294901760, %v21746_v44  ;;  %vm15460_vm5 = vcmask 1044480  }
 0x19e   : > { %v21763_v53 = vsub.f32 %v25222_v39, %v25223_v50  ;;  %25224 = vst [vmem:[#allocation37_spill] sm:$0xff] %v21765_v61  ;;  %v1619_v41 = vand.u32 4294901760, %v1618_v38  ;;  %v1630_v18 = vsub.f32 %v21735_v2, %v24772_v19  ;;  %v25229_v50 = vand.u32 4294901760, %v21751_v54  ;;  %16793 = vmatpush1.bf16.msra.mxu0 %v21765_v61 }
 0x19f   : > { %v21773_v62 = vsub.f32 %v25225_v30, %v25226_v49  ;;  %v21775_v52 = vpack.c.bf16 %v2468_v26, %v2456_v36  ;;  %v2473_v22 = vsub.f32 %v21746_v44, %v25228_v32  ;;  %v25230_v49 = vand.u32 4294901760, %v21132_v46 }
 0x1a0   : > { %v2485_v1 = vsub.f32 %v21751_v54, %v25229_v50  ;;  %v24775_v55 = vand.u32 4294901760, %v21763_v53  ;;  %v1631_v38 = vand.u32 4294901760, %v1630_v18  ;;  %v25232_v36 = vand.u32 4294901760, %v21134_v59 }
 0x1a1   : > { %25227 = vst [vmem:[#allocation38_spill] sm:$0xff] %v21775_v52  ;;  %v21789_v26 = vsub.f32 %v21132_v46, %v25230_v49  ;;  %16985 = vmatpush1.bf16.msra.mxu1 %v21775_v52  ;;  %v2474_v30 = vand.u32 4294901760, %v2473_v22  ;;  %v25234_v19 = vand.u32 4294901760, %v21145_v43  ;;  %v25237_v49 = vand.u32 4294901760, %v21773_v62 }
 0x1a2   : > { %v21794_v32 = vsub.f32 %v21134_v59, %v25232_v36  ;;  %v2486_v50 = vand.u32 4294901760, %v2485_v1  ;;  %v1624_v18 = vsub.f32 %v21763_v53, %v24775_v55  ;;  %v21805_v46 = vpack.c.bf16 %v1631_v38, %v1619_v41 }
 0x1a3   : > { %25231 = vst [vmem:[#allocation39_spill] sm:$0xff] %v21789_v26  ;;  %v21803_v39 = vsub.f32 %v21145_v43, %v25234_v19  ;;  %v1636_v59 = vsub.f32 %v21773_v62, %v25237_v49  ;;  %v24778_v36 = vand.u32 4294901760, %v21789_v26  ;;  %v25239_v61 = vand.u32 4294901760, %v21147_v40  ;;  %v25242_v49 = vld [vmem:[#allocation44_spill] sm:$0xff] }
 0x1a4   : > { %25233 = vst [vmem:[#allocation41_spill] sm:$0xff] %v21794_v32  ;;  %25236 = vst [vmem:[#allocation95_spill] sm:$0xff] %v21805_v46  ;;  %v24779_v22 = vand.u32 4294901760, %v21794_v32  ;;  %v21812_v1 = vpack.c.bf16 %v2486_v50, %v2474_v30  ;;  %v1625_v52 = vand.u32 4294901760, %v1624_v18  ;;  %16795 = vmatprep.subr.bf16.mxu0 %v21805_v46  ;;  %v25240_v30 = vld [vmem:[#allocation43_spill] sm:$0xff]  ;;  %vm15462_vm6 = vcmask 1045504  }
 0x1a5   : > { %25235 = vst [vmem:[#allocation94_spill] sm:$0xff] %v21803_v39  ;;  %v24788_v55 = vand.u32 4294901760, %v21803_v39  ;;  %v21818_v43 = vsub.f32 %v21147_v40, %v25239_v61  ;;  %v1637_v19 = vand.u32 4294901760, %v1636_v59  ;;  %v2479_v41 = vsub.f32 %v21789_v26, %v24778_v36 }
 0x1a6   : > { %25238 = vst [vmem:[#allocation96_spill] sm:$0xff] %v21812_v1  ;;  %v2491_v38 = vsub.f32 %v21794_v32, %v24779_v22  ;;  %v25241_v50 = vand.u32 4294901760, %v25240_v30  ;;  %16987 = vmatprep.subr.bf16.mxu1 %v21812_v1  ;;  %v25243_v59 = vand.u32 4294901760, %v25242_v49  ;;  %v25244_v22 = vand.u32 4294901760, %v21159_v6 }
 0x1a7   : > { %v1642_v40 = vsub.f32 %v21803_v39, %v24788_v55  ;;  %v24792_v61 = vand.u32 4294901760, %v21818_v43  ;;  %vm15464_vm7 = vcmask 1046528   ;;  %vm16223_vm8 = vcmask (%p1300_p13), 7168  }
 0x1a8   : > { %v21830_v18 = vsub.f32 %v25240_v30, %v25241_v50  ;;  %v21840_v36 = vsub.f32 %v25242_v49, %v25243_v59  ;;  %v21845_v46 = vsub.f32 %v21159_v6, %v25244_v22  ;;  %v21847_v30 = vpack.c.bf16 %v1637_v19, %v1625_v52 }
 0x1a9   : > { %v2480_v50 = vand.u32 4294901760, %v2479_v41  ;;  %v2492_v1 = vand.u32 4294901760, %v2491_v38  ;;  %v1643_v26 = vand.u32 4294901760, %v1642_v40  ;;  %v1654_v55 = vsub.f32 %v21818_v43, %v24792_v61 }
 0x1aa   : > { %25245 = vst [vmem:[#allocation43_spill] sm:$0xff] %v21845_v46  ;;  %25246 = vst [vmem:[#allocation44_spill] sm:$0xff] %v21847_v30  ;;  %v24791_v32 = vand.u32 4294901760, %v21830_v18  ;;  %v24793_v39 = vand.u32 4294901760, %v21840_v36  ;;  %v24794_v49 = vand.u32 4294901760, %v21845_v46  ;;  %16797 = vmatpush1.bf16.msra.mxu0 %v21847_v30  ;;  %v25248_v52 = vand.u32 4294901760, %v21161_v58 }
 0x1ab   : > { %v21856_v59 = vpack.c.bf16 %v2492_v1, %v2480_v50  ;;  %v25249_v19 = vand.u32 4294901760, %v21173_v14  ;;  %v1655_v38 = vand.u32 4294901760, %v1654_v55  ;;  %v25250_v50 = vld [vmem:[#allocation46_spill] sm:$0xff]  ;;  %vm16269_vm9 = vcmask (%p1300_p13), 15360  }
 0x1ac   : > { %v2497_v6 = vsub.f32 %v21830_v18, %v24791_v32  ;;  %v21864_v22 = vsub.f32 %v21161_v58, %v25248_v52  ;;  %v2509_v1 = vsub.f32 %v21840_v36, %v24793_v39  ;;  %v1648_v40 = vsub.f32 %v21845_v46, %v24794_v49 }
 0x1ad   : > { %25247 = vst [vmem:[#allocation97_spill] sm:$0xff] %v21856_v59  ;;  %v21869_v41 = vsub.f32 %v21173_v14, %v25249_v19  ;;  %v25251_v32 = vand.u32 4294901760, %v25250_v50  ;;  %16989 = vmatpush1.bf16.msra.mxu1 %v21856_v59  ;;  %v25252_v52 = vand.u32 4294901760, %v21177_v33  ;;  %v21890_v39 = vpack.c.bf16 %v1655_v38, %v1643_v26 }
 0x1ae   : > { %v2498_v58 = vand.u32 4294901760, %v2497_v6  ;;  %v24803_v14 = vand.u32 4294901760, %v21864_v22  ;;  %v2510_v49 = vand.u32 4294901760, %v2509_v1  ;;  %v1649_v30 = vand.u32 4294901760, %v1648_v40 }
 0x1af   : > { %v21880_v61 = vsub.f32 %v25250_v50, %v25251_v32  ;;  %v24801_v55 = vand.u32 4294901760, %v21869_v41  ;;  %v21888_v19 = vsub.f32 %v21177_v33, %v25252_v52  ;;  %25253 = vst [vmem:[#allocation46_spill] sm:$0xff] %v21890_v39  ;;  %v25254_v59 = vand.u32 4294901760, %v21195_v35  ;;  %16799 = vmatprep.subr.bf16.mxu0 %v21890_v39 }
 0x1b0   : > { %v1660_v32 = vsub.f32 %v21864_v22, %v24803_v14  ;;  %v21906_v26 = vpack.c.bf16 %v2510_v49, %v2498_v58  ;;  %v25256_v1 = vand.u32 4294901760, %v21197_v9  ;;  %v25257_v52 = vand.u32 4294901760, %v21209_v4 }
 0x1b1   : > { %v24802_v46 = vand.u32 4294901760, %v21880_v61  ;;  %v2503_v6 = vsub.f32 %v21869_v41, %v24801_v55  ;;  %v24804_v50 = vand.u32 4294901760, %v21888_v19  ;;  %v21903_v33 = vsub.f32 %v21195_v35, %v25254_v59 }
 0x1b2   : > { %25255 = vst [vmem:[#allocation98_spill] sm:$0xff] %v21906_v26  ;;  %v21914_v40 = vsub.f32 %v21197_v9, %v25256_v1  ;;  %v21919_v55 = vsub.f32 %v21209_v4, %v25257_v52  ;;  %v1661_v35 = vand.u32 4294901760, %v1660_v32  ;;  %16991 = vmatprep.subr.bf16.mxu1 %v21906_v26  ;;  %v25258_v1 = vand.u32 4294901760, %v21211_v34 }
 0x1b3   : > { %v2515_v38 = vsub.f32 %v21880_v61, %v24802_v46  ;;  %v2504_v59 = vand.u32 4294901760, %v2503_v6  ;;  %v1666_v49 = vsub.f32 %v21888_v19, %v24804_v50  ;;  %v24807_v58 = vand.u32 4294901760, %v21903_v33 }
 0x1b4   : > { %v21931_v4 = vsub.f32 %v21211_v34, %v25258_v1  ;;  %v21933_v32 = vpack.c.bf16 %v1661_v35, %v1649_v30  ;;  %v25260_v50 = vand.u32 4294901760, %v21213_v3  ;;  %v25262_v9 = vand.u32 4294901760, %v21914_v40 }
 0x1b5   : > { %v2516_v46 = vand.u32 4294901760, %v2515_v38  ;;  %v1667_v6 = vand.u32 4294901760, %v1666_v49  ;;  %v1678_v52 = vsub.f32 %v21903_v33, %v24807_v58  ;;  %v25263_v34 = vand.u32 4294901760, %v21919_v55 }
 0x1b6   : > { %25259 = vst [vmem:[#allocation99_spill] sm:$0xff] %v21933_v32  ;;  %v21941_v38 = vsub.f32 %v21213_v3, %v25260_v50  ;;  %v2521_v26 = vsub.f32 %v21914_v40, %v25262_v9  ;;  %v24813_v35 = vand.u32 4294901760, %v21931_v4  ;;  %16801 = vmatpush1.bf16.msra.mxu0 %v21933_v32  ;;  %v25264_v3 = vand.u32 4294901760, %v21239_v57  ;;  %v25265_v50 = vld [vmem:[#allocation53_spill] sm:$0xff] }
 0x1b7   : > { %v21943_v14 = vpack.c.bf16 %v2516_v46, %v2504_v59  ;;  %v2533_v30 = vsub.f32 %v21919_v55, %v25263_v34  ;;  %v1679_v49 = vand.u32 4294901760, %v1678_v52  ;;  %v25266_v59 = vand.u32 4294901760, %v25265_v50 }
 0x1b8   : > { %v24812_v1 = vand.u32 4294901760, %v21941_v38  ;;  %v21957_v46 = vsub.f32 %v21239_v57, %v25264_v3  ;;  %v2522_v34 = vand.u32 4294901760, %v2521_v26  ;;  %v1672_v52 = vsub.f32 %v21931_v4, %v24813_v35 }
 0x1b9   : > { %25261 = vst [vmem:[#allocation100_spill] sm:$0xff] %v21943_v14  ;;  %v21962_v9 = vsub.f32 %v25265_v50, %v25266_v59  ;;  %16993 = vmatpush1.bf16.msra.mxu1 %v21943_v14  ;;  %v2534_v58 = vand.u32 4294901760, %v2533_v30  ;;  %v21968_v32 = vpack.c.bf16 %v1679_v49, %v1667_v6  ;;  %v25269_v49 = vld [vmem:[#allocation58_spill] sm:$0xff]  ;;  %v22013_v14 = vpack.c.bf16 %v21504_v48, %v21494_v15 }
 0x1ba   : > { %v1684_v57 = vsub.f32 %v21941_v38, %v24812_v1  ;;  %v24815_v3 = vand.u32 4294901760, %v21957_v46  ;;  %v1673_v59 = vand.u32 4294901760, %v1672_v52  ;;  %v25270_v1 = vld [vmem:[#allocation59_spill] sm:$0xff]  ;;  %v21999_v52 = vpack.c.bf16 %v21455_v21, %v21450_v5 }
 0x1bb   : > { %25267 = vst [vmem:[#allocation53_spill] sm:$0xff] %v21968_v32  ;;  %v24814_v39 = vand.u32 4294901760, %v21962_v9  ;;  %v21975_v50 = vpack.c.bf16 %v2534_v58, %v2522_v34  ;;  %16803 = vmatprep.subr.bf16.mxu0 %v21968_v32  ;;  %v21987_v35 = vpack.c.bf16 %v25270_v1, %v25269_v49  ;;  %v21991_v58 = vpack.c.bf16 %v21414_v8, %v21409_v56 }
 0x1bc   : > { %v1685_v26 = vand.u32 4294901760, %v1684_v57  ;;  %v2527_v30 = vsub.f32 %v21957_v46, %v24815_v3  ;;  %v21995_v34 = vpack.c.bf16 %v21435_v11, %v21427_v29  ;;  %25274 = vst [vmem:[#allocation103_spill] sm:$0xff] %v21999_v52  ;;  %v22009_v32 = vpack.c.bf16 %v21301_v42, %v21288_v47  ;;  %25278 = vst [vmem:[#allocation107_spill] sm:$0xff] %v22013_v14 }
 0x1bd   : > { %25268 = vst [vmem:[#allocation101_spill] sm:$0xff] %v21975_v50  ;;  %v2539_v6 = vsub.f32 %v21962_v9, %v24814_v39  ;;  %16995 = vmatprep.subr.bf16.mxu1 %v21975_v50  ;;  %25271 = vst [vmem:[#allocation58_spill] sm:$0xff] %v21987_v35  ;;  %v22005_v50 = vpack.c.bf16 %v21482_v13, %v21465_v17  ;;  %v22017_v21 = vpack.c.bf16 %v21544_v28, %v21533_v10 }
 0x1be   : > { %25272 = vst [vmem:[#allocation59_spill] sm:$0xff] %v21991_v58  ;;  %25273 = vst [vmem:[#allocation102_spill] sm:$0xff] %v21995_v34  ;;  %v22001_v57 = vpack.c.bf16 %v1685_v26, %v1673_v59  ;;  %v2528_v39 = vand.u32 4294901760, %v2527_v30  ;;  %v22024_v26 = vpack.c.bf16 %v21330_v37, %v21325_v51  ;;  %v22029_v30 = vpack.c.bf16 %v21398_v63, %v21380_v31 }
 0x1bf   : > { %v2540_v3 = vand.u32 4294901760, %v2539_v6  ;;  %25276 = vst [vmem:[#allocation105_spill] sm:$0xff] %v22005_v50  ;;  %25277 = vst [vmem:[#allocation106_spill] sm:$0xff] %v22009_v32  ;;  %v22034_v6 = vpack.c.bf16 %v21369_v12, %v21357_v24  ;;  %v25295_v5 = vand.u32 4294901760, %v21504_v48  ;;  %v25297_v17 = vand.u32 4294901760, %v21509_v0 }
 0x1c0   : > { %25275 = vst [vmem:[#allocation104_spill] sm:$0xff] %v22001_v57  ;;  %25279 = vst [vmem:[#allocation108_spill] sm:$0xff] %v22017_v21  ;;  %16805 = vmatpush1.bf16.msra.mxu0 %v22001_v57  ;;  %v25292_v57 = vld [vmem:[#allocation25_spill] sm:$0xff]  ;;  %v25298_v11 = vand.u32 4294901760, %v21528_v7  ;;  %v25300_v8 = vand.u32 4294901760, %v21533_v10  ;;  %v25304_v48 = vand.u32 4294901760, %v21567_v60 }
 0x1c1   : > { %v22020_v59 = vpack.c.bf16 %v2540_v3, %v2528_v39  ;;  %25281 = vst [vmem:[#allocation110_spill] sm:$0xff] %v22024_v26  ;;  %16807 = vmatprep.subr.bf16.mxu0 %v21987_v35  ;;  %25282 = vst [vmem:[#allocation111_spill] sm:$0xff] %v22029_v30  ;;  %v22043_v39 = vpack.c.bf16 %v21962_v9, %v21957_v46  ;;  %v22048_v3 = vpack.c.bf16 %v21528_v7, %v21509_v0  ;;  %v25289_v35 = vld [vmem:[#allocation86_spill] sm:$0xff]  ;;  %v25312_v10 = vld [vmem:[#allocation88_spill] sm:$0xff] }
 0x1c2   : > { %25283 = vst [vmem:[#allocation112_spill] sm:$0xff] %v22034_v6  ;;  %v22080_v29 = vpack.c.bf16 %v25298_v11, %v25297_v17  ;;  %v25306_v0 = vand.u32 4294901760, %v21578_v23  ;;  %v25307_v7 = vand.u32 4294901760, %v21583_v16 }
 0x1c3   : > { %25280 = vst [vmem:[#allocation109_spill] sm:$0xff] %v22020_v59  ;;  %16997 = vmatpush1.bf16.msra.mxu1 %v22020_v59  ;;  %1721 = vmatmul.mubr.f32.vlgmr.msra.gmra.mrb[0].mxu0 %v21352_v25  ;;  %25284 = vst [vmem:[#allocation113_spill] sm:$0xff] %v22043_v39 }
 0x1c4   : > { %16999 = vmatprep.subr.bf16.mxu1 %v22009_v32  ;;  %16809 = vmatpush1.bf16.msra.mxu0 %v22024_v26  ;;  %25285 = vst [vmem:[#allocation114_spill] sm:$0xff] %v22048_v3  ;;  %v22054_v26 = vpack.c.bf16 %v21567_v60, %v21552_v27  ;;  %v25288_v32 = vld [vmem:[#allocation84_spill] sm:$0xff]  ;;  %25299 = vst [vmem:[#allocation25_spill] sm:$0xff] %v22080_v29  ;;  %v22099_v11 = vpack.c.bf16 %v25307_v7, %v25306_v0  ;;  %v25325_v7 = vld [vmem:[#allocation29_spill] sm:$0xff] }
 0x1c5   : > { %16811 = vmatprep.subr.bf16.mxu0 %v22029_v30  ;;  %1855 = vmatprep.mubr.f32.mxu0 %v25152_v20  ;;  %v22058_v30 = vpack.c.bf16 %v21583_v16, %v21578_v23  ;;  %v22062_v59 = vpack.c.bf16 %v25289_v35, %v25288_v32  ;;  %v25309_v17 = vand.u32 4294901760, %v25288_v32  ;;  %v25318_v16 = vand.u32 4294901760, %v25292_v57 }
 0x1c6   : > { %2576 = vmatmul.mubr.f32.vlgmr.msra.gmra.mrb[0].mxu1 %v21352_v25  ;;  %25286 = vst [vmem:[#allocation115_spill] sm:$0xff] %v22054_v26  ;;  %25308 = vst [vmem:[#allocation119_spill] sm:$0xff] %v22099_v11 }
 0x1c7   : > { %17001 = vmatpush1.bf16.msra.mxu1 %v22034_v6  ;;  %25287 = vst [vmem:[#allocation116_spill] sm:$0xff] %v22058_v30  ;;  %25290 = vst [vmem:[#allocation84_spill] sm:$0xff] %v22062_v59  ;;  %2710 = vmatprep.mubr.f32.mxu1 %v25152_v20  ;;  %v25291_v6 = vld [vmem:[#allocation23_spill] sm:$0xff] }
 0x1c8   : > { %17003 = vmatprep.subr.bf16.mxu1 %v21991_v58  ;;  %16813 = vmatpush1.bf16.msra.mxu0 %v21995_v34  ;;  %v22068_v25 = vpack.c.bf16 %v25292_v57, %v25291_v6  ;;  %v25294_v58 = vand.u32 4294901760, %v21494_v15  ;;  %v25301_v34 = vand.u32 4294901760, %v21544_v28  ;;  %v25303_v15 = vand.u32 4294901760, %v21552_v27  ;;  %v25334_v57 = vld [vmem:[#allocation34_spill] sm:$0xff] }
 0x1c9   : > { %16815 = vmatprep.subr.bf16.mxu0 %v22005_v50  ;;  %v25310_v28 = vand.u32 4294901760, %v25289_v35  ;;  %v25317_v60 = vand.u32 4294901760, %v25291_v6 }
 0x1ca   : > { %25293 = vst [vmem:[#allocation86_spill] sm:$0xff] %v22068_v25  ;;  %v22074_v13 = vpack.c.bf16 %v25295_v5, %v25294_v58  ;;  %v22086_v56 = vpack.c.bf16 %v25301_v34, %v25300_v8  ;;  %v22093_v5 = vpack.c.bf16 %v25304_v48, %v25303_v15  ;;  %v25313_v58 = vand.u32 4294901760, %v25312_v10  ;;  %v25314_v34 = vld [vmem:[#allocation22_spill] sm:$0xff]  ;;  %v25322_v48 = vld [vmem:[#allocation27_spill] sm:$0xff] }
 0x1cb   : > { %v22105_v8 = vpack.c.bf16 %v25310_v28, %v25309_v17  ;;  %v25315_v27 = vand.u32 4294901760, %v25314_v34  ;;  %17005 = vmatpush1.bf16.msra.mxu1 %v21999_v52  ;;  %v22118_v23 = vpack.c.bf16 %v25318_v16, %v25317_v60  ;;  %v25320_v15 = vld [vmem:[#allocation26_spill] sm:$0xff]  ;;  %v25323_v35 = vand.u32 4294901760, %v25322_v48 }
 0x1cc   : > { %25296 = vst [vmem:[#allocation23_spill] sm:$0xff] %v22074_v13  ;;  %25302 = vst [vmem:[#allocation117_spill] sm:$0xff] %v22086_v56  ;;  %v25321_v32 = vand.u32 4294901760, %v25320_v15  ;;  %v25326_v17 = vand.u32 4294901760, %v25325_v7  ;;  %v25327_v28 = vand.u32 4294901760, %v21696_v45  ;;  %17007 = vmatprep.subr.bf16.mxu1 %v22013_v14  ;;  %v25335_v60 = vand.u32 4294901760, %v25334_v57  ;;  %16817 = vmatpush1.bf16.msra.mxu0 %v22048_v3 }
 0x1cd   : > { %25305 = vst [vmem:[#allocation118_spill] sm:$0xff] %v22093_v5  ;;  %25311 = vst [vmem:[#allocation120_spill] sm:$0xff] %v22105_v8  ;;  %v22111_v50 = vpack.c.bf16 %v25315_v27, %v25313_v58  ;;  %v25329_v27 = vld [vmem:[#allocation30_spill] sm:$0xff]  ;;  %v25336_v16 = vand.u32 4294901760, %v21735_v2  ;;  %v25358_v56 = vand.u32 4294901760, %v21864_v22  ;;  %v25361_v3 = vand.u32 4294901760, %v21880_v61  ;;  %16819 = vmatprep.subr.bf16.mxu0 %v22054_v26 }
 0x1ce   : > { %25319 = vst [vmem:[#allocation22_spill] sm:$0xff] %v22118_v23  ;;  %v22124_v0 = vpack.c.bf16 %v25323_v35, %v25321_v32  ;;  %v22130_v58 = vpack.c.bf16 %v25327_v28, %v25326_v17  ;;  %v25330_v52 = vand.u32 4294901760, %v25329_v27  ;;  %v25338_v35 = vand.u32 4294901760, %v21746_v44 }
 0x1cf   : > { %25316 = vst [vmem:[#allocation88_spill] sm:$0xff] %v22111_v50  ;;  %v25331_v50 = vld [vmem:[#allocation33_spill] sm:$0xff]  ;;  %v22143_v32 = vpack.c.bf16 %v25336_v16, %v25335_v60  ;;  %v25341_v28 = vand.u32 4294901760, %v21763_v53  ;;  %v25349_v60 = vld [vmem:[#allocation94_spill] sm:$0xff]  ;;  %v25373_v26 = vand.u32 4294901760, %v21962_v9  ;;  %17009 = vmatpush1.bf16.msra.mxu1 %v22017_v21  ;;  %v22231_v9 = vpack.c.bf16 %v21735_v2, %v25334_v57  ;;  %v25406_v57 = vld [vmem:[#allocation40_spill] sm:$0xff] }
 0x1d0   : > { %25324 = vst [vmem:[#allocation26_spill] sm:$0xff] %v22124_v0  ;;  %25328 = vst [vmem:[#allocation27_spill] sm:$0xff] %v22130_v58  ;;  %v25332_v6 = vand.u32 4294901760, %v25331_v50  ;;  %v25339_v0 = vand.u32 4294901760, %v21751_v54  ;;  %v25342_v58 = vand.u32 4294901760, %v21773_v62  ;;  %v25350_v16 = vand.u32 4294901760, %v25349_v60  ;;  %17011 = vmatprep.subr.bf16.mxu1 %v22058_v30  ;;  %16821 = vmatpush1.bf16.msra.mxu0 %v22062_v59 }
 0x1d1   : > { %25337 = vst [vmem:[#allocation30_spill] sm:$0xff] %v22143_v32  ;;  %v25351_v32 = vand.u32 4294901760, %v21818_v43  ;;  %16823 = vmatprep.subr.bf16.mxu0 %v22068_v25  ;;  %25378 = vst [vmem:[#allocation129_spill] sm:$0xff] %v22231_v9  ;;  %v22251_v2 = vpack.c.bf16 %v21818_v43, %v25349_v60  ;;  %v22286_v43 = vpack.c.bf16 %v21941_v38, %v21931_v4  ;;  %v25408_v60 = vld [vmem:[#allocation42_spill] sm:$0xff] }
 0x1d2   : > { %v22136_v8 = vpack.c.bf16 %v25332_v6, %v25330_v52  ;;  %v22149_v17 = vpack.c.bf16 %v25339_v0, %v25338_v35  ;;  %v22155_v52 = vpack.c.bf16 %v25342_v58, %v25341_v28  ;;  %v25344_v6 = vld [vmem:[#allocation39_spill] sm:$0xff]  ;;  %v25353_v35 = vand.u32 4294901760, %v21830_v18 }
 0x1d3   : > { %v25345_v14 = vand.u32 4294901760, %v25344_v6  ;;  %v22168_v0 = vpack.c.bf16 %v25351_v32, %v25350_v16  ;;  %v25356_v28 = vld [vmem:[#allocation43_spill] sm:$0xff]  ;;  %v25363_v32 = vand.u32 4294901760, %v21888_v19  ;;  %v25364_v16 = vand.u32 4294901760, %v21903_v33  ;;  %25382 = vst [vmem:[#allocation133_spill] sm:$0xff] %v22251_v2  ;;  %25389 = vst [vmem:[#allocation140_spill] sm:$0xff] %v22286_v43 }
 0x1d4   : > { %25333 = vst [vmem:[#allocation29_spill] sm:$0xff] %v22136_v8  ;;  %25340 = vst [vmem:[#allocation33_spill] sm:$0xff] %v22149_v17  ;;  %v25346_v8 = vld [vmem:[#allocation41_spill] sm:$0xff]  ;;  %v25354_v17 = vand.u32 4294901760, %v21840_v36 }
 0x1d5   : > { %25343 = vst [vmem:[#allocation34_spill] sm:$0xff] %v22155_v52  ;;  %v25347_v23 = vand.u32 4294901760, %v25346_v8  ;;  %25352 = vst [vmem:[#allocation41_spill] sm:$0xff] %v22168_v0  ;;  %v25357_v52 = vand.u32 4294901760, %v25356_v28 }
 0x1d6   : > { %v22174_v58 = vpack.c.bf16 %v25354_v17, %v25353_v35  ;;  %v22193_v17 = vpack.c.bf16 %v25364_v16, %v25363_v32  ;;  %v25366_v35 = vand.u32 4294901760, %v21914_v40  ;;  %v22216_v32 = vpack.c.bf16 %v25314_v34, %v25312_v10  ;;  %v25401_v34 = vld [vmem:[#allocation21_spill] sm:$0xff]  ;;  %v25411_v16 = vld [vmem:[#allocation47_spill] sm:$0xff] }
 0x1d7   : > { %v22161_v11 = vpack.c.bf16 %v25347_v23, %v25345_v14  ;;  %v22180_v14 = vpack.c.bf16 %v25358_v56, %v25357_v52  ;;  %v25360_v23 = vand.u32 4294901760, %v21869_v41  ;;  %v25369_v52 = vand.u32 4294901760, %v21931_v4  ;;  %v25398_v4 = vld [vmem:[#allocation19_spill] sm:$0xff] }
 0x1d8   : > { %25355 = vst [vmem:[#allocation94_spill] sm:$0xff] %v22174_v58  ;;  %25365 = vst [vmem:[#allocation122_spill] sm:$0xff] %v22193_v17  ;;  %v25367_v58 = vand.u32 4294901760, %v21919_v55  ;;  %17013 = vmatpush1.bf16.msra.mxu1 %v22216_v32  ;;  %v22241_v10 = vpack.c.bf16 %v21751_v54, %v21746_v44  ;;  %v22261_v54 = vpack.c.bf16 %v21840_v36, %v21830_v18  ;;  %v25390_v18 = vld [vmem:[#allocation11_spill] sm:$0xff] }
 0x1d9   : > { %25348 = vst [vmem:[#allocation39_spill] sm:$0xff] %v22161_v11  ;;  %25359 = vst [vmem:[#allocation43_spill] sm:$0xff] %v22180_v14  ;;  %v22186_v11 = vpack.c.bf16 %v25361_v3, %v25360_v23  ;;  %v25370_v14 = vand.u32 4294901760, %v21941_v38  ;;  %v25372_v23 = vand.u32 4294901760, %v21957_v46  ;;  %v22226_v46 = vpack.c.bf16 %v21696_v45, %v25325_v7  ;;  %v25399_v38 = vld [vmem:[#allocation18_spill] sm:$0xff]  ;;  %v25404_v7 = vld [vmem:[#allocation31_spill] sm:$0xff] }
 0x1da   : > { %v22199_v56 = vpack.c.bf16 %v25367_v58, %v25366_v35  ;;  %25375 = vst [vmem:[#allocation126_spill] sm:$0xff] %v22216_v32  ;;  %v22221_v58 = vpack.c.bf16 %v25322_v48, %v25320_v15  ;;  %25380 = vst [vmem:[#allocation131_spill] sm:$0xff] %v22241_v10  ;;  %v22246_v45 = vpack.c.bf16 %v21773_v62, %v21763_v53  ;;  %v25402_v15 = vld [vmem:[#allocation28_spill] sm:$0xff]  ;;  %v25412_v35 = vld [vmem:[#allocation49_spill] sm:$0xff] }
 0x1db   : > { %25362 = vst [vmem:[#allocation121_spill] sm:$0xff] %v22186_v11  ;;  %v22205_v3 = vpack.c.bf16 %v25370_v14, %v25369_v52  ;;  %v22211_v11 = vpack.c.bf16 %v25373_v26, %v25372_v23  ;;  %25377 = vst [vmem:[#allocation128_spill] sm:$0xff] %v22226_v46  ;;  %v22236_v26 = vpack.c.bf16 %v25331_v50, %v25329_v27  ;;  %16825 = vmatpush1.bf16.msra.mxu0 %v22226_v46  ;;  %v25403_v48 = vld [vmem:[#allocation24_spill] sm:$0xff]  ;;  %v25413_v52 = vld [vmem:[#allocation50_spill] sm:$0xff] }
 0x1dc   : > { %25368 = vst [vmem:[#allocation123_spill] sm:$0xff] %v22199_v56  ;;  %25376 = vst [vmem:[#allocation127_spill] sm:$0xff] %v22221_v58  ;;  %17015 = vmatprep.subr.bf16.mxu1 %v22221_v58  ;;  %16827 = vmatprep.subr.bf16.mxu0 %v22231_v9  ;;  %v22256_v50 = vpack.c.bf16 %v25346_v8, %v25344_v6  ;;  %v22266_v44 = vpack.c.bf16 %v21864_v22, %v25356_v28  ;;  %v25392_v22 = vld [vmem:[#allocation65_spill] sm:$0xff]  ;;  %v25400_v8 = vld [vmem:[#allocation20_spill] sm:$0xff] }
 0x1dd   : > { %25371 = vst [vmem:[#allocation124_spill] sm:$0xff] %v22205_v3  ;;  %25374 = vst [vmem:[#allocation125_spill] sm:$0xff] %v22211_v11  ;;  %17017 = vmatpush1.bf16.msra.mxu1 %v22236_v26  ;;  %v22271_v53 = vpack.c.bf16 %v21903_v33, %v21888_v19  ;;  %v22276_v62 = vpack.c.bf16 %v21880_v61, %v21869_v41  ;;  %v22281_v36 = vpack.c.bf16 %v21919_v55, %v21914_v40  ;;  %v25391_v61 = vld [vmem:[#allocation12_spill] sm:$0xff]  ;;  %v25393_v41 = vld [vmem:[#allocation13_spill] sm:$0xff] }
 0x1de   : > { %25379 = vst [vmem:[#allocation130_spill] sm:$0xff] %v22236_v26  ;;  %25381 = vst [vmem:[#allocation132_spill] sm:$0xff] %v22246_v45  ;;  %17019 = vmatprep.subr.bf16.mxu1 %v22241_v10  ;;  %v25394_v55 = vld [vmem:[#allocation15_spill] sm:$0xff]  ;;  %v25395_v19 = vld [vmem:[#allocation14_spill] sm:$0xff]  ;;  %v25428_v26 = vand.u32 4294901760, %v21325_v51 }
 0x1df   : > { %25383 = vst [vmem:[#allocation134_spill] sm:$0xff] %v22256_v50  ;;  %25384 = vst [vmem:[#allocation135_spill] sm:$0xff] %v22261_v54  ;;  %16829 = vmatpush1.bf16.msra.mxu0 %v22246_v45  ;;  %v25396_v33 = vld [vmem:[#allocation16_spill] sm:$0xff]  ;;  %v25397_v40 = vld [vmem:[#allocation17_spill] sm:$0xff]  ;;  %v25425_v45 = vand.u32 4294901760, %v21301_v42  ;;  %v25435_v42 = vand.u32 4294901760, %v21357_v24 }
 0x1e0   : > { %25385 = vst [vmem:[#allocation136_spill] sm:$0xff] %v22266_v44  ;;  %16831 = vmatprep.subr.bf16.mxu0 %v22251_v2  ;;  %25386 = vst [vmem:[#allocation137_spill] sm:$0xff] %v22271_v53  ;;  %v25405_v27 = vld [vmem:[#allocation32_spill] sm:$0xff]  ;;  %v25409_v28 = vld [vmem:[#allocation45_spill] sm:$0xff] }
 0x1e1   : > { %17021 = vmatpush1.bf16.msra.mxu1 %v22256_v50  ;;  %25387 = vst [vmem:[#allocation138_spill] sm:$0xff] %v22276_v62  ;;  %25388 = vst [vmem:[#allocation139_spill] sm:$0xff] %v22281_v36  ;;  %v25407_v6 = vld [vmem:[#allocation36_spill] sm:$0xff]  ;;  %v25424_v50 = vand.u32 4294901760, %v21288_v47  ;;  %v25427_v9 = vld [vmem:[#allocation61_spill] sm:$0xff] }
 0x1e2   : > { %17023 = vmatprep.subr.bf16.mxu1 %v22261_v54  ;;  %v25410_v14 = vld [vmem:[#allocation48_spill] sm:$0xff]  ;;  %v25434_v47 = vld [vmem:[#allocation62_spill] sm:$0xff]  ;;  %v25439_v51 = vld [vmem:[#allocation69_spill] sm:$0xff] }
 0x1e3   : > { %16833 = vmatpush1.bf16.msra.mxu0 %v22266_v44  ;;  %v25414_v23 = vld [vmem:[#allocation52_spill] sm:$0xff]  ;;  %v22337_v10 = vpack.c.bf16 %v25425_v45, %v25424_v50  ;;  %v25436_v45 = vand.u32 4294901760, %v21369_v12 }
 0x1e4   : > { %16835 = vmatprep.subr.bf16.mxu0 %v22271_v53  ;;  %v25419_v53 = vand.u32 4294901760, %v25269_v49  ;;  %v25422_v54 = vld [vmem:[#allocation56_spill] sm:$0xff]  ;;  %v25429_v49 = vand.u32 4294901760, %v21330_v37  ;;  %v25438_v37 = vld [vmem:[#allocation67_spill] sm:$0xff] }
 0x1e5   : > { %17025 = vmatpush1.bf16.msra.mxu1 %v22276_v62  ;;  %v25420_v62 = vand.u32 4294901760, %v25270_v1  ;;  %v25423_v2 = vld [vmem:[#allocation60_spill] sm:$0xff]  ;;  %25426 = vst [vmem:[#allocation12_spill] sm:$0xff] %v22337_v10  ;;  %v25431_v1 = vand.u32 4294901760, %v21380_v31  ;;  %v22358_v50 = vpack.c.bf16 %v25436_v45, %v25435_v42  ;;  %v25451_v45 = vld [vmem:[#allocation79_spill] sm:$0xff] }
 0x1e6   : > { %17027 = vmatprep.subr.bf16.mxu1 %v22281_v36  ;;  %v25418_v36 = vld [vmem:[#allocation57_spill] sm:$0xff]  ;;  %v22344_v46 = vpack.c.bf16 %v25429_v49, %v25428_v26  ;;  %v25440_v26 = vand.u32 4294901760, %v25439_v51  ;;  %v25441_v49 = vld [vmem:[#allocation70_spill] sm:$0xff]  ;;  %v25449_v12 = vld [vmem:[#allocation76_spill] sm:$0xff]  ;;  %v25452_v51 = vand.u32 4294901760, %v25451_v45 }
 0x1e7   : > { %16837 = vmatpush1.bf16.msra.mxu0 %v22286_v43  ;;  %v25417_v43 = vld [vmem:[#allocation55_spill] sm:$0xff]  ;;  %v22329_v44 = vpack.c.bf16 %v25420_v62, %v25419_v53  ;;  %v25432_v53 = vand.u32 4294901760, %v21398_v63  ;;  %25437 = vst [vmem:[#allocation15_spill] sm:$0xff] %v22358_v50  ;;  %v25442_v31 = vand.u32 4294901760, %v25441_v49  ;;  %v25450_v42 = vand.u32 4294901760, %v25449_v12  ;;  %v25454_v49 = vld [vmem:[#allocation74_spill] sm:$0xff] }
 0x1e8   : > { %16839 = vmatprep.subr.bf16.mxu0 %v25390_v18  ;;  %25430 = vst [vmem:[#allocation65_spill] sm:$0xff] %v22344_v46  ;;  %v25444_v63 = vld [vmem:[#allocation71_spill] sm:$0xff]  ;;  %v25461_v12 = vld [vmem:[#allocation120_spill] sm:$0xff] }
 0x1e9   : > { %17029 = vmatpush1.bf16.msra.mxu1 %v22043_v39  ;;  %v25416_v39 = vld [vmem:[#allocation54_spill] sm:$0xff]  ;;  %25421 = vst [vmem:[#allocation11_spill] sm:$0xff] %v22329_v44  ;;  %v22351_v62 = vpack.c.bf16 %v25432_v53, %v25431_v1  ;;  %v25445_v1 = vand.u32 4294901760, %v25444_v63  ;;  %v25446_v53 = vld [vmem:[#allocation72_spill] sm:$0xff]  ;;  %v25456_v63 = vld [vmem:[#allocation75_spill] sm:$0xff] }
 0x1ea   : > { %17031 = vmatprep.subr.bf16.mxu1 %v25391_v61  ;;  %1858 = vmatmul.mubr.f32.vlgmr.msra.gmra.mrb[0].mxu0 %v25392_v22  ;;  %v25447_v24 = vand.u32 4294901760, %v25446_v53  ;;  %v25457_v53 = vand.u32 4294901760, %v25456_v63  ;;  %v25463_v45 = vld [vmem:[#allocation88_spill] sm:$0xff]  ;;  %v25467_v63 = vld [vmem:[#allocation29_spill] sm:$0xff] }
 0x1eb   : > { %16841 = vmatpush1.bf16.msra.mxu0 %v25393_v41  ;;  %1960 = vmatprep.mubr.f32.mxu0 %v25152_v20  ;;  %25433 = vst [vmem:[#allocation13_spill] sm:$0xff] %v22351_v62 }
 0x1ec   : > { %2713 = vmatmul.mubr.f32.vlgmr.msra.gmra.mrb[0].mxu1 %v25392_v22  ;;  %16843 = vmatprep.subr.bf16.mxu0 %v25394_v55  ;;  %v25415_v22 = vld [vmem:[#allocation51_spill] sm:$0xff]  ;;  %v22373_v58 = vpack.c.bf16 %v25447_v24, %v25445_v1 }
 0x1ed   : > { %17033 = vmatpush1.bf16.msra.mxu1 %v25395_v19  ;;  %2815 = vmatprep.mubr.f32.mxu1 %v25152_v20  ;;  %v25460_v24 = vld [vmem:[#allocation119_spill] sm:$0xff] }
 0x1ee   : > { %17035 = vmatprep.subr.bf16.mxu1 %v25396_v33  ;;  %25448 = vst [vmem:[#allocation16_spill] sm:$0xff] %v22373_v58 }
 0x1ef   : > { %16845 = vmatpush1.bf16.msra.mxu0 %v25397_v40 }
 0x1f0   : > { %16847 = vmatprep.subr.bf16.mxu0 %v25398_v4 }
 0x1f1   : > { %17037 = vmatpush1.bf16.msra.mxu1 %v25399_v38 }
 0x1f2   : > { %17039 = vmatprep.subr.bf16.mxu1 %v25400_v8 }
 0x1f3   : > { %16849 = vmatpush1.bf16.msra.mxu0 %v25401_v34 }
 0x1f4   : > { %16851 = vmatprep.subr.bf16.mxu0 %v25402_v15 }
 0x1f5   : > { %17041 = vmatpush1.bf16.msra.mxu1 %v25403_v48 }
 0x1f6   : > { %17043 = vmatprep.subr.bf16.mxu1 %v25404_v7 }
 0x1f7   : > { %16853 = vmatpush1.bf16.msra.mxu0 %v25405_v27 }
 0x1f8   : > { %16855 = vmatprep.subr.bf16.mxu0 %v25406_v57 }
 0x1f9   : > { %17045 = vmatpush1.bf16.msra.mxu1 %v25407_v6 }
 0x1fa   : > { %17047 = vmatprep.subr.bf16.mxu1 %v25408_v60 }
 0x1fb   : > { %16857 = vmatpush1.bf16.msra.mxu0 %v25409_v28 }
 0x1fc   : > { %16859 = vmatprep.subr.bf16.mxu0 %v25410_v14 }
 0x1fd   : > { %17049 = vmatpush1.bf16.msra.mxu1 %v25411_v16 }
 0x1fe   : > { %17051 = vmatprep.subr.bf16.mxu1 %v25412_v35 }
 0x1ff   : > { %16861 = vmatpush1.bf16.msra.mxu0 %v25413_v52 }
 0x200   : > { %16863 = vmatprep.subr.bf16.mxu0 %v25414_v23 }
 0x201   : > { %17053 = vmatpush1.bf16.msra.mxu1 %v25415_v22 }
 0x202   : > { %17055 = vmatprep.subr.bf16.mxu1 %v25416_v39 }
 0x203   : > { %16865 = vmatpush1.bf16.msra.mxu0 %v25417_v43 }
 0x204   : > { %16867 = vmatprep.subr.bf16.mxu0 %v25418_v36 }
 0x205   : > { %17057 = vmatpush1.bf16.msra.mxu1 %v25422_v54 }
 0x206   : > { %17059 = vmatprep.subr.bf16.mxu1 %v25423_v2 }
 0x207   : > { %16869 = vmatpush1.bf16.msra.mxu0 %v25427_v9 }
 0x208   : > { %16871 = vmatprep.subr.bf16.mxu0 %v22329_v44  ;;  %v22366_v44 = vpack.c.bf16 %v25442_v31, %v25440_v26  ;;  %v22382_v26 = vpack.c.bf16 %v25452_v51, %v25450_v42  ;;  %v25455_v31 = vand.u32 4294901760, %v25454_v49  ;;  %v25462_v42 = vld [vmem:[#allocation22_spill] sm:$0xff]  ;;  %v25465_v49 = vld [vmem:[#allocation27_spill] sm:$0xff] }
 0x209   : > { %17061 = vmatpush1.bf16.msra.mxu1 %v25434_v47  ;;  %v25464_v51 = vld [vmem:[#allocation26_spill] sm:$0xff] }
 0x20a   : > { %17063 = vmatprep.subr.bf16.mxu1 %v22337_v10  ;;  %1964 = vmatmul.mubr.f32.vlgmr.msra.gmra.mrb[0].mxu0 %v25438_v37  ;;  %25443 = vst [vmem:[#allocation14_spill] sm:$0xff] %v22366_v44  ;;  %25453 = vst [vmem:[#allocation17_spill] sm:$0xff] %v22382_v26  ;;  %v22389_v1 = vpack.c.bf16 %v25457_v53, %v25455_v31  ;;  %v25466_v31 = vld [vmem:[#allocation30_spill] sm:$0xff]  ;;  %v25468_v53 = vld [vmem:[#allocation33_spill] sm:$0xff] }
 0x20b   : > { %16873 = vmatpush1.bf16.msra.mxu0 %v22344_v46  ;;  %2130 = vmatprep.mubr.f32.mxu0 %v25152_v20 }
 0x20c   : > { %2819 = vmatmul.mubr.f32.vlgmr.msra.gmra.mrb[0].mxu1 %v25438_v37  ;;  %16875 = vmatprep.subr.bf16.mxu0 %v22351_v62  ;;  %25458 = vst [vmem:[#allocation19_spill] sm:$0xff] %v22389_v1  ;;  %v25459_v37 = vld [vmem:[#allocation117_spill] sm:$0xff] }
 0x20d   : > { %17065 = vmatpush1.bf16.msra.mxu1 %v22358_v50  ;;  %2985 = vmatprep.mubr.f32.mxu1 %v25152_v20 }
 0x20e   : > { %17067 = vmatprep.subr.bf16.mxu1 %v22366_v44 }
 0x20f   : > { %16877 = vmatpush1.bf16.msra.mxu0 %v22373_v58 }
 0x210   : > { %16879 = vmatprep.subr.bf16.mxu0 %v22382_v26 }
 0x211   : > { %17069 = vmatpush1.bf16.msra.mxu1 %v22389_v1 }
 0x212   : > { %17071 = vmatprep.subr.bf16.mxu1 %v22074_v13 }
 0x213   : > { %16881 = vmatpush1.bf16.msra.mxu0 %v22080_v29 }
 0x214   : > { %16883 = vmatprep.subr.bf16.mxu0 %v22093_v5  ;;  %v25469_v5 = vld [vmem:[#allocation34_spill] sm:$0xff] }
 0x215   : > { %17073 = vmatpush1.bf16.msra.mxu1 %v25459_v37 }
 0x216   : > { %17075 = vmatprep.subr.bf16.mxu1 %v25460_v24  ;;  %v25470_v24 = vld [vmem:[#allocation39_spill] sm:$0xff] }
 0x217   : > { %16885 = vmatpush1.bf16.msra.mxu0 %v25461_v12  ;;  %v25471_v12 = vld [vmem:[#allocation94_spill] sm:$0xff] }
 0x218   : > { %16887 = vmatprep.subr.bf16.mxu0 %v25462_v42  ;;  %v25472_v42 = vld [vmem:[#allocation43_spill] sm:$0xff] }
 0x219   : > { %17077 = vmatpush1.bf16.msra.mxu1 %v25463_v45 }
 0x21a   : > { %17079 = vmatprep.subr.bf16.mxu1 %v25464_v51  ;;  %v25473_v51 = vld [vmem:[#allocation121_spill] sm:$0xff] }
 0x21b   : > { %16889 = vmatpush1.bf16.msra.mxu0 %v25465_v49 }
 0x21c   : > { %16891 = vmatprep.subr.bf16.mxu0 %v25466_v31  ;;  %v22508_v31 = vld [vmem:[%s22494_s21 + $0x10] sm:$0xff] }
 0x21d   : > { %17081 = vmatpush1.bf16.msra.mxu1 %v25467_v63  ;;  %25480 = vst [vmem:[#allocation28_spill] sm:$0xff] %v22508_v31 }
 0x21e   : > { %17083 = vmatprep.subr.bf16.mxu1 %v25468_v53  ;;  %v22505_v53 = vld [vmem:[%s22494_s21 + $0x18] sm:$0xff] }
 0x21f   : > { %16893 = vmatpush1.bf16.msra.mxu0 %v25469_v5  ;;  %25479 = vst [vmem:[#allocation21_spill] sm:$0xff] %v22505_v53 }
 0x220   : > { %16895 = vmatprep.subr.bf16.mxu0 %v22168_v0  ;;  %v25474_v0 = vld [vmem:[#allocation63_spill] sm:$0xff] }
 0x221   : > { %17085 = vmatpush1.bf16.msra.mxu1 %v25470_v24 }
 0x222   : > { %17087 = vmatprep.subr.bf16.mxu1 %v25471_v12 }
 0x223   : > { %16897 = vmatpush1.bf16.msra.mxu0 %v25472_v42 }
 0x224   : > { %16899 = vmatprep.subr.bf16.mxu0 %v22193_v17 }
 0x225   : > { %17089 = vmatpush1.bf16.msra.mxu1 %v25473_v51 }
 0x226   : > { %17091 = vmatprep.subr.bf16.mxu1 %v22199_v56  ;;  %v22500_v56 = vld [vmem:[%s22494_s21 + $0x8] sm:$0xff] }
 0x227   : > { %16901 = vmatpush1.bf16.msra.mxu0 %v22205_v3  ;;  %v22497_v3 = vld [vmem:[%s22494_s21] sm:$0xff]  ;;  %25478 = vst [vmem:[#allocation20_spill] sm:$0xff] %v22500_v56 }
 0x228   : > { %16903 = vmatprep.subr.bf16.mxu0 %v25390_v18  ;;  %25477 = vst [vmem:[#allocation18_spill] sm:$0xff] %v22497_v3 }
 0x229   : > { %17093 = vmatpush1.bf16.msra.mxu1 %v22211_v11  ;;  %v25476_v11 = vld [vmem:[#allocation66_spill] sm:$0xff] }
 0x22a   : > { %17095 = vmatprep.subr.bf16.mxu1 %v25391_v61  ;;  %2132 = vmatmul.mubr.f32.vlgmr.msra.gmra.mrb[0].mxu0 %v25474_v0 }
 0x22b   : > { %16905 = vmatpush1.bf16.msra.mxu0 %v25393_v41  ;;  %2234 = vmatprep.mubr.f32.mxu0 %v25152_v20 }
 0x22c   : > { %2987 = vmatmul.mubr.f32.vlgmr.msra.gmra.mrb[0].mxu1 %v25474_v0  ;;  %16907 = vmatprep.subr.bf16.mxu0 %v25394_v55 }
 0x22d   : > { %17097 = vmatpush1.bf16.msra.mxu1 %v25395_v19  ;;  %3089 = vmatprep.mubr.f32.mxu1 %v25152_v20 }
 0x22e   : > { %17099 = vmatprep.subr.bf16.mxu1 %v25396_v33 }
 0x22f   : > { %16909 = vmatpush1.bf16.msra.mxu0 %v25397_v40 }
 0x230   : > { %16911 = vmatprep.subr.bf16.mxu0 %v25398_v4 }
 0x231   : > { %17101 = vmatpush1.bf16.msra.mxu1 %v25399_v38 }
 0x232   : > { %17103 = vmatprep.subr.bf16.mxu1 %v25400_v8 }
 0x233   : > { %16913 = vmatpush1.bf16.msra.mxu0 %v25401_v34 }
 0x234   : > { %16915 = vmatprep.subr.bf16.mxu0 %v25402_v15 }
 0x235   : > { %17105 = vmatpush1.bf16.msra.mxu1 %v25403_v48 }
 0x236   : > { %17107 = vmatprep.subr.bf16.mxu1 %v25404_v7 }
 0x237   : > { %16917 = vmatpush1.bf16.msra.mxu0 %v25405_v27 }
 0x238   : > { %16919 = vmatprep.subr.bf16.mxu0 %v25406_v57 }
 0x239   : > { %17109 = vmatpush1.bf16.msra.mxu1 %v25407_v6 }
 0x23a   : > { %17111 = vmatprep.subr.bf16.mxu1 %v25408_v60 }
 0x23b   : > { %16921 = vmatpush1.bf16.msra.mxu0 %v25409_v28 }
 0x23c   : > { %16923 = vmatprep.subr.bf16.mxu0 %v25410_v14 }
 0x23d   : > { %17113 = vmatpush1.bf16.msra.mxu1 %v25411_v16 }
 0x23e   : > { %17115 = vmatprep.subr.bf16.mxu1 %v25412_v35 }
 0x23f   : > { %16925 = vmatpush1.bf16.msra.mxu0 %v25413_v52 }
 0x240   : > { %16927 = vmatprep.subr.bf16.mxu0 %v25414_v23 }
 0x241   : > { %17117 = vmatpush1.bf16.msra.mxu1 %v25415_v22 }
 0x242   : > { %17119 = vmatprep.subr.bf16.mxu1 %v25416_v39 }
 0x243   : > { %16929 = vmatpush1.bf16.msra.mxu0 %v25417_v43 }
 0x244   : > { %16931 = vmatprep.subr.bf16.mxu0 %v25418_v36 }
 0x245   : > { %17121 = vmatpush1.bf16.msra.mxu1 %v25422_v54 }
 0x246   : > { %17123 = vmatprep.subr.bf16.mxu1 %v25423_v2 }
 0x247   : > { %16933 = vmatpush1.bf16.msra.mxu0 %v25427_v9 }
 0x248   : > { %17127 = vmatprep.subr.bf16.mxu0 %v25390_v18 }
 0x249   : > { %17125 = vmatpush1.bf16.msra.mxu1 %v25434_v47 }
 0x24a   : > { %2236 = vmatmul.mubr.f32.vlgmr.msra.gmra.mrb[0].mxu0 %v25474_v0  ;;  %17319 = vmatprep.subr.bf16.mxu1 %v25391_v61 }
 0x24b   : > { %17129 = vmatpush1.bf16.msra.mxu0 %v25393_v41  ;;  %3229 = vmatprep.mubr.f32.mxu0 %v25152_v20 }
 0x24c   : > { %3091 = vmatmul.mubr.f32.vlgmr.msra.gmra.mrb[0].mxu1 %v25474_v0  ;;  %17131 = vmatprep.subr.bf16.mxu0 %v25394_v55  ;;  %v25475_v0 = vld [vmem:[#allocation64_spill] sm:$0xff] }
 0x24d   : > { %17321 = vmatpush1.bf16.msra.mxu1 %v25395_v19  ;;  %4084 = vmatprep.mubr.f32.mxu1 %v25152_v20 }
 0x24e   : > { %17323 = vmatprep.subr.bf16.mxu1 %v25396_v33 }
 0x24f   : > { %17133 = vmatpush1.bf16.msra.mxu0 %v25397_v40 }
 0x250   : > { %17135 = vmatprep.subr.bf16.mxu0 %v25398_v4 }
 0x251   : > { %17325 = vmatpush1.bf16.msra.mxu1 %v25399_v38 }
 0x252   : > { %17327 = vmatprep.subr.bf16.mxu1 %v25400_v8 }
 0x253   : > { %17137 = vmatpush1.bf16.msra.mxu0 %v25401_v34 }
 0x254   : > { %17139 = vmatprep.subr.bf16.mxu0 %v25402_v15 }
 0x255   : > { %17329 = vmatpush1.bf16.msra.mxu1 %v25403_v48 }
 0x256   : > { %17331 = vmatprep.subr.bf16.mxu1 %v25404_v7 }
 0x257   : > { %17141 = vmatpush1.bf16.msra.mxu0 %v25405_v27 }
 0x258   : > { %17143 = vmatprep.subr.bf16.mxu0 %v25406_v57 }
 0x259   : > { %17333 = vmatpush1.bf16.msra.mxu1 %v25407_v6 }
 0x25a   : > { %17335 = vmatprep.subr.bf16.mxu1 %v25408_v60 }
 0x25b   : > { %17145 = vmatpush1.bf16.msra.mxu0 %v25409_v28 }
 0x25c   : > { %17147 = vmatprep.subr.bf16.mxu0 %v25410_v14 }
 0x25d   : > { %17337 = vmatpush1.bf16.msra.mxu1 %v25411_v16 }
 0x25e   : > { %17339 = vmatprep.subr.bf16.mxu1 %v25412_v35 }
 0x25f   : > { %17149 = vmatpush1.bf16.msra.mxu0 %v25413_v52 }
 0x260   : > { %17151 = vmatprep.subr.bf16.mxu0 %v25414_v23 }
 0x261   : > { %17341 = vmatpush1.bf16.msra.mxu1 %v25415_v22 }
 0x262   : > { %17343 = vmatprep.subr.bf16.mxu1 %v25416_v39 }
 0x263   : > { %17153 = vmatpush1.bf16.msra.mxu0 %v25417_v43 }
 0x264   : > { %17155 = vmatprep.subr.bf16.mxu0 %v25418_v36 }
 0x265   : > { %17345 = vmatpush1.bf16.msra.mxu1 %v25422_v54 }
 0x266   : > { %17347 = vmatprep.subr.bf16.mxu1 %v25423_v2 }
 0x267   : > { %17157 = vmatpush1.bf16.msra.mxu0 %v25427_v9 }
 0x268   : > { %17159 = vmatprep.subr.bf16.mxu0 %v25475_v0 }
 0x269   : > { %17349 = vmatpush1.bf16.msra.mxu1 %v25434_v47 }
 0x26a   : > { %17351 = vmatprep.subr.bf16.mxu1 %v25476_v11 }
 0x31d   : > { %v2237_v17 = vpop.f32.mrb[0].mxu0 }
 0x31e   : > { %v3097_v51 = vadd.f32 %v2237_v17, %v22497_v3  ;;  %v2239_v0 = vpop.f32.mrb[1].mxu0 }
 0x31f   : > { %v3092_v42 = vpop.f32.mrb[0].mxu1  ;;  %v3098_v12 = vadd.f32 %v2239_v0, %v22500_v56 }
 0x320   : > { %v16296_v11 = vmul.f32 -1.442695, %v3097_v51  ;;  %v3094_v24 = vpop.f32.mrb[1].mxu1  ;;  %v3099_v49 = vadd.f32 %v3092_v42, %v22508_v31  ;;  %v25482_v51 = vld [vmem:[#allocation10_spill] sm:$0xff] }
 0x321   : > { %v16297_v5 = vmul.f32 -1.442695, %v3098_v12  ;;  %v3100_v63 = vadd.f32 %v3094_v24, %v22505_v53 }
 0x322   : > { %20258 = vpow2.f32 %v16296_v11  ;;  %v25481_v11 = vstv %s21152_s19 }
 0x323   : > { %20260 = vpow2.f32 %v16297_v5  ;;  %v16298_v17 = vmul.f32 -1.442695, %v3100_v63  ;;  %v1319_v56 = vmul.f32 %v25482_v51, %v25481_v11 }
 0x324   : > { %20262 = vtanh.f32 %v3099_v49 }
 0x325   : > { %20264 = vpow2.f32 %v16298_v17  ;;  %v3121_v29 = vrot.slane %v1319_v56, 7 }
 0x32c   : > { %v20259_v3 = vpop.eup %20258 }
 0x32d   : > { %v3104_v45 = vadd.f32 1.0, %v20259_v3  ;;  %v20261_v0 = vpop.eup %20260  ;;  %v3130_v3 = vstv %s3129_s23 }
 0x32e   : > { %v3110_v12 = vadd.f32 1.0, %v20261_v0  ;;  %v20263_v5 = vpop.eup %20262 }
 0x32f   : > { %20266 = vrcp.f32 %v3104_v45  ;;  %v20265_v37 = vpop.eup %20264 }
 0x330   : > { %20268 = vrcp.f32 %v3110_v12  ;;  %v3117_v63 = vadd.f32 1.0, %v20265_v37 }
 0x332   : > { %20270 = vrcp.f32 %v3117_v63  ;;  %v25488_v63 = vld [vmem:[#allocation80_spill] sm:$0xff] }
 0x339   : > { %v20267_v24 = vpop.eup %20266 }
 0x33a   : > { %v3124_v53 = vmul.f32 %v20267_v24, %v20263_v5  ;;  %v20269_v42 = vpop.eup %20268  ;;  %v25485_v5 = vld [vmem:[#allocation73_spill] sm:$0xff] }
 0x33b   : > { %v3123_v31 = vmul.f32 %v20269_v42, %v3121_v29  ;;  %v25486_v24 = vld [vmem:[#allocation77_spill] sm:$0xff]  ;;  %v25487_v42 = vld [vmem:[#allocation78_spill] sm:$0xff] }
 0x33c   : > { %v20271_v17 = vpop.eup %20270 }
 0x33d   : > { %v3125_v49 = vadd.f32 %v3124_v53, %v3123_v31  ;;  %v25484_v53 = vld [vmem:[#allocation68_spill] sm:$0xff] }
 0x33f   : > { %20272 = vtanh.f32 %v3125_v49  ;;  %v22516_v45 = vmul.f32 %v3130_v3, %v3125_v49  ;;  %v25490_v49 = vld [vmem:[#allocation82_spill] sm:$0xff] }
 0x349   : > { %v20273_v0 = vpop.eup %20272 }
 0x34a   : > { %v22518_v12 = vmul.f32 %v20273_v0, %v20271_v17  ;;  %v25491_v17 = vld [vmem:[#allocation83_spill] sm:$0xff]  ;;  %v25492_v0 = vld [vmem:[#allocation85_spill] sm:$0xff] }
 0x34c   : > { %25483 = vst [vmem:[#allocation24_spill] sm:$0xff] %v22518_v12  ;;  %v3131_v11 = vmul.f32 %v3130_v3, %v22518_v12  ;;  %v25489_v3 = vld [vmem:[#allocation81_spill] sm:$0xff]  ;;  %v25496_v12 = vld [vmem:[#allocation91_spill] sm:$0xff] }
 0x34e   : > { %v22521_v51 = vand.u32 4294901760, %v3131_v11 }
 0x350   : > { %v22524_v56 = vsub.f32 %v3131_v11, %v22521_v51  ;;  %v25493_v11 = vld [vmem:[#allocation87_spill] sm:$0xff] }
 0x352   : > { %v22527_v37 = vand.u32 4294901760, %v22524_v56 }
 0x354   : > { %v3233_v29 = vsub.f32 %v22524_v56, %v22527_v37 }
 0x356   : > { %v3234_v31 = vand.u32 4294901760, %v3233_v29  ;;  %v25494_v29 = vld [vmem:[#allocation89_spill] sm:$0xff] }
 0x358   : > { %3235 = vmatmul.mubr.f32.vlgmr.msra.gmra.mrb[2].mxu0 %v3234_v31  ;;  %4090 = vmatmul.mubr.f32.vlgmr.msra.gmra.mrb[2].mxu1 %v3234_v31  ;;  %v25495_v31 = vld [vmem:[#allocation90_spill] sm:$0xff] }
 0x359   : > { %17161 = vmatpush1.bf16.msra.mxu0 %v25484_v53  ;;  %17353 = vmatpush1.bf16.msra.mxu1 %v25485_v5 }
 0x35a   : > { %17163 = vmatprep.subr.bf16.mxu0 %v25486_v24  ;;  %17355 = vmatprep.subr.bf16.mxu1 %v25487_v42  ;;  %v25497_v42 = vld [vmem:[#allocation92_spill] sm:$0xff]  ;;  %v25498_v24 = vld [vmem:[#allocation93_spill] sm:$0xff] }
 0x35b   : > { %3465 = vmatprep.mubr.f32.mxu0 %v25152_v20  ;;  %4320 = vmatprep.mubr.f32.mxu1 %v25152_v20 }
 0x35d   : > { %17165 = vmatpush1.bf16.msra.mxu0 %v25488_v63  ;;  %17357 = vmatpush1.bf16.msra.mxu1 %v25489_v3  ;;  %v25499_v63 = vld [vmem:[#allocation35_spill] sm:$0xff]  ;;  %v25500_v3 = vld [vmem:[#allocation37_spill] sm:$0xff] }
 0x35e   : > { %17167 = vmatprep.subr.bf16.mxu0 %v25490_v49  ;;  %17359 = vmatprep.subr.bf16.mxu1 %v25491_v17  ;;  %v25501_v49 = vld [vmem:[#allocation38_spill] sm:$0xff]  ;;  %v25502_v17 = vld [vmem:[#allocation95_spill] sm:$0xff] }
 0x361   : > { %17169 = vmatpush1.bf16.msra.mxu0 %v25492_v0  ;;  %17361 = vmatpush1.bf16.msra.mxu1 %v25493_v11  ;;  %v25503_v0 = vld [vmem:[#allocation96_spill] sm:$0xff] }
 0x362   : > { %17171 = vmatprep.subr.bf16.mxu0 %v25494_v29  ;;  %17363 = vmatprep.subr.bf16.mxu1 %v25495_v31  ;;  %v25504_v11 = vld [vmem:[#allocation44_spill] sm:$0xff]  ;;  %v25505_v29 = vld [vmem:[#allocation97_spill] sm:$0xff]  ;;  %v25506_v31 = vld [vmem:[#allocation46_spill] sm:$0xff] }
 0x365   : > { %17173 = vmatpush1.bf16.msra.mxu0 %v25496_v12  ;;  %17365 = vmatpush1.bf16.msra.mxu1 %v25497_v42  ;;  %v25507_v12 = vld [vmem:[#allocation98_spill] sm:$0xff]  ;;  %v25508_v42 = vld [vmem:[#allocation99_spill] sm:$0xff] }
 0x366   : > { %17175 = vmatprep.subr.bf16.mxu0 %v25498_v24  ;;  %17367 = vmatprep.subr.bf16.mxu1 %v25499_v63  ;;  %v25509_v24 = vld [vmem:[#allocation100_spill] sm:$0xff]  ;;  %v25510_v63 = vld [vmem:[#allocation53_spill] sm:$0xff] }
 0x369   : > { %17177 = vmatpush1.bf16.msra.mxu0 %v25500_v3  ;;  %17369 = vmatpush1.bf16.msra.mxu1 %v25501_v49  ;;  %v25511_v3 = vld [vmem:[#allocation101_spill] sm:$0xff]  ;;  %v25512_v49 = vld [vmem:[#allocation104_spill] sm:$0xff] }
 0x36a   : > { %17179 = vmatprep.subr.bf16.mxu0 %v25502_v17  ;;  %17371 = vmatprep.subr.bf16.mxu1 %v25503_v0  ;;  %v25513_v17 = vld [vmem:[#allocation109_spill] sm:$0xff]  ;;  %v25514_v0 = vld [vmem:[#allocation58_spill] sm:$0xff] }
 0x36d   : > { %17181 = vmatpush1.bf16.msra.mxu0 %v25504_v11  ;;  %17373 = vmatpush1.bf16.msra.mxu1 %v25505_v29  ;;  %v25515_v11 = vld [vmem:[#allocation106_spill] sm:$0xff] }
 0x36e   : > { %17183 = vmatprep.subr.bf16.mxu0 %v25506_v31  ;;  %17375 = vmatprep.subr.bf16.mxu1 %v25507_v12  ;;  %v25516_v12 = vld [vmem:[#allocation110_spill] sm:$0xff] }
 0x371   : > { %17185 = vmatpush1.bf16.msra.mxu0 %v25508_v42  ;;  %17377 = vmatpush1.bf16.msra.mxu1 %v25509_v24  ;;  %v25517_v42 = vld [vmem:[#allocation112_spill] sm:$0xff]  ;;  %v25518_v24 = vld [vmem:[#allocation111_spill] sm:$0xff] }
 0x372   : > { %17187 = vmatprep.subr.bf16.mxu0 %v25510_v63  ;;  %17379 = vmatprep.subr.bf16.mxu1 %v25511_v3  ;;  %v25519_v63 = vld [vmem:[#allocation59_spill] sm:$0xff]  ;;  %v25524_v3 = vld [vmem:[#allocation114_spill] sm:$0xff] }
 0x375   : > { %17189 = vmatpush1.bf16.msra.mxu0 %v25512_v49  ;;  %17381 = vmatpush1.bf16.msra.mxu1 %v25513_v17  ;;  %v25520_v17 = vld [vmem:[#allocation102_spill] sm:$0xff]  ;;  %v25523_v49 = vld [vmem:[#allocation107_spill] sm:$0xff] }
 0x376   : > { %17191 = vmatprep.subr.bf16.mxu0 %v25514_v0  ;;  %17383 = vmatprep.subr.bf16.mxu1 %v25515_v11  ;;  %v25521_v0 = vld [vmem:[#allocation103_spill] sm:$0xff]  ;;  %v25522_v11 = vld [vmem:[#allocation105_spill] sm:$0xff] }
 0x378   : > { %3467 = vmatmul.mubr.f32.vlgmr.msra.gmra.mrb[2].mxu0 %v22521_v51  ;;  %4322 = vmatmul.mubr.f32.vlgmr.msra.gmra.mrb[2].mxu1 %v22521_v51 }
 0x379   : > { %17193 = vmatpush1.bf16.msra.mxu0 %v25516_v12  ;;  %17385 = vmatpush1.bf16.msra.mxu1 %v25517_v42  ;;  %v25525_v42 = vld [vmem:[#allocation115_spill] sm:$0xff] }
 0x37a   : > { %17195 = vmatprep.subr.bf16.mxu0 %v25518_v24  ;;  %17387 = vmatprep.subr.bf16.mxu1 %v25519_v63 }
 0x37b   : > { %3601 = vmatprep.mubr.f32.mxu0 %v25152_v20  ;;  %4456 = vmatprep.mubr.f32.mxu1 %v25152_v20 }
 0x37d   : > { %17197 = vmatpush1.bf16.msra.mxu0 %v25520_v17  ;;  %17389 = vmatpush1.bf16.msra.mxu1 %v25521_v0  ;;  %v25526_v17 = vld [vmem:[#allocation127_spill] sm:$0xff]  ;;  %v25527_v0 = vld [vmem:[#allocation128_spill] sm:$0xff] }
 0x37e   : > { %17199 = vmatprep.subr.bf16.mxu0 %v25522_v11  ;;  %17391 = vmatprep.subr.bf16.mxu1 %v25523_v49  ;;  %v25528_v11 = vld [vmem:[#allocation130_spill] sm:$0xff]  ;;  %v25529_v49 = vld [vmem:[#allocation129_spill] sm:$0xff] }
 0x381   : > { %17201 = vmatpush1.bf16.msra.mxu0 %v25524_v3  ;;  %17393 = vmatpush1.bf16.msra.mxu1 %v22017_v21  ;;  %v25530_v3 = vld [vmem:[#allocation131_spill] sm:$0xff]  ;;  %v25531_v21 = vld [vmem:[#allocation132_spill] sm:$0xff] }
 0x382   : > { %17203 = vmatprep.subr.bf16.mxu0 %v25525_v42  ;;  %17395 = vmatprep.subr.bf16.mxu1 %v22058_v30  ;;  %v25532_v42 = vld [vmem:[#allocation134_spill] sm:$0xff]  ;;  %v25533_v30 = vld [vmem:[#allocation133_spill] sm:$0xff] }
 0x385   : > { %17205 = vmatpush1.bf16.msra.mxu0 %v22062_v59  ;;  %17397 = vmatpush1.bf16.msra.mxu1 %v22216_v32  ;;  %v25534_v59 = vld [vmem:[#allocation135_spill] sm:$0xff]  ;;  %v25535_v32 = vld [vmem:[#allocation136_spill] sm:$0xff] }
 0x386   : > { %17207 = vmatprep.subr.bf16.mxu0 %v22068_v25  ;;  %17399 = vmatprep.subr.bf16.mxu1 %v25526_v17  ;;  %v25536_v25 = vld [vmem:[#allocation138_spill] sm:$0xff]  ;;  %v25537_v17 = vld [vmem:[#allocation137_spill] sm:$0xff] }
 0x389   : > { %17209 = vmatpush1.bf16.msra.mxu0 %v25527_v0  ;;  %17401 = vmatpush1.bf16.msra.mxu1 %v25528_v11  ;;  %v25538_v0 = vld [vmem:[#allocation139_spill] sm:$0xff]  ;;  %v25539_v11 = vld [vmem:[#allocation140_spill] sm:$0xff] }
 0x38a   : > { %17211 = vmatprep.subr.bf16.mxu0 %v25529_v49  ;;  %17403 = vmatprep.subr.bf16.mxu1 %v25530_v3  ;;  %v25540_v49 = vld [vmem:[#allocation113_spill] sm:$0xff] }
 0x38d   : > { %17213 = vmatpush1.bf16.msra.mxu0 %v25531_v21  ;;  %17405 = vmatpush1.bf16.msra.mxu1 %v25532_v42 }
 0x38e   : > { %17215 = vmatprep.subr.bf16.mxu0 %v25533_v30  ;;  %17407 = vmatprep.subr.bf16.mxu1 %v25534_v59 }
 0x391   : > { %17217 = vmatpush1.bf16.msra.mxu0 %v25535_v32  ;;  %17409 = vmatpush1.bf16.msra.mxu1 %v25536_v25 }
 0x392   : > { %17219 = vmatprep.subr.bf16.mxu0 %v25537_v17  ;;  %17411 = vmatprep.subr.bf16.mxu1 %v25538_v0 }
 0x395   : > { %17221 = vmatpush1.bf16.msra.mxu0 %v25539_v11  ;;  %17413 = vmatpush1.bf16.msra.mxu1 %v25540_v49 }
 0x396   : > { %17223 = vmatprep.subr.bf16.mxu0 %v25390_v18  ;;  %17415 = vmatprep.subr.bf16.mxu1 %v25391_v61 }
 0x398   : > { %3604 = vmatmul.mubr.f32.vlgmr.msra.gmra.mrb[2].mxu0 %v22524_v56  ;;  %4459 = vmatmul.mubr.f32.vlgmr.msra.gmra.mrb[2].mxu1 %v22524_v56  ;;  %v25541_v56 = vld [vmem:[#allocation11_spill] sm:$0xff] }
 0x399   : > { %17225 = vmatpush1.bf16.msra.mxu0 %v25393_v41  ;;  %17417 = vmatpush1.bf16.msra.mxu1 %v25395_v19 }
 0x39a   : > { %17227 = vmatprep.subr.bf16.mxu0 %v25394_v55  ;;  %17419 = vmatprep.subr.bf16.mxu1 %v25396_v33 }
 0x39b   : > { %3706 = vmatprep.mubr.f32.mxu0 %v25152_v20  ;;  %4561 = vmatprep.mubr.f32.mxu1 %v25152_v20 }
 0x39d   : > { %17229 = vmatpush1.bf16.msra.mxu0 %v25397_v40  ;;  %17421 = vmatpush1.bf16.msra.mxu1 %v25399_v38 }
 0x39e   : > { %17231 = vmatprep.subr.bf16.mxu0 %v25398_v4  ;;  %17423 = vmatprep.subr.bf16.mxu1 %v25400_v8 }
 0x3a1   : > { %17233 = vmatpush1.bf16.msra.mxu0 %v25401_v34  ;;  %17425 = vmatpush1.bf16.msra.mxu1 %v25403_v48 }
 0x3a2   : > { %17235 = vmatprep.subr.bf16.mxu0 %v25402_v15  ;;  %17427 = vmatprep.subr.bf16.mxu1 %v25404_v7 }
 0x3a5   : > { %17237 = vmatpush1.bf16.msra.mxu0 %v25405_v27  ;;  %17429 = vmatpush1.bf16.msra.mxu1 %v25407_v6 }
 0x3a6   : > { %17239 = vmatprep.subr.bf16.mxu0 %v25406_v57  ;;  %17431 = vmatprep.subr.bf16.mxu1 %v25408_v60 }
 0x3a9   : > { %17241 = vmatpush1.bf16.msra.mxu0 %v25409_v28  ;;  %17433 = vmatpush1.bf16.msra.mxu1 %v25411_v16 }
 0x3aa   : > { %17243 = vmatprep.subr.bf16.mxu0 %v25410_v14  ;;  %17435 = vmatprep.subr.bf16.mxu1 %v25412_v35 }
 0x3ad   : > { %17245 = vmatpush1.bf16.msra.mxu0 %v25413_v52  ;;  %17437 = vmatpush1.bf16.msra.mxu1 %v25415_v22 }
 0x3ae   : > { %17247 = vmatprep.subr.bf16.mxu0 %v25414_v23  ;;  %17439 = vmatprep.subr.bf16.mxu1 %v25416_v39 }
 0x3b1   : > { %17249 = vmatpush1.bf16.msra.mxu0 %v25417_v43  ;;  %17441 = vmatpush1.bf16.msra.mxu1 %v25422_v54 }
 0x3b2   : > { %17251 = vmatprep.subr.bf16.mxu0 %v25418_v36  ;;  %17443 = vmatprep.subr.bf16.mxu1 %v25423_v2 }
 0x3b5   : > { %17253 = vmatpush1.bf16.msra.mxu0 %v25427_v9  ;;  %17445 = vmatpush1.bf16.msra.mxu1 %v25434_v47 }
 0x3b6   : > { %17255 = vmatprep.subr.bf16.mxu0 %v25541_v56  ;;  %17447 = vmatprep.subr.bf16.mxu1 %v22337_v10  ;;  %v25547_v10 = vld [vmem:[#allocation88_spill] sm:$0xff]  ;;  %v25548_v56 = vld [vmem:[#allocation22_spill] sm:$0xff] }
 0x3b8   : > { %3710 = vmatmul.mubr.f32.vlgmr.msra.gmra.mrb[2].mxu0 %v22527_v37  ;;  %4565 = vmatmul.mubr.f32.vlgmr.msra.gmra.mrb[2].mxu1 %v22527_v37  ;;  %v25542_v37 = vld [vmem:[#allocation25_spill] sm:$0xff] }
 0x3b9   : > { %17257 = vmatpush1.bf16.msra.mxu0 %v22344_v46  ;;  %17449 = vmatpush1.bf16.msra.mxu1 %v22358_v50  ;;  %v25543_v46 = vld [vmem:[#allocation117_spill] sm:$0xff]  ;;  %v25544_v50 = vld [vmem:[#allocation118_spill] sm:$0xff] }
 0x3ba   : > { %17259 = vmatprep.subr.bf16.mxu0 %v22351_v62  ;;  %17451 = vmatprep.subr.bf16.mxu1 %v22366_v44  ;;  %v25545_v62 = vld [vmem:[#allocation119_spill] sm:$0xff]  ;;  %v25546_v44 = vld [vmem:[#allocation120_spill] sm:$0xff] }
 0x3bb   : > { %3876 = vmatprep.mubr.f32.mxu0 %v25152_v20  ;;  %4731 = vmatprep.mubr.f32.mxu1 %v25152_v20 }
 0x3bd   : > { %17261 = vmatpush1.bf16.msra.mxu0 %v22373_v58  ;;  %17453 = vmatpush1.bf16.msra.mxu1 %v22389_v1  ;;  %v25549_v58 = vld [vmem:[#allocation26_spill] sm:$0xff]  ;;  %v25550_v1 = vld [vmem:[#allocation27_spill] sm:$0xff] }
 0x3be   : > { %17263 = vmatprep.subr.bf16.mxu0 %v22382_v26  ;;  %17455 = vmatprep.subr.bf16.mxu1 %v22074_v13  ;;  %v25551_v26 = vld [vmem:[#allocation29_spill] sm:$0xff]  ;;  %v25552_v13 = vld [vmem:[#allocation30_spill] sm:$0xff] }
 0x3c1   : > { %17265 = vmatpush1.bf16.msra.mxu0 %v25542_v37  ;;  %17457 = vmatpush1.bf16.msra.mxu1 %v25543_v46  ;;  %v25553_v37 = vld [vmem:[#allocation33_spill] sm:$0xff]  ;;  %v25554_v46 = vld [vmem:[#allocation34_spill] sm:$0xff] }
 0x3c2   : > { %17267 = vmatprep.subr.bf16.mxu0 %v25544_v50  ;;  %17459 = vmatprep.subr.bf16.mxu1 %v25545_v62  ;;  %v25555_v50 = vld [vmem:[#allocation39_spill] sm:$0xff]  ;;  %v25556_v62 = vld [vmem:[#allocation41_spill] sm:$0xff] }
 0x3c5   : > { %17269 = vmatpush1.bf16.msra.mxu0 %v25546_v44  ;;  %17461 = vmatpush1.bf16.msra.mxu1 %v25547_v10  ;;  %v25557_v44 = vld [vmem:[#allocation94_spill] sm:$0xff]  ;;  %v25558_v10 = vld [vmem:[#allocation43_spill] sm:$0xff] }
 0x3c6   : > { %17271 = vmatprep.subr.bf16.mxu0 %v25548_v56  ;;  %17463 = vmatprep.subr.bf16.mxu1 %v25549_v58  ;;  %v25559_v56 = vld [vmem:[#allocation121_spill] sm:$0xff]  ;;  %v25560_v58 = vld [vmem:[#allocation122_spill] sm:$0xff] }
 0x3c9   : > { %17273 = vmatpush1.bf16.msra.mxu0 %v25550_v1  ;;  %17465 = vmatpush1.bf16.msra.mxu1 %v25551_v26  ;;  %v25561_v1 = vld [vmem:[#allocation123_spill] sm:$0xff]  ;;  %v25562_v26 = vld [vmem:[#allocation124_spill] sm:$0xff] }
 0x3ca   : > { %17275 = vmatprep.subr.bf16.mxu0 %v25552_v13  ;;  %17467 = vmatprep.subr.bf16.mxu1 %v25553_v37  ;;  %v25563_v13 = vld [vmem:[#allocation125_spill] sm:$0xff] }
 0x3cd   : > { %17277 = vmatpush1.bf16.msra.mxu0 %v25554_v46  ;;  %17469 = vmatpush1.bf16.msra.mxu1 %v25555_v50  ;;  %v25567_v46 = vld [vmem:[#allocation20_spill] sm:$0xff] }
 0x3ce   : > { %17279 = vmatprep.subr.bf16.mxu0 %v25556_v62  ;;  %17471 = vmatprep.subr.bf16.mxu1 %v25557_v44  ;;  %v25566_v62 = vld [vmem:[#allocation18_spill] sm:$0xff] }
 0x3d1   : > { %17281 = vmatpush1.bf16.msra.mxu0 %v25558_v10  ;;  %17473 = vmatpush1.bf16.msra.mxu1 %v25559_v56 }
 0x3d2   : > { %17283 = vmatprep.subr.bf16.mxu0 %v25560_v58  ;;  %17475 = vmatprep.subr.bf16.mxu1 %v25561_v1 }
 0x3d5   : > { %17285 = vmatpush1.bf16.msra.mxu0 %v25562_v26  ;;  %17477 = vmatpush1.bf16.msra.mxu1 %v25563_v13  ;;  %v25565_v13 = vld [vmem:[#allocation66_spill] sm:$0xff] }
 0x3d6   : > { %17287 = vmatprep.subr.bf16.mxu0 %v25390_v18  ;;  %17479 = vmatprep.subr.bf16.mxu1 %v25391_v61 }
 0x3d8   : > { %3878 = vmatmul.mubr.f32.vlgmr.msra.gmra.mrb[2].mxu0 %v22521_v51  ;;  %4733 = vmatmul.mubr.f32.vlgmr.msra.gmra.mrb[2].mxu1 %v22521_v51 }
 0x3d9   : > { %17289 = vmatpush1.bf16.msra.mxu0 %v25393_v41  ;;  %17481 = vmatpush1.bf16.msra.mxu1 %v25395_v19 }
 0x3da   : > { %17291 = vmatprep.subr.bf16.mxu0 %v25394_v55  ;;  %17483 = vmatprep.subr.bf16.mxu1 %v25396_v33 }
 0x3db   : > { %3980 = vmatprep.mubr.f32.mxu0 %v25152_v20  ;;  %4835 = vmatprep.mubr.f32.mxu1 %v25152_v20 }
 0x3dd   : > { %17293 = vmatpush1.bf16.msra.mxu0 %v25397_v40  ;;  %17485 = vmatpush1.bf16.msra.mxu1 %v25399_v38 }
 0x3de   : > { %17295 = vmatprep.subr.bf16.mxu0 %v25398_v4  ;;  %17487 = vmatprep.subr.bf16.mxu1 %v25400_v8 }
 0x3e1   : > { %17297 = vmatpush1.bf16.msra.mxu0 %v25401_v34  ;;  %17489 = vmatpush1.bf16.msra.mxu1 %v25403_v48 }
 0x3e2   : > { %17299 = vmatprep.subr.bf16.mxu0 %v25402_v15  ;;  %17491 = vmatprep.subr.bf16.mxu1 %v25404_v7 }
 0x3e5   : > { %17301 = vmatpush1.bf16.msra.mxu0 %v25405_v27  ;;  %17493 = vmatpush1.bf16.msra.mxu1 %v25407_v6 }
 0x3e6   : > { %17303 = vmatprep.subr.bf16.mxu0 %v25406_v57  ;;  %17495 = vmatprep.subr.bf16.mxu1 %v25408_v60 }
 0x3e9   : > { %17305 = vmatpush1.bf16.msra.mxu0 %v25409_v28  ;;  %17497 = vmatpush1.bf16.msra.mxu1 %v25411_v16 }
 0x3ea   : > { %17307 = vmatprep.subr.bf16.mxu0 %v25410_v14  ;;  %17499 = vmatprep.subr.bf16.mxu1 %v25412_v35 }
 0x3ed   : > { %17309 = vmatpush1.bf16.msra.mxu0 %v25413_v52  ;;  %17501 = vmatpush1.bf16.msra.mxu1 %v25415_v22 }
 0x3ee   : > { %17311 = vmatprep.subr.bf16.mxu0 %v25414_v23  ;;  %17503 = vmatprep.subr.bf16.mxu1 %v25416_v39 }
 0x3f1   : > { %17313 = vmatpush1.bf16.msra.mxu0 %v25417_v43  ;;  %17505 = vmatpush1.bf16.msra.mxu1 %v25422_v54 }
 0x3f2   : > { %17315 = vmatprep.subr.bf16.mxu0 %v25418_v36  ;;  %17507 = vmatprep.subr.bf16.mxu1 %v25423_v2 }
 0x3f5   : > { %17317 = vmatpush1.bf16.msra.mxu0 %v25427_v9  ;;  %17509 = vmatpush1.bf16.msra.mxu1 %v25434_v47 }
 0x3f6   : > { %17511 = vmatprep.subr.bf16.mxu0 %v25390_v18  ;;  %17703 = vmatprep.subr.bf16.mxu1 %v25391_v61 }
 0x3f8   : > { %3982 = vmatmul.mubr.f32.vlgmr.msra.gmra.mrb[2].mxu0 %v22521_v51  ;;  %4837 = vmatmul.mubr.f32.vlgmr.msra.gmra.mrb[2].mxu1 %v22521_v51  ;;  %v25564_v51 = vld [vmem:[#allocation64_spill] sm:$0xff] }
 0x3f9   : > { %17513 = vmatpush1.bf16.msra.mxu0 %v25393_v41  ;;  %17705 = vmatpush1.bf16.msra.mxu1 %v25395_v19 }
 0x3fa   : > { %17515 = vmatprep.subr.bf16.mxu0 %v25394_v55  ;;  %17707 = vmatprep.subr.bf16.mxu1 %v25396_v33 }
 0x3fb   : > { %4990 = vmatprep.mubr.f32.mxu0 %v25152_v20  ;;  %5845 = vmatprep.mubr.f32.mxu1 %v25152_v20 }
 0x3fd   : > { %17517 = vmatpush1.bf16.msra.mxu0 %v25397_v40  ;;  %17709 = vmatpush1.bf16.msra.mxu1 %v25399_v38 }
 0x3fe   : > { %17519 = vmatprep.subr.bf16.mxu0 %v25398_v4  ;;  %17711 = vmatprep.subr.bf16.mxu1 %v25400_v8 }
 0x401   : > { %17521 = vmatpush1.bf16.msra.mxu0 %v25401_v34  ;;  %17713 = vmatpush1.bf16.msra.mxu1 %v25403_v48 }
 0x402   : > { %17523 = vmatprep.subr.bf16.mxu0 %v25402_v15  ;;  %17715 = vmatprep.subr.bf16.mxu1 %v25404_v7 }
 0x405   : > { %17525 = vmatpush1.bf16.msra.mxu0 %v25405_v27  ;;  %17717 = vmatpush1.bf16.msra.mxu1 %v25407_v6 }
 0x406   : > { %17527 = vmatprep.subr.bf16.mxu0 %v25406_v57  ;;  %17719 = vmatprep.subr.bf16.mxu1 %v25408_v60 }
 0x409   : > { %17529 = vmatpush1.bf16.msra.mxu0 %v25409_v28  ;;  %17721 = vmatpush1.bf16.msra.mxu1 %v25411_v16 }
 0x40a   : > { %17531 = vmatprep.subr.bf16.mxu0 %v25410_v14  ;;  %17723 = vmatprep.subr.bf16.mxu1 %v25412_v35 }
 0x40d   : > { %17533 = vmatpush1.bf16.msra.mxu0 %v25413_v52  ;;  %17725 = vmatpush1.bf16.msra.mxu1 %v25415_v22 }
 0x40e   : > { %17535 = vmatprep.subr.bf16.mxu0 %v25414_v23  ;;  %17727 = vmatprep.subr.bf16.mxu1 %v25416_v39 }
 0x411   : > { %17537 = vmatpush1.bf16.msra.mxu0 %v25417_v43  ;;  %17729 = vmatpush1.bf16.msra.mxu1 %v25422_v54  ;;  %v25569_v43 = vld [vmem:[#allocation28_spill] sm:$0xff] }
 0x412   : > { %17539 = vmatprep.subr.bf16.mxu0 %v25418_v36  ;;  %17731 = vmatprep.subr.bf16.mxu1 %v25423_v2 }
 0x415   : > { %17541 = vmatpush1.bf16.msra.mxu0 %v25427_v9  ;;  %17733 = vmatpush1.bf16.msra.mxu1 %v25434_v47  ;;  %v25568_v47 = vld [vmem:[#allocation21_spill] sm:$0xff] }
 0x416   : > { %17543 = vmatprep.subr.bf16.mxu0 %v25564_v51  ;;  %17735 = vmatprep.subr.bf16.mxu1 %v25565_v13 }
 0x4cb   : > { %v3983_v26 = vpop.f32.mrb[2].mxu0  ;;  %v4838_v1 = vpop.f32.mrb[2].mxu1 }
 0x4cc   : > { %v4847_v58 = vrot.slane %v3983_v26, 7  ;;  %v3985_v56 = vpop.f32.mrb[3].mxu0  ;;  %v4840_v10 = vpop.f32.mrb[3].mxu1  ;;  %v4849_v54 = vrot.slane %v4838_v1, 7 }
 0x4cd   : > { %v4848_v44 = vrot.slane %v3985_v56, 7  ;;  %v4850_v9 = vrot.slane %v4840_v10, 7 }
 0x4ce   : > { %v4855_v50 = vadd.f32 %v4847_v58, %v25566_v62  ;;  %v4857_v39 = vadd.f32 %v4849_v54, %v25569_v43  ;;  %v4888_v54 = vstv %s4887_s25 }
 0x4cf   : > { %v4856_v37 = vadd.f32 %v4848_v44, %v25567_v46  ;;  %v4858_v51 = vadd.f32 %v4850_v9, %v25568_v47 }
 0x4d0   : > { %v16299_v36 = vmul.f32 -1.442695, %v4855_v50 }
 0x4d1   : > { %v16300_v2 = vmul.f32 -1.442695, %v4856_v37  ;;  %v16301_v13 = vmul.f32 -1.442695, %v4858_v51 }
 0x4d2   : > { %20274 = vpow2.f32 %v16299_v36 }
 0x4d3   : > { %20276 = vpow2.f32 %v16300_v2  ;;  %v4879_v2 = vrot.slane %v22516_v45, 7 }
 0x4d4   : > { %20278 = vpow2.f32 %v16301_v13 }
 0x4d5   : > { %20280 = vtanh.f32 %v4857_v39 }
 0x4dc   : > { %v20275_v26 = vpop.eup %20274 }
 0x4dd   : > { %v20277_v23 = vpop.eup %20276  ;;  %v4862_v22 = vadd.f32 1.0, %v20275_v26 }
 0x4de   : > { %v4868_v58 = vadd.f32 1.0, %v20277_v23  ;;  %v20279_v46 = vpop.eup %20278 }
 0x4df   : > { %20282 = vrcp.f32 %v4862_v22  ;;  %v20281_v10 = vpop.eup %20280  ;;  %v4875_v62 = vadd.f32 1.0, %v20279_v46  ;;  %v25571_v46 = vld [vmem:[#allocation78_spill] sm:$0xff] }
 0x4e0   : > { %20284 = vrcp.f32 %v4868_v58  ;;  %v25570_v58 = vld [vmem:[#allocation77_spill] sm:$0xff] }
 0x4e1   : > { %20286 = vrcp.f32 %v4875_v62  ;;  %v25577_v62 = vld [vmem:[#allocation87_spill] sm:$0xff] }
 0x4e9   : > { %v20283_v44 = vpop.eup %20282 }
 0x4ea   : > { %v20285_v9 = vpop.eup %20284  ;;  %v4882_v36 = vmul.f32 %v20283_v44, %v20281_v10  ;;  %v25572_v10 = vld [vmem:[#allocation80_spill] sm:$0xff]  ;;  %v25573_v44 = vld [vmem:[#allocation81_spill] sm:$0xff] }
 0x4eb   : > { %v4881_v47 = vmul.f32 %v20285_v9, %v4879_v2  ;;  %v20287_v39 = vpop.eup %20286  ;;  %v25574_v2 = vld [vmem:[#allocation82_spill] sm:$0xff]  ;;  %v25575_v9 = vld [vmem:[#allocation83_spill] sm:$0xff] }
 0x4ed   : > { %v4883_v43 = vadd.f32 %v4882_v36, %v4881_v47  ;;  %v25576_v36 = vld [vmem:[#allocation85_spill] sm:$0xff] }
 0x4ee   : > { %v25578_v47 = vld [vmem:[#allocation89_spill] sm:$0xff] }
 0x4ef   : > { %20288 = vtanh.f32 %v4883_v43  ;;  %v22751_v13 = vmul.f32 %v4888_v54, %v4883_v43  ;;  %v25580_v43 = vld [vmem:[#allocation91_spill] sm:$0xff] }
 0x4f9   : > { %v20289_v23 = vpop.eup %20288 }
 0x4fa   : > { %v22753_v22 = vmul.f32 %v20289_v23, %v20287_v39  ;;  %v25581_v39 = vld [vmem:[#allocation92_spill] sm:$0xff]  ;;  %v25582_v23 = vld [vmem:[#allocation93_spill] sm:$0xff] }
 0x4fc   : > { %v4889_v50 = vmul.f32 %v4888_v54, %v22753_v22  ;;  %v25579_v54 = vld [vmem:[#allocation90_spill] sm:$0xff] }
 0x4fe   : > { %v4892_v1 = vrot.slane %v4889_v50, 1  ;;  %v25583_v50 = vld [vmem:[#allocation35_spill] sm:$0xff] }
 0x500   : > { %v22756_v56 = vand.u32 4294901760, %v4892_v1 }
 0x502   : > { %v22759_v45 = vsub.f32 %v4892_v1, %v22756_v56  ;;  %v25584_v1 = vld [vmem:[#allocation37_spill] sm:$0xff] }
 0x504   : > { %v22762_v37 = vand.u32 4294901760, %v22759_v45 }
 0x506   : > { %v4994_v51 = vsub.f32 %v22759_v45, %v22762_v37 }
 0x508   : > { %v4995_v26 = vand.u32 4294901760, %v4994_v51  ;;  %v25585_v51 = vld [vmem:[#allocation38_spill] sm:$0xff] }
 0x50a   : > { %4996 = vmatmul.mubr.f32.vlgmr.msra.gmra.mrb[4].mxu0 %v4995_v26  ;;  %5851 = vmatmul.mubr.f32.vlgmr.msra.gmra.mrb[4].mxu1 %v4995_v26  ;;  %v25586_v26 = vld [vmem:[#allocation95_spill] sm:$0xff] }
 0x50b   : > { %17545 = vmatpush1.bf16.msra.mxu0 %v25484_v53  ;;  %17737 = vmatpush1.bf16.msra.mxu1 %v25485_v5 }
 0x50c   : > { %17547 = vmatprep.subr.bf16.mxu0 %v25570_v58  ;;  %17739 = vmatprep.subr.bf16.mxu1 %v25571_v46 }
 0x50d   : > { %5226 = vmatprep.mubr.f32.mxu0 %v25152_v20  ;;  %6081 = vmatprep.mubr.f32.mxu1 %v25152_v20 }
 0x50f   : > { %17549 = vmatpush1.bf16.msra.mxu0 %v25572_v10  ;;  %17741 = vmatpush1.bf16.msra.mxu1 %v25573_v44 }
 0x510   : > { %17551 = vmatprep.subr.bf16.mxu0 %v25574_v2  ;;  %17743 = vmatprep.subr.bf16.mxu1 %v25575_v9 }
 0x513   : > { %17553 = vmatpush1.bf16.msra.mxu0 %v25576_v36  ;;  %17745 = vmatpush1.bf16.msra.mxu1 %v25577_v62  ;;  %v25587_v36 = vld [vmem:[#allocation96_spill] sm:$0xff] }
 0x514   : > { %17555 = vmatprep.subr.bf16.mxu0 %v25578_v47  ;;  %17747 = vmatprep.subr.bf16.mxu1 %v25579_v54  ;;  %v25588_v62 = vld [vmem:[#allocation44_spill] sm:$0xff] }
 0x517   : > { %17557 = vmatpush1.bf16.msra.mxu0 %v25580_v43  ;;  %17749 = vmatpush1.bf16.msra.mxu1 %v25581_v39  ;;  %v25589_v43 = vld [vmem:[#allocation98_spill] sm:$0xff]  ;;  %v25590_v39 = vld [vmem:[#allocation99_spill] sm:$0xff] }
 0x518   : > { %17559 = vmatprep.subr.bf16.mxu0 %v25582_v23  ;;  %17751 = vmatprep.subr.bf16.mxu1 %v25583_v50  ;;  %v25591_v23 = vld [vmem:[#allocation100_spill] sm:$0xff]  ;;  %v25592_v50 = vld [vmem:[#allocation53_spill] sm:$0xff] }
 0x51b   : > { %17561 = vmatpush1.bf16.msra.mxu0 %v25584_v1  ;;  %17753 = vmatpush1.bf16.msra.mxu1 %v25585_v51  ;;  %v25593_v1 = vld [vmem:[#allocation101_spill] sm:$0xff]  ;;  %v25594_v51 = vld [vmem:[#allocation104_spill] sm:$0xff] }
 0x51c   : > { %17563 = vmatprep.subr.bf16.mxu0 %v25586_v26  ;;  %17755 = vmatprep.subr.bf16.mxu1 %v25587_v36  ;;  %v25595_v26 = vld [vmem:[#allocation109_spill] sm:$0xff]  ;;  %v25596_v36 = vld [vmem:[#allocation58_spill] sm:$0xff] }
 0x51f   : > { %17565 = vmatpush1.bf16.msra.mxu0 %v25588_v62  ;;  %17757 = vmatpush1.bf16.msra.mxu1 %v25505_v29  ;;  %v25597_v62 = vld [vmem:[#allocation106_spill] sm:$0xff] }
 0x520   : > { %17567 = vmatprep.subr.bf16.mxu0 %v25506_v31  ;;  %17759 = vmatprep.subr.bf16.mxu1 %v25589_v43 }
 0x523   : > { %17569 = vmatpush1.bf16.msra.mxu0 %v25590_v39  ;;  %17761 = vmatpush1.bf16.msra.mxu1 %v25591_v23  ;;  %v25598_v39 = vld [vmem:[#allocation112_spill] sm:$0xff]  ;;  %v25609_v23 = vld [vmem:[#allocation86_spill] sm:$0xff] }
 0x524   : > { %17571 = vmatprep.subr.bf16.mxu0 %v25592_v50  ;;  %17763 = vmatprep.subr.bf16.mxu1 %v25593_v1  ;;  %v25603_v1 = vld [vmem:[#allocation114_spill] sm:$0xff] }
 0x525   : > { %v25608_v50 = vld [vmem:[#allocation126_spill] sm:$0xff] }
 0x527   : > { %17573 = vmatpush1.bf16.msra.mxu0 %v25594_v51  ;;  %17765 = vmatpush1.bf16.msra.mxu1 %v25595_v26  ;;  %v25599_v26 = vld [vmem:[#allocation102_spill] sm:$0xff]  ;;  %v25602_v51 = vld [vmem:[#allocation107_spill] sm:$0xff] }
 0x528   : > { %17575 = vmatprep.subr.bf16.mxu0 %v25596_v36  ;;  %17767 = vmatprep.subr.bf16.mxu1 %v25597_v62  ;;  %v25600_v36 = vld [vmem:[#allocation103_spill] sm:$0xff]  ;;  %v25601_v62 = vld [vmem:[#allocation105_spill] sm:$0xff] }
 0x52a   : > { %5228 = vmatmul.mubr.f32.vlgmr.msra.gmra.mrb[4].mxu0 %v22756_v56  ;;  %6083 = vmatmul.mubr.f32.vlgmr.msra.gmra.mrb[4].mxu1 %v22756_v56 }
 0x52b   : > { %17577 = vmatpush1.bf16.msra.mxu0 %v25516_v12  ;;  %17769 = vmatpush1.bf16.msra.mxu1 %v25598_v39  ;;  %v25604_v12 = vld [vmem:[#allocation108_spill] sm:$0xff]  ;;  %v25605_v39 = vld [vmem:[#allocation115_spill] sm:$0xff] }
 0x52c   : > { %17579 = vmatprep.subr.bf16.mxu0 %v25518_v24  ;;  %17771 = vmatprep.subr.bf16.mxu1 %v25519_v63  ;;  %v25606_v24 = vld [vmem:[#allocation116_spill] sm:$0xff] }
 0x52d   : > { %5362 = vmatprep.mubr.f32.mxu0 %v25152_v20  ;;  %6217 = vmatprep.mubr.f32.mxu1 %v25152_v20  ;;  %v25607_v63 = vld [vmem:[#allocation84_spill] sm:$0xff] }
 0x52f   : > { %17581 = vmatpush1.bf16.msra.mxu0 %v25599_v26  ;;  %17773 = vmatpush1.bf16.msra.mxu1 %v25600_v36  ;;  %v25610_v26 = vld [vmem:[#allocation127_spill] sm:$0xff]  ;;  %v25611_v36 = vld [vmem:[#allocation128_spill] sm:$0xff] }
 0x530   : > { %17583 = vmatprep.subr.bf16.mxu0 %v25601_v62  ;;  %17775 = vmatprep.subr.bf16.mxu1 %v25602_v51  ;;  %v25612_v62 = vld [vmem:[#allocation130_spill] sm:$0xff]  ;;  %v25613_v51 = vld [vmem:[#allocation129_spill] sm:$0xff] }
 0x533   : > { %17585 = vmatpush1.bf16.msra.mxu0 %v25603_v1  ;;  %17777 = vmatpush1.bf16.msra.mxu1 %v25604_v12 }
 0x534   : > { %17587 = vmatprep.subr.bf16.mxu0 %v25605_v39  ;;  %17779 = vmatprep.subr.bf16.mxu1 %v25606_v24 }
 0x537   : > { %17589 = vmatpush1.bf16.msra.mxu0 %v25607_v63  ;;  %17781 = vmatpush1.bf16.msra.mxu1 %v25608_v50  ;;  %v25638_v50 = vld [vmem:[#allocation88_spill] sm:$0xff]  ;;  %v25639_v63 = vld [vmem:[#allocation22_spill] sm:$0xff] }
 0x538   : > { %17591 = vmatprep.subr.bf16.mxu0 %v25609_v23  ;;  %17783 = vmatprep.subr.bf16.mxu1 %v25610_v26  ;;  %v25629_v26 = vld [vmem:[#allocation16_spill] sm:$0xff]  ;;  %v25632_v23 = vld [vmem:[#allocation23_spill] sm:$0xff] }
 0x53b   : > { %17593 = vmatpush1.bf16.msra.mxu0 %v25611_v36  ;;  %17785 = vmatpush1.bf16.msra.mxu1 %v25612_v62  ;;  %v25627_v62 = vld [vmem:[#allocation13_spill] sm:$0xff]  ;;  %v25628_v36 = vld [vmem:[#allocation14_spill] sm:$0xff] }
 0x53c   : > { %17595 = vmatprep.subr.bf16.mxu0 %v25613_v51  ;;  %17787 = vmatprep.subr.bf16.mxu1 %v25530_v3  ;;  %v25625_v3 = vld [vmem:[#allocation65_spill] sm:$0xff]  ;;  %v25626_v51 = vld [vmem:[#allocation15_spill] sm:$0xff] }
 0x53f   : > { %17597 = vmatpush1.bf16.msra.mxu0 %v25531_v21  ;;  %17789 = vmatpush1.bf16.msra.mxu1 %v25532_v42  ;;  %v25623_v42 = vld [vmem:[#allocation11_spill] sm:$0xff]  ;;  %v25624_v21 = vld [vmem:[#allocation12_spill] sm:$0xff] }
 0x540   : > { %17599 = vmatprep.subr.bf16.mxu0 %v25533_v30  ;;  %17791 = vmatprep.subr.bf16.mxu1 %v25534_v59  ;;  %v25621_v59 = vld [vmem:[#allocation61_spill] sm:$0xff]  ;;  %v25622_v30 = vld [vmem:[#allocation62_spill] sm:$0xff] }
 0x543   : > { %17601 = vmatpush1.bf16.msra.mxu0 %v25535_v32  ;;  %17793 = vmatpush1.bf16.msra.mxu1 %v25536_v25  ;;  %v25619_v25 = vld [vmem:[#allocation57_spill] sm:$0xff]  ;;  %v25620_v32 = vld [vmem:[#allocation60_spill] sm:$0xff] }
 0x544   : > { %17603 = vmatprep.subr.bf16.mxu0 %v25537_v17  ;;  %17795 = vmatprep.subr.bf16.mxu1 %v25538_v0  ;;  %v25617_v0 = vld [vmem:[#allocation55_spill] sm:$0xff]  ;;  %v25618_v17 = vld [vmem:[#allocation56_spill] sm:$0xff] }
 0x547   : > { %17605 = vmatpush1.bf16.msra.mxu0 %v25539_v11  ;;  %17797 = vmatpush1.bf16.msra.mxu1 %v25540_v49  ;;  %v25615_v49 = vld [vmem:[#allocation52_spill] sm:$0xff]  ;;  %v25616_v11 = vld [vmem:[#allocation54_spill] sm:$0xff] }
 0x548   : > { %17607 = vmatprep.subr.bf16.mxu0 %v25390_v18  ;;  %17799 = vmatprep.subr.bf16.mxu1 %v25391_v61 }
 0x54a   : > { %5365 = vmatmul.mubr.f32.vlgmr.msra.gmra.mrb[4].mxu0 %v22759_v45  ;;  %6220 = vmatmul.mubr.f32.vlgmr.msra.gmra.mrb[4].mxu1 %v22759_v45  ;;  %v25614_v45 = vld [vmem:[#allocation51_spill] sm:$0xff] }
 0x54b   : > { %17609 = vmatpush1.bf16.msra.mxu0 %v25393_v41  ;;  %17801 = vmatpush1.bf16.msra.mxu1 %v25395_v19 }
 0x54c   : > { %17611 = vmatprep.subr.bf16.mxu0 %v25394_v55  ;;  %17803 = vmatprep.subr.bf16.mxu1 %v25396_v33 }
 0x54d   : > { %5467 = vmatprep.mubr.f32.mxu0 %v25152_v20  ;;  %6322 = vmatprep.mubr.f32.mxu1 %v25152_v20 }
 0x54f   : > { %17613 = vmatpush1.bf16.msra.mxu0 %v25397_v40  ;;  %17805 = vmatpush1.bf16.msra.mxu1 %v25399_v38 }
 0x550   : > { %17615 = vmatprep.subr.bf16.mxu0 %v25398_v4  ;;  %17807 = vmatprep.subr.bf16.mxu1 %v25400_v8 }
 0x553   : > { %17617 = vmatpush1.bf16.msra.mxu0 %v25401_v34  ;;  %17809 = vmatpush1.bf16.msra.mxu1 %v25403_v48 }
 0x554   : > { %17619 = vmatprep.subr.bf16.mxu0 %v25402_v15  ;;  %17811 = vmatprep.subr.bf16.mxu1 %v25404_v7 }
 0x557   : > { %17621 = vmatpush1.bf16.msra.mxu0 %v25405_v27  ;;  %17813 = vmatpush1.bf16.msra.mxu1 %v25407_v6 }
 0x558   : > { %17623 = vmatprep.subr.bf16.mxu0 %v25406_v57  ;;  %17815 = vmatprep.subr.bf16.mxu1 %v25408_v60 }
 0x55b   : > { %17625 = vmatpush1.bf16.msra.mxu0 %v25409_v28  ;;  %17817 = vmatpush1.bf16.msra.mxu1 %v25411_v16 }
 0x55c   : > { %17627 = vmatprep.subr.bf16.mxu0 %v25410_v14  ;;  %17819 = vmatprep.subr.bf16.mxu1 %v25412_v35 }
 0x55f   : > { %17629 = vmatpush1.bf16.msra.mxu0 %v25413_v52  ;;  %17821 = vmatpush1.bf16.msra.mxu1 %v25614_v45 }
 0x560   : > { %17631 = vmatprep.subr.bf16.mxu0 %v25615_v49  ;;  %17823 = vmatprep.subr.bf16.mxu1 %v25616_v11 }
 0x563   : > { %17633 = vmatpush1.bf16.msra.mxu0 %v25617_v0  ;;  %17825 = vmatpush1.bf16.msra.mxu1 %v25618_v17 }
 0x564   : > { %17635 = vmatprep.subr.bf16.mxu0 %v25619_v25  ;;  %17827 = vmatprep.subr.bf16.mxu1 %v25620_v32 }
 0x567   : > { %17637 = vmatpush1.bf16.msra.mxu0 %v25621_v59  ;;  %17829 = vmatpush1.bf16.msra.mxu1 %v25622_v30 }
 0x568   : > { %17639 = vmatprep.subr.bf16.mxu0 %v25623_v42  ;;  %17831 = vmatprep.subr.bf16.mxu1 %v25624_v21  ;;  %v25630_v42 = vld [vmem:[#allocation19_spill] sm:$0xff]  ;;  %v25631_v21 = vld [vmem:[#allocation17_spill] sm:$0xff] }
 0x56a   : > { %5471 = vmatmul.mubr.f32.vlgmr.msra.gmra.mrb[4].mxu0 %v22762_v37  ;;  %6326 = vmatmul.mubr.f32.vlgmr.msra.gmra.mrb[4].mxu1 %v22762_v37  ;;  %v25633_v37 = vld [vmem:[#allocation25_spill] sm:$0xff] }
 0x56b   : > { %17641 = vmatpush1.bf16.msra.mxu0 %v25625_v3  ;;  %17833 = vmatpush1.bf16.msra.mxu1 %v25626_v51  ;;  %v25634_v3 = vld [vmem:[#allocation117_spill] sm:$0xff]  ;;  %v25635_v51 = vld [vmem:[#allocation118_spill] sm:$0xff] }
 0x56c   : > { %17643 = vmatprep.subr.bf16.mxu0 %v25627_v62  ;;  %17835 = vmatprep.subr.bf16.mxu1 %v25628_v36  ;;  %v25636_v62 = vld [vmem:[#allocation119_spill] sm:$0xff]  ;;  %v25637_v36 = vld [vmem:[#allocation120_spill] sm:$0xff] }
 0x56d   : > { %5637 = vmatprep.mubr.f32.mxu0 %v25152_v20  ;;  %6492 = vmatprep.mubr.f32.mxu1 %v25152_v20 }
 0x56f   : > { %17645 = vmatpush1.bf16.msra.mxu0 %v25629_v26  ;;  %17837 = vmatpush1.bf16.msra.mxu1 %v25630_v42  ;;  %v25640_v26 = vld [vmem:[#allocation26_spill] sm:$0xff]  ;;  %v25641_v42 = vld [vmem:[#allocation27_spill] sm:$0xff] }
 0x570   : > { %17647 = vmatprep.subr.bf16.mxu0 %v25631_v21  ;;  %17839 = vmatprep.subr.bf16.mxu1 %v25632_v23  ;;  %v25642_v21 = vld [vmem:[#allocation29_spill] sm:$0xff]  ;;  %v25643_v23 = vld [vmem:[#allocation30_spill] sm:$0xff] }
 0x573   : > { %17649 = vmatpush1.bf16.msra.mxu0 %v25633_v37  ;;  %17841 = vmatpush1.bf16.msra.mxu1 %v25634_v3  ;;  %v25644_v37 = vld [vmem:[#allocation33_spill] sm:$0xff]  ;;  %v25645_v3 = vld [vmem:[#allocation34_spill] sm:$0xff] }
 0x574   : > { %17651 = vmatprep.subr.bf16.mxu0 %v25635_v51  ;;  %17843 = vmatprep.subr.bf16.mxu1 %v25636_v62  ;;  %v25646_v51 = vld [vmem:[#allocation39_spill] sm:$0xff]  ;;  %v25647_v62 = vld [vmem:[#allocation41_spill] sm:$0xff] }
 0x577   : > { %17653 = vmatpush1.bf16.msra.mxu0 %v25637_v36  ;;  %17845 = vmatpush1.bf16.msra.mxu1 %v25638_v50  ;;  %v25648_v36 = vld [vmem:[#allocation94_spill] sm:$0xff]  ;;  %v25649_v50 = vld [vmem:[#allocation43_spill] sm:$0xff] }
 0x578   : > { %17655 = vmatprep.subr.bf16.mxu0 %v25639_v63  ;;  %17847 = vmatprep.subr.bf16.mxu1 %v25640_v26  ;;  %v25650_v63 = vld [vmem:[#allocation121_spill] sm:$0xff]  ;;  %v25651_v26 = vld [vmem:[#allocation122_spill] sm:$0xff] }
 0x57b   : > { %17657 = vmatpush1.bf16.msra.mxu0 %v25641_v42  ;;  %17849 = vmatpush1.bf16.msra.mxu1 %v25642_v21  ;;  %v25652_v42 = vld [vmem:[#allocation123_spill] sm:$0xff]  ;;  %v25653_v21 = vld [vmem:[#allocation124_spill] sm:$0xff] }
 0x57c   : > { %17659 = vmatprep.subr.bf16.mxu0 %v25643_v23  ;;  %17851 = vmatprep.subr.bf16.mxu1 %v25644_v37  ;;  %v25654_v23 = vld [vmem:[#allocation125_spill] sm:$0xff] }
 0x57f   : > { %17661 = vmatpush1.bf16.msra.mxu0 %v25645_v3  ;;  %17853 = vmatpush1.bf16.msra.mxu1 %v25646_v51  ;;  %v22985_v3 = vld [vmem:[%s22494_s21 + $0x8] sm:$0xff] }
 0x580   : > { %17663 = vmatprep.subr.bf16.mxu0 %v25647_v62  ;;  %17855 = vmatprep.subr.bf16.mxu1 %v25648_v36  ;;  %v22981_v62 = vld [vmem:[%s22494_s21] sm:$0xff] }
 0x581   : > { %25657 = vst [vmem:[#allocation31_spill] sm:$0xff] %v22981_v62 }
 0x583   : > { %17665 = vmatpush1.bf16.msra.mxu0 %v25649_v50  ;;  %17857 = vmatpush1.bf16.msra.mxu1 %v25650_v63 }
 0x584   : > { %17667 = vmatprep.subr.bf16.mxu0 %v25651_v26  ;;  %17859 = vmatprep.subr.bf16.mxu1 %v25652_v42 }
 0x587   : > { %17669 = vmatpush1.bf16.msra.mxu0 %v25653_v21  ;;  %17861 = vmatpush1.bf16.msra.mxu1 %v25654_v23  ;;  %v25656_v23 = vld [vmem:[#allocation66_spill] sm:$0xff] }
 0x588   : > { %17671 = vmatprep.subr.bf16.mxu0 %v25390_v18  ;;  %17863 = vmatprep.subr.bf16.mxu1 %v25391_v61 }
 0x58a   : > { %5639 = vmatmul.mubr.f32.vlgmr.msra.gmra.mrb[4].mxu0 %v22756_v56  ;;  %6494 = vmatmul.mubr.f32.vlgmr.msra.gmra.mrb[4].mxu1 %v22756_v56 }
 0x58b   : > { %17673 = vmatpush1.bf16.msra.mxu0 %v25393_v41  ;;  %17865 = vmatpush1.bf16.msra.mxu1 %v25395_v19 }
 0x58c   : > { %17675 = vmatprep.subr.bf16.mxu0 %v25394_v55  ;;  %17867 = vmatprep.subr.bf16.mxu1 %v25396_v33 }
 0x58d   : > { %5741 = vmatprep.mubr.f32.mxu0 %v25152_v20  ;;  %6596 = vmatprep.mubr.f32.mxu1 %v25152_v20 }
 0x58f   : > { %17677 = vmatpush1.bf16.msra.mxu0 %v25397_v40  ;;  %17869 = vmatpush1.bf16.msra.mxu1 %v25399_v38 }
 0x590   : > { %17679 = vmatprep.subr.bf16.mxu0 %v25398_v4  ;;  %17871 = vmatprep.subr.bf16.mxu1 %v25400_v8 }
 0x593   : > { %17681 = vmatpush1.bf16.msra.mxu0 %v25401_v34  ;;  %17873 = vmatpush1.bf16.msra.mxu1 %v25403_v48 }
 0x594   : > { %17683 = vmatprep.subr.bf16.mxu0 %v25402_v15  ;;  %17875 = vmatprep.subr.bf16.mxu1 %v25404_v7 }
 0x597   : > { %17685 = vmatpush1.bf16.msra.mxu0 %v25405_v27  ;;  %17877 = vmatpush1.bf16.msra.mxu1 %v25407_v6 }
 0x598   : > { %17687 = vmatprep.subr.bf16.mxu0 %v25406_v57  ;;  %17879 = vmatprep.subr.bf16.mxu1 %v25408_v60 }
 0x59b   : > { %17689 = vmatpush1.bf16.msra.mxu0 %v25409_v28  ;;  %17881 = vmatpush1.bf16.msra.mxu1 %v25411_v16 }
 0x59c   : > { %17691 = vmatprep.subr.bf16.mxu0 %v25410_v14  ;;  %17883 = vmatprep.subr.bf16.mxu1 %v25412_v35 }
 0x59f   : > { %17693 = vmatpush1.bf16.msra.mxu0 %v25413_v52  ;;  %17885 = vmatpush1.bf16.msra.mxu1 %v25614_v45 }
 0x5a0   : > { %17695 = vmatprep.subr.bf16.mxu0 %v25615_v49  ;;  %17887 = vmatprep.subr.bf16.mxu1 %v25616_v11 }
 0x5a3   : > { %17697 = vmatpush1.bf16.msra.mxu0 %v25617_v0  ;;  %17889 = vmatpush1.bf16.msra.mxu1 %v25618_v17 }
 0x5a4   : > { %17699 = vmatprep.subr.bf16.mxu0 %v25619_v25  ;;  %17891 = vmatprep.subr.bf16.mxu1 %v25620_v32 }
 0x5a7   : > { %17701 = vmatpush1.bf16.msra.mxu0 %v25621_v59  ;;  %17893 = vmatpush1.bf16.msra.mxu1 %v25622_v30 }
 0x5a8   : > { %17895 = vmatprep.subr.bf16.mxu0 %v25390_v18  ;;  %18087 = vmatprep.subr.bf16.mxu1 %v25391_v61 }
 0x5aa   : > { %5743 = vmatmul.mubr.f32.vlgmr.msra.gmra.mrb[4].mxu0 %v22756_v56  ;;  %6598 = vmatmul.mubr.f32.vlgmr.msra.gmra.mrb[4].mxu1 %v22756_v56  ;;  %v25655_v56 = vld [vmem:[#allocation64_spill] sm:$0xff] }
 0x5ab   : > { %17897 = vmatpush1.bf16.msra.mxu0 %v25393_v41  ;;  %18089 = vmatpush1.bf16.msra.mxu1 %v25395_v19 }
 0x5ac   : > { %17899 = vmatprep.subr.bf16.mxu0 %v25394_v55  ;;  %18091 = vmatprep.subr.bf16.mxu1 %v25396_v33 }
 0x5ad   : > { %6751 = vmatprep.mubr.f32.mxu0 %v25152_v20  ;;  %7606 = vmatprep.mubr.f32.mxu1 %v25152_v20 }
 0x5af   : > { %17901 = vmatpush1.bf16.msra.mxu0 %v25397_v40  ;;  %18093 = vmatpush1.bf16.msra.mxu1 %v25399_v38 }
 0x5b0   : > { %17903 = vmatprep.subr.bf16.mxu0 %v25398_v4  ;;  %18095 = vmatprep.subr.bf16.mxu1 %v25400_v8 }
 0x5b3   : > { %17905 = vmatpush1.bf16.msra.mxu0 %v25401_v34  ;;  %18097 = vmatpush1.bf16.msra.mxu1 %v25403_v48 }
 0x5b4   : > { %17907 = vmatprep.subr.bf16.mxu0 %v25402_v15  ;;  %18099 = vmatprep.subr.bf16.mxu1 %v25404_v7 }
 0x5b7   : > { %17909 = vmatpush1.bf16.msra.mxu0 %v25405_v27  ;;  %18101 = vmatpush1.bf16.msra.mxu1 %v25407_v6 }
 0x5b8   : > { %17911 = vmatprep.subr.bf16.mxu0 %v25406_v57  ;;  %18103 = vmatprep.subr.bf16.mxu1 %v25408_v60 }
 0x5bb   : > { %17913 = vmatpush1.bf16.msra.mxu0 %v25409_v28  ;;  %18105 = vmatpush1.bf16.msra.mxu1 %v25411_v16 }
 0x5bc   : > { %17915 = vmatprep.subr.bf16.mxu0 %v25410_v14  ;;  %18107 = vmatprep.subr.bf16.mxu1 %v25412_v35 }
 0x5bf   : > { %17917 = vmatpush1.bf16.msra.mxu0 %v25413_v52  ;;  %18109 = vmatpush1.bf16.msra.mxu1 %v25614_v45 }
 0x5c0   : > { %17919 = vmatprep.subr.bf16.mxu0 %v25615_v49  ;;  %18111 = vmatprep.subr.bf16.mxu1 %v25616_v11 }
 0x5c3   : > { %17921 = vmatpush1.bf16.msra.mxu0 %v25617_v0  ;;  %18113 = vmatpush1.bf16.msra.mxu1 %v25618_v17 }
 0x5c4   : > { %17923 = vmatprep.subr.bf16.mxu0 %v25619_v25  ;;  %18115 = vmatprep.subr.bf16.mxu1 %v25620_v32  ;;  %v22993_v25 = vld [vmem:[%s22494_s21 + $0x10] sm:$0xff] }
 0x5c5   : > { %25659 = vst [vmem:[#allocation40_spill] sm:$0xff] %v22993_v25 }
 0x5c7   : > { %17925 = vmatpush1.bf16.msra.mxu0 %v25621_v59  ;;  %18117 = vmatpush1.bf16.msra.mxu1 %v25622_v30 }
 0x5c8   : > { %17927 = vmatprep.subr.bf16.mxu0 %v25655_v56  ;;  %18119 = vmatprep.subr.bf16.mxu1 %v25656_v23  ;;  %v22989_v23 = vld [vmem:[%s22494_s21 + $0x18] sm:$0xff] }
 0x5c9   : > { %25658 = vst [vmem:[#allocation32_spill] sm:$0xff] %v22989_v23 }
 0x67d   : > { %v5744_v21 = vpop.f32.mrb[4].mxu0  ;;  %v6599_v42 = vpop.f32.mrb[4].mxu1 }
 0x67e   : > { %v6608_v26 = vrot.slane %v5744_v21, 6  ;;  %v5746_v63 = vpop.f32.mrb[5].mxu0  ;;  %v6601_v50 = vpop.f32.mrb[5].mxu1  ;;  %v6610_v32 = vrot.slane %v6599_v42, 6 }
 0x67f   : > { %v6609_v36 = vrot.slane %v5746_v63, 6  ;;  %v6611_v59 = vrot.slane %v6601_v50, 6 }
 0x680   : > { %v6616_v51 = vadd.f32 %v22981_v62, %v6608_v26  ;;  %v6618_v26 = vadd.f32 %v22993_v25, %v6610_v32  ;;  %v6649_v32 = vstv %s6648_s27 }
 0x681   : > { %v6617_v37 = vadd.f32 %v22985_v3, %v6609_v36  ;;  %v6619_v21 = vadd.f32 %v22989_v23, %v6611_v59  ;;  %v6640_v59 = vrot.slane %v22751_v13, 7 }
 0x682   : > { %v16302_v30 = vmul.f32 -1.442695, %v6616_v51 }
 0x683   : > { %v16303_v56 = vmul.f32 -1.442695, %v6617_v37  ;;  %v16304_v63 = vmul.f32 -1.442695, %v6619_v21 }
 0x684   : > { %20290 = vpow2.f32 %v16302_v30 }
 0x685   : > { %20292 = vpow2.f32 %v16303_v56 }
 0x686   : > { %20294 = vpow2.f32 %v16304_v63 }
 0x687   : > { %20296 = vtanh.f32 %v6618_v26  ;;  %v25660_v26 = vld [vmem:[#allocation24_spill] sm:$0xff] }
 0x68e   : > { %v20291_v62 = vpop.eup %20290 }
 0x68f   : > { %v20293_v17 = vpop.eup %20292  ;;  %v6623_v0 = vadd.f32 1.0, %v20291_v62 }
 0x690   : > { %v6629_v36 = vadd.f32 1.0, %v20293_v17  ;;  %v20295_v30 = vpop.eup %20294 }
 0x691   : > { %20298 = vrcp.f32 %v6623_v0  ;;  %v20297_v50 = vpop.eup %20296  ;;  %v6636_v56 = vadd.f32 1.0, %v20295_v30 }
 0x692   : > { %20300 = vrcp.f32 %v6629_v36  ;;  %v15453_v36 = vsel %vm15452_vm1, %v25660_v26, %v22753_v22  ;;  %v25661_v22 = vld [vmem:[#allocation85_spill] sm:$0xff]  ;;  %v25669_v26 = vld [vmem:[#allocation95_spill] sm:$0xff] }
 0x693   : > { %20302 = vrcp.f32 %v6636_v56  ;;  %v25663_v56 = vld [vmem:[#allocation91_spill] sm:$0xff] }
 0x69b   : > { %v20299_v51 = vpop.eup %20298 }
 0x69c   : > { %v20301_v42 = vpop.eup %20300  ;;  %v6643_v37 = vmul.f32 %v20299_v51, %v20297_v50 }
 0x69d   : > { %v6642_v21 = vmul.f32 %v20301_v42, %v6640_v59  ;;  %v20303_v17 = vpop.eup %20302 }
 0x69f   : > { %v6644_v25 = vadd.f32 %v6643_v37, %v6642_v21  ;;  %v25662_v37 = vld [vmem:[#allocation87_spill] sm:$0xff]  ;;  %v25664_v21 = vld [vmem:[#allocation92_spill] sm:$0xff] }
 0x6a1   : > { %20304 = vtanh.f32 %v6644_v25  ;;  %v22998_v62 = vmul.f32 %v6649_v32, %v6644_v25 }
 0x6ab   : > { %v20305_v0 = vpop.eup %20304 }
 0x6ac   : > { %v6646_v63 = vmul.f32 %v20305_v0, %v20303_v17  ;;  %v25666_v17 = vld [vmem:[#allocation35_spill] sm:$0xff]  ;;  %v25667_v0 = vld [vmem:[#allocation37_spill] sm:$0xff] }
 0x6ae   : > { %v23002_v23 = vsel %vm15454_vm2, %v15453_v36, %v6646_v63  ;;  %v6650_v13 = vmul.f32 %v6649_v32, %v6646_v63  ;;  %v25665_v32 = vld [vmem:[#allocation93_spill] sm:$0xff]  ;;  %v25668_v63 = vld [vmem:[#allocation38_spill] sm:$0xff]  ;;  %v25670_v36 = vld [vmem:[#allocation96_spill] sm:$0xff] }
 0x6b0   : > { %v6653_v50 = vrot.slane %v6650_v13, 2  ;;  %v25671_v13 = vld [vmem:[#allocation44_spill] sm:$0xff] }
 0x6b2   : > { %v23004_v30 = vand.u32 4294901760, %v6653_v50 }
 0x6b4   : > { %v23007_v51 = vsub.f32 %v6653_v50, %v23004_v30  ;;  %v25672_v50 = vld [vmem:[#allocation99_spill] sm:$0xff] }
 0x6b6   : > { %v23010_v25 = vand.u32 4294901760, %v23007_v51 }
 0x6b8   : > { %v6755_v59 = vsub.f32 %v23007_v51, %v23010_v25 }
 0x6ba   : > { %v6756_v42 = vand.u32 4294901760, %v6755_v59  ;;  %v25673_v59 = vld [vmem:[#allocation100_spill] sm:$0xff] }
 0x6bc   : > { %6757 = vmatmul.mubr.f32.vlgmr.msra.gmra.mrb[6].mxu0 %v6756_v42  ;;  %7612 = vmatmul.mubr.f32.vlgmr.msra.gmra.mrb[6].mxu1 %v6756_v42  ;;  %v25674_v42 = vld [vmem:[#allocation53_spill] sm:$0xff] }
 0x6bd   : > { %17929 = vmatpush1.bf16.msra.mxu0 %v25484_v53  ;;  %18121 = vmatpush1.bf16.msra.mxu1 %v25485_v5 }
 0x6be   : > { %17931 = vmatprep.subr.bf16.mxu0 %v25570_v58  ;;  %18123 = vmatprep.subr.bf16.mxu1 %v25571_v46 }
 0x6bf   : > { %6987 = vmatprep.mubr.f32.mxu0 %v25152_v20  ;;  %7842 = vmatprep.mubr.f32.mxu1 %v25152_v20 }
 0x6c1   : > { %17933 = vmatpush1.bf16.msra.mxu0 %v25572_v10  ;;  %18125 = vmatpush1.bf16.msra.mxu1 %v25573_v44 }
 0x6c2   : > { %17935 = vmatprep.subr.bf16.mxu0 %v25574_v2  ;;  %18127 = vmatprep.subr.bf16.mxu1 %v25575_v9 }
 0x6c5   : > { %17937 = vmatpush1.bf16.msra.mxu0 %v25661_v22  ;;  %18129 = vmatpush1.bf16.msra.mxu1 %v25662_v37 }
 0x6c6   : > { %17939 = vmatprep.subr.bf16.mxu0 %v25578_v47  ;;  %18131 = vmatprep.subr.bf16.mxu1 %v25579_v54 }
 0x6c9   : > { %17941 = vmatpush1.bf16.msra.mxu0 %v25663_v56  ;;  %18133 = vmatpush1.bf16.msra.mxu1 %v25664_v21 }
 0x6ca   : > { %17943 = vmatprep.subr.bf16.mxu0 %v25665_v32  ;;  %18135 = vmatprep.subr.bf16.mxu1 %v25666_v17 }
 0x6cd   : > { %17945 = vmatpush1.bf16.msra.mxu0 %v25667_v0  ;;  %18137 = vmatpush1.bf16.msra.mxu1 %v25668_v63  ;;  %v25675_v0 = vld [vmem:[#allocation101_spill] sm:$0xff]  ;;  %v25676_v63 = vld [vmem:[#allocation104_spill] sm:$0xff] }
 0x6ce   : > { %17947 = vmatprep.subr.bf16.mxu0 %v25669_v26  ;;  %18139 = vmatprep.subr.bf16.mxu1 %v25670_v36  ;;  %v25677_v26 = vld [vmem:[#allocation109_spill] sm:$0xff]  ;;  %v25678_v36 = vld [vmem:[#allocation58_spill] sm:$0xff] }
 0x6d1   : > { %17949 = vmatpush1.bf16.msra.mxu0 %v25671_v13  ;;  %18141 = vmatpush1.bf16.msra.mxu1 %v25505_v29  ;;  %v25679_v13 = vld [vmem:[#allocation106_spill] sm:$0xff] }
 0x6d2   : > { %17951 = vmatprep.subr.bf16.mxu0 %v25506_v31  ;;  %18143 = vmatprep.subr.bf16.mxu1 %v25589_v43  ;;  %v25680_v43 = vld [vmem:[#allocation110_spill] sm:$0xff]  ;;  %v25727_v31 = vld [vmem:[#allocation88_spill] sm:$0xff] }
 0x6d3   : > { %v25728_v29 = vld [vmem:[#allocation22_spill] sm:$0xff] }
 0x6d5   : > { %17953 = vmatpush1.bf16.msra.mxu0 %v25672_v50  ;;  %18145 = vmatpush1.bf16.msra.mxu1 %v25673_v59  ;;  %v25681_v50 = vld [vmem:[#allocation112_spill] sm:$0xff]  ;;  %v25682_v59 = vld [vmem:[#allocation111_spill] sm:$0xff] }
 0x6d6   : > { %17955 = vmatprep.subr.bf16.mxu0 %v25674_v42  ;;  %18147 = vmatprep.subr.bf16.mxu1 %v25675_v0  ;;  %v25683_v42 = vld [vmem:[#allocation59_spill] sm:$0xff] }
 0x6d7   : > { %v25721_v0 = vld [vmem:[#allocation23_spill] sm:$0xff] }
 0x6d9   : > { %17957 = vmatpush1.bf16.msra.mxu0 %v25676_v63  ;;  %18149 = vmatpush1.bf16.msra.mxu1 %v25677_v26  ;;  %v25684_v26 = vld [vmem:[#allocation102_spill] sm:$0xff]  ;;  %v25687_v63 = vld [vmem:[#allocation107_spill] sm:$0xff] }
 0x6da   : > { %17959 = vmatprep.subr.bf16.mxu0 %v25678_v36  ;;  %18151 = vmatprep.subr.bf16.mxu1 %v25679_v13  ;;  %v25685_v36 = vld [vmem:[#allocation103_spill] sm:$0xff]  ;;  %v25686_v13 = vld [vmem:[#allocation105_spill] sm:$0xff] }
 0x6dc   : > { %6989 = vmatmul.mubr.f32.vlgmr.msra.gmra.mrb[6].mxu0 %v23004_v30  ;;  %7844 = vmatmul.mubr.f32.vlgmr.msra.gmra.mrb[6].mxu1 %v23004_v30 }
 0x6dd   : > { %17961 = vmatpush1.bf16.msra.mxu0 %v25680_v43  ;;  %18153 = vmatpush1.bf16.msra.mxu1 %v25681_v50  ;;  %v25690_v50 = vld [vmem:[#allocation86_spill] sm:$0xff]  ;;  %v25718_v43 = vld [vmem:[#allocation16_spill] sm:$0xff] }
 0x6de   : > { %17963 = vmatprep.subr.bf16.mxu0 %v25682_v59  ;;  %18155 = vmatprep.subr.bf16.mxu1 %v25683_v42  ;;  %v25688_v42 = vld [vmem:[#allocation84_spill] sm:$0xff]  ;;  %v25689_v59 = vld [vmem:[#allocation126_spill] sm:$0xff] }
 0x6df   : > { %7123 = vmatprep.mubr.f32.mxu0 %v25152_v20  ;;  %7978 = vmatprep.mubr.f32.mxu1 %v25152_v20 }
 0x6e1   : > { %17965 = vmatpush1.bf16.msra.mxu0 %v25684_v26  ;;  %18157 = vmatpush1.bf16.msra.mxu1 %v25685_v36  ;;  %v25691_v26 = vld [vmem:[#allocation127_spill] sm:$0xff]  ;;  %v25692_v36 = vld [vmem:[#allocation128_spill] sm:$0xff] }
 0x6e2   : > { %17967 = vmatprep.subr.bf16.mxu0 %v25686_v13  ;;  %18159 = vmatprep.subr.bf16.mxu1 %v25687_v63  ;;  %v25693_v13 = vld [vmem:[#allocation130_spill] sm:$0xff]  ;;  %v25694_v63 = vld [vmem:[#allocation129_spill] sm:$0xff] }
 0x6e5   : > { %17969 = vmatpush1.bf16.msra.mxu0 %v25603_v1  ;;  %18161 = vmatpush1.bf16.msra.mxu1 %v25604_v12  ;;  %v25695_v1 = vld [vmem:[#allocation131_spill] sm:$0xff]  ;;  %v25696_v12 = vld [vmem:[#allocation132_spill] sm:$0xff] }
 0x6e6   : > { %17971 = vmatprep.subr.bf16.mxu0 %v25605_v39  ;;  %18163 = vmatprep.subr.bf16.mxu1 %v25606_v24  ;;  %v25697_v39 = vld [vmem:[#allocation134_spill] sm:$0xff]  ;;  %v25698_v24 = vld [vmem:[#allocation133_spill] sm:$0xff] }
 0x6e9   : > { %17973 = vmatpush1.bf16.msra.mxu0 %v25688_v42  ;;  %18165 = vmatpush1.bf16.msra.mxu1 %v25689_v59  ;;  %v25699_v42 = vld [vmem:[#allocation135_spill] sm:$0xff]  ;;  %v25700_v59 = vld [vmem:[#allocation136_spill] sm:$0xff] }
 0x6ea   : > { %17975 = vmatprep.subr.bf16.mxu0 %v25690_v50  ;;  %18167 = vmatprep.subr.bf16.mxu1 %v25691_v26  ;;  %v25701_v50 = vld [vmem:[#allocation138_spill] sm:$0xff]  ;;  %v25702_v26 = vld [vmem:[#allocation137_spill] sm:$0xff] }
 0x6ed   : > { %17977 = vmatpush1.bf16.msra.mxu0 %v25692_v36  ;;  %18169 = vmatpush1.bf16.msra.mxu1 %v25693_v13  ;;  %v25703_v36 = vld [vmem:[#allocation139_spill] sm:$0xff]  ;;  %v25704_v13 = vld [vmem:[#allocation140_spill] sm:$0xff] }
 0x6ee   : > { %17979 = vmatprep.subr.bf16.mxu0 %v25694_v63  ;;  %18171 = vmatprep.subr.bf16.mxu1 %v25695_v1  ;;  %v25705_v63 = vld [vmem:[#allocation113_spill] sm:$0xff]  ;;  %v25717_v1 = vld [vmem:[#allocation14_spill] sm:$0xff] }
 0x6f1   : > { %17981 = vmatpush1.bf16.msra.mxu0 %v25696_v12  ;;  %18173 = vmatpush1.bf16.msra.mxu1 %v25697_v39  ;;  %v25715_v39 = vld [vmem:[#allocation15_spill] sm:$0xff]  ;;  %v25716_v12 = vld [vmem:[#allocation13_spill] sm:$0xff] }
 0x6f2   : > { %17983 = vmatprep.subr.bf16.mxu0 %v25698_v24  ;;  %18175 = vmatprep.subr.bf16.mxu1 %v25699_v42  ;;  %v25713_v42 = vld [vmem:[#allocation12_spill] sm:$0xff]  ;;  %v25714_v24 = vld [vmem:[#allocation65_spill] sm:$0xff] }
 0x6f5   : > { %17985 = vmatpush1.bf16.msra.mxu0 %v25700_v59  ;;  %18177 = vmatpush1.bf16.msra.mxu1 %v25701_v50  ;;  %v25711_v50 = vld [vmem:[#allocation62_spill] sm:$0xff]  ;;  %v25712_v59 = vld [vmem:[#allocation11_spill] sm:$0xff] }
 0x6f6   : > { %17987 = vmatprep.subr.bf16.mxu0 %v25702_v26  ;;  %18179 = vmatprep.subr.bf16.mxu1 %v25703_v36  ;;  %v25709_v36 = vld [vmem:[#allocation60_spill] sm:$0xff]  ;;  %v25710_v26 = vld [vmem:[#allocation61_spill] sm:$0xff] }
 0x6f9   : > { %17989 = vmatpush1.bf16.msra.mxu0 %v25704_v13  ;;  %18181 = vmatpush1.bf16.msra.mxu1 %v25705_v63  ;;  %v25707_v63 = vld [vmem:[#allocation56_spill] sm:$0xff]  ;;  %v25708_v13 = vld [vmem:[#allocation57_spill] sm:$0xff] }
 0x6fa   : > { %17991 = vmatprep.subr.bf16.mxu0 %v25390_v18  ;;  %18183 = vmatprep.subr.bf16.mxu1 %v25391_v61 }
 0x6fc   : > { %7126 = vmatmul.mubr.f32.vlgmr.msra.gmra.mrb[6].mxu0 %v23007_v51  ;;  %7981 = vmatmul.mubr.f32.vlgmr.msra.gmra.mrb[6].mxu1 %v23007_v51  ;;  %v25706_v51 = vld [vmem:[#allocation55_spill] sm:$0xff] }
 0x6fd   : > { %17993 = vmatpush1.bf16.msra.mxu0 %v25393_v41  ;;  %18185 = vmatpush1.bf16.msra.mxu1 %v25395_v19 }
 0x6fe   : > { %17995 = vmatprep.subr.bf16.mxu0 %v25394_v55  ;;  %18187 = vmatprep.subr.bf16.mxu1 %v25396_v33 }
 0x6ff   : > { %7228 = vmatprep.mubr.f32.mxu0 %v25152_v20  ;;  %8083 = vmatprep.mubr.f32.mxu1 %v25152_v20 }
 0x701   : > { %17997 = vmatpush1.bf16.msra.mxu0 %v25397_v40  ;;  %18189 = vmatpush1.bf16.msra.mxu1 %v25399_v38 }
 0x702   : > { %17999 = vmatprep.subr.bf16.mxu0 %v25398_v4  ;;  %18191 = vmatprep.subr.bf16.mxu1 %v25400_v8 }
 0x705   : > { %18001 = vmatpush1.bf16.msra.mxu0 %v25401_v34  ;;  %18193 = vmatpush1.bf16.msra.mxu1 %v25403_v48 }
 0x706   : > { %18003 = vmatprep.subr.bf16.mxu0 %v25402_v15  ;;  %18195 = vmatprep.subr.bf16.mxu1 %v25404_v7 }
 0x709   : > { %18005 = vmatpush1.bf16.msra.mxu0 %v25405_v27  ;;  %18197 = vmatpush1.bf16.msra.mxu1 %v25407_v6 }
 0x70a   : > { %18007 = vmatprep.subr.bf16.mxu0 %v25406_v57  ;;  %18199 = vmatprep.subr.bf16.mxu1 %v25408_v60 }
 0x70d   : > { %18009 = vmatpush1.bf16.msra.mxu0 %v25409_v28  ;;  %18201 = vmatpush1.bf16.msra.mxu1 %v25411_v16 }
 0x70e   : > { %18011 = vmatprep.subr.bf16.mxu0 %v25410_v14  ;;  %18203 = vmatprep.subr.bf16.mxu1 %v25412_v35 }
 0x711   : > { %18013 = vmatpush1.bf16.msra.mxu0 %v25413_v52  ;;  %18205 = vmatpush1.bf16.msra.mxu1 %v25614_v45 }
 0x712   : > { %18015 = vmatprep.subr.bf16.mxu0 %v25615_v49  ;;  %18207 = vmatprep.subr.bf16.mxu1 %v25616_v11 }
 0x715   : > { %18017 = vmatpush1.bf16.msra.mxu0 %v25706_v51  ;;  %18209 = vmatpush1.bf16.msra.mxu1 %v25707_v63 }
 0x716   : > { %18019 = vmatprep.subr.bf16.mxu0 %v25708_v13  ;;  %18211 = vmatprep.subr.bf16.mxu1 %v25709_v36 }
 0x719   : > { %18021 = vmatpush1.bf16.msra.mxu0 %v25710_v26  ;;  %18213 = vmatpush1.bf16.msra.mxu1 %v25711_v50 }
 0x71a   : > { %18023 = vmatprep.subr.bf16.mxu0 %v25712_v59  ;;  %18215 = vmatprep.subr.bf16.mxu1 %v25713_v42  ;;  %v25719_v59 = vld [vmem:[#allocation19_spill] sm:$0xff]  ;;  %v25720_v42 = vld [vmem:[#allocation17_spill] sm:$0xff] }
 0x71c   : > { %7232 = vmatmul.mubr.f32.vlgmr.msra.gmra.mrb[6].mxu0 %v23010_v25  ;;  %8087 = vmatmul.mubr.f32.vlgmr.msra.gmra.mrb[6].mxu1 %v23010_v25  ;;  %v25722_v25 = vld [vmem:[#allocation25_spill] sm:$0xff] }
 0x71d   : > { %18025 = vmatpush1.bf16.msra.mxu0 %v25714_v24  ;;  %18217 = vmatpush1.bf16.msra.mxu1 %v25715_v39  ;;  %v25723_v24 = vld [vmem:[#allocation117_spill] sm:$0xff]  ;;  %v25724_v39 = vld [vmem:[#allocation118_spill] sm:$0xff] }
 0x71e   : > { %18027 = vmatprep.subr.bf16.mxu0 %v25716_v12  ;;  %18219 = vmatprep.subr.bf16.mxu1 %v25717_v1  ;;  %v25725_v12 = vld [vmem:[#allocation119_spill] sm:$0xff]  ;;  %v25726_v1 = vld [vmem:[#allocation120_spill] sm:$0xff] }
 0x71f   : > { %7398 = vmatprep.mubr.f32.mxu0 %v25152_v20  ;;  %8253 = vmatprep.mubr.f32.mxu1 %v25152_v20 }
 0x721   : > { %18029 = vmatpush1.bf16.msra.mxu0 %v25718_v43  ;;  %18221 = vmatpush1.bf16.msra.mxu1 %v25719_v59  ;;  %v25729_v43 = vld [vmem:[#allocation26_spill] sm:$0xff]  ;;  %v25730_v59 = vld [vmem:[#allocation27_spill] sm:$0xff] }
 0x722   : > { %18031 = vmatprep.subr.bf16.mxu0 %v25720_v42  ;;  %18223 = vmatprep.subr.bf16.mxu1 %v25721_v0  ;;  %v25731_v42 = vld [vmem:[#allocation29_spill] sm:$0xff]  ;;  %v25732_v0 = vld [vmem:[#allocation30_spill] sm:$0xff] }
 0x725   : > { %18033 = vmatpush1.bf16.msra.mxu0 %v25722_v25  ;;  %18225 = vmatpush1.bf16.msra.mxu1 %v25723_v24  ;;  %v25733_v25 = vld [vmem:[#allocation33_spill] sm:$0xff]  ;;  %v25734_v24 = vld [vmem:[#allocation34_spill] sm:$0xff] }
 0x726   : > { %18035 = vmatprep.subr.bf16.mxu0 %v25724_v39  ;;  %18227 = vmatprep.subr.bf16.mxu1 %v25725_v12  ;;  %v25735_v39 = vld [vmem:[#allocation39_spill] sm:$0xff]  ;;  %v25736_v12 = vld [vmem:[#allocation41_spill] sm:$0xff] }
 0x729   : > { %18037 = vmatpush1.bf16.msra.mxu0 %v25726_v1  ;;  %18229 = vmatpush1.bf16.msra.mxu1 %v25727_v31  ;;  %v25737_v1 = vld [vmem:[#allocation94_spill] sm:$0xff]  ;;  %v25738_v31 = vld [vmem:[#allocation43_spill] sm:$0xff] }
 0x72a   : > { %18039 = vmatprep.subr.bf16.mxu0 %v25728_v29  ;;  %18231 = vmatprep.subr.bf16.mxu1 %v25729_v43  ;;  %v25739_v29 = vld [vmem:[#allocation121_spill] sm:$0xff]  ;;  %v25740_v43 = vld [vmem:[#allocation122_spill] sm:$0xff] }
 0x72d   : > { %18041 = vmatpush1.bf16.msra.mxu0 %v25730_v59  ;;  %18233 = vmatpush1.bf16.msra.mxu1 %v25731_v42  ;;  %v25741_v59 = vld [vmem:[#allocation123_spill] sm:$0xff]  ;;  %v25742_v42 = vld [vmem:[#allocation124_spill] sm:$0xff] }
 0x72e   : > { %18043 = vmatprep.subr.bf16.mxu0 %v25732_v0  ;;  %18235 = vmatprep.subr.bf16.mxu1 %v25733_v25  ;;  %v25743_v0 = vld [vmem:[#allocation125_spill] sm:$0xff] }
 0x731   : > { %18045 = vmatpush1.bf16.msra.mxu0 %v25734_v24  ;;  %18237 = vmatpush1.bf16.msra.mxu1 %v25735_v39 }
 0x732   : > { %18047 = vmatprep.subr.bf16.mxu0 %v25736_v12  ;;  %18239 = vmatprep.subr.bf16.mxu1 %v25737_v1  ;;  %v25746_v12 = vld [vmem:[#allocation31_spill] sm:$0xff] }
 0x735   : > { %18049 = vmatpush1.bf16.msra.mxu0 %v25738_v31  ;;  %18241 = vmatpush1.bf16.msra.mxu1 %v25739_v29 }
 0x736   : > { %18051 = vmatprep.subr.bf16.mxu0 %v25740_v43  ;;  %18243 = vmatprep.subr.bf16.mxu1 %v25741_v59 }
 0x739   : > { %18053 = vmatpush1.bf16.msra.mxu0 %v25742_v42  ;;  %18245 = vmatpush1.bf16.msra.mxu1 %v25743_v0  ;;  %v25745_v0 = vld [vmem:[#allocation66_spill] sm:$0xff] }
 0x73a   : > { %18055 = vmatprep.subr.bf16.mxu0 %v25390_v18  ;;  %18247 = vmatprep.subr.bf16.mxu1 %v25391_v61 }
 0x73c   : > { %7400 = vmatmul.mubr.f32.vlgmr.msra.gmra.mrb[6].mxu0 %v23004_v30  ;;  %8255 = vmatmul.mubr.f32.vlgmr.msra.gmra.mrb[6].mxu1 %v23004_v30 }
 0x73d   : > { %18057 = vmatpush1.bf16.msra.mxu0 %v25393_v41  ;;  %18249 = vmatpush1.bf16.msra.mxu1 %v25395_v19 }
 0x73e   : > { %18059 = vmatprep.subr.bf16.mxu0 %v25394_v55  ;;  %18251 = vmatprep.subr.bf16.mxu1 %v25396_v33 }
 0x73f   : > { %7502 = vmatprep.mubr.f32.mxu0 %v25152_v20  ;;  %8357 = vmatprep.mubr.f32.mxu1 %v25152_v20 }
 0x741   : > { %18061 = vmatpush1.bf16.msra.mxu0 %v25397_v40  ;;  %18253 = vmatpush1.bf16.msra.mxu1 %v25399_v38 }
 0x742   : > { %18063 = vmatprep.subr.bf16.mxu0 %v25398_v4  ;;  %18255 = vmatprep.subr.bf16.mxu1 %v25400_v8 }
 0x745   : > { %18065 = vmatpush1.bf16.msra.mxu0 %v25401_v34  ;;  %18257 = vmatpush1.bf16.msra.mxu1 %v25403_v48 }
 0x746   : > { %18067 = vmatprep.subr.bf16.mxu0 %v25402_v15  ;;  %18259 = vmatprep.subr.bf16.mxu1 %v25404_v7 }
 0x749   : > { %18069 = vmatpush1.bf16.msra.mxu0 %v25405_v27  ;;  %18261 = vmatpush1.bf16.msra.mxu1 %v25407_v6 }
 0x74a   : > { %18071 = vmatprep.subr.bf16.mxu0 %v25406_v57  ;;  %18263 = vmatprep.subr.bf16.mxu1 %v25408_v60 }
 0x74d   : > { %18073 = vmatpush1.bf16.msra.mxu0 %v25409_v28  ;;  %18265 = vmatpush1.bf16.msra.mxu1 %v25411_v16 }
 0x74e   : > { %18075 = vmatprep.subr.bf16.mxu0 %v25410_v14  ;;  %18267 = vmatprep.subr.bf16.mxu1 %v25412_v35 }
 0x751   : > { %18077 = vmatpush1.bf16.msra.mxu0 %v25413_v52  ;;  %18269 = vmatpush1.bf16.msra.mxu1 %v25614_v45 }
 0x752   : > { %18079 = vmatprep.subr.bf16.mxu0 %v25615_v49  ;;  %18271 = vmatprep.subr.bf16.mxu1 %v25616_v11 }
 0x755   : > { %18081 = vmatpush1.bf16.msra.mxu0 %v25706_v51  ;;  %18273 = vmatpush1.bf16.msra.mxu1 %v25707_v63 }
 0x756   : > { %18083 = vmatprep.subr.bf16.mxu0 %v25708_v13  ;;  %18275 = vmatprep.subr.bf16.mxu1 %v25709_v36 }
 0x759   : > { %18085 = vmatpush1.bf16.msra.mxu0 %v25710_v26  ;;  %18277 = vmatpush1.bf16.msra.mxu1 %v25711_v50 }
 0x75a   : > { %18279 = vmatprep.subr.bf16.mxu0 %v25390_v18  ;;  %18471 = vmatprep.subr.bf16.mxu1 %v25391_v61 }
 0x75c   : > { %7504 = vmatmul.mubr.f32.vlgmr.msra.gmra.mrb[6].mxu0 %v23004_v30  ;;  %8359 = vmatmul.mubr.f32.vlgmr.msra.gmra.mrb[6].mxu1 %v23004_v30  ;;  %v25744_v30 = vld [vmem:[#allocation64_spill] sm:$0xff] }
 0x75d   : > { %18281 = vmatpush1.bf16.msra.mxu0 %v25393_v41  ;;  %18473 = vmatpush1.bf16.msra.mxu1 %v25395_v19 }
 0x75e   : > { %18283 = vmatprep.subr.bf16.mxu0 %v25394_v55  ;;  %18475 = vmatprep.subr.bf16.mxu1 %v25396_v33 }
 0x75f   : > { %8512 = vmatprep.mubr.f32.mxu0 %v25152_v20  ;;  %9367 = vmatprep.mubr.f32.mxu1 %v25152_v20 }
 0x761   : > { %18285 = vmatpush1.bf16.msra.mxu0 %v25397_v40  ;;  %18477 = vmatpush1.bf16.msra.mxu1 %v25399_v38 }
 0x762   : > { %18287 = vmatprep.subr.bf16.mxu0 %v25398_v4  ;;  %18479 = vmatprep.subr.bf16.mxu1 %v25400_v8 }
 0x765   : > { %18289 = vmatpush1.bf16.msra.mxu0 %v25401_v34  ;;  %18481 = vmatpush1.bf16.msra.mxu1 %v25403_v48 }
 0x766   : > { %18291 = vmatprep.subr.bf16.mxu0 %v25402_v15  ;;  %18483 = vmatprep.subr.bf16.mxu1 %v25404_v7 }
 0x769   : > { %18293 = vmatpush1.bf16.msra.mxu0 %v25405_v27  ;;  %18485 = vmatpush1.bf16.msra.mxu1 %v25407_v6 }
 0x76a   : > { %18295 = vmatprep.subr.bf16.mxu0 %v25406_v57  ;;  %18487 = vmatprep.subr.bf16.mxu1 %v25408_v60 }
 0x76d   : > { %18297 = vmatpush1.bf16.msra.mxu0 %v25409_v28  ;;  %18489 = vmatpush1.bf16.msra.mxu1 %v25411_v16 }
 0x76e   : > { %18299 = vmatprep.subr.bf16.mxu0 %v25410_v14  ;;  %18491 = vmatprep.subr.bf16.mxu1 %v25412_v35 }
 0x771   : > { %18301 = vmatpush1.bf16.msra.mxu0 %v25413_v52  ;;  %18493 = vmatpush1.bf16.msra.mxu1 %v25614_v45 }
 0x772   : > { %18303 = vmatprep.subr.bf16.mxu0 %v25615_v49  ;;  %18495 = vmatprep.subr.bf16.mxu1 %v25616_v11 }
 0x775   : > { %18305 = vmatpush1.bf16.msra.mxu0 %v25706_v51  ;;  %18497 = vmatpush1.bf16.msra.mxu1 %v25707_v63  ;;  %v25748_v63 = vld [vmem:[#allocation40_spill] sm:$0xff] }
 0x776   : > { %18307 = vmatprep.subr.bf16.mxu0 %v25708_v13  ;;  %18499 = vmatprep.subr.bf16.mxu1 %v25709_v36 }
 0x779   : > { %18309 = vmatpush1.bf16.msra.mxu0 %v25710_v26  ;;  %18501 = vmatpush1.bf16.msra.mxu1 %v25711_v50  ;;  %v25747_v50 = vld [vmem:[#allocation32_spill] sm:$0xff] }
 0x77a   : > { %18311 = vmatprep.subr.bf16.mxu0 %v25744_v30  ;;  %18503 = vmatprep.subr.bf16.mxu1 %v25745_v0 }
 0x82f   : > { %v7505_v42 = vpop.f32.mrb[6].mxu0  ;;  %v8360_v59 = vpop.f32.mrb[6].mxu1 }
 0x830   : > { %v8369_v43 = vrot.slane %v7505_v42, 5  ;;  %v7507_v29 = vpop.f32.mrb[7].mxu0  ;;  %v8362_v31 = vpop.f32.mrb[7].mxu1  ;;  %v8371_v13 = vrot.slane %v8360_v59, 5 }
 0x831   : > { %v8370_v1 = vrot.slane %v7507_v29, 5  ;;  %v8372_v26 = vrot.slane %v8362_v31, 5  ;;  %v8401_v31 = vrot.slane %v22998_v62, 7 }
 0x832   : > { %v8377_v39 = vadd.f32 %v25746_v12, %v8369_v43  ;;  %v8379_v51 = vadd.f32 %v25748_v63, %v8371_v13  ;;  %v8410_v63 = vstv %s8409_s29 }
 0x833   : > { %v8378_v24 = vadd.f32 %v22985_v3, %v8370_v1  ;;  %v8380_v30 = vadd.f32 %v25747_v50, %v8372_v26 }
 0x834   : > { %v16305_v25 = vmul.f32 -1.442695, %v8377_v39 }
 0x835   : > { %v16306_v36 = vmul.f32 -1.442695, %v8378_v24  ;;  %v16307_v0 = vmul.f32 -1.442695, %v8380_v30 }
 0x836   : > { %20306 = vpow2.f32 %v16305_v25 }
 0x837   : > { %20308 = vpow2.f32 %v16306_v36 }
 0x838   : > { %20310 = vpow2.f32 %v16307_v0 }
 0x839   : > { %20312 = vtanh.f32 %v8379_v51 }
 0x840   : > { %v20307_v42 = vpop.eup %20306 }
 0x841   : > { %v20309_v11 = vpop.eup %20308  ;;  %v8384_v49 = vadd.f32 1.0, %v20307_v42 }
 0x842   : > { %v8390_v12 = vadd.f32 1.0, %v20309_v11  ;;  %v20311_v24 = vpop.eup %20310 }
 0x843   : > { %20314 = vrcp.f32 %v8384_v49  ;;  %v20313_v3 = vpop.eup %20312  ;;  %v8397_v1 = vadd.f32 1.0, %v20311_v24  ;;  %v25750_v24 = vld [vmem:[#allocation38_spill] sm:$0xff] }
 0x844   : > { %20316 = vrcp.f32 %v8390_v12 }
 0x845   : > { %20318 = vrcp.f32 %v8397_v1  ;;  %v25756_v1 = vld [vmem:[#allocation98_spill] sm:$0xff] }
 0x84d   : > { %v20315_v29 = vpop.eup %20314 }
 0x84e   : > { %v20317_v43 = vpop.eup %20316  ;;  %v8404_v39 = vmul.f32 %v20315_v29, %v20313_v3  ;;  %v25751_v3 = vld [vmem:[#allocation95_spill] sm:$0xff]  ;;  %v25752_v29 = vld [vmem:[#allocation96_spill] sm:$0xff] }
 0x84f   : > { %v8403_v26 = vmul.f32 %v20317_v43, %v8401_v31  ;;  %v20319_v11 = vpop.eup %20318  ;;  %v25753_v31 = vld [vmem:[#allocation44_spill] sm:$0xff]  ;;  %v25754_v43 = vld [vmem:[#allocation97_spill] sm:$0xff] }
 0x851   : > { %v8405_v36 = vadd.f32 %v8404_v39, %v8403_v26  ;;  %v25755_v39 = vld [vmem:[#allocation46_spill] sm:$0xff]  ;;  %v25757_v26 = vld [vmem:[#allocation99_spill] sm:$0xff] }
 0x853   : > { %20320 = vtanh.f32 %v8405_v36  ;;  %v23234_v0 = vmul.f32 %v8410_v63, %v8405_v36  ;;  %v25759_v36 = vld [vmem:[#allocation53_spill] sm:$0xff] }
 0x85d   : > { %v20321_v49 = vpop.eup %20320 }
 0x85e   : > { %v8407_v13 = vmul.f32 %v20321_v49, %v20319_v11  ;;  %v25760_v11 = vld [vmem:[#allocation101_spill] sm:$0xff]  ;;  %v25761_v49 = vld [vmem:[#allocation104_spill] sm:$0xff] }
 0x860   : > { %v23237_v50 = vsel %vm15456_vm3, %v23002_v23, %v8407_v13  ;;  %v8411_v59 = vmul.f32 %v8410_v63, %v8407_v13  ;;  %v25749_v23 = vld [vmem:[#allocation37_spill] sm:$0xff]  ;;  %v25758_v63 = vld [vmem:[#allocation100_spill] sm:$0xff] }
 0x861   : > { %v25762_v13 = vld [vmem:[#allocation109_spill] sm:$0xff] }
 0x862   : > { %v8414_v51 = vrot.slane %v8411_v59, 3  ;;  %v25763_v59 = vld [vmem:[#allocation58_spill] sm:$0xff] }
 0x864   : > { %v23239_v62 = vand.u32 4294901760, %v8414_v51 }
 0x866   : > { %v23242_v25 = vsub.f32 %v8414_v51, %v23239_v62  ;;  %v25764_v51 = vld [vmem:[#allocation106_spill] sm:$0xff] }
 0x868   : > { %v23245_v30 = vand.u32 4294901760, %v23242_v25 }
 0x86a   : > { %v8516_v42 = vsub.f32 %v23242_v25, %v23245_v30 }
 0x86c   : > { %v8517_v12 = vand.u32 4294901760, %v8516_v42  ;;  %v25765_v42 = vld [vmem:[#allocation110_spill] sm:$0xff] }
 0x86e   : > { %8518 = vmatmul.mubr.f32.vlgmr.msra.gmra.mrb[8].mxu0 %v8517_v12  ;;  %9373 = vmatmul.mubr.f32.vlgmr.msra.gmra.mrb[8].mxu1 %v8517_v12  ;;  %v25766_v12 = vld [vmem:[#allocation112_spill] sm:$0xff] }
 0x86f   : > { %18313 = vmatpush1.bf16.msra.mxu0 %v25484_v53  ;;  %18505 = vmatpush1.bf16.msra.mxu1 %v25485_v5 }
 0x870   : > { %18315 = vmatprep.subr.bf16.mxu0 %v25570_v58  ;;  %18507 = vmatprep.subr.bf16.mxu1 %v25571_v46 }
 0x871   : > { %8748 = vmatprep.mubr.f32.mxu0 %v25152_v20  ;;  %9603 = vmatprep.mubr.f32.mxu1 %v25152_v20 }
 0x873   : > { %18317 = vmatpush1.bf16.msra.mxu0 %v25572_v10  ;;  %18509 = vmatpush1.bf16.msra.mxu1 %v25573_v44 }
 0x874   : > { %18319 = vmatprep.subr.bf16.mxu0 %v25574_v2  ;;  %18511 = vmatprep.subr.bf16.mxu1 %v25575_v9 }
 0x877   : > { %18321 = vmatpush1.bf16.msra.mxu0 %v25661_v22  ;;  %18513 = vmatpush1.bf16.msra.mxu1 %v25662_v37 }
 0x878   : > { %18323 = vmatprep.subr.bf16.mxu0 %v25578_v47  ;;  %18515 = vmatprep.subr.bf16.mxu1 %v25579_v54 }
 0x87b   : > { %18325 = vmatpush1.bf16.msra.mxu0 %v25663_v56  ;;  %18517 = vmatpush1.bf16.msra.mxu1 %v25664_v21 }
 0x87c   : > { %18327 = vmatprep.subr.bf16.mxu0 %v25665_v32  ;;  %18519 = vmatprep.subr.bf16.mxu1 %v25666_v17 }
 0x87f   : > { %18329 = vmatpush1.bf16.msra.mxu0 %v25749_v23  ;;  %18521 = vmatpush1.bf16.msra.mxu1 %v25750_v24  ;;  %v25819_v24 = vld [vmem:[#allocation22_spill] sm:$0xff] }
 0x880   : > { %18331 = vmatprep.subr.bf16.mxu0 %v25751_v3  ;;  %18523 = vmatprep.subr.bf16.mxu1 %v25752_v29  ;;  %v25812_v29 = vld [vmem:[#allocation23_spill] sm:$0xff]  ;;  %v25818_v3 = vld [vmem:[#allocation88_spill] sm:$0xff] }
 0x883   : > { %18333 = vmatpush1.bf16.msra.mxu0 %v25753_v31  ;;  %18525 = vmatpush1.bf16.msra.mxu1 %v25754_v43  ;;  %v25808_v43 = vld [vmem:[#allocation14_spill] sm:$0xff]  ;;  %v25809_v31 = vld [vmem:[#allocation16_spill] sm:$0xff] }
 0x884   : > { %18335 = vmatprep.subr.bf16.mxu0 %v25755_v39  ;;  %18527 = vmatprep.subr.bf16.mxu1 %v25756_v1  ;;  %v25779_v1 = vld [vmem:[#allocation86_spill] sm:$0xff]  ;;  %v25807_v39 = vld [vmem:[#allocation13_spill] sm:$0xff] }
 0x887   : > { %18337 = vmatpush1.bf16.msra.mxu0 %v25757_v26  ;;  %18529 = vmatpush1.bf16.msra.mxu1 %v25758_v63  ;;  %v25767_v63 = vld [vmem:[#allocation111_spill] sm:$0xff]  ;;  %v25778_v26 = vld [vmem:[#allocation126_spill] sm:$0xff] }
 0x888   : > { %18339 = vmatprep.subr.bf16.mxu0 %v25759_v36  ;;  %18531 = vmatprep.subr.bf16.mxu1 %v25760_v11  ;;  %v25768_v36 = vld [vmem:[#allocation59_spill] sm:$0xff]  ;;  %v25773_v11 = vld [vmem:[#allocation114_spill] sm:$0xff] }
 0x88b   : > { %18341 = vmatpush1.bf16.msra.mxu0 %v25761_v49  ;;  %18533 = vmatpush1.bf16.msra.mxu1 %v25762_v13  ;;  %v25769_v13 = vld [vmem:[#allocation102_spill] sm:$0xff]  ;;  %v25772_v49 = vld [vmem:[#allocation107_spill] sm:$0xff] }
 0x88c   : > { %18343 = vmatprep.subr.bf16.mxu0 %v25763_v59  ;;  %18535 = vmatprep.subr.bf16.mxu1 %v25764_v51  ;;  %v25770_v59 = vld [vmem:[#allocation103_spill] sm:$0xff]  ;;  %v25771_v51 = vld [vmem:[#allocation105_spill] sm:$0xff] }
 0x88e   : > { %8750 = vmatmul.mubr.f32.vlgmr.msra.gmra.mrb[8].mxu0 %v23239_v62  ;;  %9605 = vmatmul.mubr.f32.vlgmr.msra.gmra.mrb[8].mxu1 %v23239_v62 }
 0x88f   : > { %18345 = vmatpush1.bf16.msra.mxu0 %v25765_v42  ;;  %18537 = vmatpush1.bf16.msra.mxu1 %v25766_v12  ;;  %v25774_v42 = vld [vmem:[#allocation108_spill] sm:$0xff]  ;;  %v25775_v12 = vld [vmem:[#allocation115_spill] sm:$0xff] }
 0x890   : > { %18347 = vmatprep.subr.bf16.mxu0 %v25767_v63  ;;  %18539 = vmatprep.subr.bf16.mxu1 %v25768_v36  ;;  %v25776_v63 = vld [vmem:[#allocation116_spill] sm:$0xff] }
 0x891   : > { %8884 = vmatprep.mubr.f32.mxu0 %v25152_v20  ;;  %9739 = vmatprep.mubr.f32.mxu1 %v25152_v20  ;;  %v25777_v36 = vld [vmem:[#allocation84_spill] sm:$0xff] }
 0x893   : > { %18349 = vmatpush1.bf16.msra.mxu0 %v25769_v13  ;;  %18541 = vmatpush1.bf16.msra.mxu1 %v25770_v59  ;;  %v25780_v13 = vld [vmem:[#allocation127_spill] sm:$0xff]  ;;  %v25781_v59 = vld [vmem:[#allocation128_spill] sm:$0xff] }
 0x894   : > { %18351 = vmatprep.subr.bf16.mxu0 %v25771_v51  ;;  %18543 = vmatprep.subr.bf16.mxu1 %v25772_v49  ;;  %v25782_v51 = vld [vmem:[#allocation130_spill] sm:$0xff]  ;;  %v25783_v49 = vld [vmem:[#allocation129_spill] sm:$0xff] }
 0x897   : > { %18353 = vmatpush1.bf16.msra.mxu0 %v25773_v11  ;;  %18545 = vmatpush1.bf16.msra.mxu1 %v25774_v42  ;;  %v25784_v11 = vld [vmem:[#allocation131_spill] sm:$0xff]  ;;  %v25785_v42 = vld [vmem:[#allocation132_spill] sm:$0xff] }
 0x898   : > { %18355 = vmatprep.subr.bf16.mxu0 %v25775_v12  ;;  %18547 = vmatprep.subr.bf16.mxu1 %v25776_v63  ;;  %v25786_v12 = vld [vmem:[#allocation134_spill] sm:$0xff]  ;;  %v25787_v63 = vld [vmem:[#allocation133_spill] sm:$0xff] }
 0x89b   : > { %18357 = vmatpush1.bf16.msra.mxu0 %v25777_v36  ;;  %18549 = vmatpush1.bf16.msra.mxu1 %v25778_v26  ;;  %v25788_v36 = vld [vmem:[#allocation135_spill] sm:$0xff]  ;;  %v25789_v26 = vld [vmem:[#allocation136_spill] sm:$0xff] }
 0x89c   : > { %18359 = vmatprep.subr.bf16.mxu0 %v25779_v1  ;;  %18551 = vmatprep.subr.bf16.mxu1 %v25780_v13  ;;  %v25790_v1 = vld [vmem:[#allocation138_spill] sm:$0xff]  ;;  %v25791_v13 = vld [vmem:[#allocation137_spill] sm:$0xff] }
 0x89f   : > { %18361 = vmatpush1.bf16.msra.mxu0 %v25781_v59  ;;  %18553 = vmatpush1.bf16.msra.mxu1 %v25782_v51  ;;  %v25792_v59 = vld [vmem:[#allocation139_spill] sm:$0xff]  ;;  %v25793_v51 = vld [vmem:[#allocation140_spill] sm:$0xff] }
 0x8a0   : > { %18363 = vmatprep.subr.bf16.mxu0 %v25783_v49  ;;  %18555 = vmatprep.subr.bf16.mxu1 %v25784_v11  ;;  %v25794_v49 = vld [vmem:[#allocation113_spill] sm:$0xff]  ;;  %v25806_v11 = vld [vmem:[#allocation15_spill] sm:$0xff] }
 0x8a3   : > { %18365 = vmatpush1.bf16.msra.mxu0 %v25785_v42  ;;  %18557 = vmatpush1.bf16.msra.mxu1 %v25786_v12  ;;  %v25804_v12 = vld [vmem:[#allocation12_spill] sm:$0xff]  ;;  %v25805_v42 = vld [vmem:[#allocation65_spill] sm:$0xff] }
 0x8a4   : > { %18367 = vmatprep.subr.bf16.mxu0 %v25787_v63  ;;  %18559 = vmatprep.subr.bf16.mxu1 %v25788_v36  ;;  %v25802_v36 = vld [vmem:[#allocation62_spill] sm:$0xff]  ;;  %v25803_v63 = vld [vmem:[#allocation11_spill] sm:$0xff] }
 0x8a7   : > { %18369 = vmatpush1.bf16.msra.mxu0 %v25789_v26  ;;  %18561 = vmatpush1.bf16.msra.mxu1 %v25790_v1  ;;  %v25800_v1 = vld [vmem:[#allocation60_spill] sm:$0xff]  ;;  %v25801_v26 = vld [vmem:[#allocation61_spill] sm:$0xff] }
 0x8a8   : > { %18371 = vmatprep.subr.bf16.mxu0 %v25791_v13  ;;  %18563 = vmatprep.subr.bf16.mxu1 %v25792_v59  ;;  %v25798_v59 = vld [vmem:[#allocation56_spill] sm:$0xff]  ;;  %v25799_v13 = vld [vmem:[#allocation57_spill] sm:$0xff] }
 0x8ab   : > { %18373 = vmatpush1.bf16.msra.mxu0 %v25793_v51  ;;  %18565 = vmatpush1.bf16.msra.mxu1 %v25794_v49  ;;  %v25796_v49 = vld [vmem:[#allocation54_spill] sm:$0xff]  ;;  %v25797_v51 = vld [vmem:[#allocation55_spill] sm:$0xff] }
 0x8ac   : > { %18375 = vmatprep.subr.bf16.mxu0 %v25390_v18  ;;  %18567 = vmatprep.subr.bf16.mxu1 %v25391_v61 }
 0x8ae   : > { %8887 = vmatmul.mubr.f32.vlgmr.msra.gmra.mrb[8].mxu0 %v23242_v25  ;;  %9742 = vmatmul.mubr.f32.vlgmr.msra.gmra.mrb[8].mxu1 %v23242_v25  ;;  %v25795_v25 = vld [vmem:[#allocation52_spill] sm:$0xff] }
 0x8af   : > { %18377 = vmatpush1.bf16.msra.mxu0 %v25393_v41  ;;  %18569 = vmatpush1.bf16.msra.mxu1 %v25395_v19 }
 0x8b0   : > { %18379 = vmatprep.subr.bf16.mxu0 %v25394_v55  ;;  %18571 = vmatprep.subr.bf16.mxu1 %v25396_v33 }
 0x8b1   : > { %8989 = vmatprep.mubr.f32.mxu0 %v25152_v20  ;;  %9844 = vmatprep.mubr.f32.mxu1 %v25152_v20 }
 0x8b3   : > { %18381 = vmatpush1.bf16.msra.mxu0 %v25397_v40  ;;  %18573 = vmatpush1.bf16.msra.mxu1 %v25399_v38 }
 0x8b4   : > { %18383 = vmatprep.subr.bf16.mxu0 %v25398_v4  ;;  %18575 = vmatprep.subr.bf16.mxu1 %v25400_v8 }
 0x8b7   : > { %18385 = vmatpush1.bf16.msra.mxu0 %v25401_v34  ;;  %18577 = vmatpush1.bf16.msra.mxu1 %v25403_v48 }
 0x8b8   : > { %18387 = vmatprep.subr.bf16.mxu0 %v25402_v15  ;;  %18579 = vmatprep.subr.bf16.mxu1 %v25404_v7 }
 0x8bb   : > { %18389 = vmatpush1.bf16.msra.mxu0 %v25405_v27  ;;  %18581 = vmatpush1.bf16.msra.mxu1 %v25407_v6 }
 0x8bc   : > { %18391 = vmatprep.subr.bf16.mxu0 %v25406_v57  ;;  %18583 = vmatprep.subr.bf16.mxu1 %v25408_v60 }
 0x8bf   : > { %18393 = vmatpush1.bf16.msra.mxu0 %v25409_v28  ;;  %18585 = vmatpush1.bf16.msra.mxu1 %v25411_v16 }
 0x8c0   : > { %18395 = vmatprep.subr.bf16.mxu0 %v25410_v14  ;;  %18587 = vmatprep.subr.bf16.mxu1 %v25412_v35 }
 0x8c3   : > { %18397 = vmatpush1.bf16.msra.mxu0 %v25413_v52  ;;  %18589 = vmatpush1.bf16.msra.mxu1 %v25614_v45 }
 0x8c4   : > { %18399 = vmatprep.subr.bf16.mxu0 %v25795_v25  ;;  %18591 = vmatprep.subr.bf16.mxu1 %v25796_v49 }
 0x8c7   : > { %18401 = vmatpush1.bf16.msra.mxu0 %v25797_v51  ;;  %18593 = vmatpush1.bf16.msra.mxu1 %v25798_v59 }
 0x8c8   : > { %18403 = vmatprep.subr.bf16.mxu0 %v25799_v13  ;;  %18595 = vmatprep.subr.bf16.mxu1 %v25800_v1 }
 0x8cb   : > { %18405 = vmatpush1.bf16.msra.mxu0 %v25801_v26  ;;  %18597 = vmatpush1.bf16.msra.mxu1 %v25802_v36 }
 0x8cc   : > { %18407 = vmatprep.subr.bf16.mxu0 %v25803_v63  ;;  %18599 = vmatprep.subr.bf16.mxu1 %v25804_v12  ;;  %v25810_v63 = vld [vmem:[#allocation19_spill] sm:$0xff]  ;;  %v25811_v12 = vld [vmem:[#allocation17_spill] sm:$0xff] }
 0x8ce   : > { %8993 = vmatmul.mubr.f32.vlgmr.msra.gmra.mrb[8].mxu0 %v23245_v30  ;;  %9848 = vmatmul.mubr.f32.vlgmr.msra.gmra.mrb[8].mxu1 %v23245_v30  ;;  %v25813_v30 = vld [vmem:[#allocation25_spill] sm:$0xff] }
 0x8cf   : > { %18409 = vmatpush1.bf16.msra.mxu0 %v25805_v42  ;;  %18601 = vmatpush1.bf16.msra.mxu1 %v25806_v11  ;;  %v25814_v42 = vld [vmem:[#allocation117_spill] sm:$0xff]  ;;  %v25815_v11 = vld [vmem:[#allocation118_spill] sm:$0xff] }
 0x8d0   : > { %18411 = vmatprep.subr.bf16.mxu0 %v25807_v39  ;;  %18603 = vmatprep.subr.bf16.mxu1 %v25808_v43  ;;  %v25816_v39 = vld [vmem:[#allocation119_spill] sm:$0xff]  ;;  %v25817_v43 = vld [vmem:[#allocation120_spill] sm:$0xff] }
 0x8d1   : > { %9159 = vmatprep.mubr.f32.mxu0 %v25152_v20  ;;  %10014 = vmatprep.mubr.f32.mxu1 %v25152_v20 }
 0x8d3   : > { %18413 = vmatpush1.bf16.msra.mxu0 %v25809_v31  ;;  %18605 = vmatpush1.bf16.msra.mxu1 %v25810_v63  ;;  %v25820_v31 = vld [vmem:[#allocation26_spill] sm:$0xff]  ;;  %v25821_v63 = vld [vmem:[#allocation27_spill] sm:$0xff] }
 0x8d4   : > { %18415 = vmatprep.subr.bf16.mxu0 %v25811_v12  ;;  %18607 = vmatprep.subr.bf16.mxu1 %v25812_v29  ;;  %v25822_v12 = vld [vmem:[#allocation29_spill] sm:$0xff]  ;;  %v25823_v29 = vld [vmem:[#allocation30_spill] sm:$0xff] }
 0x8d7   : > { %18417 = vmatpush1.bf16.msra.mxu0 %v25813_v30  ;;  %18609 = vmatpush1.bf16.msra.mxu1 %v25814_v42  ;;  %v25824_v30 = vld [vmem:[#allocation33_spill] sm:$0xff]  ;;  %v25825_v42 = vld [vmem:[#allocation34_spill] sm:$0xff] }
 0x8d8   : > { %18419 = vmatprep.subr.bf16.mxu0 %v25815_v11  ;;  %18611 = vmatprep.subr.bf16.mxu1 %v25816_v39  ;;  %v25826_v11 = vld [vmem:[#allocation39_spill] sm:$0xff]  ;;  %v25827_v39 = vld [vmem:[#allocation41_spill] sm:$0xff] }
 0x8db   : > { %18421 = vmatpush1.bf16.msra.mxu0 %v25817_v43  ;;  %18613 = vmatpush1.bf16.msra.mxu1 %v25818_v3  ;;  %v25828_v43 = vld [vmem:[#allocation94_spill] sm:$0xff]  ;;  %v25829_v3 = vld [vmem:[#allocation43_spill] sm:$0xff] }
 0x8dc   : > { %18423 = vmatprep.subr.bf16.mxu0 %v25819_v24  ;;  %18615 = vmatprep.subr.bf16.mxu1 %v25820_v31  ;;  %v25830_v24 = vld [vmem:[#allocation121_spill] sm:$0xff]  ;;  %v25831_v31 = vld [vmem:[#allocation122_spill] sm:$0xff] }
 0x8df   : > { %18425 = vmatpush1.bf16.msra.mxu0 %v25821_v63  ;;  %18617 = vmatpush1.bf16.msra.mxu1 %v25822_v12  ;;  %v25832_v63 = vld [vmem:[#allocation123_spill] sm:$0xff]  ;;  %v25833_v12 = vld [vmem:[#allocation124_spill] sm:$0xff] }
 0x8e0   : > { %18427 = vmatprep.subr.bf16.mxu0 %v25823_v29  ;;  %18619 = vmatprep.subr.bf16.mxu1 %v25824_v30  ;;  %v25834_v29 = vld [vmem:[#allocation125_spill] sm:$0xff] }
 0x8e3   : > { %18429 = vmatpush1.bf16.msra.mxu0 %v25825_v42  ;;  %18621 = vmatpush1.bf16.msra.mxu1 %v25826_v11  ;;  %v23468_v42 = vld [vmem:[%s22494_s21 + $0x8] sm:$0xff] }
 0x8e4   : > { %18431 = vmatprep.subr.bf16.mxu0 %v25827_v39  ;;  %18623 = vmatprep.subr.bf16.mxu1 %v25828_v43  ;;  %v23464_v39 = vld [vmem:[%s22494_s21] sm:$0xff] }
 0x8e5   : > { %25837 = vst [vmem:[#allocation36_spill] sm:$0xff] %v23464_v39 }
 0x8e7   : > { %18433 = vmatpush1.bf16.msra.mxu0 %v25829_v3  ;;  %18625 = vmatpush1.bf16.msra.mxu1 %v25830_v24 }
 0x8e8   : > { %18435 = vmatprep.subr.bf16.mxu0 %v25831_v31  ;;  %18627 = vmatprep.subr.bf16.mxu1 %v25832_v63 }
 0x8eb   : > { %18437 = vmatpush1.bf16.msra.mxu0 %v25833_v12  ;;  %18629 = vmatpush1.bf16.msra.mxu1 %v25834_v29  ;;  %v25836_v29 = vld [vmem:[#allocation66_spill] sm:$0xff] }
 0x8ec   : > { %18439 = vmatprep.subr.bf16.mxu0 %v25390_v18  ;;  %18631 = vmatprep.subr.bf16.mxu1 %v25391_v61 }
 0x8ee   : > { %9161 = vmatmul.mubr.f32.vlgmr.msra.gmra.mrb[8].mxu0 %v23239_v62  ;;  %10016 = vmatmul.mubr.f32.vlgmr.msra.gmra.mrb[8].mxu1 %v23239_v62 }
 0x8ef   : > { %18441 = vmatpush1.bf16.msra.mxu0 %v25393_v41  ;;  %18633 = vmatpush1.bf16.msra.mxu1 %v25395_v19 }
 0x8f0   : > { %18443 = vmatprep.subr.bf16.mxu0 %v25394_v55  ;;  %18635 = vmatprep.subr.bf16.mxu1 %v25396_v33 }
 0x8f1   : > { %9263 = vmatprep.mubr.f32.mxu0 %v25152_v20  ;;  %10118 = vmatprep.mubr.f32.mxu1 %v25152_v20 }
 0x8f3   : > { %18445 = vmatpush1.bf16.msra.mxu0 %v25397_v40  ;;  %18637 = vmatpush1.bf16.msra.mxu1 %v25399_v38 }
 0x8f4   : > { %18447 = vmatprep.subr.bf16.mxu0 %v25398_v4  ;;  %18639 = vmatprep.subr.bf16.mxu1 %v25400_v8 }
 0x8f7   : > { %18449 = vmatpush1.bf16.msra.mxu0 %v25401_v34  ;;  %18641 = vmatpush1.bf16.msra.mxu1 %v25403_v48 }
 0x8f8   : > { %18451 = vmatprep.subr.bf16.mxu0 %v25402_v15  ;;  %18643 = vmatprep.subr.bf16.mxu1 %v25404_v7 }
 0x8fb   : > { %18453 = vmatpush1.bf16.msra.mxu0 %v25405_v27  ;;  %18645 = vmatpush1.bf16.msra.mxu1 %v25407_v6 }
 0x8fc   : > { %18455 = vmatprep.subr.bf16.mxu0 %v25406_v57  ;;  %18647 = vmatprep.subr.bf16.mxu1 %v25408_v60 }
 0x8ff   : > { %18457 = vmatpush1.bf16.msra.mxu0 %v25409_v28  ;;  %18649 = vmatpush1.bf16.msra.mxu1 %v25411_v16 }
 0x900   : > { %18459 = vmatprep.subr.bf16.mxu0 %v25410_v14  ;;  %18651 = vmatprep.subr.bf16.mxu1 %v25412_v35 }
 0x903   : > { %18461 = vmatpush1.bf16.msra.mxu0 %v25413_v52  ;;  %18653 = vmatpush1.bf16.msra.mxu1 %v25614_v45 }
 0x904   : > { %18463 = vmatprep.subr.bf16.mxu0 %v25795_v25  ;;  %18655 = vmatprep.subr.bf16.mxu1 %v25796_v49 }
 0x907   : > { %18465 = vmatpush1.bf16.msra.mxu0 %v25797_v51  ;;  %18657 = vmatpush1.bf16.msra.mxu1 %v25798_v59 }
 0x908   : > { %18467 = vmatprep.subr.bf16.mxu0 %v25799_v13  ;;  %18659 = vmatprep.subr.bf16.mxu1 %v25800_v1 }
 0x90b   : > { %18469 = vmatpush1.bf16.msra.mxu0 %v25801_v26  ;;  %18661 = vmatpush1.bf16.msra.mxu1 %v25802_v36 }
 0x90c   : > { %18663 = vmatprep.subr.bf16.mxu0 %v25390_v18  ;;  %18855 = vmatprep.subr.bf16.mxu1 %v25391_v61 }
 0x90e   : > { %9265 = vmatmul.mubr.f32.vlgmr.msra.gmra.mrb[8].mxu0 %v23239_v62  ;;  %10120 = vmatmul.mubr.f32.vlgmr.msra.gmra.mrb[8].mxu1 %v23239_v62  ;;  %v25835_v62 = vld [vmem:[#allocation64_spill] sm:$0xff] }
 0x90f   : > { %18665 = vmatpush1.bf16.msra.mxu0 %v25393_v41  ;;  %18857 = vmatpush1.bf16.msra.mxu1 %v25395_v19 }
 0x910   : > { %18667 = vmatprep.subr.bf16.mxu0 %v25394_v55  ;;  %18859 = vmatprep.subr.bf16.mxu1 %v25396_v33 }
 0x911   : > { %10273 = vmatprep.mubr.f32.mxu0 %v25152_v20  ;;  %11128 = vmatprep.mubr.f32.mxu1 %v25152_v20 }
 0x913   : > { %18669 = vmatpush1.bf16.msra.mxu0 %v25397_v40  ;;  %18861 = vmatpush1.bf16.msra.mxu1 %v25399_v38 }
 0x914   : > { %18671 = vmatprep.subr.bf16.mxu0 %v25398_v4  ;;  %18863 = vmatprep.subr.bf16.mxu1 %v25400_v8 }
 0x917   : > { %18673 = vmatpush1.bf16.msra.mxu0 %v25401_v34  ;;  %18865 = vmatpush1.bf16.msra.mxu1 %v25403_v48 }
 0x918   : > { %18675 = vmatprep.subr.bf16.mxu0 %v25402_v15  ;;  %18867 = vmatprep.subr.bf16.mxu1 %v25404_v7 }
 0x91b   : > { %18677 = vmatpush1.bf16.msra.mxu0 %v25405_v27  ;;  %18869 = vmatpush1.bf16.msra.mxu1 %v25407_v6 }
 0x91c   : > { %18679 = vmatprep.subr.bf16.mxu0 %v25406_v57  ;;  %18871 = vmatprep.subr.bf16.mxu1 %v25408_v60 }
 0x91f   : > { %18681 = vmatpush1.bf16.msra.mxu0 %v25409_v28  ;;  %18873 = vmatpush1.bf16.msra.mxu1 %v25411_v16 }
 0x920   : > { %18683 = vmatprep.subr.bf16.mxu0 %v25410_v14  ;;  %18875 = vmatprep.subr.bf16.mxu1 %v25412_v35 }
 0x923   : > { %18685 = vmatpush1.bf16.msra.mxu0 %v25413_v52  ;;  %18877 = vmatpush1.bf16.msra.mxu1 %v25614_v45 }
 0x924   : > { %18687 = vmatprep.subr.bf16.mxu0 %v25795_v25  ;;  %18879 = vmatprep.subr.bf16.mxu1 %v25796_v49 }
 0x927   : > { %18689 = vmatpush1.bf16.msra.mxu0 %v25797_v51  ;;  %18881 = vmatpush1.bf16.msra.mxu1 %v25798_v59 }
 0x928   : > { %18691 = vmatprep.subr.bf16.mxu0 %v25799_v13  ;;  %18883 = vmatprep.subr.bf16.mxu1 %v25800_v1  ;;  %v23476_v13 = vld [vmem:[%s22494_s21 + $0x10] sm:$0xff] }
 0x929   : > { %25839 = vst [vmem:[#allocation45_spill] sm:$0xff] %v23476_v13 }
 0x92b   : > { %18693 = vmatpush1.bf16.msra.mxu0 %v25801_v26  ;;  %18885 = vmatpush1.bf16.msra.mxu1 %v25802_v36 }
 0x92c   : > { %18695 = vmatprep.subr.bf16.mxu0 %v25835_v62  ;;  %18887 = vmatprep.subr.bf16.mxu1 %v25836_v29  ;;  %v23472_v29 = vld [vmem:[%s22494_s21 + $0x18] sm:$0xff] }
 0x92d   : > { %25838 = vst [vmem:[#allocation42_spill] sm:$0xff] %v23472_v29 }
 0x9e1   : > { %v9266_v12 = vpop.f32.mrb[8].mxu0  ;;  %v10121_v63 = vpop.f32.mrb[8].mxu1 }
 0x9e2   : > { %v10130_v31 = vrot.slane %v9266_v12, 4  ;;  %v9268_v24 = vpop.f32.mrb[9].mxu0  ;;  %v10123_v3 = vpop.f32.mrb[9].mxu1  ;;  %v10132_v1 = vrot.slane %v10121_v63, 4 }
 0x9e3   : > { %v10131_v43 = vrot.slane %v9268_v24, 4  ;;  %v10133_v26 = vrot.slane %v10123_v3, 4 }
 0x9e4   : > { %v10138_v11 = vadd.f32 %v23464_v39, %v10130_v31  ;;  %v10140_v31 = vadd.f32 %v23476_v13, %v10132_v1  ;;  %v10171_v1 = vstv %s10170_s10 }
 0x9e5   : > { %v10139_v30 = vadd.f32 %v23468_v42, %v10131_v43  ;;  %v10141_v12 = vadd.f32 %v23472_v29, %v10133_v26  ;;  %v10162_v26 = vrot.slane %v23234_v0, 7 }
 0x9e6   : > { %v16308_v36 = vmul.f32 -1.442695, %v10138_v11 }
 0x9e7   : > { %v16309_v62 = vmul.f32 -1.442695, %v10139_v30  ;;  %v16310_v24 = vmul.f32 -1.442695, %v10141_v12 }
 0x9e8   : > { %20322 = vpow2.f32 %v16308_v36 }
 0x9e9   : > { %20324 = vpow2.f32 %v16309_v62 }
 0x9ea   : > { %20326 = vpow2.f32 %v16310_v24 }
 0x9eb   : > { %20328 = vtanh.f32 %v10140_v31 }
 0x9f2   : > { %v20323_v39 = vpop.eup %20322 }
 0x9f3   : > { %v20325_v59 = vpop.eup %20324  ;;  %v10145_v51 = vadd.f32 1.0, %v20323_v39 }
 0x9f4   : > { %v10151_v43 = vadd.f32 1.0, %v20325_v59  ;;  %v20327_v3 = vpop.eup %20326 }
 0x9f5   : > { %20330 = vrcp.f32 %v10145_v51  ;;  %v20329_v36 = vpop.eup %20328  ;;  %v10158_v62 = vadd.f32 1.0, %v20327_v3 }
 0x9f6   : > { %20332 = vrcp.f32 %v10151_v43 }
 0x9f7   : > { %20334 = vrcp.f32 %v10158_v62  ;;  %v25845_v62 = vld [vmem:[#allocation46_spill] sm:$0xff] }
 0x9ff   : > { %v20331_v11 = vpop.eup %20330 }
 0xa00   : > { %v20333_v63 = vpop.eup %20332  ;;  %v10165_v30 = vmul.f32 %v20331_v11, %v20329_v36 }
 0xa01   : > { %v10164_v12 = vmul.f32 %v20333_v63, %v10162_v26  ;;  %v20335_v59 = vpop.eup %20334  ;;  %v25842_v26 = vld [vmem:[#allocation96_spill] sm:$0xff] }
 0xa02   : > { %v25843_v63 = vld [vmem:[#allocation44_spill] sm:$0xff] }
 0xa03   : > { %v10166_v13 = vadd.f32 %v10165_v30, %v10164_v12  ;;  %v25844_v30 = vld [vmem:[#allocation97_spill] sm:$0xff]  ;;  %v25846_v12 = vld [vmem:[#allocation98_spill] sm:$0xff] }
 0xa05   : > { %20336 = vtanh.f32 %v10166_v13  ;;  %v23481_v39 = vmul.f32 %v10171_v1, %v10166_v13 }
 0xa0f   : > { %v20337_v51 = vpop.eup %20336 }
 0xa10   : > { %v10168_v24 = vmul.f32 %v20337_v51, %v20335_v59  ;;  %v25848_v59 = vld [vmem:[#allocation100_spill] sm:$0xff]  ;;  %v25849_v51 = vld [vmem:[#allocation53_spill] sm:$0xff] }
 0xa12   : > { %v23484_v31 = vsel %vm15458_vm4, %v23237_v50, %v10168_v24  ;;  %v10172_v43 = vmul.f32 %v10171_v1, %v10168_v24  ;;  %v25840_v50 = vld [vmem:[#allocation38_spill] sm:$0xff]  ;;  %v25847_v1 = vld [vmem:[#allocation99_spill] sm:$0xff]  ;;  %v25850_v24 = vld [vmem:[#allocation101_spill] sm:$0xff] }
 0xa14   : > { %v10175_v29 = vrot.slane %v10172_v43, 4  ;;  %v25851_v43 = vld [vmem:[#allocation104_spill] sm:$0xff] }
 0xa16   : > { %v23486_v0 = vand.u32 4294901760, %v10175_v29 }
 0xa18   : > { %v23489_v3 = vsub.f32 %v10175_v29, %v23486_v0  ;;  %v25841_v29 = vld [vmem:[#allocation95_spill] sm:$0xff] }
 0xa1a   : > { %v23492_v36 = vand.u32 4294901760, %v23489_v3 }
 0xa1c   : > { %v10277_v13 = vsub.f32 %v23489_v3, %v23492_v36 }
 0xa1e   : > { %v10278_v11 = vand.u32 4294901760, %v10277_v13  ;;  %v25852_v13 = vld [vmem:[#allocation109_spill] sm:$0xff] }
 0xa20   : > { %10279 = vmatmul.mubr.f32.vlgmr.msra.gmra.mrb[10].mxu0 %v10278_v11  ;;  %11134 = vmatmul.mubr.f32.vlgmr.msra.gmra.mrb[10].mxu1 %v10278_v11  ;;  %v25853_v11 = vld [vmem:[#allocation58_spill] sm:$0xff] }
 0xa21   : > { %18697 = vmatpush1.bf16.msra.mxu0 %v25484_v53  ;;  %18889 = vmatpush1.bf16.msra.mxu1 %v25485_v5 }
 0xa22   : > { %18699 = vmatprep.subr.bf16.mxu0 %v25570_v58  ;;  %18891 = vmatprep.subr.bf16.mxu1 %v25571_v46 }
 0xa23   : > { %10509 = vmatprep.mubr.f32.mxu0 %v25152_v20  ;;  %11364 = vmatprep.mubr.f32.mxu1 %v25152_v20 }
 0xa25   : > { %18701 = vmatpush1.bf16.msra.mxu0 %v25572_v10  ;;  %18893 = vmatpush1.bf16.msra.mxu1 %v25573_v44 }
 0xa26   : > { %18703 = vmatprep.subr.bf16.mxu0 %v25574_v2  ;;  %18895 = vmatprep.subr.bf16.mxu1 %v25575_v9 }
 0xa29   : > { %18705 = vmatpush1.bf16.msra.mxu0 %v25661_v22  ;;  %18897 = vmatpush1.bf16.msra.mxu1 %v25662_v37 }
 0xa2a   : > { %18707 = vmatprep.subr.bf16.mxu0 %v25578_v47  ;;  %18899 = vmatprep.subr.bf16.mxu1 %v25579_v54 }
 0xa2d   : > { %18709 = vmatpush1.bf16.msra.mxu0 %v25663_v56  ;;  %18901 = vmatpush1.bf16.msra.mxu1 %v25664_v21 }
 0xa2e   : > { %18711 = vmatprep.subr.bf16.mxu0 %v25665_v32  ;;  %18903 = vmatprep.subr.bf16.mxu1 %v25666_v17 }
 0xa31   : > { %18713 = vmatpush1.bf16.msra.mxu0 %v25749_v23  ;;  %18905 = vmatpush1.bf16.msra.mxu1 %v25840_v50  ;;  %v25906_v50 = vld [vmem:[#allocation88_spill] sm:$0xff]  ;;  %v25907_v23 = vld [vmem:[#allocation22_spill] sm:$0xff] }
 0xa32   : > { %18715 = vmatprep.subr.bf16.mxu0 %v25841_v29  ;;  %18907 = vmatprep.subr.bf16.mxu1 %v25842_v26  ;;  %v25897_v26 = vld [vmem:[#allocation16_spill] sm:$0xff]  ;;  %v25900_v29 = vld [vmem:[#allocation23_spill] sm:$0xff] }
 0xa35   : > { %18717 = vmatpush1.bf16.msra.mxu0 %v25843_v63  ;;  %18909 = vmatpush1.bf16.msra.mxu1 %v25844_v30  ;;  %v25854_v63 = vld [vmem:[#allocation106_spill] sm:$0xff] }
 0xa36   : > { %18719 = vmatprep.subr.bf16.mxu0 %v25845_v62  ;;  %18911 = vmatprep.subr.bf16.mxu1 %v25846_v12  ;;  %v25855_v12 = vld [vmem:[#allocation110_spill] sm:$0xff] }
 0xa37   : > { %v25868_v62 = vld [vmem:[#allocation126_spill] sm:$0xff] }
 0xa38   : > { %v25869_v30 = vld [vmem:[#allocation86_spill] sm:$0xff] }
 0xa39   : > { %18721 = vmatpush1.bf16.msra.mxu0 %v25847_v1  ;;  %18913 = vmatpush1.bf16.msra.mxu1 %v25848_v59  ;;  %v25856_v1 = vld [vmem:[#allocation112_spill] sm:$0xff]  ;;  %v25857_v59 = vld [vmem:[#allocation111_spill] sm:$0xff] }
 0xa3a   : > { %18723 = vmatprep.subr.bf16.mxu0 %v25849_v51  ;;  %18915 = vmatprep.subr.bf16.mxu1 %v25850_v24  ;;  %v25858_v51 = vld [vmem:[#allocation59_spill] sm:$0xff]  ;;  %v25863_v24 = vld [vmem:[#allocation114_spill] sm:$0xff] }
 0xa3d   : > { %18725 = vmatpush1.bf16.msra.mxu0 %v25851_v43  ;;  %18917 = vmatpush1.bf16.msra.mxu1 %v25852_v13  ;;  %v25859_v13 = vld [vmem:[#allocation102_spill] sm:$0xff]  ;;  %v25862_v43 = vld [vmem:[#allocation107_spill] sm:$0xff] }
 0xa3e   : > { %18727 = vmatprep.subr.bf16.mxu0 %v25853_v11  ;;  %18919 = vmatprep.subr.bf16.mxu1 %v25854_v63  ;;  %v25860_v11 = vld [vmem:[#allocation103_spill] sm:$0xff]  ;;  %v25861_v63 = vld [vmem:[#allocation105_spill] sm:$0xff] }
 0xa40   : > { %10511 = vmatmul.mubr.f32.vlgmr.msra.gmra.mrb[10].mxu0 %v23486_v0  ;;  %11366 = vmatmul.mubr.f32.vlgmr.msra.gmra.mrb[10].mxu1 %v23486_v0 }
 0xa41   : > { %18729 = vmatpush1.bf16.msra.mxu0 %v25855_v12  ;;  %18921 = vmatpush1.bf16.msra.mxu1 %v25856_v1  ;;  %v25864_v12 = vld [vmem:[#allocation108_spill] sm:$0xff]  ;;  %v25865_v1 = vld [vmem:[#allocation115_spill] sm:$0xff] }
 0xa42   : > { %18731 = vmatprep.subr.bf16.mxu0 %v25857_v59  ;;  %18923 = vmatprep.subr.bf16.mxu1 %v25858_v51  ;;  %v25866_v59 = vld [vmem:[#allocation116_spill] sm:$0xff] }
 0xa43   : > { %10645 = vmatprep.mubr.f32.mxu0 %v25152_v20  ;;  %11500 = vmatprep.mubr.f32.mxu1 %v25152_v20  ;;  %v25867_v51 = vld [vmem:[#allocation84_spill] sm:$0xff] }
 0xa45   : > { %18733 = vmatpush1.bf16.msra.mxu0 %v25859_v13  ;;  %18925 = vmatpush1.bf16.msra.mxu1 %v25860_v11  ;;  %v25870_v13 = vld [vmem:[#allocation127_spill] sm:$0xff]  ;;  %v25871_v11 = vld [vmem:[#allocation128_spill] sm:$0xff] }
 0xa46   : > { %18735 = vmatprep.subr.bf16.mxu0 %v25861_v63  ;;  %18927 = vmatprep.subr.bf16.mxu1 %v25862_v43  ;;  %v25872_v63 = vld [vmem:[#allocation130_spill] sm:$0xff]  ;;  %v25873_v43 = vld [vmem:[#allocation129_spill] sm:$0xff] }
 0xa49   : > { %18737 = vmatpush1.bf16.msra.mxu0 %v25863_v24  ;;  %18929 = vmatpush1.bf16.msra.mxu1 %v25864_v12  ;;  %v25874_v24 = vld [vmem:[#allocation131_spill] sm:$0xff]  ;;  %v25875_v12 = vld [vmem:[#allocation132_spill] sm:$0xff] }
 0xa4a   : > { %18739 = vmatprep.subr.bf16.mxu0 %v25865_v1  ;;  %18931 = vmatprep.subr.bf16.mxu1 %v25866_v59  ;;  %v25876_v1 = vld [vmem:[#allocation134_spill] sm:$0xff]  ;;  %v25877_v59 = vld [vmem:[#allocation133_spill] sm:$0xff] }
 0xa4d   : > { %18741 = vmatpush1.bf16.msra.mxu0 %v25867_v51  ;;  %18933 = vmatpush1.bf16.msra.mxu1 %v25868_v62  ;;  %v25878_v51 = vld [vmem:[#allocation135_spill] sm:$0xff]  ;;  %v25879_v62 = vld [vmem:[#allocation136_spill] sm:$0xff] }
 0xa4e   : > { %18743 = vmatprep.subr.bf16.mxu0 %v25869_v30  ;;  %18935 = vmatprep.subr.bf16.mxu1 %v25870_v13  ;;  %v25880_v30 = vld [vmem:[#allocation138_spill] sm:$0xff]  ;;  %v25881_v13 = vld [vmem:[#allocation137_spill] sm:$0xff] }
 0xa51   : > { %18745 = vmatpush1.bf16.msra.mxu0 %v25871_v11  ;;  %18937 = vmatpush1.bf16.msra.mxu1 %v25872_v63  ;;  %v25882_v11 = vld [vmem:[#allocation139_spill] sm:$0xff]  ;;  %v25883_v63 = vld [vmem:[#allocation140_spill] sm:$0xff] }
 0xa52   : > { %18747 = vmatprep.subr.bf16.mxu0 %v25873_v43  ;;  %18939 = vmatprep.subr.bf16.mxu1 %v25874_v24  ;;  %v25884_v43 = vld [vmem:[#allocation113_spill] sm:$0xff]  ;;  %v25896_v24 = vld [vmem:[#allocation14_spill] sm:$0xff] }
 0xa55   : > { %18749 = vmatpush1.bf16.msra.mxu0 %v25875_v12  ;;  %18941 = vmatpush1.bf16.msra.mxu1 %v25876_v1  ;;  %v25894_v1 = vld [vmem:[#allocation15_spill] sm:$0xff]  ;;  %v25895_v12 = vld [vmem:[#allocation13_spill] sm:$0xff] }
 0xa56   : > { %18751 = vmatprep.subr.bf16.mxu0 %v25877_v59  ;;  %18943 = vmatprep.subr.bf16.mxu1 %v25878_v51  ;;  %v25892_v51 = vld [vmem:[#allocation12_spill] sm:$0xff]  ;;  %v25893_v59 = vld [vmem:[#allocation65_spill] sm:$0xff] }
 0xa59   : > { %18753 = vmatpush1.bf16.msra.mxu0 %v25879_v62  ;;  %18945 = vmatpush1.bf16.msra.mxu1 %v25880_v30  ;;  %v25890_v30 = vld [vmem:[#allocation62_spill] sm:$0xff]  ;;  %v25891_v62 = vld [vmem:[#allocation11_spill] sm:$0xff] }
 0xa5a   : > { %18755 = vmatprep.subr.bf16.mxu0 %v25881_v13  ;;  %18947 = vmatprep.subr.bf16.mxu1 %v25882_v11  ;;  %v25888_v11 = vld [vmem:[#allocation60_spill] sm:$0xff]  ;;  %v25889_v13 = vld [vmem:[#allocation61_spill] sm:$0xff] }
 0xa5d   : > { %18757 = vmatpush1.bf16.msra.mxu0 %v25883_v63  ;;  %18949 = vmatpush1.bf16.msra.mxu1 %v25884_v43  ;;  %v25886_v43 = vld [vmem:[#allocation56_spill] sm:$0xff]  ;;  %v25887_v63 = vld [vmem:[#allocation57_spill] sm:$0xff] }
 0xa5e   : > { %18759 = vmatprep.subr.bf16.mxu0 %v25390_v18  ;;  %18951 = vmatprep.subr.bf16.mxu1 %v25391_v61 }
 0xa60   : > { %10648 = vmatmul.mubr.f32.vlgmr.msra.gmra.mrb[10].mxu0 %v23489_v3  ;;  %11503 = vmatmul.mubr.f32.vlgmr.msra.gmra.mrb[10].mxu1 %v23489_v3  ;;  %v25885_v3 = vld [vmem:[#allocation55_spill] sm:$0xff] }
 0xa61   : > { %18761 = vmatpush1.bf16.msra.mxu0 %v25393_v41  ;;  %18953 = vmatpush1.bf16.msra.mxu1 %v25395_v19 }
 0xa62   : > { %18763 = vmatprep.subr.bf16.mxu0 %v25394_v55  ;;  %18955 = vmatprep.subr.bf16.mxu1 %v25396_v33 }
 0xa63   : > { %10750 = vmatprep.mubr.f32.mxu0 %v25152_v20  ;;  %11605 = vmatprep.mubr.f32.mxu1 %v25152_v20 }
 0xa65   : > { %18765 = vmatpush1.bf16.msra.mxu0 %v25397_v40  ;;  %18957 = vmatpush1.bf16.msra.mxu1 %v25399_v38 }
 0xa66   : > { %18767 = vmatprep.subr.bf16.mxu0 %v25398_v4  ;;  %18959 = vmatprep.subr.bf16.mxu1 %v25400_v8 }
 0xa69   : > { %18769 = vmatpush1.bf16.msra.mxu0 %v25401_v34  ;;  %18961 = vmatpush1.bf16.msra.mxu1 %v25403_v48 }
 0xa6a   : > { %18771 = vmatprep.subr.bf16.mxu0 %v25402_v15  ;;  %18963 = vmatprep.subr.bf16.mxu1 %v25404_v7 }
 0xa6d   : > { %18773 = vmatpush1.bf16.msra.mxu0 %v25405_v27  ;;  %18965 = vmatpush1.bf16.msra.mxu1 %v25407_v6 }
 0xa6e   : > { %18775 = vmatprep.subr.bf16.mxu0 %v25406_v57  ;;  %18967 = vmatprep.subr.bf16.mxu1 %v25408_v60 }
 0xa71   : > { %18777 = vmatpush1.bf16.msra.mxu0 %v25409_v28  ;;  %18969 = vmatpush1.bf16.msra.mxu1 %v25411_v16 }
 0xa72   : > { %18779 = vmatprep.subr.bf16.mxu0 %v25410_v14  ;;  %18971 = vmatprep.subr.bf16.mxu1 %v25412_v35 }
 0xa75   : > { %18781 = vmatpush1.bf16.msra.mxu0 %v25413_v52  ;;  %18973 = vmatpush1.bf16.msra.mxu1 %v25614_v45 }
 0xa76   : > { %18783 = vmatprep.subr.bf16.mxu0 %v25795_v25  ;;  %18975 = vmatprep.subr.bf16.mxu1 %v25796_v49 }
 0xa79   : > { %18785 = vmatpush1.bf16.msra.mxu0 %v25885_v3  ;;  %18977 = vmatpush1.bf16.msra.mxu1 %v25886_v43 }
 0xa7a   : > { %18787 = vmatprep.subr.bf16.mxu0 %v25887_v63  ;;  %18979 = vmatprep.subr.bf16.mxu1 %v25888_v11 }
 0xa7d   : > { %18789 = vmatpush1.bf16.msra.mxu0 %v25889_v13  ;;  %18981 = vmatpush1.bf16.msra.mxu1 %v25890_v30 }
 0xa7e   : > { %18791 = vmatprep.subr.bf16.mxu0 %v25891_v62  ;;  %18983 = vmatprep.subr.bf16.mxu1 %v25892_v51  ;;  %v25898_v62 = vld [vmem:[#allocation19_spill] sm:$0xff]  ;;  %v25899_v51 = vld [vmem:[#allocation17_spill] sm:$0xff] }
 0xa80   : > { %10754 = vmatmul.mubr.f32.vlgmr.msra.gmra.mrb[10].mxu0 %v23492_v36  ;;  %11609 = vmatmul.mubr.f32.vlgmr.msra.gmra.mrb[10].mxu1 %v23492_v36  ;;  %v25901_v36 = vld [vmem:[#allocation25_spill] sm:$0xff] }
 0xa81   : > { %18793 = vmatpush1.bf16.msra.mxu0 %v25893_v59  ;;  %18985 = vmatpush1.bf16.msra.mxu1 %v25894_v1  ;;  %v25902_v59 = vld [vmem:[#allocation117_spill] sm:$0xff]  ;;  %v25903_v1 = vld [vmem:[#allocation118_spill] sm:$0xff] }
 0xa82   : > { %18795 = vmatprep.subr.bf16.mxu0 %v25895_v12  ;;  %18987 = vmatprep.subr.bf16.mxu1 %v25896_v24  ;;  %v25904_v12 = vld [vmem:[#allocation119_spill] sm:$0xff]  ;;  %v25905_v24 = vld [vmem:[#allocation120_spill] sm:$0xff] }
 0xa83   : > { %10920 = vmatprep.mubr.f32.mxu0 %v25152_v20  ;;  %11775 = vmatprep.mubr.f32.mxu1 %v25152_v20 }
 0xa85   : > { %18797 = vmatpush1.bf16.msra.mxu0 %v25897_v26  ;;  %18989 = vmatpush1.bf16.msra.mxu1 %v25898_v62  ;;  %v25908_v26 = vld [vmem:[#allocation26_spill] sm:$0xff]  ;;  %v25909_v62 = vld [vmem:[#allocation27_spill] sm:$0xff] }
 0xa86   : > { %18799 = vmatprep.subr.bf16.mxu0 %v25899_v51  ;;  %18991 = vmatprep.subr.bf16.mxu1 %v25900_v29  ;;  %v25910_v51 = vld [vmem:[#allocation29_spill] sm:$0xff]  ;;  %v25911_v29 = vld [vmem:[#allocation30_spill] sm:$0xff] }
 0xa89   : > { %18801 = vmatpush1.bf16.msra.mxu0 %v25901_v36  ;;  %18993 = vmatpush1.bf16.msra.mxu1 %v25902_v59  ;;  %v25912_v36 = vld [vmem:[#allocation33_spill] sm:$0xff]  ;;  %v25913_v59 = vld [vmem:[#allocation34_spill] sm:$0xff] }
 0xa8a   : > { %18803 = vmatprep.subr.bf16.mxu0 %v25903_v1  ;;  %18995 = vmatprep.subr.bf16.mxu1 %v25904_v12  ;;  %v25914_v1 = vld [vmem:[#allocation39_spill] sm:$0xff]  ;;  %v25915_v12 = vld [vmem:[#allocation41_spill] sm:$0xff] }
 0xa8d   : > { %18805 = vmatpush1.bf16.msra.mxu0 %v25905_v24  ;;  %18997 = vmatpush1.bf16.msra.mxu1 %v25906_v50  ;;  %v25916_v24 = vld [vmem:[#allocation94_spill] sm:$0xff]  ;;  %v25917_v50 = vld [vmem:[#allocation43_spill] sm:$0xff] }
 0xa8e   : > { %18807 = vmatprep.subr.bf16.mxu0 %v25907_v23  ;;  %18999 = vmatprep.subr.bf16.mxu1 %v25908_v26  ;;  %v25918_v23 = vld [vmem:[#allocation121_spill] sm:$0xff]  ;;  %v25919_v26 = vld [vmem:[#allocation122_spill] sm:$0xff] }
 0xa91   : > { %18809 = vmatpush1.bf16.msra.mxu0 %v25909_v62  ;;  %19001 = vmatpush1.bf16.msra.mxu1 %v25910_v51  ;;  %v25920_v62 = vld [vmem:[#allocation123_spill] sm:$0xff]  ;;  %v25921_v51 = vld [vmem:[#allocation124_spill] sm:$0xff] }
 0xa92   : > { %18811 = vmatprep.subr.bf16.mxu0 %v25911_v29  ;;  %19003 = vmatprep.subr.bf16.mxu1 %v25912_v36  ;;  %v25922_v29 = vld [vmem:[#allocation125_spill] sm:$0xff] }
 0xa95   : > { %18813 = vmatpush1.bf16.msra.mxu0 %v25913_v59  ;;  %19005 = vmatpush1.bf16.msra.mxu1 %v25914_v1 }
 0xa96   : > { %18815 = vmatprep.subr.bf16.mxu0 %v25915_v12  ;;  %19007 = vmatprep.subr.bf16.mxu1 %v25916_v24  ;;  %v25925_v12 = vld [vmem:[#allocation36_spill] sm:$0xff] }
 0xa99   : > { %18817 = vmatpush1.bf16.msra.mxu0 %v25917_v50  ;;  %19009 = vmatpush1.bf16.msra.mxu1 %v25918_v23 }
 0xa9a   : > { %18819 = vmatprep.subr.bf16.mxu0 %v25919_v26  ;;  %19011 = vmatprep.subr.bf16.mxu1 %v25920_v62 }
 0xa9d   : > { %18821 = vmatpush1.bf16.msra.mxu0 %v25921_v51  ;;  %19013 = vmatpush1.bf16.msra.mxu1 %v25922_v29  ;;  %v25924_v29 = vld [vmem:[#allocation66_spill] sm:$0xff] }
 0xa9e   : > { %18823 = vmatprep.subr.bf16.mxu0 %v25390_v18  ;;  %19015 = vmatprep.subr.bf16.mxu1 %v25391_v61 }
 0xaa0   : > { %10922 = vmatmul.mubr.f32.vlgmr.msra.gmra.mrb[10].mxu0 %v23486_v0  ;;  %11777 = vmatmul.mubr.f32.vlgmr.msra.gmra.mrb[10].mxu1 %v23486_v0 }
 0xaa1   : > { %18825 = vmatpush1.bf16.msra.mxu0 %v25393_v41  ;;  %19017 = vmatpush1.bf16.msra.mxu1 %v25395_v19 }
 0xaa2   : > { %18827 = vmatprep.subr.bf16.mxu0 %v25394_v55  ;;  %19019 = vmatprep.subr.bf16.mxu1 %v25396_v33 }
 0xaa3   : > { %11024 = vmatprep.mubr.f32.mxu0 %v25152_v20  ;;  %11879 = vmatprep.mubr.f32.mxu1 %v25152_v20 }
 0xaa5   : > { %18829 = vmatpush1.bf16.msra.mxu0 %v25397_v40  ;;  %19021 = vmatpush1.bf16.msra.mxu1 %v25399_v38 }
 0xaa6   : > { %18831 = vmatprep.subr.bf16.mxu0 %v25398_v4  ;;  %19023 = vmatprep.subr.bf16.mxu1 %v25400_v8 }
 0xaa9   : > { %18833 = vmatpush1.bf16.msra.mxu0 %v25401_v34  ;;  %19025 = vmatpush1.bf16.msra.mxu1 %v25403_v48 }
 0xaaa   : > { %18835 = vmatprep.subr.bf16.mxu0 %v25402_v15  ;;  %19027 = vmatprep.subr.bf16.mxu1 %v25404_v7 }
 0xaad   : > { %18837 = vmatpush1.bf16.msra.mxu0 %v25405_v27  ;;  %19029 = vmatpush1.bf16.msra.mxu1 %v25407_v6 }
 0xaae   : > { %18839 = vmatprep.subr.bf16.mxu0 %v25406_v57  ;;  %19031 = vmatprep.subr.bf16.mxu1 %v25408_v60 }
 0xab1   : > { %18841 = vmatpush1.bf16.msra.mxu0 %v25409_v28  ;;  %19033 = vmatpush1.bf16.msra.mxu1 %v25411_v16 }
 0xab2   : > { %18843 = vmatprep.subr.bf16.mxu0 %v25410_v14  ;;  %19035 = vmatprep.subr.bf16.mxu1 %v25412_v35 }
 0xab5   : > { %18845 = vmatpush1.bf16.msra.mxu0 %v25413_v52  ;;  %19037 = vmatpush1.bf16.msra.mxu1 %v25614_v45 }
 0xab6   : > { %18847 = vmatprep.subr.bf16.mxu0 %v25795_v25  ;;  %19039 = vmatprep.subr.bf16.mxu1 %v25796_v49 }
 0xab9   : > { %18849 = vmatpush1.bf16.msra.mxu0 %v25885_v3  ;;  %19041 = vmatpush1.bf16.msra.mxu1 %v25886_v43 }
 0xaba   : > { %18851 = vmatprep.subr.bf16.mxu0 %v25887_v63  ;;  %19043 = vmatprep.subr.bf16.mxu1 %v25888_v11 }
 0xabd   : > { %18853 = vmatpush1.bf16.msra.mxu0 %v25889_v13  ;;  %19045 = vmatpush1.bf16.msra.mxu1 %v25890_v30 }
 0xabe   : > { %19047 = vmatprep.subr.bf16.mxu0 %v25390_v18  ;;  %19239 = vmatprep.subr.bf16.mxu1 %v25391_v61 }
 0xac0   : > { %11026 = vmatmul.mubr.f32.vlgmr.msra.gmra.mrb[10].mxu0 %v23486_v0  ;;  %11881 = vmatmul.mubr.f32.vlgmr.msra.gmra.mrb[10].mxu1 %v23486_v0  ;;  %v25923_v0 = vld [vmem:[#allocation64_spill] sm:$0xff] }
 0xac1   : > { %19049 = vmatpush1.bf16.msra.mxu0 %v25393_v41  ;;  %19241 = vmatpush1.bf16.msra.mxu1 %v25395_v19 }
 0xac2   : > { %19051 = vmatprep.subr.bf16.mxu0 %v25394_v55  ;;  %19243 = vmatprep.subr.bf16.mxu1 %v25396_v33 }
 0xac3   : > { %12034 = vmatprep.mubr.f32.mxu0 %v25152_v20  ;;  %12889 = vmatprep.mubr.f32.mxu1 %v25152_v20 }
 0xac5   : > { %19053 = vmatpush1.bf16.msra.mxu0 %v25397_v40  ;;  %19245 = vmatpush1.bf16.msra.mxu1 %v25399_v38 }
 0xac6   : > { %19055 = vmatprep.subr.bf16.mxu0 %v25398_v4  ;;  %19247 = vmatprep.subr.bf16.mxu1 %v25400_v8 }
 0xac9   : > { %19057 = vmatpush1.bf16.msra.mxu0 %v25401_v34  ;;  %19249 = vmatpush1.bf16.msra.mxu1 %v25403_v48 }
 0xaca   : > { %19059 = vmatprep.subr.bf16.mxu0 %v25402_v15  ;;  %19251 = vmatprep.subr.bf16.mxu1 %v25404_v7 }
 0xacd   : > { %19061 = vmatpush1.bf16.msra.mxu0 %v25405_v27  ;;  %19253 = vmatpush1.bf16.msra.mxu1 %v25407_v6 }
 0xace   : > { %19063 = vmatprep.subr.bf16.mxu0 %v25406_v57  ;;  %19255 = vmatprep.subr.bf16.mxu1 %v25408_v60 }
 0xad1   : > { %19065 = vmatpush1.bf16.msra.mxu0 %v25409_v28  ;;  %19257 = vmatpush1.bf16.msra.mxu1 %v25411_v16 }
 0xad2   : > { %19067 = vmatprep.subr.bf16.mxu0 %v25410_v14  ;;  %19259 = vmatprep.subr.bf16.mxu1 %v25412_v35 }
 0xad5   : > { %19069 = vmatpush1.bf16.msra.mxu0 %v25413_v52  ;;  %19261 = vmatpush1.bf16.msra.mxu1 %v25614_v45 }
 0xad6   : > { %19071 = vmatprep.subr.bf16.mxu0 %v25795_v25  ;;  %19263 = vmatprep.subr.bf16.mxu1 %v25796_v49 }
 0xad9   : > { %19073 = vmatpush1.bf16.msra.mxu0 %v25885_v3  ;;  %19265 = vmatpush1.bf16.msra.mxu1 %v25886_v43  ;;  %v25927_v43 = vld [vmem:[#allocation45_spill] sm:$0xff] }
 0xada   : > { %19075 = vmatprep.subr.bf16.mxu0 %v25887_v63  ;;  %19267 = vmatprep.subr.bf16.mxu1 %v25888_v11 }
 0xadd   : > { %19077 = vmatpush1.bf16.msra.mxu0 %v25889_v13  ;;  %19269 = vmatpush1.bf16.msra.mxu1 %v25890_v30  ;;  %v25926_v30 = vld [vmem:[#allocation42_spill] sm:$0xff] }
 0xade   : > { %19079 = vmatprep.subr.bf16.mxu0 %v25923_v0  ;;  %19271 = vmatprep.subr.bf16.mxu1 %v25924_v29 }
 0xb93   : > { %v11027_v51 = vpop.f32.mrb[10].mxu0  ;;  %v11882_v62 = vpop.f32.mrb[10].mxu1 }
 0xb94   : > { %v11891_v26 = vrot.slane %v11027_v51, 3  ;;  %v11029_v23 = vpop.f32.mrb[11].mxu0  ;;  %v11884_v50 = vpop.f32.mrb[11].mxu1  ;;  %v11893_v63 = vrot.slane %v11882_v62, 3 }
 0xb95   : > { %v11892_v24 = vrot.slane %v11029_v23, 3  ;;  %v11894_v13 = vrot.slane %v11884_v50, 3 }
 0xb96   : > { %v11899_v1 = vadd.f32 %v25925_v12, %v11891_v26  ;;  %v11901_v3 = vadd.f32 %v25927_v43, %v11893_v63  ;;  %v11923_v12 = vrot.slane %v23481_v39, 7  ;;  %v11932_v63 = vstv %s11931_s5  ;;  %s20490_s5 = smov (%p1300_p13), 127  }
 0xb97   : > { %v11900_v59 = vadd.f32 %v23468_v42, %v11892_v24  ;;  %v11902_v0 = vadd.f32 %v25926_v30, %v11894_v13 }
 0xb98   : > { %v16311_v36 = vmul.f32 -1.442695, %v11899_v1 }
 0xb99   : > { %v16312_v11 = vmul.f32 -1.442695, %v11900_v59  ;;  %v16313_v29 = vmul.f32 -1.442695, %v11902_v0 }
 0xb9a   : > { %20338 = vpow2.f32 %v16311_v36 }
 0xb9b   : > { %20340 = vpow2.f32 %v16312_v11 }
 0xb9c   : > { %20342 = vpow2.f32 %v16313_v29 }
 0xb9d   : > { %20344 = vtanh.f32 %v11901_v3 }
 0xba4   : > { %v20339_v51 = vpop.eup %20338 }
 0xba5   : > { %v20341_v49 = vpop.eup %20340  ;;  %v11906_v25 = vadd.f32 1.0, %v20339_v51 }
 0xba6   : > { %v11912_v23 = vadd.f32 1.0, %v20341_v49  ;;  %v20343_v42 = vpop.eup %20342 }
 0xba7   : > { %20346 = vrcp.f32 %v11906_v25  ;;  %v20345_v50 = vpop.eup %20344  ;;  %v11919_v1 = vadd.f32 1.0, %v20343_v42  ;;  %v25929_v42 = vld [vmem:[#allocation38_spill] sm:$0xff] }
 0xba8   : > { %20348 = vrcp.f32 %v11912_v23 }
 0xba9   : > { %20350 = vrcp.f32 %v11919_v1  ;;  %v25935_v1 = vld [vmem:[#allocation98_spill] sm:$0xff] }
 0xbb1   : > { %v20347_v26 = vpop.eup %20346 }
 0xbb2   : > { %v20349_v30 = vpop.eup %20348  ;;  %v11926_v62 = vmul.f32 %v20347_v26, %v20345_v50  ;;  %v25930_v50 = vld [vmem:[#allocation95_spill] sm:$0xff]  ;;  %v25931_v26 = vld [vmem:[#allocation96_spill] sm:$0xff] }
 0xbb3   : > { %v11925_v59 = vmul.f32 %v20349_v30, %v11923_v12  ;;  %v20351_v49 = vpop.eup %20350  ;;  %v25932_v12 = vld [vmem:[#allocation44_spill] sm:$0xff]  ;;  %v25933_v30 = vld [vmem:[#allocation97_spill] sm:$0xff] }
 0xbb5   : > { %v11927_v24 = vadd.f32 %v11926_v62, %v11925_v59  ;;  %v25934_v62 = vld [vmem:[#allocation46_spill] sm:$0xff]  ;;  %v25936_v59 = vld [vmem:[#allocation99_spill] sm:$0xff] }
 0xbb7   : > { %20352 = vtanh.f32 %v11927_v24  ;;  %v23716_v29 = vmul.f32 %v11932_v63, %v11927_v24  ;;  %v25938_v24 = vld [vmem:[#allocation53_spill] sm:$0xff] }
 0xbc1   : > { %v20353_v25 = vpop.eup %20352 }
 0xbc2   : > { %v11929_v43 = vmul.f32 %v20353_v25, %v20351_v49  ;;  %v25939_v49 = vld [vmem:[#allocation101_spill] sm:$0xff]  ;;  %v25940_v25 = vld [vmem:[#allocation104_spill] sm:$0xff] }
 0xbc4   : > { %v23719_v13 = vsel %vm15460_vm5, %v23484_v31, %v11929_v43  ;;  %v11933_v11 = vmul.f32 %v11932_v63, %v11929_v43  ;;  %v25928_v31 = vld [vmem:[#allocation37_spill] sm:$0xff]  ;;  %v25937_v63 = vld [vmem:[#allocation100_spill] sm:$0xff] }
 0xbc5   : > { %v25941_v43 = vld [vmem:[#allocation109_spill] sm:$0xff] }
 0xbc6   : > { %v11936_v3 = vrot.slane %v11933_v11, 5  ;;  %v25942_v11 = vld [vmem:[#allocation58_spill] sm:$0xff] }
 0xbc8   : > { %v23721_v39 = vand.u32 4294901760, %v11936_v3 }
 0xbca   : > { %v23724_v36 = vsub.f32 %v11936_v3, %v23721_v39  ;;  %v25943_v3 = vld [vmem:[#allocation106_spill] sm:$0xff] }
 0xbcc   : > { %v23727_v0 = vand.u32 4294901760, %v23724_v36 }
 0xbce   : > { %v12038_v51 = vsub.f32 %v23724_v36, %v23727_v0 }
 0xbd0   : > { %v12039_v23 = vand.u32 4294901760, %v12038_v51  ;;  %v25944_v51 = vld [vmem:[#allocation110_spill] sm:$0xff] }
 0xbd2   : > { %12040 = vmatmul.mubr.f32.vlgmr.msra.gmra.mrb[12].mxu0 %v12039_v23  ;;  %12895 = vmatmul.mubr.f32.vlgmr.msra.gmra.mrb[12].mxu1 %v12039_v23  ;;  %v25945_v23 = vld [vmem:[#allocation112_spill] sm:$0xff] }
 0xbd3   : > { %19081 = vmatpush1.bf16.msra.mxu0 %v25484_v53  ;;  %19273 = vmatpush1.bf16.msra.mxu1 %v25485_v5 }
 0xbd4   : > { %19083 = vmatprep.subr.bf16.mxu0 %v25570_v58  ;;  %19275 = vmatprep.subr.bf16.mxu1 %v25571_v46 }
 0xbd5   : > { %12270 = vmatprep.mubr.f32.mxu0 %v25152_v20  ;;  %13125 = vmatprep.mubr.f32.mxu1 %v25152_v20 }
 0xbd7   : > { %19085 = vmatpush1.bf16.msra.mxu0 %v25572_v10  ;;  %19277 = vmatpush1.bf16.msra.mxu1 %v25573_v44 }
 0xbd8   : > { %19087 = vmatprep.subr.bf16.mxu0 %v25574_v2  ;;  %19279 = vmatprep.subr.bf16.mxu1 %v25575_v9 }
 0xbdb   : > { %19089 = vmatpush1.bf16.msra.mxu0 %v25661_v22  ;;  %19281 = vmatpush1.bf16.msra.mxu1 %v25662_v37 }
 0xbdc   : > { %19091 = vmatprep.subr.bf16.mxu0 %v25578_v47  ;;  %19283 = vmatprep.subr.bf16.mxu1 %v25579_v54 }
 0xbdf   : > { %19093 = vmatpush1.bf16.msra.mxu0 %v25663_v56  ;;  %19285 = vmatpush1.bf16.msra.mxu1 %v25664_v21 }
 0xbe0   : > { %19095 = vmatprep.subr.bf16.mxu0 %v25665_v32  ;;  %19287 = vmatprep.subr.bf16.mxu1 %v25666_v17 }
 0xbe3   : > { %19097 = vmatpush1.bf16.msra.mxu0 %v25928_v31  ;;  %19289 = vmatpush1.bf16.msra.mxu1 %v25929_v42  ;;  %v25998_v42 = vld [vmem:[#allocation22_spill] sm:$0xff] }
 0xbe4   : > { %19099 = vmatprep.subr.bf16.mxu0 %v25930_v50  ;;  %19291 = vmatprep.subr.bf16.mxu1 %v25931_v26  ;;  %v25991_v26 = vld [vmem:[#allocation23_spill] sm:$0xff]  ;;  %v25997_v50 = vld [vmem:[#allocation88_spill] sm:$0xff] }
 0xbe7   : > { %19101 = vmatpush1.bf16.msra.mxu0 %v25932_v12  ;;  %19293 = vmatpush1.bf16.msra.mxu1 %v25933_v30  ;;  %v25987_v30 = vld [vmem:[#allocation14_spill] sm:$0xff]  ;;  %v25988_v12 = vld [vmem:[#allocation16_spill] sm:$0xff] }
 0xbe8   : > { %19103 = vmatprep.subr.bf16.mxu0 %v25934_v62  ;;  %19295 = vmatprep.subr.bf16.mxu1 %v25935_v1  ;;  %v25958_v1 = vld [vmem:[#allocation86_spill] sm:$0xff]  ;;  %v25986_v62 = vld [vmem:[#allocation13_spill] sm:$0xff] }
 0xbeb   : > { %19105 = vmatpush1.bf16.msra.mxu0 %v25936_v59  ;;  %19297 = vmatpush1.bf16.msra.mxu1 %v25937_v63  ;;  %v25946_v63 = vld [vmem:[#allocation111_spill] sm:$0xff]  ;;  %v25957_v59 = vld [vmem:[#allocation126_spill] sm:$0xff] }
 0xbec   : > { %19107 = vmatprep.subr.bf16.mxu0 %v25938_v24  ;;  %19299 = vmatprep.subr.bf16.mxu1 %v25939_v49  ;;  %v25947_v24 = vld [vmem:[#allocation59_spill] sm:$0xff]  ;;  %v25952_v49 = vld [vmem:[#allocation114_spill] sm:$0xff] }
 0xbef   : > { %19109 = vmatpush1.bf16.msra.mxu0 %v25940_v25  ;;  %19301 = vmatpush1.bf16.msra.mxu1 %v25941_v43  ;;  %v25948_v43 = vld [vmem:[#allocation102_spill] sm:$0xff]  ;;  %v25951_v25 = vld [vmem:[#allocation107_spill] sm:$0xff] }
 0xbf0   : > { %19111 = vmatprep.subr.bf16.mxu0 %v25942_v11  ;;  %19303 = vmatprep.subr.bf16.mxu1 %v25943_v3  ;;  %v25949_v11 = vld [vmem:[#allocation103_spill] sm:$0xff]  ;;  %v25950_v3 = vld [vmem:[#allocation105_spill] sm:$0xff] }
 0xbf2   : > { %12272 = vmatmul.mubr.f32.vlgmr.msra.gmra.mrb[12].mxu0 %v23721_v39  ;;  %13127 = vmatmul.mubr.f32.vlgmr.msra.gmra.mrb[12].mxu1 %v23721_v39 }
 0xbf3   : > { %19113 = vmatpush1.bf16.msra.mxu0 %v25944_v51  ;;  %19305 = vmatpush1.bf16.msra.mxu1 %v25945_v23  ;;  %v25953_v51 = vld [vmem:[#allocation108_spill] sm:$0xff]  ;;  %v25954_v23 = vld [vmem:[#allocation115_spill] sm:$0xff] }
 0xbf4   : > { %19115 = vmatprep.subr.bf16.mxu0 %v25946_v63  ;;  %19307 = vmatprep.subr.bf16.mxu1 %v25947_v24  ;;  %v25955_v63 = vld [vmem:[#allocation116_spill] sm:$0xff] }
 0xbf5   : > { %12406 = vmatprep.mubr.f32.mxu0 %v25152_v20  ;;  %13261 = vmatprep.mubr.f32.mxu1 %v25152_v20  ;;  %v25956_v24 = vld [vmem:[#allocation84_spill] sm:$0xff] }
 0xbf7   : > { %19117 = vmatpush1.bf16.msra.mxu0 %v25948_v43  ;;  %19309 = vmatpush1.bf16.msra.mxu1 %v25949_v11  ;;  %v25959_v43 = vld [vmem:[#allocation127_spill] sm:$0xff]  ;;  %v25960_v11 = vld [vmem:[#allocation128_spill] sm:$0xff] }
 0xbf8   : > { %19119 = vmatprep.subr.bf16.mxu0 %v25950_v3  ;;  %19311 = vmatprep.subr.bf16.mxu1 %v25951_v25  ;;  %v25961_v3 = vld [vmem:[#allocation130_spill] sm:$0xff]  ;;  %v25962_v25 = vld [vmem:[#allocation129_spill] sm:$0xff] }
 0xbfb   : > { %19121 = vmatpush1.bf16.msra.mxu0 %v25952_v49  ;;  %19313 = vmatpush1.bf16.msra.mxu1 %v25953_v51  ;;  %v25963_v49 = vld [vmem:[#allocation131_spill] sm:$0xff]  ;;  %v25964_v51 = vld [vmem:[#allocation132_spill] sm:$0xff] }
 0xbfc   : > { %19123 = vmatprep.subr.bf16.mxu0 %v25954_v23  ;;  %19315 = vmatprep.subr.bf16.mxu1 %v25955_v63  ;;  %v25965_v23 = vld [vmem:[#allocation134_spill] sm:$0xff]  ;;  %v25966_v63 = vld [vmem:[#allocation133_spill] sm:$0xff] }
 0xbff   : > { %19125 = vmatpush1.bf16.msra.mxu0 %v25956_v24  ;;  %19317 = vmatpush1.bf16.msra.mxu1 %v25957_v59  ;;  %v25967_v24 = vld [vmem:[#allocation135_spill] sm:$0xff]  ;;  %v25968_v59 = vld [vmem:[#allocation136_spill] sm:$0xff] }
 0xc00   : > { %19127 = vmatprep.subr.bf16.mxu0 %v25958_v1  ;;  %19319 = vmatprep.subr.bf16.mxu1 %v25959_v43  ;;  %v25969_v1 = vld [vmem:[#allocation138_spill] sm:$0xff]  ;;  %v25970_v43 = vld [vmem:[#allocation137_spill] sm:$0xff] }
 0xc03   : > { %19129 = vmatpush1.bf16.msra.mxu0 %v25960_v11  ;;  %19321 = vmatpush1.bf16.msra.mxu1 %v25961_v3  ;;  %v25971_v11 = vld [vmem:[#allocation139_spill] sm:$0xff]  ;;  %v25972_v3 = vld [vmem:[#allocation140_spill] sm:$0xff] }
 0xc04   : > { %19131 = vmatprep.subr.bf16.mxu0 %v25962_v25  ;;  %19323 = vmatprep.subr.bf16.mxu1 %v25963_v49  ;;  %v25973_v25 = vld [vmem:[#allocation113_spill] sm:$0xff]  ;;  %v25985_v49 = vld [vmem:[#allocation15_spill] sm:$0xff] }
 0xc07   : > { %19133 = vmatpush1.bf16.msra.mxu0 %v25964_v51  ;;  %19325 = vmatpush1.bf16.msra.mxu1 %v25965_v23  ;;  %v25983_v23 = vld [vmem:[#allocation12_spill] sm:$0xff]  ;;  %v25984_v51 = vld [vmem:[#allocation65_spill] sm:$0xff] }
 0xc08   : > { %19135 = vmatprep.subr.bf16.mxu0 %v25966_v63  ;;  %19327 = vmatprep.subr.bf16.mxu1 %v25967_v24  ;;  %v25981_v24 = vld [vmem:[#allocation62_spill] sm:$0xff]  ;;  %v25982_v63 = vld [vmem:[#allocation11_spill] sm:$0xff] }
 0xc0b   : > { %19137 = vmatpush1.bf16.msra.mxu0 %v25968_v59  ;;  %19329 = vmatpush1.bf16.msra.mxu1 %v25969_v1  ;;  %v25979_v1 = vld [vmem:[#allocation60_spill] sm:$0xff]  ;;  %v25980_v59 = vld [vmem:[#allocation61_spill] sm:$0xff] }
 0xc0c   : > { %19139 = vmatprep.subr.bf16.mxu0 %v25970_v43  ;;  %19331 = vmatprep.subr.bf16.mxu1 %v25971_v11  ;;  %v25977_v11 = vld [vmem:[#allocation56_spill] sm:$0xff]  ;;  %v25978_v43 = vld [vmem:[#allocation57_spill] sm:$0xff] }
 0xc0f   : > { %19141 = vmatpush1.bf16.msra.mxu0 %v25972_v3  ;;  %19333 = vmatpush1.bf16.msra.mxu1 %v25973_v25  ;;  %v25975_v25 = vld [vmem:[#allocation54_spill] sm:$0xff]  ;;  %v25976_v3 = vld [vmem:[#allocation55_spill] sm:$0xff] }
 0xc10   : > { %19143 = vmatprep.subr.bf16.mxu0 %v25390_v18  ;;  %19335 = vmatprep.subr.bf16.mxu1 %v25391_v61 }
 0xc12   : > { %12409 = vmatmul.mubr.f32.vlgmr.msra.gmra.mrb[12].mxu0 %v23724_v36  ;;  %13264 = vmatmul.mubr.f32.vlgmr.msra.gmra.mrb[12].mxu1 %v23724_v36  ;;  %v25974_v36 = vld [vmem:[#allocation52_spill] sm:$0xff] }
 0xc13   : > { %19145 = vmatpush1.bf16.msra.mxu0 %v25393_v41  ;;  %19337 = vmatpush1.bf16.msra.mxu1 %v25395_v19 }
 0xc14   : > { %19147 = vmatprep.subr.bf16.mxu0 %v25394_v55  ;;  %19339 = vmatprep.subr.bf16.mxu1 %v25396_v33 }
 0xc15   : > { %12511 = vmatprep.mubr.f32.mxu0 %v25152_v20  ;;  %13366 = vmatprep.mubr.f32.mxu1 %v25152_v20 }
 0xc17   : > { %19149 = vmatpush1.bf16.msra.mxu0 %v25397_v40  ;;  %19341 = vmatpush1.bf16.msra.mxu1 %v25399_v38 }
 0xc18   : > { %19151 = vmatprep.subr.bf16.mxu0 %v25398_v4  ;;  %19343 = vmatprep.subr.bf16.mxu1 %v25400_v8 }
 0xc1b   : > { %19153 = vmatpush1.bf16.msra.mxu0 %v25401_v34  ;;  %19345 = vmatpush1.bf16.msra.mxu1 %v25403_v48 }
 0xc1c   : > { %19155 = vmatprep.subr.bf16.mxu0 %v25402_v15  ;;  %19347 = vmatprep.subr.bf16.mxu1 %v25404_v7 }
 0xc1f   : > { %19157 = vmatpush1.bf16.msra.mxu0 %v25405_v27  ;;  %19349 = vmatpush1.bf16.msra.mxu1 %v25407_v6 }
 0xc20   : > { %19159 = vmatprep.subr.bf16.mxu0 %v25406_v57  ;;  %19351 = vmatprep.subr.bf16.mxu1 %v25408_v60 }
 0xc23   : > { %19161 = vmatpush1.bf16.msra.mxu0 %v25409_v28  ;;  %19353 = vmatpush1.bf16.msra.mxu1 %v25411_v16 }
 0xc24   : > { %19163 = vmatprep.subr.bf16.mxu0 %v25410_v14  ;;  %19355 = vmatprep.subr.bf16.mxu1 %v25412_v35 }
 0xc27   : > { %19165 = vmatpush1.bf16.msra.mxu0 %v25413_v52  ;;  %19357 = vmatpush1.bf16.msra.mxu1 %v25614_v45 }
 0xc28   : > { %19167 = vmatprep.subr.bf16.mxu0 %v25974_v36  ;;  %19359 = vmatprep.subr.bf16.mxu1 %v25975_v25 }
 0xc2b   : > { %19169 = vmatpush1.bf16.msra.mxu0 %v25976_v3  ;;  %19361 = vmatpush1.bf16.msra.mxu1 %v25977_v11 }
 0xc2c   : > { %19171 = vmatprep.subr.bf16.mxu0 %v25978_v43  ;;  %19363 = vmatprep.subr.bf16.mxu1 %v25979_v1 }
 0xc2f   : > { %19173 = vmatpush1.bf16.msra.mxu0 %v25980_v59  ;;  %19365 = vmatpush1.bf16.msra.mxu1 %v25981_v24 }
 0xc30   : > { %19175 = vmatprep.subr.bf16.mxu0 %v25982_v63  ;;  %19367 = vmatprep.subr.bf16.mxu1 %v25983_v23  ;;  %v25989_v63 = vld [vmem:[#allocation19_spill] sm:$0xff]  ;;  %v25990_v23 = vld [vmem:[#allocation17_spill] sm:$0xff] }
 0xc32   : > { %12515 = vmatmul.mubr.f32.vlgmr.msra.gmra.mrb[12].mxu0 %v23727_v0  ;;  %13370 = vmatmul.mubr.f32.vlgmr.msra.gmra.mrb[12].mxu1 %v23727_v0  ;;  %v25992_v0 = vld [vmem:[#allocation25_spill] sm:$0xff] }
 0xc33   : > { %19177 = vmatpush1.bf16.msra.mxu0 %v25984_v51  ;;  %19369 = vmatpush1.bf16.msra.mxu1 %v25985_v49  ;;  %v25993_v51 = vld [vmem:[#allocation117_spill] sm:$0xff]  ;;  %v25994_v49 = vld [vmem:[#allocation118_spill] sm:$0xff] }
 0xc34   : > { %19179 = vmatprep.subr.bf16.mxu0 %v25986_v62  ;;  %19371 = vmatprep.subr.bf16.mxu1 %v25987_v30  ;;  %v25995_v62 = vld [vmem:[#allocation119_spill] sm:$0xff]  ;;  %v25996_v30 = vld [vmem:[#allocation120_spill] sm:$0xff] }
 0xc35   : > { %12681 = vmatprep.mubr.f32.mxu0 %v25152_v20  ;;  %13536 = vmatprep.mubr.f32.mxu1 %v25152_v20 }
 0xc37   : > { %19181 = vmatpush1.bf16.msra.mxu0 %v25988_v12  ;;  %19373 = vmatpush1.bf16.msra.mxu1 %v25989_v63  ;;  %v25999_v12 = vld [vmem:[#allocation26_spill] sm:$0xff]  ;;  %v26000_v63 = vld [vmem:[#allocation27_spill] sm:$0xff] }
 0xc38   : > { %19183 = vmatprep.subr.bf16.mxu0 %v25990_v23  ;;  %19375 = vmatprep.subr.bf16.mxu1 %v25991_v26  ;;  %v26001_v23 = vld [vmem:[#allocation29_spill] sm:$0xff]  ;;  %v26002_v26 = vld [vmem:[#allocation30_spill] sm:$0xff] }
 0xc3b   : > { %19185 = vmatpush1.bf16.msra.mxu0 %v25992_v0  ;;  %19377 = vmatpush1.bf16.msra.mxu1 %v25993_v51  ;;  %v26003_v0 = vld [vmem:[#allocation33_spill] sm:$0xff]  ;;  %v26004_v51 = vld [vmem:[#allocation34_spill] sm:$0xff] }
 0xc3c   : > { %19187 = vmatprep.subr.bf16.mxu0 %v25994_v49  ;;  %19379 = vmatprep.subr.bf16.mxu1 %v25995_v62  ;;  %v26005_v49 = vld [vmem:[#allocation39_spill] sm:$0xff]  ;;  %v26006_v62 = vld [vmem:[#allocation41_spill] sm:$0xff] }
 0xc3f   : > { %19189 = vmatpush1.bf16.msra.mxu0 %v25996_v30  ;;  %19381 = vmatpush1.bf16.msra.mxu1 %v25997_v50  ;;  %v26007_v30 = vld [vmem:[#allocation94_spill] sm:$0xff]  ;;  %v26008_v50 = vld [vmem:[#allocation43_spill] sm:$0xff] }
 0xc40   : > { %19191 = vmatprep.subr.bf16.mxu0 %v25998_v42  ;;  %19383 = vmatprep.subr.bf16.mxu1 %v25999_v12  ;;  %v26009_v42 = vld [vmem:[#allocation121_spill] sm:$0xff]  ;;  %v26010_v12 = vld [vmem:[#allocation122_spill] sm:$0xff] }
 0xc43   : > { %19193 = vmatpush1.bf16.msra.mxu0 %v26000_v63  ;;  %19385 = vmatpush1.bf16.msra.mxu1 %v26001_v23  ;;  %v26011_v63 = vld [vmem:[#allocation123_spill] sm:$0xff]  ;;  %v26012_v23 = vld [vmem:[#allocation124_spill] sm:$0xff] }
 0xc44   : > { %19195 = vmatprep.subr.bf16.mxu0 %v26002_v26  ;;  %19387 = vmatprep.subr.bf16.mxu1 %v26003_v0  ;;  %v26013_v26 = vld [vmem:[#allocation125_spill] sm:$0xff] }
 0xc47   : > { %19197 = vmatpush1.bf16.msra.mxu0 %v26004_v51  ;;  %19389 = vmatpush1.bf16.msra.mxu1 %v26005_v49  ;;  %v23950_v51 = vld [vmem:[%s22494_s21 + $0x8] sm:$0xff] }
 0xc48   : > { %19199 = vmatprep.subr.bf16.mxu0 %v26006_v62  ;;  %19391 = vmatprep.subr.bf16.mxu1 %v26007_v30  ;;  %v23946_v62 = vld [vmem:[%s22494_s21] sm:$0xff] }
 0xc49   : > { %26016 = vst [vmem:[#allocation48_spill] sm:$0xff] %v23946_v62 }
 0xc4b   : > { %19201 = vmatpush1.bf16.msra.mxu0 %v26008_v50  ;;  %19393 = vmatpush1.bf16.msra.mxu1 %v26009_v42 }
 0xc4c   : > { %19203 = vmatprep.subr.bf16.mxu0 %v26010_v12  ;;  %19395 = vmatprep.subr.bf16.mxu1 %v26011_v63 }
 0xc4f   : > { %19205 = vmatpush1.bf16.msra.mxu0 %v26012_v23  ;;  %19397 = vmatpush1.bf16.msra.mxu1 %v26013_v26  ;;  %v26015_v26 = vld [vmem:[#allocation66_spill] sm:$0xff] }
 0xc50   : > { %19207 = vmatprep.subr.bf16.mxu0 %v25390_v18  ;;  %19399 = vmatprep.subr.bf16.mxu1 %v25391_v61 }
 0xc52   : > { %12683 = vmatmul.mubr.f32.vlgmr.msra.gmra.mrb[12].mxu0 %v23721_v39  ;;  %13538 = vmatmul.mubr.f32.vlgmr.msra.gmra.mrb[12].mxu1 %v23721_v39 }
 0xc53   : > { %19209 = vmatpush1.bf16.msra.mxu0 %v25393_v41  ;;  %19401 = vmatpush1.bf16.msra.mxu1 %v25395_v19 }
 0xc54   : > { %19211 = vmatprep.subr.bf16.mxu0 %v25394_v55  ;;  %19403 = vmatprep.subr.bf16.mxu1 %v25396_v33 }
 0xc55   : > { %12785 = vmatprep.mubr.f32.mxu0 %v25152_v20  ;;  %13640 = vmatprep.mubr.f32.mxu1 %v25152_v20 }
 0xc57   : > { %19213 = vmatpush1.bf16.msra.mxu0 %v25397_v40  ;;  %19405 = vmatpush1.bf16.msra.mxu1 %v25399_v38 }
 0xc58   : > { %19215 = vmatprep.subr.bf16.mxu0 %v25398_v4  ;;  %19407 = vmatprep.subr.bf16.mxu1 %v25400_v8 }
 0xc5b   : > { %19217 = vmatpush1.bf16.msra.mxu0 %v25401_v34  ;;  %19409 = vmatpush1.bf16.msra.mxu1 %v25403_v48 }
 0xc5c   : > { %19219 = vmatprep.subr.bf16.mxu0 %v25402_v15  ;;  %19411 = vmatprep.subr.bf16.mxu1 %v25404_v7 }
 0xc5f   : > { %19221 = vmatpush1.bf16.msra.mxu0 %v25405_v27  ;;  %19413 = vmatpush1.bf16.msra.mxu1 %v25407_v6 }
 0xc60   : > { %19223 = vmatprep.subr.bf16.mxu0 %v25406_v57  ;;  %19415 = vmatprep.subr.bf16.mxu1 %v25408_v60 }
 0xc63   : > { %19225 = vmatpush1.bf16.msra.mxu0 %v25409_v28  ;;  %19417 = vmatpush1.bf16.msra.mxu1 %v25411_v16 }
 0xc64   : > { %19227 = vmatprep.subr.bf16.mxu0 %v25410_v14  ;;  %19419 = vmatprep.subr.bf16.mxu1 %v25412_v35 }
 0xc67   : > { %19229 = vmatpush1.bf16.msra.mxu0 %v25413_v52  ;;  %19421 = vmatpush1.bf16.msra.mxu1 %v25614_v45 }
 0xc68   : > { %19231 = vmatprep.subr.bf16.mxu0 %v25974_v36  ;;  %19423 = vmatprep.subr.bf16.mxu1 %v25975_v25 }
 0xc6b   : > { %19233 = vmatpush1.bf16.msra.mxu0 %v25976_v3  ;;  %19425 = vmatpush1.bf16.msra.mxu1 %v25977_v11 }
 0xc6c   : > { %19235 = vmatprep.subr.bf16.mxu0 %v25978_v43  ;;  %19427 = vmatprep.subr.bf16.mxu1 %v25979_v1 }
 0xc6f   : > { %19237 = vmatpush1.bf16.msra.mxu0 %v25980_v59  ;;  %19429 = vmatpush1.bf16.msra.mxu1 %v25981_v24 }
 0xc70   : > { %19431 = vmatprep.subr.bf16.mxu0 %v25390_v18  ;;  %19623 = vmatprep.subr.bf16.mxu1 %v25391_v61 }
 0xc72   : > { %12787 = vmatmul.mubr.f32.vlgmr.msra.gmra.mrb[12].mxu0 %v23721_v39  ;;  %13642 = vmatmul.mubr.f32.vlgmr.msra.gmra.mrb[12].mxu1 %v23721_v39  ;;  %v26014_v39 = vld [vmem:[#allocation64_spill] sm:$0xff] }
 0xc73   : > { %19433 = vmatpush1.bf16.msra.mxu0 %v25393_v41  ;;  %19625 = vmatpush1.bf16.msra.mxu1 %v25395_v19 }
 0xc74   : > { %19435 = vmatprep.subr.bf16.mxu0 %v25394_v55  ;;  %19627 = vmatprep.subr.bf16.mxu1 %v25396_v33 }
 0xc75   : > { %13795 = vmatprep.mubr.f32.mxu0 %v25152_v20  ;;  %14650 = vmatprep.mubr.f32.mxu1 %v25152_v20 }
 0xc77   : > { %19437 = vmatpush1.bf16.msra.mxu0 %v25397_v40  ;;  %19629 = vmatpush1.bf16.msra.mxu1 %v25399_v38 }
 0xc78   : > { %19439 = vmatprep.subr.bf16.mxu0 %v25398_v4  ;;  %19631 = vmatprep.subr.bf16.mxu1 %v25400_v8 }
 0xc7b   : > { %19441 = vmatpush1.bf16.msra.mxu0 %v25401_v34  ;;  %19633 = vmatpush1.bf16.msra.mxu1 %v25403_v48 }
 0xc7c   : > { %19443 = vmatprep.subr.bf16.mxu0 %v25402_v15  ;;  %19635 = vmatprep.subr.bf16.mxu1 %v25404_v7 }
 0xc7f   : > { %19445 = vmatpush1.bf16.msra.mxu0 %v25405_v27  ;;  %19637 = vmatpush1.bf16.msra.mxu1 %v25407_v6 }
 0xc80   : > { %19447 = vmatprep.subr.bf16.mxu0 %v25406_v57  ;;  %19639 = vmatprep.subr.bf16.mxu1 %v25408_v60 }
 0xc83   : > { %19449 = vmatpush1.bf16.msra.mxu0 %v25409_v28  ;;  %19641 = vmatpush1.bf16.msra.mxu1 %v25411_v16 }
 0xc84   : > { %19451 = vmatprep.subr.bf16.mxu0 %v25410_v14  ;;  %19643 = vmatprep.subr.bf16.mxu1 %v25412_v35 }
 0xc87   : > { %19453 = vmatpush1.bf16.msra.mxu0 %v25413_v52  ;;  %19645 = vmatpush1.bf16.msra.mxu1 %v25614_v45 }
 0xc88   : > { %19455 = vmatprep.subr.bf16.mxu0 %v25974_v36  ;;  %19647 = vmatprep.subr.bf16.mxu1 %v25975_v25 }
 0xc8b   : > { %19457 = vmatpush1.bf16.msra.mxu0 %v25976_v3  ;;  %19649 = vmatpush1.bf16.msra.mxu1 %v25977_v11 }
 0xc8c   : > { %19459 = vmatprep.subr.bf16.mxu0 %v25978_v43  ;;  %19651 = vmatprep.subr.bf16.mxu1 %v25979_v1  ;;  %v23958_v43 = vld [vmem:[%s22494_s21 + $0x10] sm:$0xff] }
 0xc8d   : > { %26018 = vst [vmem:[#allocation49_spill] sm:$0xff] %v23958_v43 }
 0xc8f   : > { %19461 = vmatpush1.bf16.msra.mxu0 %v25980_v59  ;;  %19653 = vmatpush1.bf16.msra.mxu1 %v25981_v24 }
 0xc90   : > { %19463 = vmatprep.subr.bf16.mxu0 %v26014_v39  ;;  %19655 = vmatprep.subr.bf16.mxu1 %v26015_v26  ;;  %v23954_v26 = vld [vmem:[%s22494_s21 + $0x18] sm:$0xff] }
 0xc91   : > { %26017 = vst [vmem:[#allocation47_spill] sm:$0xff] %v23954_v26 }
 0xd45   : > { %v12788_v23 = vpop.f32.mrb[12].mxu0  ;;  %v13643_v63 = vpop.f32.mrb[12].mxu1 }
 0xd46   : > { %v13652_v12 = vrot.slane %v12788_v23, 2  ;;  %v12790_v42 = vpop.f32.mrb[13].mxu0  ;;  %v13645_v50 = vpop.f32.mrb[13].mxu1  ;;  %v13654_v1 = vrot.slane %v13643_v63, 2 }
 0xd47   : > { %v13653_v30 = vrot.slane %v12790_v42, 2  ;;  %v13655_v59 = vrot.slane %v13645_v50, 2 }
 0xd48   : > { %v13660_v49 = vadd.f32 %v23946_v62, %v13652_v12  ;;  %v13662_v12 = vadd.f32 %v23958_v43, %v13654_v1  ;;  %v13693_v1 = vstv %s13692_s13 }
 0xd49   : > { %v13661_v0 = vadd.f32 %v23950_v51, %v13653_v30  ;;  %v13663_v23 = vadd.f32 %v23954_v26, %v13655_v59  ;;  %v13684_v59 = vrot.slane %v23716_v29, 7 }
 0xd4a   : > { %v16314_v24 = vmul.f32 -1.442695, %v13660_v49 }
 0xd4b   : > { %v16315_v39 = vmul.f32 -1.442695, %v13661_v0  ;;  %v16316_v42 = vmul.f32 -1.442695, %v13663_v23 }
 0xd4c   : > { %20354 = vpow2.f32 %v16314_v24 }
 0xd4d   : > { %20356 = vpow2.f32 %v16315_v39 }
 0xd4e   : > { %20358 = vpow2.f32 %v16316_v42 }
 0xd4f   : > { %20360 = vtanh.f32 %v13662_v12 }
 0xd56   : > { %v20355_v62 = vpop.eup %20354 }
 0xd57   : > { %v20357_v11 = vpop.eup %20356  ;;  %v13667_v3 = vadd.f32 1.0, %v20355_v62 }
 0xd58   : > { %v13673_v30 = vadd.f32 1.0, %v20357_v11  ;;  %v20359_v50 = vpop.eup %20358 }
 0xd59   : > { %20362 = vrcp.f32 %v13667_v3  ;;  %v20361_v24 = vpop.eup %20360  ;;  %v13680_v39 = vadd.f32 1.0, %v20359_v50 }
 0xd5a   : > { %20364 = vrcp.f32 %v13673_v30 }
 0xd5b   : > { %20366 = vrcp.f32 %v13680_v39  ;;  %v26041_v39 = vld [vmem:[#allocation107_spill] sm:$0xff] }
 0xd63   : > { %v20363_v49 = vpop.eup %20362 }
 0xd64   : > { %v20365_v63 = vpop.eup %20364  ;;  %v13687_v0 = vmul.f32 %v20363_v49, %v20361_v24 }
 0xd65   : > { %v13686_v23 = vmul.f32 %v20365_v63, %v13684_v59  ;;  %v20367_v11 = vpop.eup %20366  ;;  %v26038_v59 = vld [vmem:[#allocation102_spill] sm:$0xff]  ;;  %v26039_v63 = vld [vmem:[#allocation103_spill] sm:$0xff] }
 0xd67   : > { %v13688_v43 = vadd.f32 %v13687_v0, %v13686_v23  ;;  %v26040_v0 = vld [vmem:[#allocation105_spill] sm:$0xff]  ;;  %v26042_v23 = vld [vmem:[#allocation114_spill] sm:$0xff] }
 0xd69   : > { %20368 = vtanh.f32 %v13688_v43  ;;  %v23963_v62 = vmul.f32 %v13693_v1, %v13688_v43 }
 0xd73   : > { %v20369_v3 = vpop.eup %20368 }
 0xd74   : > { %v13690_v42 = vmul.f32 %v20369_v3, %v20367_v11  ;;  %v26044_v11 = vld [vmem:[#allocation115_spill] sm:$0xff]  ;;  %v26045_v3 = vld [vmem:[#allocation116_spill] sm:$0xff] }
 0xd76   : > { %v23966_v12 = vsel %vm15462_vm6, %v23719_v13, %v13690_v42  ;;  %v13694_v30 = vmul.f32 %v13693_v1, %v13690_v42  ;;  %v26035_v13 = vld [vmem:[#allocation112_spill] sm:$0xff] }
 0xd77   : > { %v26043_v1 = vld [vmem:[#allocation108_spill] sm:$0xff] }
 0xd78   : > { %v13697_v26 = vrot.slane %v13694_v30, 6  ;;  %v26046_v42 = vld [vmem:[#allocation84_spill] sm:$0xff]  ;;  %v26047_v30 = vld [vmem:[#allocation126_spill] sm:$0xff] }
 0xd7a   : > { %v23968_v29 = vand.u32 4294901760, %v13697_v26 }
 0xd7c   : > { %v23971_v50 = vsub.f32 %v13697_v26, %v23968_v29  ;;  %v26037_v26 = vld [vmem:[#allocation59_spill] sm:$0xff] }
 0xd7e   : > { %v23974_v24 = vand.u32 4294901760, %v23971_v50 }
 0xd80   : > { %v13799_v43 = vsub.f32 %v23971_v50, %v23974_v24 }
 0xd82   : > { %v13800_v49 = vand.u32 4294901760, %v13799_v43  ;;  %v26048_v43 = vld [vmem:[#allocation86_spill] sm:$0xff] }
 0xd84   : > { %13801 = vmatmul.mubr.f32.vlgmr.msra.gmra.mrb[14].mxu0 %v13800_v49  ;;  %14656 = vmatmul.mubr.f32.vlgmr.msra.gmra.mrb[14].mxu1 %v13800_v49  ;;  %v26049_v49 = vld [vmem:[#allocation127_spill] sm:$0xff] }
 0xd85   : > { %19465 = vmatpush1.bf16.msra.mxu0 %v25484_v53  ;;  %19657 = vmatpush1.bf16.msra.mxu1 %v25485_v5  ;;  %v26019_v53 = vld [vmem:[#allocation38_spill] sm:$0xff]  ;;  %v26020_v5 = vld [vmem:[#allocation95_spill] sm:$0xff] }
 0xd86   : > { %19467 = vmatprep.subr.bf16.mxu0 %v25570_v58  ;;  %19659 = vmatprep.subr.bf16.mxu1 %v25571_v46  ;;  %v26021_v58 = vld [vmem:[#allocation96_spill] sm:$0xff] }
 0xd87   : > { %14031 = vmatprep.mubr.f32.mxu0 %v25152_v20  ;;  %14886 = vmatprep.mubr.f32.mxu1 %v25152_v20  ;;  %v26022_v46 = vld [vmem:[#allocation44_spill] sm:$0xff] }
 0xd89   : > { %19469 = vmatpush1.bf16.msra.mxu0 %v25572_v10  ;;  %19661 = vmatpush1.bf16.msra.mxu1 %v25573_v44  ;;  %v26023_v10 = vld [vmem:[#allocation97_spill] sm:$0xff]  ;;  %v26024_v44 = vld [vmem:[#allocation46_spill] sm:$0xff] }
 0xd8a   : > { %19471 = vmatprep.subr.bf16.mxu0 %v25574_v2  ;;  %19663 = vmatprep.subr.bf16.mxu1 %v25575_v9  ;;  %v26025_v2 = vld [vmem:[#allocation98_spill] sm:$0xff]  ;;  %v26026_v9 = vld [vmem:[#allocation99_spill] sm:$0xff] }
 0xd8d   : > { %19473 = vmatpush1.bf16.msra.mxu0 %v25661_v22  ;;  %19665 = vmatpush1.bf16.msra.mxu1 %v25662_v37  ;;  %v26029_v22 = vld [vmem:[#allocation101_spill] sm:$0xff]  ;;  %v26030_v37 = vld [vmem:[#allocation104_spill] sm:$0xff] }
 0xd8e   : > { %19475 = vmatprep.subr.bf16.mxu0 %v25578_v47  ;;  %19667 = vmatprep.subr.bf16.mxu1 %v25579_v54  ;;  %v26027_v47 = vld [vmem:[#allocation100_spill] sm:$0xff]  ;;  %v26028_v54 = vld [vmem:[#allocation53_spill] sm:$0xff] }
 0xd91   : > { %19477 = vmatpush1.bf16.msra.mxu0 %v25663_v56  ;;  %19669 = vmatpush1.bf16.msra.mxu1 %v25664_v21  ;;  %v26031_v56 = vld [vmem:[#allocation109_spill] sm:$0xff]  ;;  %v26032_v21 = vld [vmem:[#allocation58_spill] sm:$0xff] }
 0xd92   : > { %19479 = vmatprep.subr.bf16.mxu0 %v25665_v32  ;;  %19671 = vmatprep.subr.bf16.mxu1 %v25666_v17  ;;  %v26033_v32 = vld [vmem:[#allocation106_spill] sm:$0xff] }
 0xd93   : > { %v26034_v17 = vld [vmem:[#allocation110_spill] sm:$0xff] }
 0xd95   : > { %19481 = vmatpush1.bf16.msra.mxu0 %v25928_v31  ;;  %19673 = vmatpush1.bf16.msra.mxu1 %v26019_v53  ;;  %v26036_v31 = vld [vmem:[#allocation111_spill] sm:$0xff]  ;;  %v26050_v53 = vld [vmem:[#allocation128_spill] sm:$0xff] }
 0xd96   : > { %19483 = vmatprep.subr.bf16.mxu0 %v26020_v5  ;;  %19675 = vmatprep.subr.bf16.mxu1 %v26021_v58  ;;  %v26051_v5 = vld [vmem:[#allocation130_spill] sm:$0xff]  ;;  %v26052_v58 = vld [vmem:[#allocation129_spill] sm:$0xff] }
 0xd99   : > { %19485 = vmatpush1.bf16.msra.mxu0 %v26022_v46  ;;  %19677 = vmatpush1.bf16.msra.mxu1 %v26023_v10  ;;  %v26053_v46 = vld [vmem:[#allocation131_spill] sm:$0xff]  ;;  %v26054_v10 = vld [vmem:[#allocation132_spill] sm:$0xff] }
 0xd9a   : > { %19487 = vmatprep.subr.bf16.mxu0 %v26024_v44  ;;  %19679 = vmatprep.subr.bf16.mxu1 %v26025_v2  ;;  %v26055_v44 = vld [vmem:[#allocation134_spill] sm:$0xff]  ;;  %v26056_v2 = vld [vmem:[#allocation133_spill] sm:$0xff] }
 0xd9d   : > { %19489 = vmatpush1.bf16.msra.mxu0 %v26026_v9  ;;  %19681 = vmatpush1.bf16.msra.mxu1 %v26027_v47  ;;  %v26057_v9 = vld [vmem:[#allocation135_spill] sm:$0xff]  ;;  %v26058_v47 = vld [vmem:[#allocation136_spill] sm:$0xff] }
 0xd9e   : > { %19491 = vmatprep.subr.bf16.mxu0 %v26028_v54  ;;  %19683 = vmatprep.subr.bf16.mxu1 %v26029_v22  ;;  %v26059_v54 = vld [vmem:[#allocation138_spill] sm:$0xff]  ;;  %v26060_v22 = vld [vmem:[#allocation137_spill] sm:$0xff] }
 0xda1   : > { %19493 = vmatpush1.bf16.msra.mxu0 %v26030_v37  ;;  %19685 = vmatpush1.bf16.msra.mxu1 %v26031_v56  ;;  %v26061_v37 = vld [vmem:[#allocation139_spill] sm:$0xff]  ;;  %v26062_v56 = vld [vmem:[#allocation140_spill] sm:$0xff] }
 0xda2   : > { %19495 = vmatprep.subr.bf16.mxu0 %v26032_v21  ;;  %19687 = vmatprep.subr.bf16.mxu1 %v26033_v32  ;;  %v26063_v21 = vld [vmem:[#allocation113_spill] sm:$0xff]  ;;  %v26065_v32 = vld [vmem:[#allocation56_spill] sm:$0xff] }
 0xda4   : > { %14033 = vmatmul.mubr.f32.vlgmr.msra.gmra.mrb[14].mxu0 %v23968_v29  ;;  %14888 = vmatmul.mubr.f32.vlgmr.msra.gmra.mrb[14].mxu1 %v23968_v29 }
 0xda5   : > { %19497 = vmatpush1.bf16.msra.mxu0 %v26034_v17  ;;  %19689 = vmatpush1.bf16.msra.mxu1 %v26035_v13  ;;  %v26066_v17 = vld [vmem:[#allocation57_spill] sm:$0xff]  ;;  %v26067_v13 = vld [vmem:[#allocation60_spill] sm:$0xff] }
 0xda6   : > { %19499 = vmatprep.subr.bf16.mxu0 %v26036_v31  ;;  %19691 = vmatprep.subr.bf16.mxu1 %v26037_v26  ;;  %v26068_v31 = vld [vmem:[#allocation61_spill] sm:$0xff]  ;;  %v26069_v26 = vld [vmem:[#allocation62_spill] sm:$0xff] }
 0xda7   : > { %14167 = vmatprep.mubr.f32.mxu0 %v25152_v20  ;;  %15022 = vmatprep.mubr.f32.mxu1 %v25152_v20 }
 0xda9   : > { %19501 = vmatpush1.bf16.msra.mxu0 %v26038_v59  ;;  %19693 = vmatpush1.bf16.msra.mxu1 %v26039_v63  ;;  %v26070_v59 = vld [vmem:[#allocation11_spill] sm:$0xff]  ;;  %v26071_v63 = vld [vmem:[#allocation12_spill] sm:$0xff] }
 0xdaa   : > { %19503 = vmatprep.subr.bf16.mxu0 %v26040_v0  ;;  %19695 = vmatprep.subr.bf16.mxu1 %v26041_v39  ;;  %v26072_v0 = vld [vmem:[#allocation65_spill] sm:$0xff]  ;;  %v26073_v39 = vld [vmem:[#allocation15_spill] sm:$0xff] }
 0xdad   : > { %19505 = vmatpush1.bf16.msra.mxu0 %v26042_v23  ;;  %19697 = vmatpush1.bf16.msra.mxu1 %v26043_v1  ;;  %v26074_v23 = vld [vmem:[#allocation13_spill] sm:$0xff]  ;;  %v26075_v1 = vld [vmem:[#allocation14_spill] sm:$0xff] }
 0xdae   : > { %19507 = vmatprep.subr.bf16.mxu0 %v26044_v11  ;;  %19699 = vmatprep.subr.bf16.mxu1 %v26045_v3  ;;  %v26076_v11 = vld [vmem:[#allocation16_spill] sm:$0xff]  ;;  %v26077_v3 = vld [vmem:[#allocation19_spill] sm:$0xff] }
 0xdb1   : > { %19509 = vmatpush1.bf16.msra.mxu0 %v26046_v42  ;;  %19701 = vmatpush1.bf16.msra.mxu1 %v26047_v30  ;;  %v26078_v42 = vld [vmem:[#allocation17_spill] sm:$0xff]  ;;  %v26079_v30 = vld [vmem:[#allocation23_spill] sm:$0xff] }
 0xdb2   : > { %19511 = vmatprep.subr.bf16.mxu0 %v26048_v43  ;;  %19703 = vmatprep.subr.bf16.mxu1 %v26049_v49  ;;  %v26081_v43 = vld [vmem:[#allocation117_spill] sm:$0xff]  ;;  %v26082_v49 = vld [vmem:[#allocation118_spill] sm:$0xff] }
 0xdb5   : > { %19513 = vmatpush1.bf16.msra.mxu0 %v26050_v53  ;;  %19705 = vmatpush1.bf16.msra.mxu1 %v26051_v5  ;;  %v26083_v53 = vld [vmem:[#allocation119_spill] sm:$0xff]  ;;  %v26084_v5 = vld [vmem:[#allocation120_spill] sm:$0xff] }
 0xdb6   : > { %19515 = vmatprep.subr.bf16.mxu0 %v26052_v58  ;;  %19707 = vmatprep.subr.bf16.mxu1 %v26053_v46  ;;  %v26085_v58 = vld [vmem:[#allocation88_spill] sm:$0xff]  ;;  %v26086_v46 = vld [vmem:[#allocation22_spill] sm:$0xff] }
 0xdb9   : > { %19517 = vmatpush1.bf16.msra.mxu0 %v26054_v10  ;;  %19709 = vmatpush1.bf16.msra.mxu1 %v26055_v44  ;;  %v26087_v10 = vld [vmem:[#allocation26_spill] sm:$0xff]  ;;  %v26088_v44 = vld [vmem:[#allocation27_spill] sm:$0xff] }
 0xdba   : > { %19519 = vmatprep.subr.bf16.mxu0 %v26056_v2  ;;  %19711 = vmatprep.subr.bf16.mxu1 %v26057_v9  ;;  %v26089_v2 = vld [vmem:[#allocation29_spill] sm:$0xff]  ;;  %v26090_v9 = vld [vmem:[#allocation30_spill] sm:$0xff] }
 0xdbd   : > { %19521 = vmatpush1.bf16.msra.mxu0 %v26058_v47  ;;  %19713 = vmatpush1.bf16.msra.mxu1 %v26059_v54  ;;  %v26091_v47 = vld [vmem:[#allocation33_spill] sm:$0xff]  ;;  %v26092_v54 = vld [vmem:[#allocation34_spill] sm:$0xff] }
 0xdbe   : > { %19523 = vmatprep.subr.bf16.mxu0 %v26060_v22  ;;  %19715 = vmatprep.subr.bf16.mxu1 %v26061_v37  ;;  %v26093_v22 = vld [vmem:[#allocation39_spill] sm:$0xff]  ;;  %v26094_v37 = vld [vmem:[#allocation41_spill] sm:$0xff] }
 0xdc1   : > { %19525 = vmatpush1.bf16.msra.mxu0 %v26062_v56  ;;  %19717 = vmatpush1.bf16.msra.mxu1 %v26063_v21  ;;  %v26095_v56 = vld [vmem:[#allocation94_spill] sm:$0xff]  ;;  %v26096_v21 = vld [vmem:[#allocation43_spill] sm:$0xff] }
 0xdc2   : > { %19527 = vmatprep.subr.bf16.mxu0 %v25390_v18  ;;  %19719 = vmatprep.subr.bf16.mxu1 %v25391_v61 }
 0xdc4   : > { %14170 = vmatmul.mubr.f32.vlgmr.msra.gmra.mrb[14].mxu0 %v23971_v50  ;;  %15025 = vmatmul.mubr.f32.vlgmr.msra.gmra.mrb[14].mxu1 %v23971_v50  ;;  %v26064_v50 = vld [vmem:[#allocation55_spill] sm:$0xff] }
 0xdc5   : > { %19529 = vmatpush1.bf16.msra.mxu0 %v25393_v41  ;;  %19721 = vmatpush1.bf16.msra.mxu1 %v25395_v19 }
 0xdc6   : > { %19531 = vmatprep.subr.bf16.mxu0 %v25394_v55  ;;  %19723 = vmatprep.subr.bf16.mxu1 %v25396_v33 }
 0xdc7   : > { %14272 = vmatprep.mubr.f32.mxu0 %v25152_v20  ;;  %15127 = vmatprep.mubr.f32.mxu1 %v25152_v20 }
 0xdc9   : > { %19533 = vmatpush1.bf16.msra.mxu0 %v25397_v40  ;;  %19725 = vmatpush1.bf16.msra.mxu1 %v25399_v38 }
 0xdca   : > { %19535 = vmatprep.subr.bf16.mxu0 %v25398_v4  ;;  %19727 = vmatprep.subr.bf16.mxu1 %v25400_v8 }
 0xdcd   : > { %19537 = vmatpush1.bf16.msra.mxu0 %v25401_v34  ;;  %19729 = vmatpush1.bf16.msra.mxu1 %v25403_v48 }
 0xdce   : > { %19539 = vmatprep.subr.bf16.mxu0 %v25402_v15  ;;  %19731 = vmatprep.subr.bf16.mxu1 %v25404_v7 }
 0xdd1   : > { %19541 = vmatpush1.bf16.msra.mxu0 %v25405_v27  ;;  %19733 = vmatpush1.bf16.msra.mxu1 %v25407_v6 }
 0xdd2   : > { %19543 = vmatprep.subr.bf16.mxu0 %v25406_v57  ;;  %19735 = vmatprep.subr.bf16.mxu1 %v25408_v60 }
 0xdd5   : > { %19545 = vmatpush1.bf16.msra.mxu0 %v25409_v28  ;;  %19737 = vmatpush1.bf16.msra.mxu1 %v25411_v16 }
 0xdd6   : > { %19547 = vmatprep.subr.bf16.mxu0 %v25410_v14  ;;  %19739 = vmatprep.subr.bf16.mxu1 %v25412_v35 }
 0xdd9   : > { %19549 = vmatpush1.bf16.msra.mxu0 %v25413_v52  ;;  %19741 = vmatpush1.bf16.msra.mxu1 %v25614_v45 }
 0xdda   : > { %19551 = vmatprep.subr.bf16.mxu0 %v25974_v36  ;;  %19743 = vmatprep.subr.bf16.mxu1 %v25975_v25 }
 0xddd   : > { %19553 = vmatpush1.bf16.msra.mxu0 %v26064_v50  ;;  %19745 = vmatpush1.bf16.msra.mxu1 %v26065_v32 }
 0xdde   : > { %19555 = vmatprep.subr.bf16.mxu0 %v26066_v17  ;;  %19747 = vmatprep.subr.bf16.mxu1 %v26067_v13 }
 0xde1   : > { %19557 = vmatpush1.bf16.msra.mxu0 %v26068_v31  ;;  %19749 = vmatpush1.bf16.msra.mxu1 %v26069_v26 }
 0xde2   : > { %19559 = vmatprep.subr.bf16.mxu0 %v26070_v59  ;;  %19751 = vmatprep.subr.bf16.mxu1 %v26071_v63  ;;  %v26097_v59 = vld [vmem:[#allocation121_spill] sm:$0xff]  ;;  %v26098_v63 = vld [vmem:[#allocation122_spill] sm:$0xff] }
 0xde4   : > { %14276 = vmatmul.mubr.f32.vlgmr.msra.gmra.mrb[14].mxu0 %v23974_v24  ;;  %15131 = vmatmul.mubr.f32.vlgmr.msra.gmra.mrb[14].mxu1 %v23974_v24  ;;  %v26080_v24 = vld [vmem:[#allocation25_spill] sm:$0xff] }
 0xde5   : > { %19561 = vmatpush1.bf16.msra.mxu0 %v26072_v0  ;;  %19753 = vmatpush1.bf16.msra.mxu1 %v26073_v39  ;;  %v26099_v0 = vld [vmem:[#allocation123_spill] sm:$0xff]  ;;  %v26100_v39 = vld [vmem:[#allocation124_spill] sm:$0xff] }
 0xde6   : > { %19563 = vmatprep.subr.bf16.mxu0 %v26074_v23  ;;  %19755 = vmatprep.subr.bf16.mxu1 %v26075_v1  ;;  %v26101_v23 = vld [vmem:[#allocation125_spill] sm:$0xff] }
 0xde7   : > { %14442 = vmatprep.mubr.f32.mxu0 %v25152_v20  ;;  %15297 = vmatprep.mubr.f32.mxu1 %v25152_v20 }
 0xde9   : > { %19565 = vmatpush1.bf16.msra.mxu0 %v26076_v11  ;;  %19757 = vmatpush1.bf16.msra.mxu1 %v26077_v3  ;;  %v24184_v11 = vld [vmem:[%s24536_s7 + $0x18] sm:$0xff] (%p1300_p13) }
 0xdea   : > { %19567 = vmatprep.subr.bf16.mxu0 %v26078_v42  ;;  %19759 = vmatprep.subr.bf16.mxu1 %v26079_v30  ;;  %v24190_v42 = vld [vmem:[%s24536_s7 + $0x20] sm:$0xff] (%p1300_p13)  ;;  %v24195_v30 = vld [vmem:[%s24536_s7 + $0x28] sm:$0xff] (%p1300_p13) }
 0xded   : > { %19569 = vmatpush1.bf16.msra.mxu0 %v26080_v24  ;;  %19761 = vmatpush1.bf16.msra.mxu1 %v26081_v43  ;;  %v15503_v24 = vand.u32 (%p1300_p13), 4294901760, %v24184_v11 }
 0xdee   : > { %19571 = vmatprep.subr.bf16.mxu0 %v26082_v49  ;;  %19763 = vmatprep.subr.bf16.mxu1 %v26083_v53  ;;  %v15506_v49 = vand.u32 (%p1300_p13), 4294901760, %v24190_v42  ;;  %v15509_v53 = vand.u32 (%p1300_p13), 4294901760, %v24195_v30 }
 0xdf1   : > { %19573 = vmatpush1.bf16.msra.mxu0 %v26084_v5  ;;  %19765 = vmatpush1.bf16.msra.mxu1 %v26085_v58  ;;  %v24209_v58 = vld [vmem:[%s24536_s7 + $0x30] sm:$0xff] (%p1300_p13) }
 0xdf2   : > { %19575 = vmatprep.subr.bf16.mxu0 %v26086_v46  ;;  %19767 = vmatprep.subr.bf16.mxu1 %v26087_v10  ;;  %v24214_v46 = vld [vmem:[%s24536_s7 + $0x38] sm:$0xff] (%p1300_p13) }
 0xdf5   : > { %19577 = vmatpush1.bf16.msra.mxu0 %v26088_v44  ;;  %19769 = vmatpush1.bf16.msra.mxu1 %v26089_v2  ;;  %v24225_v2 = vld [vmem:[%s24530_s1] sm:$0xff] (%p1300_p13) }
 0xdf6   : > { %19579 = vmatprep.subr.bf16.mxu0 %v26090_v9  ;;  %19771 = vmatprep.subr.bf16.mxu1 %v26091_v47  ;;  %v24233_v9 = vpack.c.bf16 (%p1300_p13), %v15509_v53, %v15506_v49  ;;  %v15512_v47 = vand.u32 (%p1300_p13), 4294901760, %v24209_v58 }
 0xdf7   :  { %16193 = vrot.lane.b32.xlu0 (%p1300_p13), %v24225_v2, %s20490_s5 }
 0xdf9   : > { %19581 = vmatpush1.bf16.msra.mxu0 %v26092_v54  ;;  %19773 = vmatpush1.bf16.msra.mxu1 %v26093_v22  ;;  %v15515_v54 = vand.u32 (%p1300_p13), 4294901760, %v24214_v46  ;;  %v24240_v22 = vld [vmem:[%s24536_s7 + $0x40] sm:$0xff] (%p1300_p13) }
 0xdfa   : > { %19583 = vmatprep.subr.bf16.mxu0 %v26094_v37  ;;  %19775 = vmatprep.subr.bf16.mxu1 %v26095_v56  ;;  %v24245_v37 = vld [vmem:[%s24536_s7 + $0x48] sm:$0xff] (%p1300_p13) }
 0xdfd   : > { %19585 = vmatpush1.bf16.msra.mxu0 %v26096_v21  ;;  %19777 = vmatpush1.bf16.msra.mxu1 %v26097_v59  ;;  %v24258_v59 = vld [vmem:[%s24530_s1 + $0x8] sm:$0xff] (%p1300_p13) }
 0xdfe   : > { %19587 = vmatprep.subr.bf16.mxu0 %v26098_v63  ;;  %19779 = vmatprep.subr.bf16.mxu1 %v26099_v0  ;;  %v24266_v63 = vpack.c.bf16 (%p1300_p13), %v15515_v54, %v15512_v47  ;;  %v15518_v0 = vand.u32 (%p1300_p13), 4294901760, %v24240_v22 }
 0xdff   :  { %16195 = vrot.lane.b32.xlu0 (%p1300_p13), %v24258_v59, %s20490_s5 }
 0xe01   : > { %19589 = vmatpush1.bf16.msra.mxu0 %v26100_v39  ;;  %19781 = vmatpush1.bf16.msra.mxu1 %v26101_v23  ;;  %v15521_v39 = vand.u32 (%p1300_p13), 4294901760, %v24245_v37  ;;  %v24273_v23 = vld [vmem:[%s24536_s7 + $0x50] sm:$0xff] (%p1300_p13) }
 0xe02   : > { %19591 = vmatprep.subr.bf16.mxu0 %v25390_v18  ;;  %19783 = vmatprep.subr.bf16.mxu1 %v25391_v61 }
 0xe04   : > { %14444 = vmatmul.mubr.f32.vlgmr.msra.gmra.mrb[14].mxu0 %v23968_v29  ;;  %15299 = vmatmul.mubr.f32.vlgmr.msra.gmra.mrb[14].mxu1 %v23968_v29 }
 0xe05   : > { %19593 = vmatpush1.bf16.msra.mxu0 %v25393_v41  ;;  %19785 = vmatpush1.bf16.msra.mxu1 %v25395_v19 }
 0xe06   : > { %19595 = vmatprep.subr.bf16.mxu0 %v25394_v55  ;;  %19787 = vmatprep.subr.bf16.mxu1 %v25396_v33  ;;  %v26102_v33 = vld [vmem:[#allocation48_spill] sm:$0xff] }
 0xe07   : > { %14546 = vmatprep.mubr.f32.mxu0 %v25152_v20  ;;  %15401 = vmatprep.mubr.f32.mxu1 %v25152_v20 }
 0xe09   : > { %19597 = vmatpush1.bf16.msra.mxu0 %v25397_v40  ;;  %19789 = vmatpush1.bf16.msra.mxu1 %v25399_v38 }
 0xe0a   : > { %19599 = vmatprep.subr.bf16.mxu0 %v25398_v4  ;;  %19791 = vmatprep.subr.bf16.mxu1 %v25400_v8 }
 0xe0d   : > { %19601 = vmatpush1.bf16.msra.mxu0 %v25401_v34  ;;  %19793 = vmatpush1.bf16.msra.mxu1 %v25403_v48 }
 0xe0e   : > { %19603 = vmatprep.subr.bf16.mxu0 %v25402_v15  ;;  %19795 = vmatprep.subr.bf16.mxu1 %v25404_v7  ;;  %v26103_v15 = vld [vmem:[#allocation47_spill] sm:$0xff] }
 0xe11   : > { %19605 = vmatpush1.bf16.msra.mxu0 %v25405_v27  ;;  %19797 = vmatpush1.bf16.msra.mxu1 %v25407_v6 }
 0xe12   : > { %19607 = vmatprep.subr.bf16.mxu0 %v25406_v57  ;;  %19799 = vmatprep.subr.bf16.mxu1 %v25408_v60  ;;  %v26104_v57 = vld [vmem:[#allocation49_spill] sm:$0xff] }
 0xe15   : > { %19609 = vmatpush1.bf16.msra.mxu0 %v25409_v28  ;;  %19801 = vmatpush1.bf16.msra.mxu1 %v25411_v16 }
 0xe16   : > { %19611 = vmatprep.subr.bf16.mxu0 %v25410_v14  ;;  %19803 = vmatprep.subr.bf16.mxu1 %v25412_v35 }
 0xe19   : > { %19613 = vmatpush1.bf16.msra.mxu0 %v25413_v52  ;;  %19805 = vmatpush1.bf16.msra.mxu1 %v25614_v45 }
 0xe1a   : > { %19615 = vmatprep.subr.bf16.mxu0 %v25974_v36  ;;  %19807 = vmatprep.subr.bf16.mxu1 %v25975_v25  ;;  %v15445_v25 = vrot.slane %v23963_v62, 7  ;;  %v15470_v62 = vld [vmem:[%s24536_s7] sm:$0xff] (%p1300_p13) }
 0xe1d   : > { %19617 = vmatpush1.bf16.msra.mxu0 %v26064_v50  ;;  %19809 = vmatpush1.bf16.msra.mxu1 %v26065_v32 }
 0xe1e   : > { %19619 = vmatprep.subr.bf16.mxu0 %v26066_v17  ;;  %19811 = vmatprep.subr.bf16.mxu1 %v26067_v13 }
 0xe21   : > { %19621 = vmatpush1.bf16.msra.mxu0 %v26068_v31  ;;  %19813 = vmatpush1.bf16.msra.mxu1 %v26069_v26  ;;  %v24179_v31 = vld [vmem:[%s24536_s7 + $0x10] sm:$0xff] (%p1300_p13)  ;;  %v15494_v26 = vand.u32 (%p1300_p13), 4294901760, %v15470_v62 }
 0xe22   :  { %v15500_v3 = vand.u32 (%p1300_p13), 4294901760, %v24179_v31 }
 0xe24   : > { %14548 = vmatmul.mubr.f32.vlgmr.msra.gmra.mrb[14].mxu0 %v23968_v29  ;;  %15403 = vmatmul.mubr.f32.vlgmr.msra.gmra.mrb[14].mxu1 %v23968_v29  ;;  %v24204_v5 = vpack.c.bf16 (%p1300_p13), %v15503_v24, %v15500_v3 }
 0xef7   : > { %v14549_v20 = vpop.f32.mrb[14].mxu0  ;;  %v15404_v18 = vpop.f32.mrb[14].mxu1 }
 0xef8   : > { %v15413_v61 = vrot.slane %v14549_v20, 1  ;;  %v14551_v41 = vpop.f32.mrb[15].mxu0  ;;  %v15406_v55 = vpop.f32.mrb[15].mxu1  ;;  %v15415_v7 = vrot.slane %v15404_v18, 1  ;;  %v24278_v20 = vld [vmem:[%s24536_s7 + $0x58] sm:$0xff] (%p1300_p13) }
 0xef9   : > { %v15414_v19 = vrot.slane %v14551_v41, 1  ;;  %v15416_v34 = vrot.slane %v15406_v55, 1 }
 0xefa   : > { %v15421_v40 = vadd.f32 %v26102_v33, %v15413_v61  ;;  %v15423_v6 = vadd.f32 %v26104_v57, %v15415_v7  ;;  %v15524_v61 = vand.u32 (%p1300_p13), 4294901760, %v24273_v23  ;;  %v15527_v33 = vand.u32 (%p1300_p13), 4294901760, %v24278_v20  ;;  %v24318_v7 = vld [vmem:[%s24536_s7 + $0x70] sm:$0xff] (%p1300_p13) }
 0xefb   : > { %v15422_v4 = vadd.f32 %v23950_v51, %v15414_v19  ;;  %v15424_v48 = vadd.f32 %v26103_v15, %v15416_v34  ;;  %v24292_v19 = vpack.c.bf16 (%p1300_p13), %v15521_v39, %v15518_v0  ;;  %v24326_v57 = vsub.f32 (%p1300_p13), %v24179_v31, %v15500_v3 }
 0xefc   : > { %v16317_v38 = vmul.f32 -1.442695, %v15421_v40  ;;  %v24298_v40 = vld [vmem:[%s24536_s7 + $0x60] sm:$0xff] (%p1300_p13)  ;;  %v24386_v31 = vsub.f32 (%p1300_p13), %v24209_v58, %v15512_v47 }
 0xefd   : > { %v16318_v8 = vmul.f32 -1.442695, %v15422_v4  ;;  %v16319_v27 = vmul.f32 -1.442695, %v15424_v48  ;;  %v24303_v4 = vld [vmem:[%s24536_s7 + $0x68] sm:$0xff] (%p1300_p13)  ;;  %v15530_v15 = vand.u32 (%p1300_p13), 4294901760, %v24298_v40 }
 0xefe   : > { %20370 = vpow2.f32 %v16317_v38  ;;  %v24305_v38 = vsub.f32 (%p1300_p13), %v15470_v62, %v15494_v26  ;;  %v15533_v48 = vand.u32 (%p1300_p13), 4294901760, %v24303_v4 }
 0xeff   : > { %20372 = vpow2.f32 %v16318_v8 }
 0xf00   : > { %20374 = vpow2.f32 %v16319_v27  ;;  %v24323_v27 = vld [vmem:[%s24536_s7 + $0x78] sm:$0xff] (%p1300_p13) }
 0xf01   : > { %20376 = vtanh.f32 %v15423_v6  ;;  %v24334_v6 = vpack.c.bf16 (%p1300_p13), %v15527_v33, %v15524_v61 }
 0xf08   : > { %v20371_v60 = vpop.eup %20370 }
 0xf09   : > { %v20373_v28 = vpop.eup %20372  ;;  %v15428_v14 = vadd.f32 1.0, %v20371_v60  ;;  %v15597_v60 = vand.u32 (%p1300_p13), 4294901760, %v24305_v38 }
 0xf0a   : > { %v15434_v16 = vadd.f32 1.0, %v20373_v28  ;;  %v20375_v35 = vpop.eup %20374 }
 0xf0b   : > { %20378 = vrcp.f32 %v15428_v14  ;;  %v20377_v52 = vpop.eup %20376  ;;  %v15441_v29 = vadd.f32 1.0, %v20375_v35  ;;  %v24341_v14 = vsub.f32 (%p1300_p13), %v24184_v11, %v15503_v24  ;;  %v15539_v35 = vand.u32 (%p1300_p13), 4294901760, %v24323_v27 }
 0xf0c   : > { %20380 = vrcp.f32 %v15434_v16  ;;  %v15536_v16 = vand.u32 (%p1300_p13), 4294901760, %v24318_v7 }
 0xf0d   : > { %20382 = vrcp.f32 %v15441_v29 }
 0xf15   : > { %v20379_v45 = vpop.eup %20378 }
 0xf16   : > { %v20381_v51 = vpop.eup %20380  ;;  %v15448_v36 = vmul.f32 %v20379_v45, %v20377_v52  ;;  %v24354_v45 = vpack.c.bf16 (%p1300_p13), %v15533_v48, %v15530_v15 }
 0xf17   : > { %v15447_v50 = vmul.f32 %v20381_v51, %v15445_v25  ;;  %v20383_v32 = vpop.eup %20382  ;;  %v15611_v25 = vand.u32 (%p1300_p13), 4294901760, %v24326_v57  ;;  %v24360_v51 = vsub.f32 (%p1300_p13), %v24190_v42, %v15506_v49  ;;  %v24401_v49 = vsub.f32 (%p1300_p13), %v24240_v22, %v15518_v0 }
 0xf19   : > { %v15449_v8 = vadd.f32 %v15448_v36, %v15447_v50   ;;  %v15598_v36 = vsub.f32 (%p1300_p13), %v24305_v38, %v15597_v60  ;;  %v15618_v50 = vand.u32 (%p1300_p13), 4294901760, %v24341_v14  ;;  %v15612_v62 = vsub.f32 (%p1300_p13), %v24326_v57, %v15611_v25 }
 0xf1b   : > { %20384 = vtanh.f32 %v15449_v8  ;;  %v15619_v3 = vsub.f32 (%p1300_p13), %v24341_v14, %v15618_v50 }
 0xf23   :  { %1302 = sbr.rel (!%p1300_p13) target bundleno = 321 (0x141), region = 73 }
 0xf25   : > { %v20385_v17 = vpop.eup %20384 }
 0xf26   : > { %v15451_v21 = vmul.f32 %v20385_v17, %v20383_v32   ;;  %v24370_v32 = vsub.f32 (%p1300_p13), %v24195_v30, %v15509_v53  ;;  %v24376_v17 = vpack.c.bf16 (%p1300_p13), %v15539_v35, %v15536_v16  ;;  %v15613_v53 = vand.u32 (%p1300_p13), 4294901760, %v15612_v62 }
 0xf28   : > { %v15465_v13 = vsel %vm15464_vm7, %v23966_v12, %v15451_v21  ;;  %v15471_v12 = vld [vmem:[%s24536_s7 + $0x8] sm:$0xff] (%p1300_p13)  ;;  %v15632_v42 = vand.u32 (%p1300_p13), 4294901760, %v24370_v32  ;;  %s20491_s7 = smov (%p1300_p13), 1  }
 0xf29   : > { %15467 = vst [vmem:[%s15466_s14] sm:$0xff] %v15465_v13  ;;  %v15497_v1 = vand.u32 (%p1300_p13), 4294901760, %v15471_v12 }
 0xf2a   :  { %v15633_v22 = vsub.f32 %v24370_v32, %v15632_v42 }
 0xf2b   :  { %v24198_v43 = vpack.c.bf16 %v15497_v1, %v15494_v26  ;;  %v24307_v8 = vsub.f32 %v15471_v12, %v15497_v1  ;;  %v15625_v12 = vand.u32 4294901760, %v24360_v51  ;;  %v24391_v26 = vsub.f32 %v24214_v46, %v15515_v54 }
 0xf2c   :  { %v15599_v1 = vand.u32 4294901760, %v15598_v36  ;;  %v15639_v46 = vand.u32 4294901760, %v24386_v31  ;;  %v15620_v54 = vand.u32 4294901760, %v15619_v3  ;;  %v15634_v36 = vand.u32 4294901760, %v15633_v22 }
 0xf2d   :  { %19815 = vmatprep.subr.bf16.mxu1 %v24198_v43  ;;  %19911 = vmatprep.subr.bf16.mxu0 %v24198_v43  ;;  %v15604_v28 = vand.u32 4294901760, %v24307_v8  ;;  %v15626_v58 = vsub.f32 %v24360_v51, %v15625_v12 }
 0xf2e   :  { %19817 = vmatpush3.bf16.msra.mxu1 %v24198_v43  ;;  %19913 = vmatpush3.bf16.msra.mxu0 %v24198_v43 }
 0xf2f   :  { %19819 = vmatprep.subr.bf16.mxu1 %v24204_v5  ;;  %19915 = vmatprep.subr.bf16.mxu0 %v24204_v5  ;;  %v15605_v29 = vsub.f32 %v24307_v8, %v15604_v28  ;;  %v19942_v30 = vpack.c.bf16 %v15604_v28, %v15597_v60  ;;  %v15640_v60 = vsub.f32 %v24386_v31, %v15639_v46 }
 0xf30   :  { %v15468_v10 = vld [vmem:[#allocation3] sm:$0xff]  ;;  %v15469_v55 = vld [vmem:[#allocation3 + $0x8] sm:$0xff] }
 0xf31   :  { %v24220_v44 = vand.u32 4294901760, %v15468_v10  ;;  %v24309_v34 = vand.u32 4294901760, %v15469_v55  ;;  %v15606_v11 = vand.u32 4294901760, %v15605_v29 }
 0xf32   :  { %19821 = vmatpush3.bf16.msra.mxu1 %v24204_v5  ;;  %19917 = vmatpush3.bf16.msra.mxu0 %v24204_v5 }
 0xf33   :  { %v24248_v56 = vsub.f32 %v15468_v10, %v24220_v44  ;;  %19823 = vmatprep.subr.bf16.mxu1 %v24233_v9  ;;  %19919 = vmatprep.subr.bf16.mxu0 %v24233_v9  ;;  %v24346_v52 = vsub.f32 %v15469_v55, %v24309_v34  ;;  %v15646_v10 = vand.u32 4294901760, %v24391_v26  ;;  %v19846_v47 = vpack.c.bf16 %v15606_v11, %v15599_v1 }
 0xf34   :  { %v24420_v55 = vsub.f32 %v24273_v23, %v15524_v61  ;;  %v19950_v61 = vpack.c.bf16 %v15632_v42, %v15625_v12  ;;  %v24444_v12 = vsub.f32 %v24303_v4, %v15533_v48  ;;  %v24455_v48 = vsub.f32 %v24318_v7, %v15536_v16 }
 0xf35   :  { %v15576_v21 = vand.u32 4294901760, %v24248_v56  ;;  %v15586_v13 = vand.u32 4294901760, %v24346_v52  ;;  %v15647_v28 = vsub.f32 %v24391_v26, %v15646_v10 }
 0xf36   :  { %19825 = vmatpush3.bf16.msra.mxu1 %v24233_v9  ;;  %19921 = vmatpush3.bf16.msra.mxu0 %v24233_v9  ;;  %v15667_v62 = vand.u32 4294901760, %v24420_v55  ;;  %v15688_v4 = vand.u32 4294901760, %v24444_v12  ;;  %v15695_v7 = vand.u32 4294901760, %v24455_v48 }
 0xf37   :  { %v15577_v18 = vsub.f32 %v24248_v56, %v15576_v21  ;;  %16573 = vmatprep.mubr.f32.mxu0 %v15576_v21  ;;  %19827 = vmatprep.subr.bf16.mxu1 %v24266_v63  ;;  %v15587_v24 = vsub.f32 %v24346_v52, %v15586_v13  ;;  %v24414_v21 = vsub.f32 %v24245_v37, %v15521_v39 }
 0xf38   :  { %19923 = vmatprep.subr.bf16.mxu0 %v24266_v63  ;;  %v24429_v37 = vsub.f32 %v24278_v20, %v15527_v33  ;;  %v19850_v39 = vpack.c.bf16 %v15620_v54, %v15613_v53  ;;  %v15641_v20 = vand.u32 4294901760, %v15640_v60  ;;  %v15648_v33 = vand.u32 4294901760, %v15647_v28 }
 0xf39   :  { %v15578_v41 = vand.u32 4294901760, %v15577_v18  ;;  %v15588_v0 = vand.u32 4294901760, %v15587_v24  ;;  %v19946_v18 = vpack.c.bf16 %v15618_v50, %v15611_v25  ;;  %v15627_v25 = vand.u32 4294901760, %v15626_v58 }
 0xf3a   :  { %19829 = vmatpush3.bf16.msra.mxu1 %v24266_v63  ;;  %19925 = vmatpush3.bf16.msra.mxu0 %v24266_v63  ;;  %v15660_v23 = vand.u32 4294901760, %v24414_v21  ;;  %v24436_v50 = vsub.f32 %v24298_v40, %v15530_v15  ;;  %v15674_v1 = vand.u32 4294901760, %v24429_v37  ;;  %v19954_v40 = vpack.c.bf16 %v15646_v10, %v15639_v46 }
 0xf3b   :  { %16468 = vmatprep.mubr.f32.mxu1 %v15578_v41  ;;  %19831 = vmatprep.subr.bf16.mxu1 %v24292_v19  ;;  %v15653_v41 = vand.u32 4294901760, %v24401_v49  ;;  %v19854_v11 = vpack.c.bf16 %v15634_v36, %v15627_v25  ;;  %v19858_v3 = vpack.c.bf16 %v15648_v33, %v15641_v20  ;;  %v15668_v42 = vsub.f32 %v24420_v55, %v15667_v62 }
 0xf3c   :  { %19927 = vmatprep.subr.bf16.mxu0 %v24292_v19  ;;  %v15681_v24 = vand.u32 4294901760, %v24436_v50  ;;  %v24460_v58 = vsub.f32 %v24323_v27, %v15539_v35  ;;  %v19962_v35 = vpack.c.bf16 %v15674_v1, %v15667_v62  ;;  %v15696_v60 = vsub.f32 %v24455_v48, %v15695_v7 }
 0xf3d   :  { %v15654_v29 = vsub.f32 %v24401_v49, %v15653_v41  ;;  %v19958_v46 = vpack.c.bf16 %v15660_v23, %v15653_v41  ;;  %v15669_v10 = vand.u32 4294901760, %v15668_v42  ;;  %v19878_v20 = vpack.c.bf16 %v24307_v8, %v24305_v38 }
 0xf3e   :  { %19833 = vmatpush3.bf16.msra.mxu1 %v24292_v19  ;;  %19929 = vmatpush3.bf16.msra.mxu0 %v24292_v19  ;;  %v15682_v54 = vsub.f32 %v24436_v50, %v15681_v24  ;;  %v15702_v16 = vand.u32 4294901760, %v24460_v58  ;;  %v19966_v25 = vpack.c.bf16 %v15688_v4, %v15681_v24  ;;  %v15697_v36 = vand.u32 4294901760, %v15696_v60 }
 0xf3f   :  { %19835 = vmatprep.subr.bf16.mxu1 %v24334_v6  ;;  %19931 = vmatprep.subr.bf16.mxu0 %v24334_v6  ;;  %v15655_v15 = vand.u32 4294901760, %v15654_v29  ;;  %v19882_v33 = vpack.c.bf16 %v24341_v14, %v24326_v57  ;;  %v19886_v38 = vpack.c.bf16 %v24370_v32, %v24360_v51  ;;  %v19890_v8 = vpack.c.bf16 %v24391_v26, %v24386_v31 }
 0xf40   :  { %v15703_v28 = vsub.f32 %v24460_v58, %v15702_v16  ;;  %v19970_v29 = vpack.c.bf16 %v15702_v16, %v15695_v7 }
 0xf42   :  { %19837 = vmatpush3.bf16.msra.mxu1 %v24334_v6  ;;  %19933 = vmatpush3.bf16.msra.mxu0 %v24334_v6 }
 0xf43   :  { %19839 = vmatprep.subr.bf16.mxu1 %v24354_v45  ;;  %19935 = vmatprep.subr.bf16.mxu0 %v24354_v45 }
 0xf46   :  { %19841 = vmatpush3.bf16.msra.mxu1 %v24354_v45  ;;  %19937 = vmatpush3.bf16.msra.mxu0 %v24354_v45 }
 0xf47   :  { %19843 = vmatprep.subr.bf16.mxu1 %v24376_v17  ;;  %19939 = vmatprep.subr.bf16.mxu0 %v24376_v17 }
 0xf4a   :  { %19845 = vmatpush3.bf16.msra.mxu1 %v24376_v17  ;;  %19941 = vmatpush3.bf16.msra.mxu0 %v24376_v17 }
 0xf4b   :  { %19847 = vmatprep.subr.bf16.mxu1 %v19846_v47  ;;  %19943 = vmatprep.subr.bf16.mxu0 %v19942_v30 }
 0xf4d   :  { %16469 = vmatmul.mubr.f32.vlgmr.msra.gmra.mrb[0].mxu1 %v15588_v0  ;;  %16574 = vmatmul.mubr.f32.vlgmr.msra.gmra.mrb[0].mxu0 %v15586_v13  ;;  %v15661_v13 = vsub.f32 %v24414_v21, %v15660_v23  ;;  %v15689_v0 = vsub.f32 %v24444_v12, %v15688_v4  ;;  %v15704_v23 = vand.u32 4294901760, %v15703_v28 }
 0xf4e   :  { %19849 = vmatpush3.bf16.msra.mxu1 %v19846_v47  ;;  %19945 = vmatpush3.bf16.msra.mxu0 %v19942_v30  ;;  %v15675_v30 = vsub.f32 %v24429_v37, %v15674_v1 }
 0xf4f   :  { %19851 = vmatprep.subr.bf16.mxu1 %v19850_v39  ;;  %19947 = vmatprep.subr.bf16.mxu0 %v19946_v18  ;;  %v15662_v53 = vand.u32 4294901760, %v15661_v13  ;;  %v15690_v41 = vand.u32 4294901760, %v15689_v0 }
 0xf50   :  { %16503 = vmatprep.mubr.f32.mxu1 %v24220_v44  ;;  %16608 = vmatprep.mubr.f32.mxu0 %v24220_v44  ;;  %v15676_v47 = vand.u32 4294901760, %v15675_v30 }
 0xf51   :  { %v19862_v22 = vpack.c.bf16 %v15662_v53, %v15655_v15 }
 0xf52   :  { %19853 = vmatpush3.bf16.msra.mxu1 %v19850_v39  ;;  %19949 = vmatpush3.bf16.msra.mxu0 %v19946_v18  ;;  %v19866_v27 = vpack.c.bf16 %v15676_v47, %v15669_v10  ;;  %v15683_v18 = vand.u32 4294901760, %v15682_v54 }
 0xf53   :  { %19855 = vmatprep.subr.bf16.mxu1 %v19854_v11  ;;  %19951 = vmatprep.subr.bf16.mxu0 %v19950_v61 }
 0xf54   :  { %v19870_v39 = vpack.c.bf16 %v15690_v41, %v15683_v18  ;;  %v16226_v18 = vld [vmem:[%s24531_s2] sm:$0xff] }
 0xf56   :  { %19857 = vmatpush3.bf16.msra.mxu1 %v19854_v11  ;;  %19953 = vmatpush3.bf16.msra.mxu0 %v19950_v61  ;;  %v19874_v61 = vpack.c.bf16 %v15704_v23, %v15697_v36  ;;  %v16227_v23 = vld [vmem:[%s24531_s2 + $0x8] sm:$0xff] }
 0xf57   :  { %19859 = vmatprep.subr.bf16.mxu1 %v19858_v3  ;;  %19955 = vmatprep.subr.bf16.mxu0 %v19954_v40 }
 0xf5a   :  { %19861 = vmatpush3.bf16.msra.mxu1 %v19858_v3  ;;  %19957 = vmatpush3.bf16.msra.mxu0 %v19954_v40 }
 0xf5b   :  { %19863 = vmatprep.subr.bf16.mxu1 %v19862_v22  ;;  %19959 = vmatprep.subr.bf16.mxu0 %v19958_v46 }
 0xf5e   :  { %19865 = vmatpush3.bf16.msra.mxu1 %v19862_v22  ;;  %19961 = vmatpush3.bf16.msra.mxu0 %v19958_v46 }
 0xf5f   :  { %19867 = vmatprep.subr.bf16.mxu1 %v19866_v27  ;;  %19963 = vmatprep.subr.bf16.mxu0 %v19962_v35 }
 0xf62   :  { %19869 = vmatpush3.bf16.msra.mxu1 %v19866_v27  ;;  %19965 = vmatpush3.bf16.msra.mxu0 %v19962_v35 }
 0xf63   :  { %19871 = vmatprep.subr.bf16.mxu1 %v19870_v39  ;;  %19967 = vmatprep.subr.bf16.mxu0 %v19966_v25 }
 0xf66   :  { %19873 = vmatpush3.bf16.msra.mxu1 %v19870_v39  ;;  %19969 = vmatpush3.bf16.msra.mxu0 %v19966_v25 }
 0xf67   :  { %19875 = vmatprep.subr.bf16.mxu1 %v19874_v61  ;;  %19971 = vmatprep.subr.bf16.mxu0 %v19970_v29 }
 0xf6a   :  { %19877 = vmatpush3.bf16.msra.mxu1 %v19874_v61  ;;  %19973 = vmatpush3.bf16.msra.mxu0 %v19970_v29 }
 0xf6b   :  { %19879 = vmatprep.subr.bf16.mxu1 %v19878_v20  ;;  %19975 = vmatprep.subr.bf16.mxu0 %v24198_v43 }
 0xf6d   :  { %16504 = vmatmul.mubr.f32.vlgmr.msra.gmra.mrb[0].mxu1 %v24309_v34  ;;  %16609 = vmatmul.mubr.f32.vlgmr.msra.gmra.mrb[0].mxu0 %v24309_v34 }
 0xf6e   :  { %19881 = vmatpush3.bf16.msra.mxu1 %v19878_v20  ;;  %19977 = vmatpush3.bf16.msra.mxu0 %v24198_v43  ;;  %v19894_v43 = vpack.c.bf16 %v24414_v21, %v24401_v49 }
 0xf6f   :  { %19883 = vmatprep.subr.bf16.mxu1 %v19882_v33  ;;  %19979 = vmatprep.subr.bf16.mxu0 %v24204_v5 }
 0xf70   :  { %16538 = vmatprep.mubr.f32.mxu1 %v24248_v56  ;;  %16643 = vmatprep.mubr.f32.mxu0 %v24220_v44  ;;  %v19902_v44 = vpack.c.bf16 %v24444_v12, %v24436_v50  ;;  %v16194_v56 = vpop.permute.xlu0 %16193 }
 0xf72   :  { %19885 = vmatpush3.bf16.msra.mxu1 %v19882_v33  ;;  %19981 = vmatpush3.bf16.msra.mxu0 %v24204_v5  ;;  %v19898_v5 = vpack.c.bf16 %v24429_v37, %v24420_v55 }
 0xf73   :  { %19887 = vmatprep.subr.bf16.mxu1 %v19886_v38  ;;  %19983 = vmatprep.subr.bf16.mxu0 %v24233_v9 }
 0xf74   :  { %v16196_v51 = vpop.permute.xlu0 %16195 }
 0xf76   :  { %19889 = vmatpush3.bf16.msra.mxu1 %v19886_v38  ;;  %19985 = vmatpush3.bf16.msra.mxu0 %v24233_v9  ;;  %v19906_v9 = vpack.c.bf16 %v24460_v58, %v24455_v48 }
 0xf77   :  { %19891 = vmatprep.subr.bf16.mxu1 %v19890_v8  ;;  %19987 = vmatprep.subr.bf16.mxu0 %v24266_v63 }
 0xf7a   :  { %19893 = vmatpush3.bf16.msra.mxu1 %v19890_v8  ;;  %19989 = vmatpush3.bf16.msra.mxu0 %v24266_v63  ;;  %v16199_v63 = vsub.f32 %v24225_v2, %v16194_v56 }
 0xf7b   :  { %19895 = vmatprep.subr.bf16.mxu1 %v19894_v43  ;;  %19991 = vmatprep.subr.bf16.mxu0 %v24292_v19 }
 0xf7e   :  { %19897 = vmatpush3.bf16.msra.mxu1 %v19894_v43  ;;  %19993 = vmatpush3.bf16.msra.mxu0 %v24292_v19  ;;  %v16323_v19 = vmul.f32 -1.442695, %v16199_v63 }
 0xf7f   :  { %19899 = vmatprep.subr.bf16.mxu1 %v19898_v5  ;;  %19995 = vmatprep.subr.bf16.mxu0 %v24334_v6 }
 0xf80   :  { %20398 = vpow2.f32 %v16323_v19 }
 0xf82   :  { %19901 = vmatpush3.bf16.msra.mxu1 %v19898_v5  ;;  %19997 = vmatpush3.bf16.msra.mxu0 %v24334_v6 }
 0xf83   :  { %19903 = vmatprep.subr.bf16.mxu1 %v19902_v44  ;;  %19999 = vmatprep.subr.bf16.mxu0 %v24354_v45 }
 0xf86   :  { %19905 = vmatpush3.bf16.msra.mxu1 %v19902_v44  ;;  %20001 = vmatpush3.bf16.msra.mxu0 %v24354_v45 }
 0xf87   :  { %19907 = vmatprep.subr.bf16.mxu1 %v19906_v9  ;;  %20003 = vmatprep.subr.bf16.mxu0 %v24376_v17 }
 0xf8a   :  { %19909 = vmatpush3.bf16.msra.mxu1 %v19906_v9  ;;  %20005 = vmatpush3.bf16.msra.mxu0 %v24376_v17  ;;  %v20399_v57 = vpop.eup %20398 }
 0xf8b   :  { %v16207_v6 = vadd.f32 1.0, %v20399_v57 }
 0xf8d   :  { %16539 = vmatmul.mubr.f32.vlgmr.msra.gmra.mrb[0].mxu1 %v24346_v52  ;;  %16644 = vmatmul.mubr.f32.vlgmr.msra.gmra.mrb[0].mxu0 %v24309_v34  ;;  %20400 = vrcp.f32 %v16207_v6  ;;  %v16320_v52 = vld [vmem:[%s24537_s8] ss:$0 sm:$0xff]  ;;  %v16200_v34 = vsub.f32 %v24258_v59, %v16196_v51 }
 0xf8f   :  { %v16324_v21 = vmul.f32 -1.442695, %v16200_v34 }
 0xf91   :  { %20402 = vpow2.f32 %v16324_v21 }
 0xf97   :  { %v20401_v14 = vpop.eup %20400 }
 0xf98   :  { %v16213_v45 = vsub.f32 1.0, %v20401_v14 }
 0xf9a   :  { %16217 = vrot.lane.b32.xlu0 %v16213_v45, %s20491_s7 }
 0xf9b   :  { %v20403_v1 = vpop.eup %20402 }
 0xf9c   :  { %v16208_v40 = vadd.f32 1.0, %v20403_v1 }
0x100c   :  { %v16218_v35 = vpop.permute.xlu0 %16217 }
0x100d   :  { %v16224_v41 = vsel %vm16223_vm8, %v20401_v14, %v16218_v35 }
0x100e   :  { %v16228_v25 = vadd.f32 %v16226_v18, %v16224_v41 }
0x1060   :  { %v16540_v32 = vpop.f32.mrb[0].mxu1  ;;  %v16645_v17 = vpop.f32.mrb[0].mxu0 }
0x1061   :  { %v20214_v2 = vadd.f32 %v16540_v32, %v16320_v52  ;;  %v15851_v31 = vpop.f32.mrb[1].mxu1  ;;  %v16167_v26 = vpop.f32.mrb[1].mxu0 }
0x1062   :  { %v20216_v49 = vadd.f32 %v16320_v52, %v15851_v31 }
0x1063   :  { %v20215_v55 = vadd.f32 %v20214_v2, %v16645_v17 }
0x1064   :  { %v20217_v37 = vadd.f32 %v20216_v49, %v16167_v26 }
0x1065   :  { %v16322_v50 = vmul.f32 -1.442695, %v20215_v55 }
0x1066   :  { %v16321_v62 = vmul.f32 -1.442695, %v20217_v37 }
0x1067   :  { %20404 = vpow2.f32 %v16322_v50 }
0x1068   :  { %20406 = vpow2.f32 %v16321_v62 }
0x1071   :  { %v20405_v11 = vpop.eup %20404 }
0x1072   :  { %v20407_v13 = vpop.eup %20406  ;;  %v16184_v59 = vadd.f32 1.0, %v20405_v11 }
0x1073   :  { %v16183_v12 = vadd.f32 1.0, %v20407_v13 }
0x1075   :  { %20408 = vrcp.f32 %v16183_v12 }
0x1076   :  { %20410 = vrcp.f32 %v16208_v40 }
0x1077   :  { %20412 = vrcp.f32 %v16184_v59 }
0x107f   :  { %v20409_v15 = vpop.eup %20408 }
0x1080   :  { %16232 = vrot.lane.b32.xlu1 %v20409_v15, %s20490_s5  ;;  %v20411_v3 = vpop.eup %20410 }
0x1081   :  { %v20413_v42 = vpop.eup %20412  ;;  %v16214_v30 = vsub.f32 1.0, %v20411_v3 }
0x1084   :  { %16234 = vrot.lane.b32.xlu1 %v20413_v42, %s20490_s5 }
0x1088   :  { %16219 = vrot.lane.b32.xlu1 %v16214_v30, %s20491_s7 }
0x10f2   :  { %v16233_v24 = vpop.permute.xlu1 %16232 }
0x10f3   :  { %v16238_v53 = vsub.f32 %v20409_v15, %v16233_v24 }
0x10f5   :  { %v16325_v4 = vmul.f32 -1.442695, %v16238_v53 }
0x10f6   :  { %v16235_v48 = vpop.permute.xlu1 %16234 }
0x10f7   :  { %20414 = vpow2.f32 %v16325_v4  ;;  %v16239_v58 = vsub.f32 %v20413_v42, %v16235_v48 }
0x10f9   :  { %v16326_v46 = vmul.f32 -1.442695, %v16239_v58 }
0x10fa   :  { %v16220_v60 = vpop.permute.xlu1 %16219 }
0x10fb   :  { %20416 = vpow2.f32 %v16326_v46  ;;  %v16225_v61 = vsel %vm16223_vm8, %v20411_v3, %v16220_v60 }
0x10fc   :  { %v16229_v38 = vadd.f32 %v16227_v23, %v16225_v61 }
0x1101   :  { %v20415_v10 = vpop.eup %20414 }
0x1102   :  { %v16246_v47 = vadd.f32 1.0, %v20415_v10 }
0x1104   :  { %20418 = vrcp.f32 %v16246_v47 }
0x1105   :  { %v20417_v54 = vpop.eup %20416 }
0x1106   :  { %v16247_v22 = vadd.f32 1.0, %v20417_v54 }
0x1108   :  { %20420 = vrcp.f32 %v16247_v22 }
0x110e   :  { %v20419_v0 = vpop.eup %20418 }
0x110f   :  { %v16252_v7 = vsub.f32 1.0, %v20419_v0 }
0x1111   :  { %16256 = vrot.lane.b32.xlu0 %v16252_v7, %s20491_s7 }
0x1112   :  { %v20421_v16 = vpop.eup %20420 }
0x1113   :  { %v16253_v27 = vsub.f32 1.0, %v20421_v16 }
0x1115   :  { %16258 = vrot.lane.b32.xlu1 %v16253_v27, %s20491_s7 }
0x1183   :  { %v16257_v28 = vpop.permute.xlu0 %16256 }
0x1184   :  { %v16262_v39 = vsel %vm16223_vm8, %v20419_v0, %v16257_v28 }
0x1185   :  { %v16265_v36 = vmul.f32 0.33333334, %v16262_v39 }
0x1187   :  { %v16267_v29 = vadd.f32 %v16265_v36, %v16228_v25  ;;  %v16259_v20 = vpop.permute.xlu1 %16258 }
0x1188   :  { %v16263_v33 = vsel %vm16223_vm8, %v20421_v16, %v16259_v20 }
0x1189   :  { %16270 = vst.msk [vmem:[%s24538_s9] sm:$0xff] %vm16269_vm9, %v16267_v29  ;;  %v16266_v8 = vmul.f32 0.33333334, %v16263_v33 }
0x118b   :  { %v16268_v43 = vadd.f32 %v16266_v8, %v16229_v38 }
0x118d   :  { %16271 = vst.msk [vmem:[%s24538_s9 + $0x8] sm:$0xff] %vm16269_vm9, %v16268_v43 }
0x118e   :  { %16276 = vsyncpa [#allocation5], 1 }
0x118f   :  { %16277 = vsyncpa [#allocation6], 1 }

</bundles_post_ra>
